<compile_context>
chip_gen: v7x
topology: tpu7x:2x2x1
jax: 0.10.0
libtpu: 0.0.40
codegen_flags: <defaults>
</compile_context>

<pallas_src>
import functools
import math

import jax
import jax.numpy as jnp
from jax.experimental import pallas as pl
from jax.experimental.pallas import tpu as pltpu


# ----------------------------------------------------------------------------- helpers

def _mm_nt(a, b):
    """a @ b.T without an explicit transpose: a (M,K), b (N,K) -> (M,N), f32 accum."""
    return jax.lax.dot_general(
        a, b, (((1,), (1,)), ((), ())), preferred_element_type=jnp.float32)


def _full_spec(shape):
    """BlockSpec covering the whole array, ignoring the grid index."""
    return pl.BlockSpec(shape, lambda *_: (0,) * len(shape))


def _row_block(n, cap=128):
    """Largest row-block size that divides n, is <= cap and keeps 8-row alignment."""
    if n <= cap:
        return n
    for d in range(cap - cap % 8, 0, -8):          # multiples of 8 only
        if n % d == 0:
            return d
    return n


def _batch_block(b, t, cap_rows=512):
    """Batches per grid step for the stage-2 kernel (8-row alignment or full)."""
    valid = [rb for rb in range(1, b + 1)
             if b % rb == 0 and (rb == b or (rb * t) % 8 == 0)]
    under = [rb for rb in valid if rb * t <= cap_rows]
    pool = under if under else valid
    return max(pool)


def _softmax_rows(s):
    """Stable softmax over the last axis; single reciprocal + multiply."""
    s = s - jnp.max(s, axis=-1, keepdims=True)
    e = jnp.exp(s)
    return e * pl.reciprocal(jnp.sum(e, axis=-1, keepdims=True), approx=False)


def _layernorm(x, g, b, eps):
    mu = jnp.mean(x, axis=-1, keepdims=True)
    xc = x - mu
    var = jnp.mean(xc * xc, axis=-1, keepdims=True)
    return xc * jax.lax.rsqrt(var + eps) * g + b


# ----------------------------------------------------------------------------- kernel A

def vaf_kernel(x_ref, ew_ref, eb_ref,
               wq_ref, wk_ref, wv_ref, bq_ref, bk_ref, bv_ref, wo_ref, bo_ref,
               g_ref, b_ref, w1_ref, b1_ref, w2_ref, b2_ref, o_ref,
               *, num_heads, eps):
    """Fused VariantAwareFusion for a block of R rows of one trend.

    x_ref: (R, V)  ew/eb: (V, D)  attn/MLP weights: (D, D) in (in,out) layout
    biases / LN params: (1, D)    o_ref: (R, D)
    """
    x = x_ref[...].astype(jnp.float32)                       # (R, V)
    ew = ew_ref[...].astype(jnp.float32)                     # (V, D)
    eb = eb_ref[...].astype(jnp.float32)
    wq, wk, wv, wo = wq_ref[...], wk_ref[...], wv_ref[...], wo_ref[...]
    R = x.shape[0]
    V, D = ew.shape
    H = num_heads
    hd = D // H
    scale = 1.0 / math.sqrt(hd)

    # Per-variant embedding is affine in the scalar input, so the Q/K/V projections
    # of the embeddings collapse to tiny (V,D)@(D,D) matmuls:
    #   Q[r, v, :] = x[r, v] * (ew[v] @ Wq) + (eb[v] @ Wq + bq)
    ewq = jnp.dot(ew, wq, preferred_element_type=jnp.float32)
    ewk = jnp.dot(ew, wk, preferred_element_type=jnp.float32)
    ewv = jnp.dot(ew, wv, preferred_element_type=jnp.float32)
    ebq = jnp.dot(eb, wq, preferred_element_type=jnp.float32) + bq_ref[...]
    ebk = jnp.dot(eb, wk, preferred_element_type=jnp.float32) + bk_ref[...]
    ebv = jnp.dot(eb, wv, preferred_element_type=jnp.float32) + bv_ref[...]

    # Per-variant Q/K/V as 2-D (R, D) slabs (V is tiny & static -> unrolled).
    Qv, Kv, Vv = [], [], []
    for v in range(V):
        xv = x[:, v:v + 1]                                    # (R, 1)
        Qv.append(xv * ewq[v:v + 1, :] + ebq[v:v + 1, :])
        Kv.append(xv * ewk[v:v + 1, :] + ebk[v:v + 1, :])
        Vv.append(xv * ewv[v:v + 1, :] + ebv[v:v + 1, :])

    # Attention over the V variant tokens, per head, vectorized over the R rows.
    # The mean over query tokens is pushed into the probabilities:
    #   mean_q ctx_q = sum_k (mean_q p[q,k]) * V_k
    # so each head does only V weighted adds of (R, hd), not V*V.
    inv_V = 1.0 / V
    head_ctx = []
    for h in range(H):
        sl = slice(h * hd, (h + 1) * hd)
        Kh = [Kv[k][:, sl] for k in range(V)]
        Vh = [Vv[k][:, sl] for k in range(V)]
        pm = jnp.zeros((R, V), jnp.float32)                   # mean-over-q probs
        for q in range(V):
            Qh = Qv[q][:, sl] * scale                         # (R, hd)
            s = jnp.concatenate(
                [jnp.sum(Qh * Kh[k], axis=-1, keepdims=True) for k in range(V)],
                axis=-1)                                      # (R, V)
            pm = pm + _softmax_rows(s)
        pm = pm * inv_V
        ctx = pm[:, 0:1] * Vh[0]
        for k in range(1, V):
            ctx = ctx + pm[:, k:k + 1] * Vh[k]
        head_ctx.append(ctx)                                  # (R, hd)
    ctx_full = jnp.concatenate(head_ctx, axis=-1)             # (R, D)

    # Single out-projection (query mean commutes with it), LayerNorm, MLP -- fused.
    fused = jnp.dot(ctx_full, wo, preferred_element_type=jnp.float32) + bo_ref[...]
    normed = _layernorm(fused, g_ref[...], b_ref[...], eps)
    h1 = jnp.maximum(
        jnp.dot(normed, w1_ref[...], preferred_element_type=jnp.float32) + b1_ref[...], 0.0)
    out = jnp.dot(h1, w2_ref[...], preferred_element_type=jnp.float32) + b2_ref[...]
    o_ref[...] = out.astype(o_ref.dtype)


# ----------------------------------------------------------------------------- kernel B

def stage2_kernel(vaf_ref,
                  twq_ref, twk_ref, twv_ref, tbq_ref, tbk_ref, tbv_ref, two_ref, tbo_ref,
                  tg_ref, tb_ref,
                  fwq_ref, fwk_ref, fwv_ref, fbq_ref, fbk_ref, fbv_ref, fwo_ref, fbo_ref,
                  fg_ref, fb_ref,
                  w1_ref, b1_ref, w2_ref, b2_ref, o_ref,
                  *, tq, num_heads, eps):
    """Whole stage 2 for a block of Rb batch elements.

    vaf_ref: (4, Rb*tq, D) stacked [t1, t2, t3, r3] embeddings.
      tf  = LN(t1 + MHA(t1, [t2;t3]))
      out = MLP(LN(tf + MHA(tf, [tf;r3])))
    """
    t1 = vaf_ref[0].astype(jnp.float32)                       # (M, D)
    t2 = vaf_ref[1].astype(jnp.float32)
    t3 = vaf_ref[2].astype(jnp.float32)
    r3 = vaf_ref[3].astype(jnp.float32)
    M, D = t1.shape
    nb = M // tq
    hd = D // num_heads
    scale = 1.0 / math.sqrt(hd)

    def mha(q_in, kv_parts, wq, wk, wv, bq, bk, bv, wo, bo):
        # Big 2-D projections over all rows in the block (MXU friendly).
        Q = jnp.dot(q_in, wq, preferred_element_type=jnp.float32) + bq
        Ks = [jnp.dot(kv, wk, preferred_element_type=jnp.float32) + bk for kv in kv_parts]
        Vs = [jnp.dot(kv, wv, preferred_element_type=jnp.float32) + bv for kv in kv_parts]
        ctx_rows = []
        for bi in range(nb):                                  # nb small & static
            sl_b = slice(bi * tq, (bi + 1) * tq)
            Qb = Q[sl_b]                                      # (tq, D)
            Kb = jnp.concatenate([K[sl_b] for K in Ks], axis=0)   # (n_kv*tq, D)
            Vb = jnp.concatenate([Vw[sl_b] for Vw in Vs], axis=0)
            heads = []
            for h in range(num_heads):
                sl = slice(h * hd, (h + 1) * hd)
                s = _mm_nt(Qb[:, sl] * scale, Kb[:, sl])      # (tq, n_kv*tq)
                p = _softmax_rows(s)
                heads.append(jnp.dot(p, Vb[:, sl], preferred_element_type=jnp.float32))
            ctx_rows.append(jnp.concatenate(heads, axis=-1))  # (tq, D)
        ctx = jnp.concatenate(ctx_rows, axis=0) if nb > 1 else ctx_rows[0]
        return jnp.dot(ctx, wo, preferred_element_type=jnp.float32) + bo

    # trend attention + residual + LayerNorm
    ta = mha(t1, [t2, t3],
             twq_ref[...], twk_ref[...], twv_ref[...],
             tbq_ref[...], tbk_ref[...], tbv_ref[...], two_ref[...], tbo_ref[...])
    tf = _layernorm(t1 + ta, tg_ref[...], tb_ref[...], eps)

    # final attention + residual + LayerNorm
    fa = mha(tf, [tf, r3],
             fwq_ref[...], fwk_ref[...], fwv_ref[...],
             fbq_ref[...], fbk_ref[...], fbv_ref[...], fwo_ref[...], fbo_ref[...])
    y = _layernorm(tf + fa, fg_ref[...], fb_ref[...], eps)

    # MLP head
    h1 = jnp.maximum(
        jnp.dot(y, w1_ref[...], preferred_element_type=jnp.float32) + b1_ref[...], 0.0)
    out = jnp.dot(h1, w2_ref[...], preferred_element_type=jnp.float32) + b2_ref[...]
    o_ref[...] = out.astype(o_ref.dtype)


# ----------------------------------------------------------------------------- wrappers

def multi_trend_forward(params, trend1, trend2, trend3, residual3, *, num_heads=4,
                        eps=1e-5):
    B, T, V = trend1.shape
    vp = params["vaf"]
    D = vp["emb_w"].shape[-1]
    N = B * T

    # -------- stage 1: all four VariantAwareFusion branches in one pallas_call ----
    x_all = jnp.stack([trend1, trend2, trend3, residual3], axis=0).reshape(4, N, V)
    R = _row_block(N)

    def per_trend(shape):          # weight blocks selected by the trend grid index
        return pl.BlockSpec((None,) + shape, lambda t, i: (t,) + (0,) * len(shape))

    vaf_out = pl.pallas_call(
        functools.partial(vaf_kernel, num_heads=num_heads, eps=eps),
        out_shape=jax.ShapeDtypeStruct((4, N, D), trend1.dtype),
        grid=(4, N // R),
        in_specs=[
            pl.BlockSpec((None, R, V), lambda t, i: (t, i, 0)),   # x
            per_trend((V, D)), per_trend((V, D)),                 # emb_w, emb_b
            per_trend((D, D)), per_trend((D, D)), per_trend((D, D)),   # wq, wk, wv
            per_trend((1, D)), per_trend((1, D)), per_trend((1, D)),   # bq, bk, bv
            per_trend((D, D)), per_trend((1, D)),                  # wo, bo
            per_trend((1, D)), per_trend((1, D)),                  # ln_g, ln_b
            per_trend((D, D)), per_trend((1, D)),                  # w1, b1
            per_trend((D, D)), per_trend((1, D)),                  # w2, b2
        ],
        out_specs=pl.BlockSpec((None, R, D), lambda t, i: (t, i, 0)),
        compiler_params=pltpu.CompilerParams(
            dimension_semantics=("parallel", "parallel")),
    )(x_all,
      vp["emb_w"], vp["emb_b"],
      vp["wq"], vp["wk"], vp["wv"], vp["bq"], vp["bk"], vp["bv"], vp["wo"], vp["bo"],
      vp["ln_g"], vp["ln_b"], vp["w1"], vp["b1"], vp["w2"], vp["b2"])

    # -------- stage 2: trend attn + LN, final attn + LN, MLP -- one pallas_call ---
    Rb = _batch_block(B, T)
    ta, fa, fc = params["trend_attn"], params["final_attn"], params["fc"]

    out = pl.pallas_call(
        functools.partial(stage2_kernel, tq=T, num_heads=num_heads, eps=eps),
        out_shape=jax.ShapeDtypeStruct((N, D), trend1.dtype),
        grid=(B // Rb,),
        in_specs=[
            pl.BlockSpec((4, Rb * T, D), lambda i: (0, i, 0)),    # stacked embeddings
            _full_spec((D, D)), _full_spec((D, D)), _full_spec((D, D)),
            _full_spec((1, D)), _full_spec((1, D)), _full_spec((1, D)),
            _full_spec((D, D)), _full_spec((1, D)),
            _full_spec((1, D)), _full_spec((1, D)),               # ln_trend
            _full_spec((D, D)), _full_spec((D, D)), _full_spec((D, D)),
            _full_spec((1, D)), _full_spec((1, D)), _full_spec((1, D)),
            _full_spec((D, D)), _full_spec((1, D)),
            _full_spec((1, D)), _full_spec((1, D)),               # ln_final
            _full_spec((D, D)), _full_spec((1, D)),
            _full_spec((D, D)), _full_spec((1, D)),               # fc
        ],
        out_specs=pl.BlockSpec((Rb * T, D), lambda i: (i, 0)),
        compiler_params=pltpu.CompilerParams(dimension_semantics=("parallel",)),
    )(vaf_out,
      ta["wq"], ta["wk"], ta["wv"], ta["bq"], ta["bk"], ta["bv"], ta["wo"], ta["bo"],
      params["ln_trend_g"], params["ln_trend_b"],
      fa["wq"], fa["wk"], fa["wv"], fa["bq"], fa["bk"], fa["bv"], fa["wo"], fa["bo"],
      params["ln_final_g"], params["ln_final_b"],
      fc["w1"], fc["b1"], fc["w2"], fc["b2"])
    return out.reshape(B, T, D)


# ----------------------------------------------------------------------------- params
# All projection / MLP weights are stored pre-transposed as (D_in, D_out): y = x @ W + b.

def make_mha_params(key, D):
    ks = jax.random.split(key, 8)
    s = 1.0 / math.sqrt(D)
    return {
        "wq": jax.random.normal(ks[0], (D, D), jnp.float32) * s,
        "wk": jax.random.normal(ks[1], (D, D), jnp.float32) * s,
        "wv": jax.random.normal(ks[2], (D, D), jnp.float32) * s,
        "bq": jax.random.normal(ks[3], (1, D), jnp.float32) * 0.02,
        "bk": jax.random.normal(ks[4], (1, D), jnp.float32) * 0.02,
        "bv": jax.random.normal(ks[5], (1, D), jnp.float32) * 0.02,
        "wo": jax.random.normal(ks[6], (D, D), jnp.float32) * s,
        "bo": jax.random.normal(ks[7], (1, D), jnp.float32) * 0.02,
    }


def make_mlp_params(key, D):
    ks = jax.random.split(key, 4)
    s = 1.0 / math.sqrt(D)
    return {
        "w1": jax.random.normal(ks[0], (D, D), jnp.float32) * s,
        "b1": jax.random.normal(ks[1], (1, D), jnp.float32) * 0.02,
        "w2": jax.random.normal(ks[2], (D, D), jnp.float32) * s,
        "b2": jax.random.normal(ks[3], (1, D), jnp.float32) * 0.02,
    }


def make_ln_params(key, D):
    kg, kb = jax.random.split(key)
    g = 1.0 + 0.05 * jax.random.normal(kg, (1, D), jnp.float32)
    b = 0.05 * jax.random.normal(kb, (1, D), jnp.float32)
    return g, b


def make_vaf_params(key, V, D):
    """Flat param dict for one VariantAwareFusion branch."""
    ks = jax.random.split(key, 5)
    g, b = make_ln_params(ks[3], D)
    p = {"emb_w": jax.random.normal(ks[0], (V, D), jnp.float32) * 0.5,
         "emb_b": jax.random.normal(ks[1], (V, D), jnp.float32) * 0.1,
         "ln_g": g, "ln_b": b}
    p.update(make_mha_params(ks[2], D))
    p.update(make_mlp_params(ks[4], D))
    return p


def make_params(key, V, D):
    ks = jax.random.split(key, 9)
    vaf_list = [make_vaf_params(ks[i], V, D) for i in range(4)]
    vaf = jax.tree_util.tree_map(lambda *xs: jnp.stack(xs, axis=0), *vaf_list)
    gT, bT = make_ln_params(ks[5], D)
    gF, bF = make_ln_params(ks[6], D)
    return {
        "vaf": vaf,                                # each leaf has leading dim 4
        "trend_attn": make_mha_params(ks[4], D),
        "ln_trend_g": gT, "ln_trend_b": bT,
        "final_attn": make_mha_params(ks[7], D),
        "ln_final_g": gF, "ln_final_b": bF,
        "fc": make_mlp_params(ks[8], D),
    }


# ----------------------------------------------------------------------------- pure-JAX reference

def ref_mha(q, kv, p, num_heads, mean_queries=False):
    N, Tq, D = q.shape
    hd = D // num_heads
    Q = q @ p["wq"] + p["bq"]
    K = kv @ p["wk"] + p["bk"]
    V = kv @ p["wv"] + p["bv"]

    def split(x):
        n, t, _ = x.shape
        return x.reshape(n, t, num_heads, hd).transpose(0, 2, 1, 3)

    Qh, Kh, Vh = split(Q), split(K), split(V)
    s = jnp.einsum("nhqd,nhkd->nhqk", Qh, Kh) / math.sqrt(hd)
    pa = jax.nn.softmax(s, axis=-1)
    ctx = jnp.einsum("nhqk,nhkd->nhqd", pa, Vh).transpose(0, 2, 1, 3).reshape(N, Tq, D)
    out = ctx @ p["wo"] + p["bo"]
    if mean_queries:
        out = out.mean(axis=1)
    return out


def ref_layernorm(x, g, b, eps=1e-5):
    mu = x.mean(-1, keepdims=True)
    var = ((x - mu) ** 2).mean(-1, keepdims=True)
    return (x - mu) / jnp.sqrt(var + eps) * g + b


def ref_mlp(x, p):
    h = jnp.maximum(x @ p["w1"] + p["b1"], 0.0)
    return h @ p["w2"] + p["b2"]


def ref_vaf(x, p, num_heads):
    B, T, V = x.shape
    D = p["emb_w"].shape[1]
    emb = x[..., None] * p["emb_w"][None, None] + p["emb_b"][None, None]  # (B,T,V,D)
    emb = emb.reshape(B * T, V, D)
    fused = ref_mha(emb, emb, p, num_heads, mean_queries=True)            # (B*T, D)
    normed = ref_layernorm(fused, p["ln_g"], p["ln_b"])
    return ref_mlp(normed, p).reshape(B, T, D)


def ref_forward(params, trend1, trend2, trend3, residual3, num_heads):
    vaf = params["vaf"]
    embs = []
    for i, x in enumerate([trend1, trend2, trend3, residual3]):
        p_i = jax.tree_util.tree_map(lambda a: a[i], vaf)
        embs.append(ref_vaf(x, p_i, num_heads))
    t1e, t2e, t3e, r3e = embs
    trend_kv = jnp.concatenate([t2e, t3e], axis=1)
    tf = ref_mha(t1e, trend_kv, params["trend_attn"], num_heads)
    tf = ref_layernorm(t1e + tf, params["ln_trend_g"], params["ln_trend_b"])
    final_kv = jnp.concatenate([tf, r3e], axis=1)
    ff = ref_mha(tf, final_kv, params["final_attn"], num_heads)
    ff = ref_layernorm(tf + ff, params["ln_final_g"], params["ln_final_b"])
    return ref_mlp(ff, params["fc"])


# ----------------------------------------------------------------------------- main

if __name__ == "__main__":
    B, T, V, D, H = 2, 8, 4, 32, 4          # batch, time, variants, llm_dim, heads

    key = jax.random.PRNGKey(0)
    kp, k1, k2, k3, k4 = jax.random.split(key, 5)
    params = make_params(kp, V, D)

    trend1 = jax.random.normal(k1, (B, T, V), jnp.float32)
    trend2 = jax.random.normal(k2, (B, T, V), jnp.float32)
    trend3 = jax.random.normal(k3, (B, T, V), jnp.float32)
    residual3 = jax.random.normal(k4, (B, T, V), jnp.float32)

    fwd = jax.jit(functools.partial(multi_trend_forward, num_heads=H))
    out = jax.block_until_ready(fwd(params, trend1, trend2, trend3, residual3))

    assert out.shape == (B, T, D), out.shape

    ref = ref_forward(params, trend1, trend2, trend3, residual3, H)
    max_err = float(jnp.max(jnp.abs(out - ref)))
    assert max_err < 1e-3, f"Pallas vs reference mismatch: max_err={max_err}"

    print("KERNEL_OK")
</pallas_src>

<mosaic_0001>
module attributes {stable_mosaic.version = 11 : i64} {
  func.func @stage2_kernel(%arg0: i32, %arg1: memref<4x16x32xf32, #tpu.memory_space<vmem>>, %arg2: memref<32x32xf32, #tpu.memory_space<vmem>>, %arg3: memref<32x32xf32, #tpu.memory_space<vmem>>, %arg4: memref<32x32xf32, #tpu.memory_space<vmem>>, %arg5: memref<1x32xf32, #tpu.memory_space<vmem>>, %arg6: memref<1x32xf32, #tpu.memory_space<vmem>>, %arg7: memref<1x32xf32, #tpu.memory_space<vmem>>, %arg8: memref<32x32xf32, #tpu.memory_space<vmem>>, %arg9: memref<1x32xf32, #tpu.memory_space<vmem>>, %arg10: memref<1x32xf32, #tpu.memory_space<vmem>>, %arg11: memref<1x32xf32, #tpu.memory_space<vmem>>, %arg12: memref<32x32xf32, #tpu.memory_space<vmem>>, %arg13: memref<32x32xf32, #tpu.memory_space<vmem>>, %arg14: memref<32x32xf32, #tpu.memory_space<vmem>>, %arg15: memref<1x32xf32, #tpu.memory_space<vmem>>, %arg16: memref<1x32xf32, #tpu.memory_space<vmem>>, %arg17: memref<1x32xf32, #tpu.memory_space<vmem>>, %arg18: memref<32x32xf32, #tpu.memory_space<vmem>>, %arg19: memref<1x32xf32, #tpu.memory_space<vmem>>, %arg20: memref<1x32xf32, #tpu.memory_space<vmem>>, %arg21: memref<1x32xf32, #tpu.memory_space<vmem>>, %arg22: memref<32x32xf32, #tpu.memory_space<vmem>>, %arg23: memref<1x32xf32, #tpu.memory_space<vmem>>, %arg24: memref<32x32xf32, #tpu.memory_space<vmem>>, %arg25: memref<1x32xf32, #tpu.memory_space<vmem>>, %arg26: memref<16x32xf32, #tpu.memory_space<vmem>>) attributes {dimension_semantics = [#tpu.dimension_semantics<parallel>], iteration_bounds = array<i64: 1>, scalar_prefetch = 0 : i64, scratch_operands = 0 : i64, tpu.core_type = #tpu.core_type<tc>, window_params = [{transform_indices = @transform_0, window_bounds = array<i64: 4, 16, 32>}, {pipeline_mode = #tpu.pipeline_mode<synchronous>, transform_indices = @transform_1, window_bounds = array<i64: 32, 32>}, {pipeline_mode = #tpu.pipeline_mode<synchronous>, transform_indices = @transform_2, window_bounds = array<i64: 32, 32>}, {pipeline_mode = #tpu.pipeline_mode<synchronous>, transform_indices = @transform_3, window_bounds = array<i64: 32, 32>}, {pipeline_mode = #tpu.pipeline_mode<synchronous>, transform_indices = @transform_4, window_bounds = array<i64: 1, 32>}, {pipeline_mode = #tpu.pipeline_mode<synchronous>, transform_indices = @transform_5, window_bounds = array<i64: 1, 32>}, {pipeline_mode = #tpu.pipeline_mode<synchronous>, transform_indices = @transform_6, window_bounds = array<i64: 1, 32>}, {pipeline_mode = #tpu.pipeline_mode<synchronous>, transform_indices = @transform_7, window_bounds = array<i64: 32, 32>}, {pipeline_mode = #tpu.pipeline_mode<synchronous>, transform_indices = @transform_8, window_bounds = array<i64: 1, 32>}, {pipeline_mode = #tpu.pipeline_mode<synchronous>, transform_indices = @transform_9, window_bounds = array<i64: 1, 32>}, {pipeline_mode = #tpu.pipeline_mode<synchronous>, transform_indices = @transform_10, window_bounds = array<i64: 1, 32>}, {pipeline_mode = #tpu.pipeline_mode<synchronous>, transform_indices = @transform_11, window_bounds = array<i64: 32, 32>}, {pipeline_mode = #tpu.pipeline_mode<synchronous>, transform_indices = @transform_12, window_bounds = array<i64: 32, 32>}, {pipeline_mode = #tpu.pipeline_mode<synchronous>, transform_indices = @transform_13, window_bounds = array<i64: 32, 32>}, {pipeline_mode = #tpu.pipeline_mode<synchronous>, transform_indices = @transform_14, window_bounds = array<i64: 1, 32>}, {pipeline_mode = #tpu.pipeline_mode<synchronous>, transform_indices = @transform_15, window_bounds = array<i64: 1, 32>}, {pipeline_mode = #tpu.pipeline_mode<synchronous>, transform_indices = @transform_16, window_bounds = array<i64: 1, 32>}, {pipeline_mode = #tpu.pipeline_mode<synchronous>, transform_indices = @transform_17, window_bounds = array<i64: 32, 32>}, {pipeline_mode = #tpu.pipeline_mode<synchronous>, transform_indices = @transform_18, window_bounds = array<i64: 1, 32>}, {pipeline_mode = #tpu.pipeline_mode<synchronous>, transform_indices = @transform_19, window_bounds = array<i64: 1, 32>}, {pipeline_mode = #tpu.pipeline_mode<synchronous>, transform_indices = @transform_20, window_bounds = array<i64: 1, 32>}, {pipeline_mode = #tpu.pipeline_mode<synchronous>, transform_indices = @transform_21, window_bounds = array<i64: 32, 32>}, {pipeline_mode = #tpu.pipeline_mode<synchronous>, transform_indices = @transform_22, window_bounds = array<i64: 1, 32>}, {pipeline_mode = #tpu.pipeline_mode<synchronous>, transform_indices = @transform_23, window_bounds = array<i64: 32, 32>}, {pipeline_mode = #tpu.pipeline_mode<synchronous>, transform_indices = @transform_24, window_bounds = array<i64: 1, 32>}, {transform_indices = @transform_25, window_bounds = array<i64: 16, 32>}]} {
    %c0 = arith.constant 0 : index
    %c0_0 = arith.constant 0 : index
    %c0_1 = arith.constant 0 : index
    %0 = vector.load %arg1[%c0, %c0_0, %c0_1] : memref<4x16x32xf32, #tpu.memory_space<vmem>>, vector<1x16x32xf32>
    %1 = vector.shape_cast %0 : vector<1x16x32xf32> to vector<16x32xf32>
    %c1 = arith.constant 1 : index
    %c0_2 = arith.constant 0 : index
    %c0_3 = arith.constant 0 : index
    %2 = vector.load %arg1[%c1, %c0_2, %c0_3] : memref<4x16x32xf32, #tpu.memory_space<vmem>>, vector<1x16x32xf32>
    %3 = vector.shape_cast %2 : vector<1x16x32xf32> to vector<16x32xf32>
    %c2 = arith.constant 2 : index
    %c0_4 = arith.constant 0 : index
    %c0_5 = arith.constant 0 : index
    %4 = vector.load %arg1[%c2, %c0_4, %c0_5] : memref<4x16x32xf32, #tpu.memory_space<vmem>>, vector<1x16x32xf32>
    %5 = vector.shape_cast %4 : vector<1x16x32xf32> to vector<16x32xf32>
    %c3 = arith.constant 3 : index
    %c0_6 = arith.constant 0 : index
    %c0_7 = arith.constant 0 : index
    %6 = vector.load %arg1[%c3, %c0_6, %c0_7] : memref<4x16x32xf32, #tpu.memory_space<vmem>>, vector<1x16x32xf32>
    %7 = vector.shape_cast %6 : vector<1x16x32xf32> to vector<16x32xf32>
    %c0_8 = arith.constant 0 : index
    %c0_9 = arith.constant 0 : index
    %8 = vector.load %arg2[%c0_8, %c0_9] : memref<32x32xf32, #tpu.memory_space<vmem>>, vector<32x32xf32>
    %c0_10 = arith.constant 0 : index
    %c0_11 = arith.constant 0 : index
    %9 = vector.load %arg3[%c0_10, %c0_11] : memref<32x32xf32, #tpu.memory_space<vmem>>, vector<32x32xf32>
    %c0_12 = arith.constant 0 : index
    %c0_13 = arith.constant 0 : index
    %10 = vector.load %arg4[%c0_12, %c0_13] : memref<32x32xf32, #tpu.memory_space<vmem>>, vector<32x32xf32>
    %c0_14 = arith.constant 0 : index
    %c0_15 = arith.constant 0 : index
    %11 = vector.load %arg5[%c0_14, %c0_15] : memref<1x32xf32, #tpu.memory_space<vmem>>, vector<1x32xf32>
    %c0_16 = arith.constant 0 : index
    %c0_17 = arith.constant 0 : index
    %12 = vector.load %arg6[%c0_16, %c0_17] : memref<1x32xf32, #tpu.memory_space<vmem>>, vector<1x32xf32>
    %c0_18 = arith.constant 0 : index
    %c0_19 = arith.constant 0 : index
    %13 = vector.load %arg7[%c0_18, %c0_19] : memref<1x32xf32, #tpu.memory_space<vmem>>, vector<1x32xf32>
    %c0_20 = arith.constant 0 : index
    %c0_21 = arith.constant 0 : index
    %14 = vector.load %arg8[%c0_20, %c0_21] : memref<32x32xf32, #tpu.memory_space<vmem>>, vector<32x32xf32>
    %c0_22 = arith.constant 0 : index
    %c0_23 = arith.constant 0 : index
    %15 = vector.load %arg9[%c0_22, %c0_23] : memref<1x32xf32, #tpu.memory_space<vmem>>, vector<1x32xf32>
    %cst = arith.constant dense<0.000000e+00> : vector<16x32xf32>
    %16 = tpu.matmul %1, %8, %cst {dimension_numbers = #tpu.dot_dimension_numbers<[1], [0], [0], [1], [0, 0, 1, 1], [], []>} : vector<16x32xf32>, vector<32x32xf32>, vector<16x32xf32> -> vector<16x32xf32>
    %17 = vector.broadcast %11 : vector<1x32xf32> to vector<16x32xf32>
    %18 = arith.addf %16, %17 : vector<16x32xf32>
    %cst_24 = arith.constant dense<0.000000e+00> : vector<16x32xf32>
    %19 = tpu.matmul %3, %9, %cst_24 {dimension_numbers = #tpu.dot_dimension_numbers<[1], [0], [0], [1], [0, 0, 1, 1], [], []>} : vector<16x32xf32>, vector<32x32xf32>, vector<16x32xf32> -> vector<16x32xf32>
    %20 = vector.broadcast %12 : vector<1x32xf32> to vector<16x32xf32>
    %21 = arith.addf %19, %20 : vector<16x32xf32>
    %cst_25 = arith.constant dense<0.000000e+00> : vector<16x32xf32>
    %22 = tpu.matmul %5, %9, %cst_25 {dimension_numbers = #tpu.dot_dimension_numbers<[1], [0], [0], [1], [0, 0, 1, 1], [], []>} : vector<16x32xf32>, vector<32x32xf32>, vector<16x32xf32> -> vector<16x32xf32>
    %23 = vector.broadcast %12 : vector<1x32xf32> to vector<16x32xf32>
    %24 = arith.addf %22, %23 : vector<16x32xf32>
    %cst_26 = arith.constant dense<0.000000e+00> : vector<16x32xf32>
    %25 = tpu.matmul %3, %10, %cst_26 {dimension_numbers = #tpu.dot_dimension_numbers<[1], [0], [0], [1], [0, 0, 1, 1], [], []>} : vector<16x32xf32>, vector<32x32xf32>, vector<16x32xf32> -> vector<16x32xf32>
    %26 = vector.broadcast %13 : vector<1x32xf32> to vector<16x32xf32>
    %27 = arith.addf %25, %26 : vector<16x32xf32>
    %cst_27 = arith.constant dense<0.000000e+00> : vector<16x32xf32>
    %28 = tpu.matmul %5, %10, %cst_27 {dimension_numbers = #tpu.dot_dimension_numbers<[1], [0], [0], [1], [0, 0, 1, 1], [], []>} : vector<16x32xf32>, vector<32x32xf32>, vector<16x32xf32> -> vector<16x32xf32>
    %29 = vector.broadcast %13 : vector<1x32xf32> to vector<16x32xf32>
    %30 = arith.addf %28, %29 : vector<16x32xf32>
    %31 = vector.extract_strided_slice %18 {offsets = [0, 0], sizes = [8, 32], strides = [1, 1]} : vector<16x32xf32> to vector<8x32xf32>
    %32 = vector.extract_strided_slice %21 {offsets = [0, 0], sizes = [8, 32], strides = [1, 1]} : vector<16x32xf32> to vector<8x32xf32>
    %33 = vector.extract_strided_slice %24 {offsets = [0, 0], sizes = [8, 32], strides = [1, 1]} : vector<16x32xf32> to vector<8x32xf32>
    %34 = tpu.concatenate %32, %33 in 0 : vector<8x32xf32>, vector<8x32xf32> -> vector<16x32xf32>
    %35 = vector.extract_strided_slice %27 {offsets = [0, 0], sizes = [8, 32], strides = [1, 1]} : vector<16x32xf32> to vector<8x32xf32>
    %36 = vector.extract_strided_slice %30 {offsets = [0, 0], sizes = [8, 32], strides = [1, 1]} : vector<16x32xf32> to vector<8x32xf32>
    %37 = tpu.concatenate %35, %36 in 0 : vector<8x32xf32>, vector<8x32xf32> -> vector<16x32xf32>
    %38 = vector.extract_strided_slice %31 {offsets = [0, 0], sizes = [8, 8], strides = [1, 1]} : vector<8x32xf32> to vector<8x8xf32>
    %cst_28 = arith.constant 0.353553385 : f32
    %39 = vector.broadcast %cst_28 : f32 to vector<8x8xf32>
    %40 = arith.mulf %38, %39 : vector<8x8xf32>
    %41 = vector.extract_strided_slice %34 {offsets = [0, 0], sizes = [16, 8], strides = [1, 1]} : vector<16x32xf32> to vector<16x8xf32>
    %cst_29 = arith.constant dense<0.000000e+00> : vector<8x16xf32>
    %42 = tpu.matmul %40, %41, %cst_29 {dimension_numbers = #tpu.dot_dimension_numbers<[1], [1], [0], [0], [0, 0, 1, 0], [], []>} : vector<8x8xf32>, vector<16x8xf32>, vector<8x16xf32> -> vector<8x16xf32>
    %cst_30 = arith.constant dense<0xFF800000> : vector<8xf32>
    %43 = vector.multi_reduction <maximumf>, %42, %cst_30 [1] : vector<8x16xf32> to vector<8xf32>
    %44 = vector.shape_cast %43 : vector<8xf32> to vector<8x1xf32>
    %45 = vector.broadcast %44 : vector<8x1xf32> to vector<8x16xf32>
    %46 = arith.subf %42, %45 : vector<8x16xf32>
    %47 = math.exp %46 : vector<8x16xf32>
    %cst_31 = arith.constant dense<0.000000e+00> : vector<8xf32>
    %48 = vector.multi_reduction <add>, %47, %cst_31 [1] : vector<8x16xf32> to vector<8xf32>
    %49 = vector.shape_cast %48 : vector<8xf32> to vector<8x1xf32>
    %50 = tpu.reciprocal %49 : vector<8x1xf32> -> vector<8x1xf32>
    %51 = vector.broadcast %50 : vector<8x1xf32> to vector<8x16xf32>
    %52 = arith.mulf %47, %51 : vector<8x16xf32>
    %53 = vector.extract_strided_slice %37 {offsets = [0, 0], sizes = [16, 8], strides = [1, 1]} : vector<16x32xf32> to vector<16x8xf32>
    %cst_32 = arith.constant dense<0.000000e+00> : vector<8x8xf32>
    %54 = tpu.matmul %52, %53, %cst_32 {dimension_numbers = #tpu.dot_dimension_numbers<[1], [0], [0], [1], [0, 0, 1, 1], [], []>} : vector<8x16xf32>, vector<16x8xf32>, vector<8x8xf32> -> vector<8x8xf32>
    %55 = vector.extract_strided_slice %31 {offsets = [0, 8], sizes = [8, 8], strides = [1, 1]} : vector<8x32xf32> to vector<8x8xf32>
    %cst_33 = arith.constant 0.353553385 : f32
    %56 = vector.broadcast %cst_33 : f32 to vector<8x8xf32>
    %57 = arith.mulf %55, %56 : vector<8x8xf32>
    %58 = vector.extract_strided_slice %34 {offsets = [0, 8], sizes = [16, 8], strides = [1, 1]} : vector<16x32xf32> to vector<16x8xf32>
    %cst_34 = arith.constant dense<0.000000e+00> : vector<8x16xf32>
    %59 = tpu.matmul %57, %58, %cst_34 {dimension_numbers = #tpu.dot_dimension_numbers<[1], [1], [0], [0], [0, 0, 1, 0], [], []>} : vector<8x8xf32>, vector<16x8xf32>, vector<8x16xf32> -> vector<8x16xf32>
    %cst_35 = arith.constant dense<0xFF800000> : vector<8xf32>
    %60 = vector.multi_reduction <maximumf>, %59, %cst_35 [1] : vector<8x16xf32> to vector<8xf32>
    %61 = vector.shape_cast %60 : vector<8xf32> to vector<8x1xf32>
    %62 = vector.broadcast %61 : vector<8x1xf32> to vector<8x16xf32>
    %63 = arith.subf %59, %62 : vector<8x16xf32>
    %64 = math.exp %63 : vector<8x16xf32>
    %cst_36 = arith.constant dense<0.000000e+00> : vector<8xf32>
    %65 = vector.multi_reduction <add>, %64, %cst_36 [1] : vector<8x16xf32> to vector<8xf32>
    %66 = vector.shape_cast %65 : vector<8xf32> to vector<8x1xf32>
    %67 = tpu.reciprocal %66 : vector<8x1xf32> -> vector<8x1xf32>
    %68 = vector.broadcast %67 : vector<8x1xf32> to vector<8x16xf32>
    %69 = arith.mulf %64, %68 : vector<8x16xf32>
    %70 = vector.extract_strided_slice %37 {offsets = [0, 8], sizes = [16, 8], strides = [1, 1]} : vector<16x32xf32> to vector<16x8xf32>
    %cst_37 = arith.constant dense<0.000000e+00> : vector<8x8xf32>
    %71 = tpu.matmul %69, %70, %cst_37 {dimension_numbers = #tpu.dot_dimension_numbers<[1], [0], [0], [1], [0, 0, 1, 1], [], []>} : vector<8x16xf32>, vector<16x8xf32>, vector<8x8xf32> -> vector<8x8xf32>
    %72 = vector.extract_strided_slice %31 {offsets = [0, 16], sizes = [8, 8], strides = [1, 1]} : vector<8x32xf32> to vector<8x8xf32>
    %cst_38 = arith.constant 0.353553385 : f32
    %73 = vector.broadcast %cst_38 : f32 to vector<8x8xf32>
    %74 = arith.mulf %72, %73 : vector<8x8xf32>
    %75 = vector.extract_strided_slice %34 {offsets = [0, 16], sizes = [16, 8], strides = [1, 1]} : vector<16x32xf32> to vector<16x8xf32>
    %cst_39 = arith.constant dense<0.000000e+00> : vector<8x16xf32>
    %76 = tpu.matmul %74, %75, %cst_39 {dimension_numbers = #tpu.dot_dimension_numbers<[1], [1], [0], [0], [0, 0, 1, 0], [], []>} : vector<8x8xf32>, vector<16x8xf32>, vector<8x16xf32> -> vector<8x16xf32>
    %cst_40 = arith.constant dense<0xFF800000> : vector<8xf32>
    %77 = vector.multi_reduction <maximumf>, %76, %cst_40 [1] : vector<8x16xf32> to vector<8xf32>
    %78 = vector.shape_cast %77 : vector<8xf32> to vector<8x1xf32>
    %79 = vector.broadcast %78 : vector<8x1xf32> to vector<8x16xf32>
    %80 = arith.subf %76, %79 : vector<8x16xf32>
    %81 = math.exp %80 : vector<8x16xf32>
    %cst_41 = arith.constant dense<0.000000e+00> : vector<8xf32>
    %82 = vector.multi_reduction <add>, %81, %cst_41 [1] : vector<8x16xf32> to vector<8xf32>
    %83 = vector.shape_cast %82 : vector<8xf32> to vector<8x1xf32>
    %84 = tpu.reciprocal %83 : vector<8x1xf32> -> vector<8x1xf32>
    %85 = vector.broadcast %84 : vector<8x1xf32> to vector<8x16xf32>
    %86 = arith.mulf %81, %85 : vector<8x16xf32>
    %87 = vector.extract_strided_slice %37 {offsets = [0, 16], sizes = [16, 8], strides = [1, 1]} : vector<16x32xf32> to vector<16x8xf32>
    %cst_42 = arith.constant dense<0.000000e+00> : vector<8x8xf32>
    %88 = tpu.matmul %86, %87, %cst_42 {dimension_numbers = #tpu.dot_dimension_numbers<[1], [0], [0], [1], [0, 0, 1, 1], [], []>} : vector<8x16xf32>, vector<16x8xf32>, vector<8x8xf32> -> vector<8x8xf32>
    %89 = vector.extract_strided_slice %31 {offsets = [0, 24], sizes = [8, 8], strides = [1, 1]} : vector<8x32xf32> to vector<8x8xf32>
    %cst_43 = arith.constant 0.353553385 : f32
    %90 = vector.broadcast %cst_43 : f32 to vector<8x8xf32>
    %91 = arith.mulf %89, %90 : vector<8x8xf32>
    %92 = vector.extract_strided_slice %34 {offsets = [0, 24], sizes = [16, 8], strides = [1, 1]} : vector<16x32xf32> to vector<16x8xf32>
    %cst_44 = arith.constant dense<0.000000e+00> : vector<8x16xf32>
    %93 = tpu.matmul %91, %92, %cst_44 {dimension_numbers = #tpu.dot_dimension_numbers<[1], [1], [0], [0], [0, 0, 1, 0], [], []>} : vector<8x8xf32>, vector<16x8xf32>, vector<8x16xf32> -> vector<8x16xf32>
    %cst_45 = arith.constant dense<0xFF800000> : vector<8xf32>
    %94 = vector.multi_reduction <maximumf>, %93, %cst_45 [1] : vector<8x16xf32> to vector<8xf32>
    %95 = vector.shape_cast %94 : vector<8xf32> to vector<8x1xf32>
    %96 = vector.broadcast %95 : vector<8x1xf32> to vector<8x16xf32>
    %97 = arith.subf %93, %96 : vector<8x16xf32>
    %98 = math.exp %97 : vector<8x16xf32>
    %cst_46 = arith.constant dense<0.000000e+00> : vector<8xf32>
    %99 = vector.multi_reduction <add>, %98, %cst_46 [1] : vector<8x16xf32> to vector<8xf32>
    %100 = vector.shape_cast %99 : vector<8xf32> to vector<8x1xf32>
    %101 = tpu.reciprocal %100 : vector<8x1xf32> -> vector<8x1xf32>
    %102 = vector.broadcast %101 : vector<8x1xf32> to vector<8x16xf32>
    %103 = arith.mulf %98, %102 : vector<8x16xf32>
    %104 = vector.extract_strided_slice %37 {offsets = [0, 24], sizes = [16, 8], strides = [1, 1]} : vector<16x32xf32> to vector<16x8xf32>
    %cst_47 = arith.constant dense<0.000000e+00> : vector<8x8xf32>
    %105 = tpu.matmul %103, %104, %cst_47 {dimension_numbers = #tpu.dot_dimension_numbers<[1], [0], [0], [1], [0, 0, 1, 1], [], []>} : vector<8x16xf32>, vector<16x8xf32>, vector<8x8xf32> -> vector<8x8xf32>
    %106 = tpu.concatenate %54, %71, %88, %105 in 1 : vector<8x8xf32>, vector<8x8xf32>, vector<8x8xf32>, vector<8x8xf32> -> vector<8x32xf32>
    %107 = vector.extract_strided_slice %18 {offsets = [8, 0], sizes = [8, 32], strides = [1, 1]} : vector<16x32xf32> to vector<8x32xf32>
    %108 = vector.extract_strided_slice %21 {offsets = [8, 0], sizes = [8, 32], strides = [1, 1]} : vector<16x32xf32> to vector<8x32xf32>
    %109 = vector.extract_strided_slice %24 {offsets = [8, 0], sizes = [8, 32], strides = [1, 1]} : vector<16x32xf32> to vector<8x32xf32>
    %110 = tpu.concatenate %108, %109 in 0 : vector<8x32xf32>, vector<8x32xf32> -> vector<16x32xf32>
    %111 = vector.extract_strided_slice %27 {offsets = [8, 0], sizes = [8, 32], strides = [1, 1]} : vector<16x32xf32> to vector<8x32xf32>
    %112 = vector.extract_strided_slice %30 {offsets = [8, 0], sizes = [8, 32], strides = [1, 1]} : vector<16x32xf32> to vector<8x32xf32>
    %113 = tpu.concatenate %111, %112 in 0 : vector<8x32xf32>, vector<8x32xf32> -> vector<16x32xf32>
    %114 = vector.extract_strided_slice %107 {offsets = [0, 0], sizes = [8, 8], strides = [1, 1]} : vector<8x32xf32> to vector<8x8xf32>
    %cst_48 = arith.constant 0.353553385 : f32
    %115 = vector.broadcast %cst_48 : f32 to vector<8x8xf32>
    %116 = arith.mulf %114, %115 : vector<8x8xf32>
    %117 = vector.extract_strided_slice %110 {offsets = [0, 0], sizes = [16, 8], strides = [1, 1]} : vector<16x32xf32> to vector<16x8xf32>
    %cst_49 = arith.constant dense<0.000000e+00> : vector<8x16xf32>
    %118 = tpu.matmul %116, %117, %cst_49 {dimension_numbers = #tpu.dot_dimension_numbers<[1], [1], [0], [0], [0, 0, 1, 0], [], []>} : vector<8x8xf32>, vector<16x8xf32>, vector<8x16xf32> -> vector<8x16xf32>
    %cst_50 = arith.constant dense<0xFF800000> : vector<8xf32>
    %119 = vector.multi_reduction <maximumf>, %118, %cst_50 [1] : vector<8x16xf32> to vector<8xf32>
    %120 = vector.shape_cast %119 : vector<8xf32> to vector<8x1xf32>
    %121 = vector.broadcast %120 : vector<8x1xf32> to vector<8x16xf32>
    %122 = arith.subf %118, %121 : vector<8x16xf32>
    %123 = math.exp %122 : vector<8x16xf32>
    %cst_51 = arith.constant dense<0.000000e+00> : vector<8xf32>
    %124 = vector.multi_reduction <add>, %123, %cst_51 [1] : vector<8x16xf32> to vector<8xf32>
    %125 = vector.shape_cast %124 : vector<8xf32> to vector<8x1xf32>
    %126 = tpu.reciprocal %125 : vector<8x1xf32> -> vector<8x1xf32>
    %127 = vector.broadcast %126 : vector<8x1xf32> to vector<8x16xf32>
    %128 = arith.mulf %123, %127 : vector<8x16xf32>
    %129 = vector.extract_strided_slice %113 {offsets = [0, 0], sizes = [16, 8], strides = [1, 1]} : vector<16x32xf32> to vector<16x8xf32>
    %cst_52 = arith.constant dense<0.000000e+00> : vector<8x8xf32>
    %130 = tpu.matmul %128, %129, %cst_52 {dimension_numbers = #tpu.dot_dimension_numbers<[1], [0], [0], [1], [0, 0, 1, 1], [], []>} : vector<8x16xf32>, vector<16x8xf32>, vector<8x8xf32> -> vector<8x8xf32>
    %131 = vector.extract_strided_slice %107 {offsets = [0, 8], sizes = [8, 8], strides = [1, 1]} : vector<8x32xf32> to vector<8x8xf32>
    %cst_53 = arith.constant 0.353553385 : f32
    %132 = vector.broadcast %cst_53 : f32 to vector<8x8xf32>
    %133 = arith.mulf %131, %132 : vector<8x8xf32>
    %134 = vector.extract_strided_slice %110 {offsets = [0, 8], sizes = [16, 8], strides = [1, 1]} : vector<16x32xf32> to vector<16x8xf32>
    %cst_54 = arith.constant dense<0.000000e+00> : vector<8x16xf32>
    %135 = tpu.matmul %133, %134, %cst_54 {dimension_numbers = #tpu.dot_dimension_numbers<[1], [1], [0], [0], [0, 0, 1, 0], [], []>} : vector<8x8xf32>, vector<16x8xf32>, vector<8x16xf32> -> vector<8x16xf32>
    %cst_55 = arith.constant dense<0xFF800000> : vector<8xf32>
    %136 = vector.multi_reduction <maximumf>, %135, %cst_55 [1] : vector<8x16xf32> to vector<8xf32>
    %137 = vector.shape_cast %136 : vector<8xf32> to vector<8x1xf32>
    %138 = vector.broadcast %137 : vector<8x1xf32> to vector<8x16xf32>
    %139 = arith.subf %135, %138 : vector<8x16xf32>
    %140 = math.exp %139 : vector<8x16xf32>
    %cst_56 = arith.constant dense<0.000000e+00> : vector<8xf32>
    %141 = vector.multi_reduction <add>, %140, %cst_56 [1] : vector<8x16xf32> to vector<8xf32>
    %142 = vector.shape_cast %141 : vector<8xf32> to vector<8x1xf32>
    %143 = tpu.reciprocal %142 : vector<8x1xf32> -> vector<8x1xf32>
    %144 = vector.broadcast %143 : vector<8x1xf32> to vector<8x16xf32>
    %145 = arith.mulf %140, %144 : vector<8x16xf32>
    %146 = vector.extract_strided_slice %113 {offsets = [0, 8], sizes = [16, 8], strides = [1, 1]} : vector<16x32xf32> to vector<16x8xf32>
    %cst_57 = arith.constant dense<0.000000e+00> : vector<8x8xf32>
    %147 = tpu.matmul %145, %146, %cst_57 {dimension_numbers = #tpu.dot_dimension_numbers<[1], [0], [0], [1], [0, 0, 1, 1], [], []>} : vector<8x16xf32>, vector<16x8xf32>, vector<8x8xf32> -> vector<8x8xf32>
    %148 = vector.extract_strided_slice %107 {offsets = [0, 16], sizes = [8, 8], strides = [1, 1]} : vector<8x32xf32> to vector<8x8xf32>
    %cst_58 = arith.constant 0.353553385 : f32
    %149 = vector.broadcast %cst_58 : f32 to vector<8x8xf32>
    %150 = arith.mulf %148, %149 : vector<8x8xf32>
    %151 = vector.extract_strided_slice %110 {offsets = [0, 16], sizes = [16, 8], strides = [1, 1]} : vector<16x32xf32> to vector<16x8xf32>
    %cst_59 = arith.constant dense<0.000000e+00> : vector<8x16xf32>
    %152 = tpu.matmul %150, %151, %cst_59 {dimension_numbers = #tpu.dot_dimension_numbers<[1], [1], [0], [0], [0, 0, 1, 0], [], []>} : vector<8x8xf32>, vector<16x8xf32>, vector<8x16xf32> -> vector<8x16xf32>
    %cst_60 = arith.constant dense<0xFF800000> : vector<8xf32>
    %153 = vector.multi_reduction <maximumf>, %152, %cst_60 [1] : vector<8x16xf32> to vector<8xf32>
    %154 = vector.shape_cast %153 : vector<8xf32> to vector<8x1xf32>
    %155 = vector.broadcast %154 : vector<8x1xf32> to vector<8x16xf32>
    %156 = arith.subf %152, %155 : vector<8x16xf32>
    %157 = math.exp %156 : vector<8x16xf32>
    %cst_61 = arith.constant dense<0.000000e+00> : vector<8xf32>
    %158 = vector.multi_reduction <add>, %157, %cst_61 [1] : vector<8x16xf32> to vector<8xf32>
    %159 = vector.shape_cast %158 : vector<8xf32> to vector<8x1xf32>
    %160 = tpu.reciprocal %159 : vector<8x1xf32> -> vector<8x1xf32>
    %161 = vector.broadcast %160 : vector<8x1xf32> to vector<8x16xf32>
    %162 = arith.mulf %157, %161 : vector<8x16xf32>
    %163 = vector.extract_strided_slice %113 {offsets = [0, 16], sizes = [16, 8], strides = [1, 1]} : vector<16x32xf32> to vector<16x8xf32>
    %cst_62 = arith.constant dense<0.000000e+00> : vector<8x8xf32>
    %164 = tpu.matmul %162, %163, %cst_62 {dimension_numbers = #tpu.dot_dimension_numbers<[1], [0], [0], [1], [0, 0, 1, 1], [], []>} : vector<8x16xf32>, vector<16x8xf32>, vector<8x8xf32> -> vector<8x8xf32>
    %165 = vector.extract_strided_slice %107 {offsets = [0, 24], sizes = [8, 8], strides = [1, 1]} : vector<8x32xf32> to vector<8x8xf32>
    %cst_63 = arith.constant 0.353553385 : f32
    %166 = vector.broadcast %cst_63 : f32 to vector<8x8xf32>
    %167 = arith.mulf %165, %166 : vector<8x8xf32>
    %168 = vector.extract_strided_slice %110 {offsets = [0, 24], sizes = [16, 8], strides = [1, 1]} : vector<16x32xf32> to vector<16x8xf32>
    %cst_64 = arith.constant dense<0.000000e+00> : vector<8x16xf32>
    %169 = tpu.matmul %167, %168, %cst_64 {dimension_numbers = #tpu.dot_dimension_numbers<[1], [1], [0], [0], [0, 0, 1, 0], [], []>} : vector<8x8xf32>, vector<16x8xf32>, vector<8x16xf32> -> vector<8x16xf32>
    %cst_65 = arith.constant dense<0xFF800000> : vector<8xf32>
    %170 = vector.multi_reduction <maximumf>, %169, %cst_65 [1] : vector<8x16xf32> to vector<8xf32>
    %171 = vector.shape_cast %170 : vector<8xf32> to vector<8x1xf32>
    %172 = vector.broadcast %171 : vector<8x1xf32> to vector<8x16xf32>
    %173 = arith.subf %169, %172 : vector<8x16xf32>
    %174 = math.exp %173 : vector<8x16xf32>
    %cst_66 = arith.constant dense<0.000000e+00> : vector<8xf32>
    %175 = vector.multi_reduction <add>, %174, %cst_66 [1] : vector<8x16xf32> to vector<8xf32>
    %176 = vector.shape_cast %175 : vector<8xf32> to vector<8x1xf32>
    %177 = tpu.reciprocal %176 : vector<8x1xf32> -> vector<8x1xf32>
    %178 = vector.broadcast %177 : vector<8x1xf32> to vector<8x16xf32>
    %179 = arith.mulf %174, %178 : vector<8x16xf32>
    %180 = vector.extract_strided_slice %113 {offsets = [0, 24], sizes = [16, 8], strides = [1, 1]} : vector<16x32xf32> to vector<16x8xf32>
    %cst_67 = arith.constant dense<0.000000e+00> : vector<8x8xf32>
    %181 = tpu.matmul %179, %180, %cst_67 {dimension_numbers = #tpu.dot_dimension_numbers<[1], [0], [0], [1], [0, 0, 1, 1], [], []>} : vector<8x16xf32>, vector<16x8xf32>, vector<8x8xf32> -> vector<8x8xf32>
    %182 = tpu.concatenate %130, %147, %164, %181 in 1 : vector<8x8xf32>, vector<8x8xf32>, vector<8x8xf32>, vector<8x8xf32> -> vector<8x32xf32>
    %183 = tpu.concatenate %106, %182 in 0 : vector<8x32xf32>, vector<8x32xf32> -> vector<16x32xf32>
    %cst_68 = arith.constant dense<0.000000e+00> : vector<16x32xf32>
    %184 = tpu.matmul %183, %14, %cst_68 {dimension_numbers = #tpu.dot_dimension_numbers<[1], [0], [0], [1], [0, 0, 1, 1], [], []>} : vector<16x32xf32>, vector<32x32xf32>, vector<16x32xf32> -> vector<16x32xf32>
    %185 = vector.broadcast %15 : vector<1x32xf32> to vector<16x32xf32>
    %186 = arith.addf %184, %185 : vector<16x32xf32>
    %187 = arith.addf %1, %186 : vector<16x32xf32>
    %c0_69 = arith.constant 0 : index
    %c0_70 = arith.constant 0 : index
    %188 = vector.load %arg10[%c0_69, %c0_70] : memref<1x32xf32, #tpu.memory_space<vmem>>, vector<1x32xf32>
    %c0_71 = arith.constant 0 : index
    %c0_72 = arith.constant 0 : index
    %189 = vector.load %arg11[%c0_71, %c0_72] : memref<1x32xf32, #tpu.memory_space<vmem>>, vector<1x32xf32>
    %cst_73 = arith.constant dense<0.000000e+00> : vector<16xf32>
    %190 = vector.multi_reduction <add>, %187, %cst_73 [1] : vector<16x32xf32> to vector<16xf32>
    %191 = vector.shape_cast %190 : vector<16xf32> to vector<16x1xf32>
    %cst_74 = arith.constant 3.200000e+01 : f32
    %192 = vector.broadcast %cst_74 : f32 to vector<16x1xf32>
    %193 = arith.divf %191, %192 : vector<16x1xf32>
    %194 = vector.broadcast %193 : vector<16x1xf32> to vector<16x32xf32>
    %195 = arith.subf %187, %194 : vector<16x32xf32>
    %196 = arith.mulf %195, %195 : vector<16x32xf32>
    %cst_75 = arith.constant dense<0.000000e+00> : vector<16xf32>
    %197 = vector.multi_reduction <add>, %196, %cst_75 [1] : vector<16x32xf32> to vector<16xf32>
    %198 = vector.shape_cast %197 : vector<16xf32> to vector<16x1xf32>
    %cst_76 = arith.constant 3.200000e+01 : f32
    %199 = vector.broadcast %cst_76 : f32 to vector<16x1xf32>
    %200 = arith.divf %198, %199 : vector<16x1xf32>
    %cst_77 = arith.constant 9.99999974E-6 : f32
    %201 = vector.broadcast %cst_77 : f32 to vector<16x1xf32>
    %202 = arith.addf %200, %201 : vector<16x1xf32>
    %203 = math.rsqrt %202 : vector<16x1xf32>
    %204 = vector.broadcast %203 : vector<16x1xf32> to vector<16x32xf32>
    %205 = arith.mulf %195, %204 : vector<16x32xf32>
    %206 = vector.broadcast %188 : vector<1x32xf32> to vector<16x32xf32>
    %207 = arith.mulf %205, %206 : vector<16x32xf32>
    %208 = vector.broadcast %189 : vector<1x32xf32> to vector<16x32xf32>
    %209 = arith.addf %207, %208 : vector<16x32xf32>
    %c0_78 = arith.constant 0 : index
    %c0_79 = arith.constant 0 : index
    %210 = vector.load %arg12[%c0_78, %c0_79] : memref<32x32xf32, #tpu.memory_space<vmem>>, vector<32x32xf32>
    %c0_80 = arith.constant 0 : index
    %c0_81 = arith.constant 0 : index
    %211 = vector.load %arg13[%c0_80, %c0_81] : memref<32x32xf32, #tpu.memory_space<vmem>>, vector<32x32xf32>
    %c0_82 = arith.constant 0 : index
    %c0_83 = arith.constant 0 : index
    %212 = vector.load %arg14[%c0_82, %c0_83] : memref<32x32xf32, #tpu.memory_space<vmem>>, vector<32x32xf32>
    %c0_84 = arith.constant 0 : index
    %c0_85 = arith.constant 0 : index
    %213 = vector.load %arg15[%c0_84, %c0_85] : memref<1x32xf32, #tpu.memory_space<vmem>>, vector<1x32xf32>
    %c0_86 = arith.constant 0 : index
    %c0_87 = arith.constant 0 : index
    %214 = vector.load %arg16[%c0_86, %c0_87] : memref<1x32xf32, #tpu.memory_space<vmem>>, vector<1x32xf32>
    %c0_88 = arith.constant 0 : index
    %c0_89 = arith.constant 0 : index
    %215 = vector.load %arg17[%c0_88, %c0_89] : memref<1x32xf32, #tpu.memory_space<vmem>>, vector<1x32xf32>
    %c0_90 = arith.constant 0 : index
    %c0_91 = arith.constant 0 : index
    %216 = vector.load %arg18[%c0_90, %c0_91] : memref<32x32xf32, #tpu.memory_space<vmem>>, vector<32x32xf32>
    %c0_92 = arith.constant 0 : index
    %c0_93 = arith.constant 0 : index
    %217 = vector.load %arg19[%c0_92, %c0_93] : memref<1x32xf32, #tpu.memory_space<vmem>>, vector<1x32xf32>
    %cst_94 = arith.constant dense<0.000000e+00> : vector<16x32xf32>
    %218 = tpu.matmul %209, %210, %cst_94 {dimension_numbers = #tpu.dot_dimension_numbers<[1], [0], [0], [1], [0, 0, 1, 1], [], []>} : vector<16x32xf32>, vector<32x32xf32>, vector<16x32xf32> -> vector<16x32xf32>
    %219 = vector.broadcast %213 : vector<1x32xf32> to vector<16x32xf32>
    %220 = arith.addf %218, %219 : vector<16x32xf32>
    %cst_95 = arith.constant dense<0.000000e+00> : vector<16x32xf32>
    %221 = tpu.matmul %209, %211, %cst_95 {dimension_numbers = #tpu.dot_dimension_numbers<[1], [0], [0], [1], [0, 0, 1, 1], [], []>} : vector<16x32xf32>, vector<32x32xf32>, vector<16x32xf32> -> vector<16x32xf32>
    %222 = vector.broadcast %214 : vector<1x32xf32> to vector<16x32xf32>
    %223 = arith.addf %221, %222 : vector<16x32xf32>
    %cst_96 = arith.constant dense<0.000000e+00> : vector<16x32xf32>
    %224 = tpu.matmul %7, %211, %cst_96 {dimension_numbers = #tpu.dot_dimension_numbers<[1], [0], [0], [1], [0, 0, 1, 1], [], []>} : vector<16x32xf32>, vector<32x32xf32>, vector<16x32xf32> -> vector<16x32xf32>
    %225 = vector.broadcast %214 : vector<1x32xf32> to vector<16x32xf32>
    %226 = arith.addf %224, %225 : vector<16x32xf32>
    %cst_97 = arith.constant dense<0.000000e+00> : vector<16x32xf32>
    %227 = tpu.matmul %209, %212, %cst_97 {dimension_numbers = #tpu.dot_dimension_numbers<[1], [0], [0], [1], [0, 0, 1, 1], [], []>} : vector<16x32xf32>, vector<32x32xf32>, vector<16x32xf32> -> vector<16x32xf32>
    %228 = vector.broadcast %215 : vector<1x32xf32> to vector<16x32xf32>
    %229 = arith.addf %227, %228 : vector<16x32xf32>
    %cst_98 = arith.constant dense<0.000000e+00> : vector<16x32xf32>
    %230 = tpu.matmul %7, %212, %cst_98 {dimension_numbers = #tpu.dot_dimension_numbers<[1], [0], [0], [1], [0, 0, 1, 1], [], []>} : vector<16x32xf32>, vector<32x32xf32>, vector<16x32xf32> -> vector<16x32xf32>
    %231 = vector.broadcast %215 : vector<1x32xf32> to vector<16x32xf32>
    %232 = arith.addf %230, %231 : vector<16x32xf32>
    %233 = vector.extract_strided_slice %220 {offsets = [0, 0], sizes = [8, 32], strides = [1, 1]} : vector<16x32xf32> to vector<8x32xf32>
    %234 = vector.extract_strided_slice %223 {offsets = [0, 0], sizes = [8, 32], strides = [1, 1]} : vector<16x32xf32> to vector<8x32xf32>
    %235 = vector.extract_strided_slice %226 {offsets = [0, 0], sizes = [8, 32], strides = [1, 1]} : vector<16x32xf32> to vector<8x32xf32>
    %236 = tpu.concatenate %234, %235 in 0 : vector<8x32xf32>, vector<8x32xf32> -> vector<16x32xf32>
    %237 = vector.extract_strided_slice %229 {offsets = [0, 0], sizes = [8, 32], strides = [1, 1]} : vector<16x32xf32> to vector<8x32xf32>
    %238 = vector.extract_strided_slice %232 {offsets = [0, 0], sizes = [8, 32], strides = [1, 1]} : vector<16x32xf32> to vector<8x32xf32>
    %239 = tpu.concatenate %237, %238 in 0 : vector<8x32xf32>, vector<8x32xf32> -> vector<16x32xf32>
    %240 = vector.extract_strided_slice %233 {offsets = [0, 0], sizes = [8, 8], strides = [1, 1]} : vector<8x32xf32> to vector<8x8xf32>
    %cst_99 = arith.constant 0.353553385 : f32
    %241 = vector.broadcast %cst_99 : f32 to vector<8x8xf32>
    %242 = arith.mulf %240, %241 : vector<8x8xf32>
    %243 = vector.extract_strided_slice %236 {offsets = [0, 0], sizes = [16, 8], strides = [1, 1]} : vector<16x32xf32> to vector<16x8xf32>
    %cst_100 = arith.constant dense<0.000000e+00> : vector<8x16xf32>
    %244 = tpu.matmul %242, %243, %cst_100 {dimension_numbers = #tpu.dot_dimension_numbers<[1], [1], [0], [0], [0, 0, 1, 0], [], []>} : vector<8x8xf32>, vector<16x8xf32>, vector<8x16xf32> -> vector<8x16xf32>
    %cst_101 = arith.constant dense<0xFF800000> : vector<8xf32>
    %245 = vector.multi_reduction <maximumf>, %244, %cst_101 [1] : vector<8x16xf32> to vector<8xf32>
    %246 = vector.shape_cast %245 : vector<8xf32> to vector<8x1xf32>
    %247 = vector.broadcast %246 : vector<8x1xf32> to vector<8x16xf32>
    %248 = arith.subf %244, %247 : vector<8x16xf32>
    %249 = math.exp %248 : vector<8x16xf32>
    %cst_102 = arith.constant dense<0.000000e+00> : vector<8xf32>
    %250 = vector.multi_reduction <add>, %249, %cst_102 [1] : vector<8x16xf32> to vector<8xf32>
    %251 = vector.shape_cast %250 : vector<8xf32> to vector<8x1xf32>
    %252 = tpu.reciprocal %251 : vector<8x1xf32> -> vector<8x1xf32>
    %253 = vector.broadcast %252 : vector<8x1xf32> to vector<8x16xf32>
    %254 = arith.mulf %249, %253 : vector<8x16xf32>
    %255 = vector.extract_strided_slice %239 {offsets = [0, 0], sizes = [16, 8], strides = [1, 1]} : vector<16x32xf32> to vector<16x8xf32>
    %cst_103 = arith.constant dense<0.000000e+00> : vector<8x8xf32>
    %256 = tpu.matmul %254, %255, %cst_103 {dimension_numbers = #tpu.dot_dimension_numbers<[1], [0], [0], [1], [0, 0, 1, 1], [], []>} : vector<8x16xf32>, vector<16x8xf32>, vector<8x8xf32> -> vector<8x8xf32>
    %257 = vector.extract_strided_slice %233 {offsets = [0, 8], sizes = [8, 8], strides = [1, 1]} : vector<8x32xf32> to vector<8x8xf32>
    %cst_104 = arith.constant 0.353553385 : f32
    %258 = vector.broadcast %cst_104 : f32 to vector<8x8xf32>
    %259 = arith.mulf %257, %258 : vector<8x8xf32>
    %260 = vector.extract_strided_slice %236 {offsets = [0, 8], sizes = [16, 8], strides = [1, 1]} : vector<16x32xf32> to vector<16x8xf32>
    %cst_105 = arith.constant dense<0.000000e+00> : vector<8x16xf32>
    %261 = tpu.matmul %259, %260, %cst_105 {dimension_numbers = #tpu.dot_dimension_numbers<[1], [1], [0], [0], [0, 0, 1, 0], [], []>} : vector<8x8xf32>, vector<16x8xf32>, vector<8x16xf32> -> vector<8x16xf32>
    %cst_106 = arith.constant dense<0xFF800000> : vector<8xf32>
    %262 = vector.multi_reduction <maximumf>, %261, %cst_106 [1] : vector<8x16xf32> to vector<8xf32>
    %263 = vector.shape_cast %262 : vector<8xf32> to vector<8x1xf32>
    %264 = vector.broadcast %263 : vector<8x1xf32> to vector<8x16xf32>
    %265 = arith.subf %261, %264 : vector<8x16xf32>
    %266 = math.exp %265 : vector<8x16xf32>
    %cst_107 = arith.constant dense<0.000000e+00> : vector<8xf32>
    %267 = vector.multi_reduction <add>, %266, %cst_107 [1] : vector<8x16xf32> to vector<8xf32>
    %268 = vector.shape_cast %267 : vector<8xf32> to vector<8x1xf32>
    %269 = tpu.reciprocal %268 : vector<8x1xf32> -> vector<8x1xf32>
    %270 = vector.broadcast %269 : vector<8x1xf32> to vector<8x16xf32>
    %271 = arith.mulf %266, %270 : vector<8x16xf32>
    %272 = vector.extract_strided_slice %239 {offsets = [0, 8], sizes = [16, 8], strides = [1, 1]} : vector<16x32xf32> to vector<16x8xf32>
    %cst_108 = arith.constant dense<0.000000e+00> : vector<8x8xf32>
    %273 = tpu.matmul %271, %272, %cst_108 {dimension_numbers = #tpu.dot_dimension_numbers<[1], [0], [0], [1], [0, 0, 1, 1], [], []>} : vector<8x16xf32>, vector<16x8xf32>, vector<8x8xf32> -> vector<8x8xf32>
    %274 = vector.extract_strided_slice %233 {offsets = [0, 16], sizes = [8, 8], strides = [1, 1]} : vector<8x32xf32> to vector<8x8xf32>
    %cst_109 = arith.constant 0.353553385 : f32
    %275 = vector.broadcast %cst_109 : f32 to vector<8x8xf32>
    %276 = arith.mulf %274, %275 : vector<8x8xf32>
    %277 = vector.extract_strided_slice %236 {offsets = [0, 16], sizes = [16, 8], strides = [1, 1]} : vector<16x32xf32> to vector<16x8xf32>
    %cst_110 = arith.constant dense<0.000000e+00> : vector<8x16xf32>
    %278 = tpu.matmul %276, %277, %cst_110 {dimension_numbers = #tpu.dot_dimension_numbers<[1], [1], [0], [0], [0, 0, 1, 0], [], []>} : vector<8x8xf32>, vector<16x8xf32>, vector<8x16xf32> -> vector<8x16xf32>
    %cst_111 = arith.constant dense<0xFF800000> : vector<8xf32>
    %279 = vector.multi_reduction <maximumf>, %278, %cst_111 [1] : vector<8x16xf32> to vector<8xf32>
    %280 = vector.shape_cast %279 : vector<8xf32> to vector<8x1xf32>
    %281 = vector.broadcast %280 : vector<8x1xf32> to vector<8x16xf32>
    %282 = arith.subf %278, %281 : vector<8x16xf32>
    %283 = math.exp %282 : vector<8x16xf32>
    %cst_112 = arith.constant dense<0.000000e+00> : vector<8xf32>
    %284 = vector.multi_reduction <add>, %283, %cst_112 [1] : vector<8x16xf32> to vector<8xf32>
    %285 = vector.shape_cast %284 : vector<8xf32> to vector<8x1xf32>
    %286 = tpu.reciprocal %285 : vector<8x1xf32> -> vector<8x1xf32>
    %287 = vector.broadcast %286 : vector<8x1xf32> to vector<8x16xf32>
    %288 = arith.mulf %283, %287 : vector<8x16xf32>
    %289 = vector.extract_strided_slice %239 {offsets = [0, 16], sizes = [16, 8], strides = [1, 1]} : vector<16x32xf32> to vector<16x8xf32>
    %cst_113 = arith.constant dense<0.000000e+00> : vector<8x8xf32>
    %290 = tpu.matmul %288, %289, %cst_113 {dimension_numbers = #tpu.dot_dimension_numbers<[1], [0], [0], [1], [0, 0, 1, 1], [], []>} : vector<8x16xf32>, vector<16x8xf32>, vector<8x8xf32> -> vector<8x8xf32>
    %291 = vector.extract_strided_slice %233 {offsets = [0, 24], sizes = [8, 8], strides = [1, 1]} : vector<8x32xf32> to vector<8x8xf32>
    %cst_114 = arith.constant 0.353553385 : f32
    %292 = vector.broadcast %cst_114 : f32 to vector<8x8xf32>
    %293 = arith.mulf %291, %292 : vector<8x8xf32>
    %294 = vector.extract_strided_slice %236 {offsets = [0, 24], sizes = [16, 8], strides = [1, 1]} : vector<16x32xf32> to vector<16x8xf32>
    %cst_115 = arith.constant dense<0.000000e+00> : vector<8x16xf32>
    %295 = tpu.matmul %293, %294, %cst_115 {dimension_numbers = #tpu.dot_dimension_numbers<[1], [1], [0], [0], [0, 0, 1, 0], [], []>} : vector<8x8xf32>, vector<16x8xf32>, vector<8x16xf32> -> vector<8x16xf32>
    %cst_116 = arith.constant dense<0xFF800000> : vector<8xf32>
    %296 = vector.multi_reduction <maximumf>, %295, %cst_116 [1] : vector<8x16xf32> to vector<8xf32>
    %297 = vector.shape_cast %296 : vector<8xf32> to vector<8x1xf32>
    %298 = vector.broadcast %297 : vector<8x1xf32> to vector<8x16xf32>
    %299 = arith.subf %295, %298 : vector<8x16xf32>
    %300 = math.exp %299 : vector<8x16xf32>
    %cst_117 = arith.constant dense<0.000000e+00> : vector<8xf32>
    %301 = vector.multi_reduction <add>, %300, %cst_117 [1] : vector<8x16xf32> to vector<8xf32>
    %302 = vector.shape_cast %301 : vector<8xf32> to vector<8x1xf32>
    %303 = tpu.reciprocal %302 : vector<8x1xf32> -> vector<8x1xf32>
    %304 = vector.broadcast %303 : vector<8x1xf32> to vector<8x16xf32>
    %305 = arith.mulf %300, %304 : vector<8x16xf32>
    %306 = vector.extract_strided_slice %239 {offsets = [0, 24], sizes = [16, 8], strides = [1, 1]} : vector<16x32xf32> to vector<16x8xf32>
    %cst_118 = arith.constant dense<0.000000e+00> : vector<8x8xf32>
    %307 = tpu.matmul %305, %306, %cst_118 {dimension_numbers = #tpu.dot_dimension_numbers<[1], [0], [0], [1], [0, 0, 1, 1], [], []>} : vector<8x16xf32>, vector<16x8xf32>, vector<8x8xf32> -> vector<8x8xf32>
    %308 = tpu.concatenate %256, %273, %290, %307 in 1 : vector<8x8xf32>, vector<8x8xf32>, vector<8x8xf32>, vector<8x8xf32> -> vector<8x32xf32>
    %309 = vector.extract_strided_slice %220 {offsets = [8, 0], sizes = [8, 32], strides = [1, 1]} : vector<16x32xf32> to vector<8x32xf32>
    %310 = vector.extract_strided_slice %223 {offsets = [8, 0], sizes = [8, 32], strides = [1, 1]} : vector<16x32xf32> to vector<8x32xf32>
    %311 = vector.extract_strided_slice %226 {offsets = [8, 0], sizes = [8, 32], strides = [1, 1]} : vector<16x32xf32> to vector<8x32xf32>
    %312 = tpu.concatenate %310, %311 in 0 : vector<8x32xf32>, vector<8x32xf32> -> vector<16x32xf32>
    %313 = vector.extract_strided_slice %229 {offsets = [8, 0], sizes = [8, 32], strides = [1, 1]} : vector<16x32xf32> to vector<8x32xf32>
    %314 = vector.extract_strided_slice %232 {offsets = [8, 0], sizes = [8, 32], strides = [1, 1]} : vector<16x32xf32> to vector<8x32xf32>
    %315 = tpu.concatenate %313, %314 in 0 : vector<8x32xf32>, vector<8x32xf32> -> vector<16x32xf32>
    %316 = vector.extract_strided_slice %309 {offsets = [0, 0], sizes = [8, 8], strides = [1, 1]} : vector<8x32xf32> to vector<8x8xf32>
    %cst_119 = arith.constant 0.353553385 : f32
    %317 = vector.broadcast %cst_119 : f32 to vector<8x8xf32>
    %318 = arith.mulf %316, %317 : vector<8x8xf32>
    %319 = vector.extract_strided_slice %312 {offsets = [0, 0], sizes = [16, 8], strides = [1, 1]} : vector<16x32xf32> to vector<16x8xf32>
    %cst_120 = arith.constant dense<0.000000e+00> : vector<8x16xf32>
    %320 = tpu.matmul %318, %319, %cst_120 {dimension_numbers = #tpu.dot_dimension_numbers<[1], [1], [0], [0], [0, 0, 1, 0], [], []>} : vector<8x8xf32>, vector<16x8xf32>, vector<8x16xf32> -> vector<8x16xf32>
    %cst_121 = arith.constant dense<0xFF800000> : vector<8xf32>
    %321 = vector.multi_reduction <maximumf>, %320, %cst_121 [1] : vector<8x16xf32> to vector<8xf32>
    %322 = vector.shape_cast %321 : vector<8xf32> to vector<8x1xf32>
    %323 = vector.broadcast %322 : vector<8x1xf32> to vector<8x16xf32>
    %324 = arith.subf %320, %323 : vector<8x16xf32>
    %325 = math.exp %324 : vector<8x16xf32>
    %cst_122 = arith.constant dense<0.000000e+00> : vector<8xf32>
    %326 = vector.multi_reduction <add>, %325, %cst_122 [1] : vector<8x16xf32> to vector<8xf32>
    %327 = vector.shape_cast %326 : vector<8xf32> to vector<8x1xf32>
    %328 = tpu.reciprocal %327 : vector<8x1xf32> -> vector<8x1xf32>
    %329 = vector.broadcast %328 : vector<8x1xf32> to vector<8x16xf32>
    %330 = arith.mulf %325, %329 : vector<8x16xf32>
    %331 = vector.extract_strided_slice %315 {offsets = [0, 0], sizes = [16, 8], strides = [1, 1]} : vector<16x32xf32> to vector<16x8xf32>
    %cst_123 = arith.constant dense<0.000000e+00> : vector<8x8xf32>
    %332 = tpu.matmul %330, %331, %cst_123 {dimension_numbers = #tpu.dot_dimension_numbers<[1], [0], [0], [1], [0, 0, 1, 1], [], []>} : vector<8x16xf32>, vector<16x8xf32>, vector<8x8xf32> -> vector<8x8xf32>
    %333 = vector.extract_strided_slice %309 {offsets = [0, 8], sizes = [8, 8], strides = [1, 1]} : vector<8x32xf32> to vector<8x8xf32>
    %cst_124 = arith.constant 0.353553385 : f32
    %334 = vector.broadcast %cst_124 : f32 to vector<8x8xf32>
    %335 = arith.mulf %333, %334 : vector<8x8xf32>
    %336 = vector.extract_strided_slice %312 {offsets = [0, 8], sizes = [16, 8], strides = [1, 1]} : vector<16x32xf32> to vector<16x8xf32>
    %cst_125 = arith.constant dense<0.000000e+00> : vector<8x16xf32>
    %337 = tpu.matmul %335, %336, %cst_125 {dimension_numbers = #tpu.dot_dimension_numbers<[1], [1], [0], [0], [0, 0, 1, 0], [], []>} : vector<8x8xf32>, vector<16x8xf32>, vector<8x16xf32> -> vector<8x16xf32>
    %cst_126 = arith.constant dense<0xFF800000> : vector<8xf32>
    %338 = vector.multi_reduction <maximumf>, %337, %cst_126 [1] : vector<8x16xf32> to vector<8xf32>
    %339 = vector.shape_cast %338 : vector<8xf32> to vector<8x1xf32>
    %340 = vector.broadcast %339 : vector<8x1xf32> to vector<8x16xf32>
    %341 = arith.subf %337, %340 : vector<8x16xf32>
    %342 = math.exp %341 : vector<8x16xf32>
    %cst_127 = arith.constant dense<0.000000e+00> : vector<8xf32>
    %343 = vector.multi_reduction <add>, %342, %cst_127 [1] : vector<8x16xf32> to vector<8xf32>
    %344 = vector.shape_cast %343 : vector<8xf32> to vector<8x1xf32>
    %345 = tpu.reciprocal %344 : vector<8x1xf32> -> vector<8x1xf32>
    %346 = vector.broadcast %345 : vector<8x1xf32> to vector<8x16xf32>
    %347 = arith.mulf %342, %346 : vector<8x16xf32>
    %348 = vector.extract_strided_slice %315 {offsets = [0, 8], sizes = [16, 8], strides = [1, 1]} : vector<16x32xf32> to vector<16x8xf32>
    %cst_128 = arith.constant dense<0.000000e+00> : vector<8x8xf32>
    %349 = tpu.matmul %347, %348, %cst_128 {dimension_numbers = #tpu.dot_dimension_numbers<[1], [0], [0], [1], [0, 0, 1, 1], [], []>} : vector<8x16xf32>, vector<16x8xf32>, vector<8x8xf32> -> vector<8x8xf32>
    %350 = vector.extract_strided_slice %309 {offsets = [0, 16], sizes = [8, 8], strides = [1, 1]} : vector<8x32xf32> to vector<8x8xf32>
    %cst_129 = arith.constant 0.353553385 : f32
    %351 = vector.broadcast %cst_129 : f32 to vector<8x8xf32>
    %352 = arith.mulf %350, %351 : vector<8x8xf32>
    %353 = vector.extract_strided_slice %312 {offsets = [0, 16], sizes = [16, 8], strides = [1, 1]} : vector<16x32xf32> to vector<16x8xf32>
    %cst_130 = arith.constant dense<0.000000e+00> : vector<8x16xf32>
    %354 = tpu.matmul %352, %353, %cst_130 {dimension_numbers = #tpu.dot_dimension_numbers<[1], [1], [0], [0], [0, 0, 1, 0], [], []>} : vector<8x8xf32>, vector<16x8xf32>, vector<8x16xf32> -> vector<8x16xf32>
    %cst_131 = arith.constant dense<0xFF800000> : vector<8xf32>
    %355 = vector.multi_reduction <maximumf>, %354, %cst_131 [1] : vector<8x16xf32> to vector<8xf32>
    %356 = vector.shape_cast %355 : vector<8xf32> to vector<8x1xf32>
    %357 = vector.broadcast %356 : vector<8x1xf32> to vector<8x16xf32>
    %358 = arith.subf %354, %357 : vector<8x16xf32>
    %359 = math.exp %358 : vector<8x16xf32>
    %cst_132 = arith.constant dense<0.000000e+00> : vector<8xf32>
    %360 = vector.multi_reduction <add>, %359, %cst_132 [1] : vector<8x16xf32> to vector<8xf32>
    %361 = vector.shape_cast %360 : vector<8xf32> to vector<8x1xf32>
    %362 = tpu.reciprocal %361 : vector<8x1xf32> -> vector<8x1xf32>
    %363 = vector.broadcast %362 : vector<8x1xf32> to vector<8x16xf32>
    %364 = arith.mulf %359, %363 : vector<8x16xf32>
    %365 = vector.extract_strided_slice %315 {offsets = [0, 16], sizes = [16, 8], strides = [1, 1]} : vector<16x32xf32> to vector<16x8xf32>
    %cst_133 = arith.constant dense<0.000000e+00> : vector<8x8xf32>
    %366 = tpu.matmul %364, %365, %cst_133 {dimension_numbers = #tpu.dot_dimension_numbers<[1], [0], [0], [1], [0, 0, 1, 1], [], []>} : vector<8x16xf32>, vector<16x8xf32>, vector<8x8xf32> -> vector<8x8xf32>
    %367 = vector.extract_strided_slice %309 {offsets = [0, 24], sizes = [8, 8], strides = [1, 1]} : vector<8x32xf32> to vector<8x8xf32>
    %cst_134 = arith.constant 0.353553385 : f32
    %368 = vector.broadcast %cst_134 : f32 to vector<8x8xf32>
    %369 = arith.mulf %367, %368 : vector<8x8xf32>
    %370 = vector.extract_strided_slice %312 {offsets = [0, 24], sizes = [16, 8], strides = [1, 1]} : vector<16x32xf32> to vector<16x8xf32>
    %cst_135 = arith.constant dense<0.000000e+00> : vector<8x16xf32>
    %371 = tpu.matmul %369, %370, %cst_135 {dimension_numbers = #tpu.dot_dimension_numbers<[1], [1], [0], [0], [0, 0, 1, 0], [], []>} : vector<8x8xf32>, vector<16x8xf32>, vector<8x16xf32> -> vector<8x16xf32>
    %cst_136 = arith.constant dense<0xFF800000> : vector<8xf32>
    %372 = vector.multi_reduction <maximumf>, %371, %cst_136 [1] : vector<8x16xf32> to vector<8xf32>
    %373 = vector.shape_cast %372 : vector<8xf32> to vector<8x1xf32>
    %374 = vector.broadcast %373 : vector<8x1xf32> to vector<8x16xf32>
    %375 = arith.subf %371, %374 : vector<8x16xf32>
    %376 = math.exp %375 : vector<8x16xf32>
    %cst_137 = arith.constant dense<0.000000e+00> : vector<8xf32>
    %377 = vector.multi_reduction <add>, %376, %cst_137 [1] : vector<8x16xf32> to vector<8xf32>
    %378 = vector.shape_cast %377 : vector<8xf32> to vector<8x1xf32>
    %379 = tpu.reciprocal %378 : vector<8x1xf32> -> vector<8x1xf32>
    %380 = vector.broadcast %379 : vector<8x1xf32> to vector<8x16xf32>
    %381 = arith.mulf %376, %380 : vector<8x16xf32>
    %382 = vector.extract_strided_slice %315 {offsets = [0, 24], sizes = [16, 8], strides = [1, 1]} : vector<16x32xf32> to vector<16x8xf32>
    %cst_138 = arith.constant dense<0.000000e+00> : vector<8x8xf32>
    %383 = tpu.matmul %381, %382, %cst_138 {dimension_numbers = #tpu.dot_dimension_numbers<[1], [0], [0], [1], [0, 0, 1, 1], [], []>} : vector<8x16xf32>, vector<16x8xf32>, vector<8x8xf32> -> vector<8x8xf32>
    %384 = tpu.concatenate %332, %349, %366, %383 in 1 : vector<8x8xf32>, vector<8x8xf32>, vector<8x8xf32>, vector<8x8xf32> -> vector<8x32xf32>
    %385 = tpu.concatenate %308, %384 in 0 : vector<8x32xf32>, vector<8x32xf32> -> vector<16x32xf32>
    %cst_139 = arith.constant dense<0.000000e+00> : vector<16x32xf32>
    %386 = tpu.matmul %385, %216, %cst_139 {dimension_numbers = #tpu.dot_dimension_numbers<[1], [0], [0], [1], [0, 0, 1, 1], [], []>} : vector<16x32xf32>, vector<32x32xf32>, vector<16x32xf32> -> vector<16x32xf32>
    %387 = vector.broadcast %217 : vector<1x32xf32> to vector<16x32xf32>
    %388 = arith.addf %386, %387 : vector<16x32xf32>
    %389 = arith.addf %209, %388 : vector<16x32xf32>
    %c0_140 = arith.constant 0 : index
    %c0_141 = arith.constant 0 : index
    %390 = vector.load %arg20[%c0_140, %c0_141] : memref<1x32xf32, #tpu.memory_space<vmem>>, vector<1x32xf32>
    %c0_142 = arith.constant 0 : index
    %c0_143 = arith.constant 0 : index
    %391 = vector.load %arg21[%c0_142, %c0_143] : memref<1x32xf32, #tpu.memory_space<vmem>>, vector<1x32xf32>
    %cst_144 = arith.constant dense<0.000000e+00> : vector<16xf32>
    %392 = vector.multi_reduction <add>, %389, %cst_144 [1] : vector<16x32xf32> to vector<16xf32>
    %393 = vector.shape_cast %392 : vector<16xf32> to vector<16x1xf32>
    %cst_145 = arith.constant 3.200000e+01 : f32
    %394 = vector.broadcast %cst_145 : f32 to vector<16x1xf32>
    %395 = arith.divf %393, %394 : vector<16x1xf32>
    %396 = vector.broadcast %395 : vector<16x1xf32> to vector<16x32xf32>
    %397 = arith.subf %389, %396 : vector<16x32xf32>
    %398 = arith.mulf %397, %397 : vector<16x32xf32>
    %cst_146 = arith.constant dense<0.000000e+00> : vector<16xf32>
    %399 = vector.multi_reduction <add>, %398, %cst_146 [1] : vector<16x32xf32> to vector<16xf32>
    %400 = vector.shape_cast %399 : vector<16xf32> to vector<16x1xf32>
    %cst_147 = arith.constant 3.200000e+01 : f32
    %401 = vector.broadcast %cst_147 : f32 to vector<16x1xf32>
    %402 = arith.divf %400, %401 : vector<16x1xf32>
    %cst_148 = arith.constant 9.99999974E-6 : f32
    %403 = vector.broadcast %cst_148 : f32 to vector<16x1xf32>
    %404 = arith.addf %402, %403 : vector<16x1xf32>
    %405 = math.rsqrt %404 : vector<16x1xf32>
    %406 = vector.broadcast %405 : vector<16x1xf32> to vector<16x32xf32>
    %407 = arith.mulf %397, %406 : vector<16x32xf32>
    %408 = vector.broadcast %390 : vector<1x32xf32> to vector<16x32xf32>
    %409 = arith.mulf %407, %408 : vector<16x32xf32>
    %410 = vector.broadcast %391 : vector<1x32xf32> to vector<16x32xf32>
    %411 = arith.addf %409, %410 : vector<16x32xf32>
    %c0_149 = arith.constant 0 : index
    %c0_150 = arith.constant 0 : index
    %412 = vector.load %arg22[%c0_149, %c0_150] : memref<32x32xf32, #tpu.memory_space<vmem>>, vector<32x32xf32>
    %cst_151 = arith.constant dense<0.000000e+00> : vector<16x32xf32>
    %413 = tpu.matmul %411, %412, %cst_151 {dimension_numbers = #tpu.dot_dimension_numbers<[1], [0], [0], [1], [0, 0, 1, 1], [], []>} : vector<16x32xf32>, vector<32x32xf32>, vector<16x32xf32> -> vector<16x32xf32>
    %c0_152 = arith.constant 0 : index
    %c0_153 = arith.constant 0 : index
    %414 = vector.load %arg23[%c0_152, %c0_153] : memref<1x32xf32, #tpu.memory_space<vmem>>, vector<1x32xf32>
    %415 = vector.broadcast %414 : vector<1x32xf32> to vector<16x32xf32>
    %416 = arith.addf %413, %415 : vector<16x32xf32>
    %cst_154 = arith.constant 0.000000e+00 : f32
    %417 = vector.broadcast %cst_154 : f32 to vector<16x32xf32>
    %418 = arith.maximumf %416, %417 : vector<16x32xf32>
    %c0_155 = arith.constant 0 : index
    %c0_156 = arith.constant 0 : index
    %419 = vector.load %arg24[%c0_155, %c0_156] : memref<32x32xf32, #tpu.memory_space<vmem>>, vector<32x32xf32>
    %cst_157 = arith.constant dense<0.000000e+00> : vector<16x32xf32>
    %420 = tpu.matmul %418, %419, %cst_157 {dimension_numbers = #tpu.dot_dimension_numbers<[1], [0], [0], [1], [0, 0, 1, 1], [], []>} : vector<16x32xf32>, vector<32x32xf32>, vector<16x32xf32> -> vector<16x32xf32>
    %c0_158 = arith.constant 0 : index
    %c0_159 = arith.constant 0 : index
    %421 = vector.load %arg25[%c0_158, %c0_159] : memref<1x32xf32, #tpu.memory_space<vmem>>, vector<1x32xf32>
    %422 = vector.broadcast %421 : vector<1x32xf32> to vector<16x32xf32>
    %423 = arith.addf %420, %422 : vector<16x32xf32>
    %c0_160 = arith.constant 0 : index
    %c0_161 = arith.constant 0 : index
    %424 = vector.load %arg26[%c0_160, %c0_161] : memref<16x32xf32, #tpu.memory_space<vmem>>, vector<16x32xf32>
    tpu.vector_store %arg26[%c0_160, %c0_161], %423 {strides = array<i32>} : memref<16x32xf32, #tpu.memory_space<vmem>>, vector<16x32xf32>,
    return
  }
  func.func @transform_0(%arg0: i32) -> (i32, i32, i32) {
    %c0_i32 = arith.constant 0 : i32
    %c0_i32_0 = arith.constant 0 : i32
    %c0_i32_1 = arith.constant 0 : i32
    return %c0_i32, %arg0, %c0_i32_0 : i32, i32, i32
  }
  func.func @transform_1(%arg0: i32) -> (i32, i32) {
    %c0_i32 = arith.constant 0 : i32
    %c0_i32_0 = arith.constant 0 : i32
    %c0_i32_1 = arith.constant 0 : i32
    return %c0_i32, %c0_i32_0 : i32, i32
  }
  func.func @transform_2(%arg0: i32) -> (i32, i32) {
    %c0_i32 = arith.constant 0 : i32
    %c0_i32_0 = arith.constant 0 : i32
    %c0_i32_1 = arith.constant 0 : i32
    return %c0_i32, %c0_i32_0 : i32, i32
  }
  func.func @transform_3(%arg0: i32) -> (i32, i32) {
    %c0_i32 = arith.constant 0 : i32
    %c0_i32_0 = arith.constant 0 : i32
    %c0_i32_1 = arith.constant 0 : i32
    return %c0_i32, %c0_i32_0 : i32, i32
  }
  func.func @transform_4(%arg0: i32) -> (i32, i32) {
    %c0_i32 = arith.constant 0 : i32
    %c0_i32_0 = arith.constant 0 : i32
    %c0_i32_1 = arith.constant 0 : i32
    return %c0_i32, %c0_i32_0 : i32, i32
  }
  func.func @transform_5(%arg0: i32) -> (i32, i32) {
    %c0_i32 = arith.constant 0 : i32
    %c0_i32_0 = arith.constant 0 : i32
    %c0_i32_1 = arith.constant 0 : i32
    return %c0_i32, %c0_i32_0 : i32, i32
  }
  func.func @transform_6(%arg0: i32) -> (i32, i32) {
    %c0_i32 = arith.constant 0 : i32
    %c0_i32_0 = arith.constant 0 : i32
    %c0_i32_1 = arith.constant 0 : i32
    return %c0_i32, %c0_i32_0 : i32, i32
  }
  func.func @transform_7(%arg0: i32) -> (i32, i32) {
    %c0_i32 = arith.constant 0 : i32
    %c0_i32_0 = arith.constant 0 : i32
    %c0_i32_1 = arith.constant 0 : i32
    return %c0_i32, %c0_i32_0 : i32, i32
  }
  func.func @transform_8(%arg0: i32) -> (i32, i32) {
    %c0_i32 = arith.constant 0 : i32
    %c0_i32_0 = arith.constant 0 : i32
    %c0_i32_1 = arith.constant 0 : i32
    return %c0_i32, %c0_i32_0 : i32, i32
  }
  func.func @transform_9(%arg0: i32) -> (i32, i32) {
    %c0_i32 = arith.constant 0 : i32
    %c0_i32_0 = arith.constant 0 : i32
    %c0_i32_1 = arith.constant 0 : i32
    return %c0_i32, %c0_i32_0 : i32, i32
  }
  func.func @transform_10(%arg0: i32) -> (i32, i32) {
    %c0_i32 = arith.constant 0 : i32
    %c0_i32_0 = arith.constant 0 : i32
    %c0_i32_1 = arith.constant 0 : i32
    return %c0_i32, %c0_i32_0 : i32, i32
  }
  func.func @transform_11(%arg0: i32) -> (i32, i32) {
    %c0_i32 = arith.constant 0 : i32
    %c0_i32_0 = arith.constant 0 : i32
    %c0_i32_1 = arith.constant 0 : i32
    return %c0_i32, %c0_i32_0 : i32, i32
  }
  func.func @transform_12(%arg0: i32) -> (i32, i32) {
    %c0_i32 = arith.constant 0 : i32
    %c0_i32_0 = arith.constant 0 : i32
    %c0_i32_1 = arith.constant 0 : i32
    return %c0_i32, %c0_i32_0 : i32, i32
  }
  func.func @transform_13(%arg0: i32) -> (i32, i32) {
    %c0_i32 = arith.constant 0 : i32
    %c0_i32_0 = arith.constant 0 : i32
    %c0_i32_1 = arith.constant 0 : i32
    return %c0_i32, %c0_i32_0 : i32, i32
  }
  func.func @transform_14(%arg0: i32) -> (i32, i32) {
    %c0_i32 = arith.constant 0 : i32
    %c0_i32_0 = arith.constant 0 : i32
    %c0_i32_1 = arith.constant 0 : i32
    return %c0_i32, %c0_i32_0 : i32, i32
  }
  func.func @transform_15(%arg0: i32) -> (i32, i32) {
    %c0_i32 = arith.constant 0 : i32
    %c0_i32_0 = arith.constant 0 : i32
    %c0_i32_1 = arith.constant 0 : i32
    return %c0_i32, %c0_i32_0 : i32, i32
  }
  func.func @transform_16(%arg0: i32) -> (i32, i32) {
    %c0_i32 = arith.constant 0 : i32
    %c0_i32_0 = arith.constant 0 : i32
    %c0_i32_1 = arith.constant 0 : i32
    return %c0_i32, %c0_i32_0 : i32, i32
  }
  func.func @transform_17(%arg0: i32) -> (i32, i32) {
    %c0_i32 = arith.constant 0 : i32
    %c0_i32_0 = arith.constant 0 : i32
    %c0_i32_1 = arith.constant 0 : i32
    return %c0_i32, %c0_i32_0 : i32, i32
  }
  func.func @transform_18(%arg0: i32) -> (i32, i32) {
    %c0_i32 = arith.constant 0 : i32
    %c0_i32_0 = arith.constant 0 : i32
    %c0_i32_1 = arith.constant 0 : i32
    return %c0_i32, %c0_i32_0 : i32, i32
  }
  func.func @transform_19(%arg0: i32) -> (i32, i32) {
    %c0_i32 = arith.constant 0 : i32
    %c0_i32_0 = arith.constant 0 : i32
    %c0_i32_1 = arith.constant 0 : i32
    return %c0_i32, %c0_i32_0 : i32, i32
  }
  func.func @transform_20(%arg0: i32) -> (i32, i32) {
    %c0_i32 = arith.constant 0 : i32
    %c0_i32_0 = arith.constant 0 : i32
    %c0_i32_1 = arith.constant 0 : i32
    return %c0_i32, %c0_i32_0 : i32, i32
  }
  func.func @transform_21(%arg0: i32) -> (i32, i32) {
    %c0_i32 = arith.constant 0 : i32
    %c0_i32_0 = arith.constant 0 : i32
    %c0_i32_1 = arith.constant 0 : i32
    return %c0_i32, %c0_i32_0 : i32, i32
  }
  func.func @transform_22(%arg0: i32) -> (i32, i32) {
    %c0_i32 = arith.constant 0 : i32
    %c0_i32_0 = arith.constant 0 : i32
    %c0_i32_1 = arith.constant 0 : i32
    return %c0_i32, %c0_i32_0 : i32, i32
  }
  func.func @transform_23(%arg0: i32) -> (i32, i32) {
    %c0_i32 = arith.constant 0 : i32
    %c0_i32_0 = arith.constant 0 : i32
    %c0_i32_1 = arith.constant 0 : i32
    return %c0_i32, %c0_i32_0 : i32, i32
  }
  func.func @transform_24(%arg0: i32) -> (i32, i32) {
    %c0_i32 = arith.constant 0 : i32
    %c0_i32_0 = arith.constant 0 : i32
    %c0_i32_1 = arith.constant 0 : i32
    return %c0_i32, %c0_i32_0 : i32, i32
  }
  func.func @transform_25(%arg0: i32) -> (i32, i32) {
    %c0_i32 = arith.constant 0 : i32
    %c0_i32_0 = arith.constant 0 : i32
    return %arg0, %c0_i32 : i32, i32
  }
}

module attributes {stable_mosaic.version = 11 : i64} {
  func.func @vaf_kernel(%arg0: i32, %arg1: i32, %arg2: memref<1x16x4xf32, #tpu.memory_space<vmem>>, %arg3: memref<1x4x32xf32, #tpu.memory_space<vmem>>, %arg4: memref<1x4x32xf32, #tpu.memory_space<vmem>>, %arg5: memref<1x32x32xf32, #tpu.memory_space<vmem>>, %arg6: memref<1x32x32xf32, #tpu.memory_space<vmem>>, %arg7: memref<1x32x32xf32, #tpu.memory_space<vmem>>, %arg8: memref<1x1x32xf32, #tpu.memory_space<vmem>>, %arg9: memref<1x1x32xf32, #tpu.memory_space<vmem>>, %arg10: memref<1x1x32xf32, #tpu.memory_space<vmem>>, %arg11: memref<1x32x32xf32, #tpu.memory_space<vmem>>, %arg12: memref<1x1x32xf32, #tpu.memory_space<vmem>>, %arg13: memref<1x1x32xf32, #tpu.memory_space<vmem>>, %arg14: memref<1x1x32xf32, #tpu.memory_space<vmem>>, %arg15: memref<1x32x32xf32, #tpu.memory_space<vmem>>, %arg16: memref<1x1x32xf32, #tpu.memory_space<vmem>>, %arg17: memref<1x32x32xf32, #tpu.memory_space<vmem>>, %arg18: memref<1x1x32xf32, #tpu.memory_space<vmem>>, %arg19: memref<1x16x32xf32, #tpu.memory_space<vmem>>) attributes {dimension_semantics = [#tpu.dimension_semantics<parallel>, #tpu.dimension_semantics<parallel>], iteration_bounds = array<i64: 4, 1>, scalar_prefetch = 0 : i64, scratch_operands = 0 : i64, tpu.core_type = #tpu.core_type<tc>, window_params = [{transform_indices = @transform_0, window_bounds = array<i64: 1, 16, 4>}, {transform_indices = @transform_1, window_bounds = array<i64: 1, 4, 32>}, {transform_indices = @transform_2, window_bounds = array<i64: 1, 4, 32>}, {transform_indices = @transform_3, window_bounds = array<i64: 1, 32, 32>}, {transform_indices = @transform_4, window_bounds = array<i64: 1, 32, 32>}, {transform_indices = @transform_5, window_bounds = array<i64: 1, 32, 32>}, {transform_indices = @transform_6, window_bounds = array<i64: 1, 1, 32>}, {transform_indices = @transform_7, window_bounds = array<i64: 1, 1, 32>}, {transform_indices = @transform_8, window_bounds = array<i64: 1, 1, 32>}, {transform_indices = @transform_9, window_bounds = array<i64: 1, 32, 32>}, {transform_indices = @transform_10, window_bounds = array<i64: 1, 1, 32>}, {transform_indices = @transform_11, window_bounds = array<i64: 1, 1, 32>}, {transform_indices = @transform_12, window_bounds = array<i64: 1, 1, 32>}, {transform_indices = @transform_13, window_bounds = array<i64: 1, 32, 32>}, {transform_indices = @transform_14, window_bounds = array<i64: 1, 1, 32>}, {transform_indices = @transform_15, window_bounds = array<i64: 1, 32, 32>}, {transform_indices = @transform_16, window_bounds = array<i64: 1, 1, 32>}, {transform_indices = @transform_17, window_bounds = array<i64: 1, 16, 32>}]} {
    %c0 = arith.constant 0 : index
    %c0_0 = arith.constant 0 : index
    %c0_1 = arith.constant 0 : index
    %0 = vector.load %arg2[%c0, %c0_0, %c0_1] : memref<1x16x4xf32, #tpu.memory_space<vmem>>, vector<1x16x4xf32>
    %1 = vector.shape_cast %0 : vector<1x16x4xf32> to vector<16x4xf32>
    %c0_2 = arith.constant 0 : index
    %c0_3 = arith.constant 0 : index
    %c0_4 = arith.constant 0 : index
    %2 = vector.load %arg3[%c0_2, %c0_3, %c0_4] : memref<1x4x32xf32, #tpu.memory_space<vmem>>, vector<1x4x32xf32>
    %3 = vector.shape_cast %2 : vector<1x4x32xf32> to vector<4x32xf32>
    %c0_5 = arith.constant 0 : index
    %c0_6 = arith.constant 0 : index
    %c0_7 = arith.constant 0 : index
    %4 = vector.load %arg4[%c0_5, %c0_6, %c0_7] : memref<1x4x32xf32, #tpu.memory_space<vmem>>, vector<1x4x32xf32>
    %5 = vector.shape_cast %4 : vector<1x4x32xf32> to vector<4x32xf32>
    %c0_8 = arith.constant 0 : index
    %c0_9 = arith.constant 0 : index
    %c0_10 = arith.constant 0 : index
    %6 = vector.load %arg5[%c0_8, %c0_9, %c0_10] : memref<1x32x32xf32, #tpu.memory_space<vmem>>, vector<1x32x32xf32>
    %7 = vector.shape_cast %6 : vector<1x32x32xf32> to vector<32x32xf32>
    %c0_11 = arith.constant 0 : index
    %c0_12 = arith.constant 0 : index
    %c0_13 = arith.constant 0 : index
    %8 = vector.load %arg6[%c0_11, %c0_12, %c0_13] : memref<1x32x32xf32, #tpu.memory_space<vmem>>, vector<1x32x32xf32>
    %9 = vector.shape_cast %8 : vector<1x32x32xf32> to vector<32x32xf32>
    %c0_14 = arith.constant 0 : index
    %c0_15 = arith.constant 0 : index
    %c0_16 = arith.constant 0 : index
    %10 = vector.load %arg7[%c0_14, %c0_15, %c0_16] : memref<1x32x32xf32, #tpu.memory_space<vmem>>, vector<1x32x32xf32>
    %11 = vector.shape_cast %10 : vector<1x32x32xf32> to vector<32x32xf32>
    %c0_17 = arith.constant 0 : index
    %c0_18 = arith.constant 0 : index
    %c0_19 = arith.constant 0 : index
    %12 = vector.load %arg11[%c0_17, %c0_18, %c0_19] : memref<1x32x32xf32, #tpu.memory_space<vmem>>, vector<1x32x32xf32>
    %13 = vector.shape_cast %12 : vector<1x32x32xf32> to vector<32x32xf32>
    %cst = arith.constant dense<0.000000e+00> : vector<4x32xf32>
    %14 = tpu.matmul %3, %7, %cst {dimension_numbers = #tpu.dot_dimension_numbers<[1], [0], [0], [1], [0, 0, 1, 1], [], []>} : vector<4x32xf32>, vector<32x32xf32>, vector<4x32xf32> -> vector<4x32xf32>
    %cst_20 = arith.constant dense<0.000000e+00> : vector<4x32xf32>
    %15 = tpu.matmul %3, %9, %cst_20 {dimension_numbers = #tpu.dot_dimension_numbers<[1], [0], [0], [1], [0, 0, 1, 1], [], []>} : vector<4x32xf32>, vector<32x32xf32>, vector<4x32xf32> -> vector<4x32xf32>
    %cst_21 = arith.constant dense<0.000000e+00> : vector<4x32xf32>
    %16 = tpu.matmul %3, %11, %cst_21 {dimension_numbers = #tpu.dot_dimension_numbers<[1], [0], [0], [1], [0, 0, 1, 1], [], []>} : vector<4x32xf32>, vector<32x32xf32>, vector<4x32xf32> -> vector<4x32xf32>
    %cst_22 = arith.constant dense<0.000000e+00> : vector<4x32xf32>
    %17 = tpu.matmul %5, %7, %cst_22 {dimension_numbers = #tpu.dot_dimension_numbers<[1], [0], [0], [1], [0, 0, 1, 1], [], []>} : vector<4x32xf32>, vector<32x32xf32>, vector<4x32xf32> -> vector<4x32xf32>
    %c0_23 = arith.constant 0 : index
    %c0_24 = arith.constant 0 : index
    %c0_25 = arith.constant 0 : index
    %18 = vector.load %arg8[%c0_23, %c0_24, %c0_25] : memref<1x1x32xf32, #tpu.memory_space<vmem>>, vector<1x1x32xf32>
    %19 = vector.shape_cast %18 : vector<1x1x32xf32> to vector<1x32xf32>
    %20 = vector.broadcast %19 : vector<1x32xf32> to vector<4x32xf32>
    %21 = arith.addf %17, %20 : vector<4x32xf32>
    %cst_26 = arith.constant dense<0.000000e+00> : vector<4x32xf32>
    %22 = tpu.matmul %5, %9, %cst_26 {dimension_numbers = #tpu.dot_dimension_numbers<[1], [0], [0], [1], [0, 0, 1, 1], [], []>} : vector<4x32xf32>, vector<32x32xf32>, vector<4x32xf32> -> vector<4x32xf32>
    %c0_27 = arith.constant 0 : index
    %c0_28 = arith.constant 0 : index
    %c0_29 = arith.constant 0 : index
    %23 = vector.load %arg9[%c0_27, %c0_28, %c0_29] : memref<1x1x32xf32, #tpu.memory_space<vmem>>, vector<1x1x32xf32>
    %24 = vector.shape_cast %23 : vector<1x1x32xf32> to vector<1x32xf32>
    %25 = vector.broadcast %24 : vector<1x32xf32> to vector<4x32xf32>
    %26 = arith.addf %22, %25 : vector<4x32xf32>
    %cst_30 = arith.constant dense<0.000000e+00> : vector<4x32xf32>
    %27 = tpu.matmul %5, %11, %cst_30 {dimension_numbers = #tpu.dot_dimension_numbers<[1], [0], [0], [1], [0, 0, 1, 1], [], []>} : vector<4x32xf32>, vector<32x32xf32>, vector<4x32xf32> -> vector<4x32xf32>
    %c0_31 = arith.constant 0 : index
    %c0_32 = arith.constant 0 : index
    %c0_33 = arith.constant 0 : index
    %28 = vector.load %arg10[%c0_31, %c0_32, %c0_33] : memref<1x1x32xf32, #tpu.memory_space<vmem>>, vector<1x1x32xf32>
    %29 = vector.shape_cast %28 : vector<1x1x32xf32> to vector<1x32xf32>
    %30 = vector.broadcast %29 : vector<1x32xf32> to vector<4x32xf32>
    %31 = arith.addf %27, %30 : vector<4x32xf32>
    %32 = vector.extract_strided_slice %1 {offsets = [0, 0], sizes = [16, 1], strides = [1, 1]} : vector<16x4xf32> to vector<16x1xf32>
    %33 = vector.extract_strided_slice %14 {offsets = [0, 0], sizes = [1, 32], strides = [1, 1]} : vector<4x32xf32> to vector<1x32xf32>
    %34 = vector.broadcast %32 : vector<16x1xf32> to vector<16x32xf32>
    %35 = vector.broadcast %33 : vector<1x32xf32> to vector<16x32xf32>
    %36 = arith.mulf %34, %35 : vector<16x32xf32>
    %37 = vector.extract_strided_slice %21 {offsets = [0, 0], sizes = [1, 32], strides = [1, 1]} : vector<4x32xf32> to vector<1x32xf32>
    %38 = vector.broadcast %37 : vector<1x32xf32> to vector<16x32xf32>
    %39 = arith.addf %36, %38 : vector<16x32xf32>
    %40 = vector.extract_strided_slice %15 {offsets = [0, 0], sizes = [1, 32], strides = [1, 1]} : vector<4x32xf32> to vector<1x32xf32>
    %41 = vector.broadcast %32 : vector<16x1xf32> to vector<16x32xf32>
    %42 = vector.broadcast %40 : vector<1x32xf32> to vector<16x32xf32>
    %43 = arith.mulf %41, %42 : vector<16x32xf32>
    %44 = vector.extract_strided_slice %26 {offsets = [0, 0], sizes = [1, 32], strides = [1, 1]} : vector<4x32xf32> to vector<1x32xf32>
    %45 = vector.broadcast %44 : vector<1x32xf32> to vector<16x32xf32>
    %46 = arith.addf %43, %45 : vector<16x32xf32>
    %47 = vector.extract_strided_slice %16 {offsets = [0, 0], sizes = [1, 32], strides = [1, 1]} : vector<4x32xf32> to vector<1x32xf32>
    %48 = vector.broadcast %32 : vector<16x1xf32> to vector<16x32xf32>
    %49 = vector.broadcast %47 : vector<1x32xf32> to vector<16x32xf32>
    %50 = arith.mulf %48, %49 : vector<16x32xf32>
    %51 = vector.extract_strided_slice %31 {offsets = [0, 0], sizes = [1, 32], strides = [1, 1]} : vector<4x32xf32> to vector<1x32xf32>
    %52 = vector.broadcast %51 : vector<1x32xf32> to vector<16x32xf32>
    %53 = arith.addf %50, %52 : vector<16x32xf32>
    %54 = vector.extract_strided_slice %1 {offsets = [0, 1], sizes = [16, 1], strides = [1, 1]} : vector<16x4xf32> to vector<16x1xf32>
    %55 = vector.extract_strided_slice %14 {offsets = [1, 0], sizes = [1, 32], strides = [1, 1]} : vector<4x32xf32> to vector<1x32xf32>
    %56 = vector.broadcast %54 : vector<16x1xf32> to vector<16x32xf32>
    %57 = vector.broadcast %55 : vector<1x32xf32> to vector<16x32xf32>
    %58 = arith.mulf %56, %57 : vector<16x32xf32>
    %59 = vector.extract_strided_slice %21 {offsets = [1, 0], sizes = [1, 32], strides = [1, 1]} : vector<4x32xf32> to vector<1x32xf32>
    %60 = vector.broadcast %59 : vector<1x32xf32> to vector<16x32xf32>
    %61 = arith.addf %58, %60 : vector<16x32xf32>
    %62 = vector.extract_strided_slice %15 {offsets = [1, 0], sizes = [1, 32], strides = [1, 1]} : vector<4x32xf32> to vector<1x32xf32>
    %63 = vector.broadcast %54 : vector<16x1xf32> to vector<16x32xf32>
    %64 = vector.broadcast %62 : vector<1x32xf32> to vector<16x32xf32>
    %65 = arith.mulf %63, %64 : vector<16x32xf32>
    %66 = vector.extract_strided_slice %26 {offsets = [1, 0], sizes = [1, 32], strides = [1, 1]} : vector<4x32xf32> to vector<1x32xf32>
    %67 = vector.broadcast %66 : vector<1x32xf32> to vector<16x32xf32>
    %68 = arith.addf %65, %67 : vector<16x32xf32>
    %69 = vector.extract_strided_slice %16 {offsets = [1, 0], sizes = [1, 32], strides = [1, 1]} : vector<4x32xf32> to vector<1x32xf32>
    %70 = vector.broadcast %54 : vector<16x1xf32> to vector<16x32xf32>
    %71 = vector.broadcast %69 : vector<1x32xf32> to vector<16x32xf32>
    %72 = arith.mulf %70, %71 : vector<16x32xf32>
    %73 = vector.extract_strided_slice %31 {offsets = [1, 0], sizes = [1, 32], strides = [1, 1]} : vector<4x32xf32> to vector<1x32xf32>
    %74 = vector.broadcast %73 : vector<1x32xf32> to vector<16x32xf32>
    %75 = arith.addf %72, %74 : vector<16x32xf32>
    %76 = vector.extract_strided_slice %1 {offsets = [0, 2], sizes = [16, 1], strides = [1, 1]} : vector<16x4xf32> to vector<16x1xf32>
    %77 = vector.extract_strided_slice %14 {offsets = [2, 0], sizes = [1, 32], strides = [1, 1]} : vector<4x32xf32> to vector<1x32xf32>
    %78 = vector.broadcast %76 : vector<16x1xf32> to vector<16x32xf32>
    %79 = vector.broadcast %77 : vector<1x32xf32> to vector<16x32xf32>
    %80 = arith.mulf %78, %79 : vector<16x32xf32>
    %81 = vector.extract_strided_slice %21 {offsets = [2, 0], sizes = [1, 32], strides = [1, 1]} : vector<4x32xf32> to vector<1x32xf32>
    %82 = vector.broadcast %81 : vector<1x32xf32> to vector<16x32xf32>
    %83 = arith.addf %80, %82 : vector<16x32xf32>
    %84 = vector.extract_strided_slice %15 {offsets = [2, 0], sizes = [1, 32], strides = [1, 1]} : vector<4x32xf32> to vector<1x32xf32>
    %85 = vector.broadcast %76 : vector<16x1xf32> to vector<16x32xf32>
    %86 = vector.broadcast %84 : vector<1x32xf32> to vector<16x32xf32>
    %87 = arith.mulf %85, %86 : vector<16x32xf32>
    %88 = vector.extract_strided_slice %26 {offsets = [2, 0], sizes = [1, 32], strides = [1, 1]} : vector<4x32xf32> to vector<1x32xf32>
    %89 = vector.broadcast %88 : vector<1x32xf32> to vector<16x32xf32>
    %90 = arith.addf %87, %89 : vector<16x32xf32>
    %91 = vector.extract_strided_slice %16 {offsets = [2, 0], sizes = [1, 32], strides = [1, 1]} : vector<4x32xf32> to vector<1x32xf32>
    %92 = vector.broadcast %76 : vector<16x1xf32> to vector<16x32xf32>
    %93 = vector.broadcast %91 : vector<1x32xf32> to vector<16x32xf32>
    %94 = arith.mulf %92, %93 : vector<16x32xf32>
    %95 = vector.extract_strided_slice %31 {offsets = [2, 0], sizes = [1, 32], strides = [1, 1]} : vector<4x32xf32> to vector<1x32xf32>
    %96 = vector.broadcast %95 : vector<1x32xf32> to vector<16x32xf32>
    %97 = arith.addf %94, %96 : vector<16x32xf32>
    %98 = vector.extract_strided_slice %1 {offsets = [0, 3], sizes = [16, 1], strides = [1, 1]} : vector<16x4xf32> to vector<16x1xf32>
    %99 = vector.extract_strided_slice %14 {offsets = [3, 0], sizes = [1, 32], strides = [1, 1]} : vector<4x32xf32> to vector<1x32xf32>
    %100 = vector.broadcast %98 : vector<16x1xf32> to vector<16x32xf32>
    %101 = vector.broadcast %99 : vector<1x32xf32> to vector<16x32xf32>
    %102 = arith.mulf %100, %101 : vector<16x32xf32>
    %103 = vector.extract_strided_slice %21 {offsets = [3, 0], sizes = [1, 32], strides = [1, 1]} : vector<4x32xf32> to vector<1x32xf32>
    %104 = vector.broadcast %103 : vector<1x32xf32> to vector<16x32xf32>
    %105 = arith.addf %102, %104 : vector<16x32xf32>
    %106 = vector.extract_strided_slice %15 {offsets = [3, 0], sizes = [1, 32], strides = [1, 1]} : vector<4x32xf32> to vector<1x32xf32>
    %107 = vector.broadcast %98 : vector<16x1xf32> to vector<16x32xf32>
    %108 = vector.broadcast %106 : vector<1x32xf32> to vector<16x32xf32>
    %109 = arith.mulf %107, %108 : vector<16x32xf32>
    %110 = vector.extract_strided_slice %26 {offsets = [3, 0], sizes = [1, 32], strides = [1, 1]} : vector<4x32xf32> to vector<1x32xf32>
    %111 = vector.broadcast %110 : vector<1x32xf32> to vector<16x32xf32>
    %112 = arith.addf %109, %111 : vector<16x32xf32>
    %113 = vector.extract_strided_slice %16 {offsets = [3, 0], sizes = [1, 32], strides = [1, 1]} : vector<4x32xf32> to vector<1x32xf32>
    %114 = vector.broadcast %98 : vector<16x1xf32> to vector<16x32xf32>
    %115 = vector.broadcast %113 : vector<1x32xf32> to vector<16x32xf32>
    %116 = arith.mulf %114, %115 : vector<16x32xf32>
    %117 = vector.extract_strided_slice %31 {offsets = [3, 0], sizes = [1, 32], strides = [1, 1]} : vector<4x32xf32> to vector<1x32xf32>
    %118 = vector.broadcast %117 : vector<1x32xf32> to vector<16x32xf32>
    %119 = arith.addf %116, %118 : vector<16x32xf32>
    %120 = vector.extract_strided_slice %46 {offsets = [0, 0], sizes = [16, 8], strides = [1, 1]} : vector<16x32xf32> to vector<16x8xf32>
    %121 = vector.extract_strided_slice %68 {offsets = [0, 0], sizes = [16, 8], strides = [1, 1]} : vector<16x32xf32> to vector<16x8xf32>
    %122 = vector.extract_strided_slice %90 {offsets = [0, 0], sizes = [16, 8], strides = [1, 1]} : vector<16x32xf32> to vector<16x8xf32>
    %123 = vector.extract_strided_slice %112 {offsets = [0, 0], sizes = [16, 8], strides = [1, 1]} : vector<16x32xf32> to vector<16x8xf32>
    %124 = vector.extract_strided_slice %53 {offsets = [0, 0], sizes = [16, 8], strides = [1, 1]} : vector<16x32xf32> to vector<16x8xf32>
    %125 = vector.extract_strided_slice %75 {offsets = [0, 0], sizes = [16, 8], strides = [1, 1]} : vector<16x32xf32> to vector<16x8xf32>
    %126 = vector.extract_strided_slice %97 {offsets = [0, 0], sizes = [16, 8], strides = [1, 1]} : vector<16x32xf32> to vector<16x8xf32>
    %127 = vector.extract_strided_slice %119 {offsets = [0, 0], sizes = [16, 8], strides = [1, 1]} : vector<16x32xf32> to vector<16x8xf32>
    %cst_34 = arith.constant 0.000000e+00 : f32
    %128 = vector.broadcast %cst_34 : f32 to vector<16x4xf32>
    %129 = vector.extract_strided_slice %39 {offsets = [0, 0], sizes = [16, 8], strides = [1, 1]} : vector<16x32xf32> to vector<16x8xf32>
    %cst_35 = arith.constant 0.353553385 : f32
    %130 = vector.broadcast %cst_35 : f32 to vector<16x8xf32>
    %131 = arith.mulf %129, %130 : vector<16x8xf32>
    %132 = arith.mulf %131, %120 : vector<16x8xf32>
    %cst_36 = arith.constant dense<0.000000e+00> : vector<16xf32>
    %133 = vector.multi_reduction <add>, %132, %cst_36 [1] : vector<16x8xf32> to vector<16xf32>
    %134 = vector.shape_cast %133 : vector<16xf32> to vector<16x1xf32>
    %135 = arith.mulf %131, %121 : vector<16x8xf32>
    %cst_37 = arith.constant dense<0.000000e+00> : vector<16xf32>
    %136 = vector.multi_reduction <add>, %135, %cst_37 [1] : vector<16x8xf32> to vector<16xf32>
    %137 = vector.shape_cast %136 : vector<16xf32> to vector<16x1xf32>
    %138 = arith.mulf %131, %122 : vector<16x8xf32>
    %cst_38 = arith.constant dense<0.000000e+00> : vector<16xf32>
    %139 = vector.multi_reduction <add>, %138, %cst_38 [1] : vector<16x8xf32> to vector<16xf32>
    %140 = vector.shape_cast %139 : vector<16xf32> to vector<16x1xf32>
    %141 = arith.mulf %131, %123 : vector<16x8xf32>
    %cst_39 = arith.constant dense<0.000000e+00> : vector<16xf32>
    %142 = vector.multi_reduction <add>, %141, %cst_39 [1] : vector<16x8xf32> to vector<16xf32>
    %143 = vector.shape_cast %142 : vector<16xf32> to vector<16x1xf32>
    %144 = tpu.concatenate %134, %137, %140, %143 in 1 : vector<16x1xf32>, vector<16x1xf32>, vector<16x1xf32>, vector<16x1xf32> -> vector<16x4xf32>
    %cst_40 = arith.constant dense<0xFF800000> : vector<16xf32>
    %145 = vector.multi_reduction <maximumf>, %144, %cst_40 [1] : vector<16x4xf32> to vector<16xf32>
    %146 = vector.shape_cast %145 : vector<16xf32> to vector<16x1xf32>
    %147 = vector.broadcast %146 : vector<16x1xf32> to vector<16x4xf32>
    %148 = arith.subf %144, %147 : vector<16x4xf32>
    %149 = math.exp %148 : vector<16x4xf32>
    %cst_41 = arith.constant dense<0.000000e+00> : vector<16xf32>
    %150 = vector.multi_reduction <add>, %149, %cst_41 [1] : vector<16x4xf32> to vector<16xf32>
    %151 = vector.shape_cast %150 : vector<16xf32> to vector<16x1xf32>
    %152 = tpu.reciprocal %151 : vector<16x1xf32> -> vector<16x1xf32>
    %153 = vector.broadcast %152 : vector<16x1xf32> to vector<16x4xf32>
    %154 = arith.mulf %149, %153 : vector<16x4xf32>
    %155 = arith.addf %128, %154 : vector<16x4xf32>
    %156 = vector.extract_strided_slice %61 {offsets = [0, 0], sizes = [16, 8], strides = [1, 1]} : vector<16x32xf32> to vector<16x8xf32>
    %cst_42 = arith.constant 0.353553385 : f32
    %157 = vector.broadcast %cst_42 : f32 to vector<16x8xf32>
    %158 = arith.mulf %156, %157 : vector<16x8xf32>
    %159 = arith.mulf %158, %120 : vector<16x8xf32>
    %cst_43 = arith.constant dense<0.000000e+00> : vector<16xf32>
    %160 = vector.multi_reduction <add>, %159, %cst_43 [1] : vector<16x8xf32> to vector<16xf32>
    %161 = vector.shape_cast %160 : vector<16xf32> to vector<16x1xf32>
    %162 = arith.mulf %158, %121 : vector<16x8xf32>
    %cst_44 = arith.constant dense<0.000000e+00> : vector<16xf32>
    %163 = vector.multi_reduction <add>, %162, %cst_44 [1] : vector<16x8xf32> to vector<16xf32>
    %164 = vector.shape_cast %163 : vector<16xf32> to vector<16x1xf32>
    %165 = arith.mulf %158, %122 : vector<16x8xf32>
    %cst_45 = arith.constant dense<0.000000e+00> : vector<16xf32>
    %166 = vector.multi_reduction <add>, %165, %cst_45 [1] : vector<16x8xf32> to vector<16xf32>
    %167 = vector.shape_cast %166 : vector<16xf32> to vector<16x1xf32>
    %168 = arith.mulf %158, %123 : vector<16x8xf32>
    %cst_46 = arith.constant dense<0.000000e+00> : vector<16xf32>
    %169 = vector.multi_reduction <add>, %168, %cst_46 [1] : vector<16x8xf32> to vector<16xf32>
    %170 = vector.shape_cast %169 : vector<16xf32> to vector<16x1xf32>
    %171 = tpu.concatenate %161, %164, %167, %170 in 1 : vector<16x1xf32>, vector<16x1xf32>, vector<16x1xf32>, vector<16x1xf32> -> vector<16x4xf32>
    %cst_47 = arith.constant dense<0xFF800000> : vector<16xf32>
    %172 = vector.multi_reduction <maximumf>, %171, %cst_47 [1] : vector<16x4xf32> to vector<16xf32>
    %173 = vector.shape_cast %172 : vector<16xf32> to vector<16x1xf32>
    %174 = vector.broadcast %173 : vector<16x1xf32> to vector<16x4xf32>
    %175 = arith.subf %171, %174 : vector<16x4xf32>
    %176 = math.exp %175 : vector<16x4xf32>
    %cst_48 = arith.constant dense<0.000000e+00> : vector<16xf32>
    %177 = vector.multi_reduction <add>, %176, %cst_48 [1] : vector<16x4xf32> to vector<16xf32>
    %178 = vector.shape_cast %177 : vector<16xf32> to vector<16x1xf32>
    %179 = tpu.reciprocal %178 : vector<16x1xf32> -> vector<16x1xf32>
    %180 = vector.broadcast %179 : vector<16x1xf32> to vector<16x4xf32>
    %181 = arith.mulf %176, %180 : vector<16x4xf32>
    %182 = arith.addf %155, %181 : vector<16x4xf32>
    %183 = vector.extract_strided_slice %83 {offsets = [0, 0], sizes = [16, 8], strides = [1, 1]} : vector<16x32xf32> to vector<16x8xf32>
    %cst_49 = arith.constant 0.353553385 : f32
    %184 = vector.broadcast %cst_49 : f32 to vector<16x8xf32>
    %185 = arith.mulf %183, %184 : vector<16x8xf32>
    %186 = arith.mulf %185, %120 : vector<16x8xf32>
    %cst_50 = arith.constant dense<0.000000e+00> : vector<16xf32>
    %187 = vector.multi_reduction <add>, %186, %cst_50 [1] : vector<16x8xf32> to vector<16xf32>
    %188 = vector.shape_cast %187 : vector<16xf32> to vector<16x1xf32>
    %189 = arith.mulf %185, %121 : vector<16x8xf32>
    %cst_51 = arith.constant dense<0.000000e+00> : vector<16xf32>
    %190 = vector.multi_reduction <add>, %189, %cst_51 [1] : vector<16x8xf32> to vector<16xf32>
    %191 = vector.shape_cast %190 : vector<16xf32> to vector<16x1xf32>
    %192 = arith.mulf %185, %122 : vector<16x8xf32>
    %cst_52 = arith.constant dense<0.000000e+00> : vector<16xf32>
    %193 = vector.multi_reduction <add>, %192, %cst_52 [1] : vector<16x8xf32> to vector<16xf32>
    %194 = vector.shape_cast %193 : vector<16xf32> to vector<16x1xf32>
    %195 = arith.mulf %185, %123 : vector<16x8xf32>
    %cst_53 = arith.constant dense<0.000000e+00> : vector<16xf32>
    %196 = vector.multi_reduction <add>, %195, %cst_53 [1] : vector<16x8xf32> to vector<16xf32>
    %197 = vector.shape_cast %196 : vector<16xf32> to vector<16x1xf32>
    %198 = tpu.concatenate %188, %191, %194, %197 in 1 : vector<16x1xf32>, vector<16x1xf32>, vector<16x1xf32>, vector<16x1xf32> -> vector<16x4xf32>
    %cst_54 = arith.constant dense<0xFF800000> : vector<16xf32>
    %199 = vector.multi_reduction <maximumf>, %198, %cst_54 [1] : vector<16x4xf32> to vector<16xf32>
    %200 = vector.shape_cast %199 : vector<16xf32> to vector<16x1xf32>
    %201 = vector.broadcast %200 : vector<16x1xf32> to vector<16x4xf32>
    %202 = arith.subf %198, %201 : vector<16x4xf32>
    %203 = math.exp %202 : vector<16x4xf32>
    %cst_55 = arith.constant dense<0.000000e+00> : vector<16xf32>
    %204 = vector.multi_reduction <add>, %203, %cst_55 [1] : vector<16x4xf32> to vector<16xf32>
    %205 = vector.shape_cast %204 : vector<16xf32> to vector<16x1xf32>
    %206 = tpu.reciprocal %205 : vector<16x1xf32> -> vector<16x1xf32>
    %207 = vector.broadcast %206 : vector<16x1xf32> to vector<16x4xf32>
    %208 = arith.mulf %203, %207 : vector<16x4xf32>
    %209 = arith.addf %182, %208 : vector<16x4xf32>
    %210 = vector.extract_strided_slice %105 {offsets = [0, 0], sizes = [16, 8], strides = [1, 1]} : vector<16x32xf32> to vector<16x8xf32>
    %cst_56 = arith.constant 0.353553385 : f32
    %211 = vector.broadcast %cst_56 : f32 to vector<16x8xf32>
    %212 = arith.mulf %210, %211 : vector<16x8xf32>
    %213 = arith.mulf %212, %120 : vector<16x8xf32>
    %cst_57 = arith.constant dense<0.000000e+00> : vector<16xf32>
    %214 = vector.multi_reduction <add>, %213, %cst_57 [1] : vector<16x8xf32> to vector<16xf32>
    %215 = vector.shape_cast %214 : vector<16xf32> to vector<16x1xf32>
    %216 = arith.mulf %212, %121 : vector<16x8xf32>
    %cst_58 = arith.constant dense<0.000000e+00> : vector<16xf32>
    %217 = vector.multi_reduction <add>, %216, %cst_58 [1] : vector<16x8xf32> to vector<16xf32>
    %218 = vector.shape_cast %217 : vector<16xf32> to vector<16x1xf32>
    %219 = arith.mulf %212, %122 : vector<16x8xf32>
    %cst_59 = arith.constant dense<0.000000e+00> : vector<16xf32>
    %220 = vector.multi_reduction <add>, %219, %cst_59 [1] : vector<16x8xf32> to vector<16xf32>
    %221 = vector.shape_cast %220 : vector<16xf32> to vector<16x1xf32>
    %222 = arith.mulf %212, %123 : vector<16x8xf32>
    %cst_60 = arith.constant dense<0.000000e+00> : vector<16xf32>
    %223 = vector.multi_reduction <add>, %222, %cst_60 [1] : vector<16x8xf32> to vector<16xf32>
    %224 = vector.shape_cast %223 : vector<16xf32> to vector<16x1xf32>
    %225 = tpu.concatenate %215, %218, %221, %224 in 1 : vector<16x1xf32>, vector<16x1xf32>, vector<16x1xf32>, vector<16x1xf32> -> vector<16x4xf32>
    %cst_61 = arith.constant dense<0xFF800000> : vector<16xf32>
    %226 = vector.multi_reduction <maximumf>, %225, %cst_61 [1] : vector<16x4xf32> to vector<16xf32>
    %227 = vector.shape_cast %226 : vector<16xf32> to vector<16x1xf32>
    %228 = vector.broadcast %227 : vector<16x1xf32> to vector<16x4xf32>
    %229 = arith.subf %225, %228 : vector<16x4xf32>
    %230 = math.exp %229 : vector<16x4xf32>
    %cst_62 = arith.constant dense<0.000000e+00> : vector<16xf32>
    %231 = vector.multi_reduction <add>, %230, %cst_62 [1] : vector<16x4xf32> to vector<16xf32>
    %232 = vector.shape_cast %231 : vector<16xf32> to vector<16x1xf32>
    %233 = tpu.reciprocal %232 : vector<16x1xf32> -> vector<16x1xf32>
    %234 = vector.broadcast %233 : vector<16x1xf32> to vector<16x4xf32>
    %235 = arith.mulf %230, %234 : vector<16x4xf32>
    %236 = arith.addf %209, %235 : vector<16x4xf32>
    %cst_63 = arith.constant 2.500000e-01 : f32
    %237 = vector.broadcast %cst_63 : f32 to vector<16x4xf32>
    %238 = arith.mulf %236, %237 : vector<16x4xf32>
    %239 = vector.extract_strided_slice %238 {offsets = [0, 0], sizes = [16, 1], strides = [1, 1]} : vector<16x4xf32> to vector<16x1xf32>
    %240 = vector.broadcast %239 : vector<16x1xf32> to vector<16x8xf32>
    %241 = arith.mulf %240, %124 : vector<16x8xf32>
    %242 = vector.extract_strided_slice %238 {offsets = [0, 1], sizes = [16, 1], strides = [1, 1]} : vector<16x4xf32> to vector<16x1xf32>
    %243 = vector.broadcast %242 : vector<16x1xf32> to vector<16x8xf32>
    %244 = arith.mulf %243, %125 : vector<16x8xf32>
    %245 = arith.addf %241, %244 : vector<16x8xf32>
    %246 = vector.extract_strided_slice %238 {offsets = [0, 2], sizes = [16, 1], strides = [1, 1]} : vector<16x4xf32> to vector<16x1xf32>
    %247 = vector.broadcast %246 : vector<16x1xf32> to vector<16x8xf32>
    %248 = arith.mulf %247, %126 : vector<16x8xf32>
    %249 = arith.addf %245, %248 : vector<16x8xf32>
    %250 = vector.extract_strided_slice %238 {offsets = [0, 3], sizes = [16, 1], strides = [1, 1]} : vector<16x4xf32> to vector<16x1xf32>
    %251 = vector.broadcast %250 : vector<16x1xf32> to vector<16x8xf32>
    %252 = arith.mulf %251, %127 : vector<16x8xf32>
    %253 = arith.addf %249, %252 : vector<16x8xf32>
    %254 = vector.extract_strided_slice %46 {offsets = [0, 8], sizes = [16, 8], strides = [1, 1]} : vector<16x32xf32> to vector<16x8xf32>
    %255 = vector.extract_strided_slice %68 {offsets = [0, 8], sizes = [16, 8], strides = [1, 1]} : vector<16x32xf32> to vector<16x8xf32>
    %256 = vector.extract_strided_slice %90 {offsets = [0, 8], sizes = [16, 8], strides = [1, 1]} : vector<16x32xf32> to vector<16x8xf32>
    %257 = vector.extract_strided_slice %112 {offsets = [0, 8], sizes = [16, 8], strides = [1, 1]} : vector<16x32xf32> to vector<16x8xf32>
    %258 = vector.extract_strided_slice %53 {offsets = [0, 8], sizes = [16, 8], strides = [1, 1]} : vector<16x32xf32> to vector<16x8xf32>
    %259 = vector.extract_strided_slice %75 {offsets = [0, 8], sizes = [16, 8], strides = [1, 1]} : vector<16x32xf32> to vector<16x8xf32>
    %260 = vector.extract_strided_slice %97 {offsets = [0, 8], sizes = [16, 8], strides = [1, 1]} : vector<16x32xf32> to vector<16x8xf32>
    %261 = vector.extract_strided_slice %119 {offsets = [0, 8], sizes = [16, 8], strides = [1, 1]} : vector<16x32xf32> to vector<16x8xf32>
    %cst_64 = arith.constant 0.000000e+00 : f32
    %262 = vector.broadcast %cst_64 : f32 to vector<16x4xf32>
    %263 = vector.extract_strided_slice %39 {offsets = [0, 8], sizes = [16, 8], strides = [1, 1]} : vector<16x32xf32> to vector<16x8xf32>
    %cst_65 = arith.constant 0.353553385 : f32
    %264 = vector.broadcast %cst_65 : f32 to vector<16x8xf32>
    %265 = arith.mulf %263, %264 : vector<16x8xf32>
    %266 = arith.mulf %265, %254 : vector<16x8xf32>
    %cst_66 = arith.constant dense<0.000000e+00> : vector<16xf32>
    %267 = vector.multi_reduction <add>, %266, %cst_66 [1] : vector<16x8xf32> to vector<16xf32>
    %268 = vector.shape_cast %267 : vector<16xf32> to vector<16x1xf32>
    %269 = arith.mulf %265, %255 : vector<16x8xf32>
    %cst_67 = arith.constant dense<0.000000e+00> : vector<16xf32>
    %270 = vector.multi_reduction <add>, %269, %cst_67 [1] : vector<16x8xf32> to vector<16xf32>
    %271 = vector.shape_cast %270 : vector<16xf32> to vector<16x1xf32>
    %272 = arith.mulf %265, %256 : vector<16x8xf32>
    %cst_68 = arith.constant dense<0.000000e+00> : vector<16xf32>
    %273 = vector.multi_reduction <add>, %272, %cst_68 [1] : vector<16x8xf32> to vector<16xf32>
    %274 = vector.shape_cast %273 : vector<16xf32> to vector<16x1xf32>
    %275 = arith.mulf %265, %257 : vector<16x8xf32>
    %cst_69 = arith.constant dense<0.000000e+00> : vector<16xf32>
    %276 = vector.multi_reduction <add>, %275, %cst_69 [1] : vector<16x8xf32> to vector<16xf32>
    %277 = vector.shape_cast %276 : vector<16xf32> to vector<16x1xf32>
    %278 = tpu.concatenate %268, %271, %274, %277 in 1 : vector<16x1xf32>, vector<16x1xf32>, vector<16x1xf32>, vector<16x1xf32> -> vector<16x4xf32>
    %cst_70 = arith.constant dense<0xFF800000> : vector<16xf32>
    %279 = vector.multi_reduction <maximumf>, %278, %cst_70 [1] : vector<16x4xf32> to vector<16xf32>
    %280 = vector.shape_cast %279 : vector<16xf32> to vector<16x1xf32>
    %281 = vector.broadcast %280 : vector<16x1xf32> to vector<16x4xf32>
    %282 = arith.subf %278, %281 : vector<16x4xf32>
    %283 = math.exp %282 : vector<16x4xf32>
    %cst_71 = arith.constant dense<0.000000e+00> : vector<16xf32>
    %284 = vector.multi_reduction <add>, %283, %cst_71 [1] : vector<16x4xf32> to vector<16xf32>
    %285 = vector.shape_cast %284 : vector<16xf32> to vector<16x1xf32>
    %286 = tpu.reciprocal %285 : vector<16x1xf32> -> vector<16x1xf32>
    %287 = vector.broadcast %286 : vector<16x1xf32> to vector<16x4xf32>
    %288 = arith.mulf %283, %287 : vector<16x4xf32>
    %289 = arith.addf %262, %288 : vector<16x4xf32>
    %290 = vector.extract_strided_slice %61 {offsets = [0, 8], sizes = [16, 8], strides = [1, 1]} : vector<16x32xf32> to vector<16x8xf32>
    %cst_72 = arith.constant 0.353553385 : f32
    %291 = vector.broadcast %cst_72 : f32 to vector<16x8xf32>
    %292 = arith.mulf %290, %291 : vector<16x8xf32>
    %293 = arith.mulf %292, %254 : vector<16x8xf32>
    %cst_73 = arith.constant dense<0.000000e+00> : vector<16xf32>
    %294 = vector.multi_reduction <add>, %293, %cst_73 [1] : vector<16x8xf32> to vector<16xf32>
    %295 = vector.shape_cast %294 : vector<16xf32> to vector<16x1xf32>
    %296 = arith.mulf %292, %255 : vector<16x8xf32>
    %cst_74 = arith.constant dense<0.000000e+00> : vector<16xf32>
    %297 = vector.multi_reduction <add>, %296, %cst_74 [1] : vector<16x8xf32> to vector<16xf32>
    %298 = vector.shape_cast %297 : vector<16xf32> to vector<16x1xf32>
    %299 = arith.mulf %292, %256 : vector<16x8xf32>
    %cst_75 = arith.constant dense<0.000000e+00> : vector<16xf32>
    %300 = vector.multi_reduction <add>, %299, %cst_75 [1] : vector<16x8xf32> to vector<16xf32>
    %301 = vector.shape_cast %300 : vector<16xf32> to vector<16x1xf32>
    %302 = arith.mulf %292, %257 : vector<16x8xf32>
    %cst_76 = arith.constant dense<0.000000e+00> : vector<16xf32>
    %303 = vector.multi_reduction <add>, %302, %cst_76 [1] : vector<16x8xf32> to vector<16xf32>
    %304 = vector.shape_cast %303 : vector<16xf32> to vector<16x1xf32>
    %305 = tpu.concatenate %295, %298, %301, %304 in 1 : vector<16x1xf32>, vector<16x1xf32>, vector<16x1xf32>, vector<16x1xf32> -> vector<16x4xf32>
    %cst_77 = arith.constant dense<0xFF800000> : vector<16xf32>
    %306 = vector.multi_reduction <maximumf>, %305, %cst_77 [1] : vector<16x4xf32> to vector<16xf32>
    %307 = vector.shape_cast %306 : vector<16xf32> to vector<16x1xf32>
    %308 = vector.broadcast %307 : vector<16x1xf32> to vector<16x4xf32>
    %309 = arith.subf %305, %308 : vector<16x4xf32>
    %310 = math.exp %309 : vector<16x4xf32>
    %cst_78 = arith.constant dense<0.000000e+00> : vector<16xf32>
    %311 = vector.multi_reduction <add>, %310, %cst_78 [1] : vector<16x4xf32> to vector<16xf32>
    %312 = vector.shape_cast %311 : vector<16xf32> to vector<16x1xf32>
    %313 = tpu.reciprocal %312 : vector<16x1xf32> -> vector<16x1xf32>
    %314 = vector.broadcast %313 : vector<16x1xf32> to vector<16x4xf32>
    %315 = arith.mulf %310, %314 : vector<16x4xf32>
    %316 = arith.addf %289, %315 : vector<16x4xf32>
    %317 = vector.extract_strided_slice %83 {offsets = [0, 8], sizes = [16, 8], strides = [1, 1]} : vector<16x32xf32> to vector<16x8xf32>
    %cst_79 = arith.constant 0.353553385 : f32
    %318 = vector.broadcast %cst_79 : f32 to vector<16x8xf32>
    %319 = arith.mulf %317, %318 : vector<16x8xf32>
    %320 = arith.mulf %319, %254 : vector<16x8xf32>
    %cst_80 = arith.constant dense<0.000000e+00> : vector<16xf32>
    %321 = vector.multi_reduction <add>, %320, %cst_80 [1] : vector<16x8xf32> to vector<16xf32>
    %322 = vector.shape_cast %321 : vector<16xf32> to vector<16x1xf32>
    %323 = arith.mulf %319, %255 : vector<16x8xf32>
    %cst_81 = arith.constant dense<0.000000e+00> : vector<16xf32>
    %324 = vector.multi_reduction <add>, %323, %cst_81 [1] : vector<16x8xf32> to vector<16xf32>
    %325 = vector.shape_cast %324 : vector<16xf32> to vector<16x1xf32>
    %326 = arith.mulf %319, %256 : vector<16x8xf32>
    %cst_82 = arith.constant dense<0.000000e+00> : vector<16xf32>
    %327 = vector.multi_reduction <add>, %326, %cst_82 [1] : vector<16x8xf32> to vector<16xf32>
    %328 = vector.shape_cast %327 : vector<16xf32> to vector<16x1xf32>
    %329 = arith.mulf %319, %257 : vector<16x8xf32>
    %cst_83 = arith.constant dense<0.000000e+00> : vector<16xf32>
    %330 = vector.multi_reduction <add>, %329, %cst_83 [1] : vector<16x8xf32> to vector<16xf32>
    %331 = vector.shape_cast %330 : vector<16xf32> to vector<16x1xf32>
    %332 = tpu.concatenate %322, %325, %328, %331 in 1 : vector<16x1xf32>, vector<16x1xf32>, vector<16x1xf32>, vector<16x1xf32> -> vector<16x4xf32>
    %cst_84 = arith.constant dense<0xFF800000> : vector<16xf32>
    %333 = vector.multi_reduction <maximumf>, %332, %cst_84 [1] : vector<16x4xf32> to vector<16xf32>
    %334 = vector.shape_cast %333 : vector<16xf32> to vector<16x1xf32>
    %335 = vector.broadcast %334 : vector<16x1xf32> to vector<16x4xf32>
    %336 = arith.subf %332, %335 : vector<16x4xf32>
    %337 = math.exp %336 : vector<16x4xf32>
    %cst_85 = arith.constant dense<0.000000e+00> : vector<16xf32>
    %338 = vector.multi_reduction <add>, %337, %cst_85 [1] : vector<16x4xf32> to vector<16xf32>
    %339 = vector.shape_cast %338 : vector<16xf32> to vector<16x1xf32>
    %340 = tpu.reciprocal %339 : vector<16x1xf32> -> vector<16x1xf32>
    %341 = vector.broadcast %340 : vector<16x1xf32> to vector<16x4xf32>
    %342 = arith.mulf %337, %341 : vector<16x4xf32>
    %343 = arith.addf %316, %342 : vector<16x4xf32>
    %344 = vector.extract_strided_slice %105 {offsets = [0, 8], sizes = [16, 8], strides = [1, 1]} : vector<16x32xf32> to vector<16x8xf32>
    %cst_86 = arith.constant 0.353553385 : f32
    %345 = vector.broadcast %cst_86 : f32 to vector<16x8xf32>
    %346 = arith.mulf %344, %345 : vector<16x8xf32>
    %347 = arith.mulf %346, %254 : vector<16x8xf32>
    %cst_87 = arith.constant dense<0.000000e+00> : vector<16xf32>
    %348 = vector.multi_reduction <add>, %347, %cst_87 [1] : vector<16x8xf32> to vector<16xf32>
    %349 = vector.shape_cast %348 : vector<16xf32> to vector<16x1xf32>
    %350 = arith.mulf %346, %255 : vector<16x8xf32>
    %cst_88 = arith.constant dense<0.000000e+00> : vector<16xf32>
    %351 = vector.multi_reduction <add>, %350, %cst_88 [1] : vector<16x8xf32> to vector<16xf32>
    %352 = vector.shape_cast %351 : vector<16xf32> to vector<16x1xf32>
    %353 = arith.mulf %346, %256 : vector<16x8xf32>
    %cst_89 = arith.constant dense<0.000000e+00> : vector<16xf32>
    %354 = vector.multi_reduction <add>, %353, %cst_89 [1] : vector<16x8xf32> to vector<16xf32>
    %355 = vector.shape_cast %354 : vector<16xf32> to vector<16x1xf32>
    %356 = arith.mulf %346, %257 : vector<16x8xf32>
    %cst_90 = arith.constant dense<0.000000e+00> : vector<16xf32>
    %357 = vector.multi_reduction <add>, %356, %cst_90 [1] : vector<16x8xf32> to vector<16xf32>
    %358 = vector.shape_cast %357 : vector<16xf32> to vector<16x1xf32>
    %359 = tpu.concatenate %349, %352, %355, %358 in 1 : vector<16x1xf32>, vector<16x1xf32>, vector<16x1xf32>, vector<16x1xf32> -> vector<16x4xf32>
    %cst_91 = arith.constant dense<0xFF800000> : vector<16xf32>
    %360 = vector.multi_reduction <maximumf>, %359, %cst_91 [1] : vector<16x4xf32> to vector<16xf32>
    %361 = vector.shape_cast %360 : vector<16xf32> to vector<16x1xf32>
    %362 = vector.broadcast %361 : vector<16x1xf32> to vector<16x4xf32>
    %363 = arith.subf %359, %362 : vector<16x4xf32>
    %364 = math.exp %363 : vector<16x4xf32>
    %cst_92 = arith.constant dense<0.000000e+00> : vector<16xf32>
    %365 = vector.multi_reduction <add>, %364, %cst_92 [1] : vector<16x4xf32> to vector<16xf32>
    %366 = vector.shape_cast %365 : vector<16xf32> to vector<16x1xf32>
    %367 = tpu.reciprocal %366 : vector<16x1xf32> -> vector<16x1xf32>
    %368 = vector.broadcast %367 : vector<16x1xf32> to vector<16x4xf32>
    %369 = arith.mulf %364, %368 : vector<16x4xf32>
    %370 = arith.addf %343, %369 : vector<16x4xf32>
    %cst_93 = arith.constant 2.500000e-01 : f32
    %371 = vector.broadcast %cst_93 : f32 to vector<16x4xf32>
    %372 = arith.mulf %370, %371 : vector<16x4xf32>
    %373 = vector.extract_strided_slice %372 {offsets = [0, 0], sizes = [16, 1], strides = [1, 1]} : vector<16x4xf32> to vector<16x1xf32>
    %374 = vector.broadcast %373 : vector<16x1xf32> to vector<16x8xf32>
    %375 = arith.mulf %374, %258 : vector<16x8xf32>
    %376 = vector.extract_strided_slice %372 {offsets = [0, 1], sizes = [16, 1], strides = [1, 1]} : vector<16x4xf32> to vector<16x1xf32>
    %377 = vector.broadcast %376 : vector<16x1xf32> to vector<16x8xf32>
    %378 = arith.mulf %377, %259 : vector<16x8xf32>
    %379 = arith.addf %375, %378 : vector<16x8xf32>
    %380 = vector.extract_strided_slice %372 {offsets = [0, 2], sizes = [16, 1], strides = [1, 1]} : vector<16x4xf32> to vector<16x1xf32>
    %381 = vector.broadcast %380 : vector<16x1xf32> to vector<16x8xf32>
    %382 = arith.mulf %381, %260 : vector<16x8xf32>
    %383 = arith.addf %379, %382 : vector<16x8xf32>
    %384 = vector.extract_strided_slice %372 {offsets = [0, 3], sizes = [16, 1], strides = [1, 1]} : vector<16x4xf32> to vector<16x1xf32>
    %385 = vector.broadcast %384 : vector<16x1xf32> to vector<16x8xf32>
    %386 = arith.mulf %385, %261 : vector<16x8xf32>
    %387 = arith.addf %383, %386 : vector<16x8xf32>
    %388 = vector.extract_strided_slice %46 {offsets = [0, 16], sizes = [16, 8], strides = [1, 1]} : vector<16x32xf32> to vector<16x8xf32>
    %389 = vector.extract_strided_slice %68 {offsets = [0, 16], sizes = [16, 8], strides = [1, 1]} : vector<16x32xf32> to vector<16x8xf32>
    %390 = vector.extract_strided_slice %90 {offsets = [0, 16], sizes = [16, 8], strides = [1, 1]} : vector<16x32xf32> to vector<16x8xf32>
    %391 = vector.extract_strided_slice %112 {offsets = [0, 16], sizes = [16, 8], strides = [1, 1]} : vector<16x32xf32> to vector<16x8xf32>
    %392 = vector.extract_strided_slice %53 {offsets = [0, 16], sizes = [16, 8], strides = [1, 1]} : vector<16x32xf32> to vector<16x8xf32>
    %393 = vector.extract_strided_slice %75 {offsets = [0, 16], sizes = [16, 8], strides = [1, 1]} : vector<16x32xf32> to vector<16x8xf32>
    %394 = vector.extract_strided_slice %97 {offsets = [0, 16], sizes = [16, 8], strides = [1, 1]} : vector<16x32xf32> to vector<16x8xf32>
    %395 = vector.extract_strided_slice %119 {offsets = [0, 16], sizes = [16, 8], strides = [1, 1]} : vector<16x32xf32> to vector<16x8xf32>
    %cst_94 = arith.constant 0.000000e+00 : f32
    %396 = vector.broadcast %cst_94 : f32 to vector<16x4xf32>
    %397 = vector.extract_strided_slice %39 {offsets = [0, 16], sizes = [16, 8], strides = [1, 1]} : vector<16x32xf32> to vector<16x8xf32>
    %cst_95 = arith.constant 0.353553385 : f32
    %398 = vector.broadcast %cst_95 : f32 to vector<16x8xf32>
    %399 = arith.mulf %397, %398 : vector<16x8xf32>
    %400 = arith.mulf %399, %388 : vector<16x8xf32>
    %cst_96 = arith.constant dense<0.000000e+00> : vector<16xf32>
    %401 = vector.multi_reduction <add>, %400, %cst_96 [1] : vector<16x8xf32> to vector<16xf32>
    %402 = vector.shape_cast %401 : vector<16xf32> to vector<16x1xf32>
    %403 = arith.mulf %399, %389 : vector<16x8xf32>
    %cst_97 = arith.constant dense<0.000000e+00> : vector<16xf32>
    %404 = vector.multi_reduction <add>, %403, %cst_97 [1] : vector<16x8xf32> to vector<16xf32>
    %405 = vector.shape_cast %404 : vector<16xf32> to vector<16x1xf32>
    %406 = arith.mulf %399, %390 : vector<16x8xf32>
    %cst_98 = arith.constant dense<0.000000e+00> : vector<16xf32>
    %407 = vector.multi_reduction <add>, %406, %cst_98 [1] : vector<16x8xf32> to vector<16xf32>
    %408 = vector.shape_cast %407 : vector<16xf32> to vector<16x1xf32>
    %409 = arith.mulf %399, %391 : vector<16x8xf32>
    %cst_99 = arith.constant dense<0.000000e+00> : vector<16xf32>
    %410 = vector.multi_reduction <add>, %409, %cst_99 [1] : vector<16x8xf32> to vector<16xf32>
    %411 = vector.shape_cast %410 : vector<16xf32> to vector<16x1xf32>
    %412 = tpu.concatenate %402, %405, %408, %411 in 1 : vector<16x1xf32>, vector<16x1xf32>, vector<16x1xf32>, vector<16x1xf32> -> vector<16x4xf32>
    %cst_100 = arith.constant dense<0xFF800000> : vector<16xf32>
    %413 = vector.multi_reduction <maximumf>, %412, %cst_100 [1] : vector<16x4xf32> to vector<16xf32>
    %414 = vector.shape_cast %413 : vector<16xf32> to vector<16x1xf32>
    %415 = vector.broadcast %414 : vector<16x1xf32> to vector<16x4xf32>
    %416 = arith.subf %412, %415 : vector<16x4xf32>
    %417 = math.exp %416 : vector<16x4xf32>
    %cst_101 = arith.constant dense<0.000000e+00> : vector<16xf32>
    %418 = vector.multi_reduction <add>, %417, %cst_101 [1] : vector<16x4xf32> to vector<16xf32>
    %419 = vector.shape_cast %418 : vector<16xf32> to vector<16x1xf32>
    %420 = tpu.reciprocal %419 : vector<16x1xf32> -> vector<16x1xf32>
    %421 = vector.broadcast %420 : vector<16x1xf32> to vector<16x4xf32>
    %422 = arith.mulf %417, %421 : vector<16x4xf32>
    %423 = arith.addf %396, %422 : vector<16x4xf32>
    %424 = vector.extract_strided_slice %61 {offsets = [0, 16], sizes = [16, 8], strides = [1, 1]} : vector<16x32xf32> to vector<16x8xf32>
    %cst_102 = arith.constant 0.353553385 : f32
    %425 = vector.broadcast %cst_102 : f32 to vector<16x8xf32>
    %426 = arith.mulf %424, %425 : vector<16x8xf32>
    %427 = arith.mulf %426, %388 : vector<16x8xf32>
    %cst_103 = arith.constant dense<0.000000e+00> : vector<16xf32>
    %428 = vector.multi_reduction <add>, %427, %cst_103 [1] : vector<16x8xf32> to vector<16xf32>
    %429 = vector.shape_cast %428 : vector<16xf32> to vector<16x1xf32>
    %430 = arith.mulf %426, %389 : vector<16x8xf32>
    %cst_104 = arith.constant dense<0.000000e+00> : vector<16xf32>
    %431 = vector.multi_reduction <add>, %430, %cst_104 [1] : vector<16x8xf32> to vector<16xf32>
    %432 = vector.shape_cast %431 : vector<16xf32> to vector<16x1xf32>
    %433 = arith.mulf %426, %390 : vector<16x8xf32>
    %cst_105 = arith.constant dense<0.000000e+00> : vector<16xf32>
    %434 = vector.multi_reduction <add>, %433, %cst_105 [1] : vector<16x8xf32> to vector<16xf32>
    %435 = vector.shape_cast %434 : vector<16xf32> to vector<16x1xf32>
    %436 = arith.mulf %426, %391 : vector<16x8xf32>
    %cst_106 = arith.constant dense<0.000000e+00> : vector<16xf32>
    %437 = vector.multi_reduction <add>, %436, %cst_106 [1] : vector<16x8xf32> to vector<16xf32>
    %438 = vector.shape_cast %437 : vector<16xf32> to vector<16x1xf32>
    %439 = tpu.concatenate %429, %432, %435, %438 in 1 : vector<16x1xf32>, vector<16x1xf32>, vector<16x1xf32>, vector<16x1xf32> -> vector<16x4xf32>
    %cst_107 = arith.constant dense<0xFF800000> : vector<16xf32>
    %440 = vector.multi_reduction <maximumf>, %439, %cst_107 [1] : vector<16x4xf32> to vector<16xf32>
    %441 = vector.shape_cast %440 : vector<16xf32> to vector<16x1xf32>
    %442 = vector.broadcast %441 : vector<16x1xf32> to vector<16x4xf32>
    %443 = arith.subf %439, %442 : vector<16x4xf32>
    %444 = math.exp %443 : vector<16x4xf32>
    %cst_108 = arith.constant dense<0.000000e+00> : vector<16xf32>
    %445 = vector.multi_reduction <add>, %444, %cst_108 [1] : vector<16x4xf32> to vector<16xf32>
    %446 = vector.shape_cast %445 : vector<16xf32> to vector<16x1xf32>
    %447 = tpu.reciprocal %446 : vector<16x1xf32> -> vector<16x1xf32>
    %448 = vector.broadcast %447 : vector<16x1xf32> to vector<16x4xf32>
    %449 = arith.mulf %444, %448 : vector<16x4xf32>
    %450 = arith.addf %423, %449 : vector<16x4xf32>
    %451 = vector.extract_strided_slice %83 {offsets = [0, 16], sizes = [16, 8], strides = [1, 1]} : vector<16x32xf32> to vector<16x8xf32>
    %cst_109 = arith.constant 0.353553385 : f32
    %452 = vector.broadcast %cst_109 : f32 to vector<16x8xf32>
    %453 = arith.mulf %451, %452 : vector<16x8xf32>
    %454 = arith.mulf %453, %388 : vector<16x8xf32>
    %cst_110 = arith.constant dense<0.000000e+00> : vector<16xf32>
    %455 = vector.multi_reduction <add>, %454, %cst_110 [1] : vector<16x8xf32> to vector<16xf32>
    %456 = vector.shape_cast %455 : vector<16xf32> to vector<16x1xf32>
    %457 = arith.mulf %453, %389 : vector<16x8xf32>
    %cst_111 = arith.constant dense<0.000000e+00> : vector<16xf32>
    %458 = vector.multi_reduction <add>, %457, %cst_111 [1] : vector<16x8xf32> to vector<16xf32>
    %459 = vector.shape_cast %458 : vector<16xf32> to vector<16x1xf32>
    %460 = arith.mulf %453, %390 : vector<16x8xf32>
    %cst_112 = arith.constant dense<0.000000e+00> : vector<16xf32>
    %461 = vector.multi_reduction <add>, %460, %cst_112 [1] : vector<16x8xf32> to vector<16xf32>
    %462 = vector.shape_cast %461 : vector<16xf32> to vector<16x1xf32>
    %463 = arith.mulf %453, %391 : vector<16x8xf32>
    %cst_113 = arith.constant dense<0.000000e+00> : vector<16xf32>
    %464 = vector.multi_reduction <add>, %463, %cst_113 [1] : vector<16x8xf32> to vector<16xf32>
    %465 = vector.shape_cast %464 : vector<16xf32> to vector<16x1xf32>
    %466 = tpu.concatenate %456, %459, %462, %465 in 1 : vector<16x1xf32>, vector<16x1xf32>, vector<16x1xf32>, vector<16x1xf32> -> vector<16x4xf32>
    %cst_114 = arith.constant dense<0xFF800000> : vector<16xf32>
    %467 = vector.multi_reduction <maximumf>, %466, %cst_114 [1] : vector<16x4xf32> to vector<16xf32>
    %468 = vector.shape_cast %467 : vector<16xf32> to vector<16x1xf32>
    %469 = vector.broadcast %468 : vector<16x1xf32> to vector<16x4xf32>
    %470 = arith.subf %466, %469 : vector<16x4xf32>
    %471 = math.exp %470 : vector<16x4xf32>
    %cst_115 = arith.constant dense<0.000000e+00> : vector<16xf32>
    %472 = vector.multi_reduction <add>, %471, %cst_115 [1] : vector<16x4xf32> to vector<16xf32>
    %473 = vector.shape_cast %472 : vector<16xf32> to vector<16x1xf32>
    %474 = tpu.reciprocal %473 : vector<16x1xf32> -> vector<16x1xf32>
    %475 = vector.broadcast %474 : vector<16x1xf32> to vector<16x4xf32>
    %476 = arith.mulf %471, %475 : vector<16x4xf32>
    %477 = arith.addf %450, %476 : vector<16x4xf32>
    %478 = vector.extract_strided_slice %105 {offsets = [0, 16], sizes = [16, 8], strides = [1, 1]} : vector<16x32xf32> to vector<16x8xf32>
    %cst_116 = arith.constant 0.353553385 : f32
    %479 = vector.broadcast %cst_116 : f32 to vector<16x8xf32>
    %480 = arith.mulf %478, %479 : vector<16x8xf32>
    %481 = arith.mulf %480, %388 : vector<16x8xf32>
    %cst_117 = arith.constant dense<0.000000e+00> : vector<16xf32>
    %482 = vector.multi_reduction <add>, %481, %cst_117 [1] : vector<16x8xf32> to vector<16xf32>
    %483 = vector.shape_cast %482 : vector<16xf32> to vector<16x1xf32>
    %484 = arith.mulf %480, %389 : vector<16x8xf32>
    %cst_118 = arith.constant dense<0.000000e+00> : vector<16xf32>
    %485 = vector.multi_reduction <add>, %484, %cst_118 [1] : vector<16x8xf32> to vector<16xf32>
    %486 = vector.shape_cast %485 : vector<16xf32> to vector<16x1xf32>
    %487 = arith.mulf %480, %390 : vector<16x8xf32>
    %cst_119 = arith.constant dense<0.000000e+00> : vector<16xf32>
    %488 = vector.multi_reduction <add>, %487, %cst_119 [1] : vector<16x8xf32> to vector<16xf32>
    %489 = vector.shape_cast %488 : vector<16xf32> to vector<16x1xf32>
    %490 = arith.mulf %480, %391 : vector<16x8xf32>
    %cst_120 = arith.constant dense<0.000000e+00> : vector<16xf32>
    %491 = vector.multi_reduction <add>, %490, %cst_120 [1] : vector<16x8xf32> to vector<16xf32>
    %492 = vector.shape_cast %491 : vector<16xf32> to vector<16x1xf32>
    %493 = tpu.concatenate %483, %486, %489, %492 in 1 : vector<16x1xf32>, vector<16x1xf32>, vector<16x1xf32>, vector<16x1xf32> -> vector<16x4xf32>
    %cst_121 = arith.constant dense<0xFF800000> : vector<16xf32>
    %494 = vector.multi_reduction <maximumf>, %493, %cst_121 [1] : vector<16x4xf32> to vector<16xf32>
    %495 = vector.shape_cast %494 : vector<16xf32> to vector<16x1xf32>
    %496 = vector.broadcast %495 : vector<16x1xf32> to vector<16x4xf32>
    %497 = arith.subf %493, %496 : vector<16x4xf32>
    %498 = math.exp %497 : vector<16x4xf32>
    %cst_122 = arith.constant dense<0.000000e+00> : vector<16xf32>
    %499 = vector.multi_reduction <add>, %498, %cst_122 [1] : vector<16x4xf32> to vector<16xf32>
    %500 = vector.shape_cast %499 : vector<16xf32> to vector<16x1xf32>
    %501 = tpu.reciprocal %500 : vector<16x1xf32> -> vector<16x1xf32>
    %502 = vector.broadcast %501 : vector<16x1xf32> to vector<16x4xf32>
    %503 = arith.mulf %498, %502 : vector<16x4xf32>
    %504 = arith.addf %477, %503 : vector<16x4xf32>
    %cst_123 = arith.constant 2.500000e-01 : f32
    %505 = vector.broadcast %cst_123 : f32 to vector<16x4xf32>
    %506 = arith.mulf %504, %505 : vector<16x4xf32>
    %507 = vector.extract_strided_slice %506 {offsets = [0, 0], sizes = [16, 1], strides = [1, 1]} : vector<16x4xf32> to vector<16x1xf32>
    %508 = vector.broadcast %507 : vector<16x1xf32> to vector<16x8xf32>
    %509 = arith.mulf %508, %392 : vector<16x8xf32>
    %510 = vector.extract_strided_slice %506 {offsets = [0, 1], sizes = [16, 1], strides = [1, 1]} : vector<16x4xf32> to vector<16x1xf32>
    %511 = vector.broadcast %510 : vector<16x1xf32> to vector<16x8xf32>
    %512 = arith.mulf %511, %393 : vector<16x8xf32>
    %513 = arith.addf %509, %512 : vector<16x8xf32>
    %514 = vector.extract_strided_slice %506 {offsets = [0, 2], sizes = [16, 1], strides = [1, 1]} : vector<16x4xf32> to vector<16x1xf32>
    %515 = vector.broadcast %514 : vector<16x1xf32> to vector<16x8xf32>
    %516 = arith.mulf %515, %394 : vector<16x8xf32>
    %517 = arith.addf %513, %516 : vector<16x8xf32>
    %518 = vector.extract_strided_slice %506 {offsets = [0, 3], sizes = [16, 1], strides = [1, 1]} : vector<16x4xf32> to vector<16x1xf32>
    %519 = vector.broadcast %518 : vector<16x1xf32> to vector<16x8xf32>
    %520 = arith.mulf %519, %395 : vector<16x8xf32>
    %521 = arith.addf %517, %520 : vector<16x8xf32>
    %522 = vector.extract_strided_slice %46 {offsets = [0, 24], sizes = [16, 8], strides = [1, 1]} : vector<16x32xf32> to vector<16x8xf32>
    %523 = vector.extract_strided_slice %68 {offsets = [0, 24], sizes = [16, 8], strides = [1, 1]} : vector<16x32xf32> to vector<16x8xf32>
    %524 = vector.extract_strided_slice %90 {offsets = [0, 24], sizes = [16, 8], strides = [1, 1]} : vector<16x32xf32> to vector<16x8xf32>
    %525 = vector.extract_strided_slice %112 {offsets = [0, 24], sizes = [16, 8], strides = [1, 1]} : vector<16x32xf32> to vector<16x8xf32>
    %526 = vector.extract_strided_slice %53 {offsets = [0, 24], sizes = [16, 8], strides = [1, 1]} : vector<16x32xf32> to vector<16x8xf32>
    %527 = vector.extract_strided_slice %75 {offsets = [0, 24], sizes = [16, 8], strides = [1, 1]} : vector<16x32xf32> to vector<16x8xf32>
    %528 = vector.extract_strided_slice %97 {offsets = [0, 24], sizes = [16, 8], strides = [1, 1]} : vector<16x32xf32> to vector<16x8xf32>
    %529 = vector.extract_strided_slice %119 {offsets = [0, 24], sizes = [16, 8], strides = [1, 1]} : vector<16x32xf32> to vector<16x8xf32>
    %cst_124 = arith.constant 0.000000e+00 : f32
    %530 = vector.broadcast %cst_124 : f32 to vector<16x4xf32>
    %531 = vector.extract_strided_slice %39 {offsets = [0, 24], sizes = [16, 8], strides = [1, 1]} : vector<16x32xf32> to vector<16x8xf32>
    %cst_125 = arith.constant 0.353553385 : f32
    %532 = vector.broadcast %cst_125 : f32 to vector<16x8xf32>
    %533 = arith.mulf %531, %532 : vector<16x8xf32>
    %534 = arith.mulf %533, %522 : vector<16x8xf32>
    %cst_126 = arith.constant dense<0.000000e+00> : vector<16xf32>
    %535 = vector.multi_reduction <add>, %534, %cst_126 [1] : vector<16x8xf32> to vector<16xf32>
    %536 = vector.shape_cast %535 : vector<16xf32> to vector<16x1xf32>
    %537 = arith.mulf %533, %523 : vector<16x8xf32>
    %cst_127 = arith.constant dense<0.000000e+00> : vector<16xf32>
    %538 = vector.multi_reduction <add>, %537, %cst_127 [1] : vector<16x8xf32> to vector<16xf32>
    %539 = vector.shape_cast %538 : vector<16xf32> to vector<16x1xf32>
    %540 = arith.mulf %533, %524 : vector<16x8xf32>
    %cst_128 = arith.constant dense<0.000000e+00> : vector<16xf32>
    %541 = vector.multi_reduction <add>, %540, %cst_128 [1] : vector<16x8xf32> to vector<16xf32>
    %542 = vector.shape_cast %541 : vector<16xf32> to vector<16x1xf32>
    %543 = arith.mulf %533, %525 : vector<16x8xf32>
    %cst_129 = arith.constant dense<0.000000e+00> : vector<16xf32>
    %544 = vector.multi_reduction <add>, %543, %cst_129 [1] : vector<16x8xf32> to vector<16xf32>
    %545 = vector.shape_cast %544 : vector<16xf32> to vector<16x1xf32>
    %546 = tpu.concatenate %536, %539, %542, %545 in 1 : vector<16x1xf32>, vector<16x1xf32>, vector<16x1xf32>, vector<16x1xf32> -> vector<16x4xf32>
    %cst_130 = arith.constant dense<0xFF800000> : vector<16xf32>
    %547 = vector.multi_reduction <maximumf>, %546, %cst_130 [1] : vector<16x4xf32> to vector<16xf32>
    %548 = vector.shape_cast %547 : vector<16xf32> to vector<16x1xf32>
    %549 = vector.broadcast %548 : vector<16x1xf32> to vector<16x4xf32>
    %550 = arith.subf %546, %549 : vector<16x4xf32>
    %551 = math.exp %550 : vector<16x4xf32>
    %cst_131 = arith.constant dense<0.000000e+00> : vector<16xf32>
    %552 = vector.multi_reduction <add>, %551, %cst_131 [1] : vector<16x4xf32> to vector<16xf32>
    %553 = vector.shape_cast %552 : vector<16xf32> to vector<16x1xf32>
    %554 = tpu.reciprocal %553 : vector<16x1xf32> -> vector<16x1xf32>
    %555 = vector.broadcast %554 : vector<16x1xf32> to vector<16x4xf32>
    %556 = arith.mulf %551, %555 : vector<16x4xf32>
    %557 = arith.addf %530, %556 : vector<16x4xf32>
    %558 = vector.extract_strided_slice %61 {offsets = [0, 24], sizes = [16, 8], strides = [1, 1]} : vector<16x32xf32> to vector<16x8xf32>
    %cst_132 = arith.constant 0.353553385 : f32
    %559 = vector.broadcast %cst_132 : f32 to vector<16x8xf32>
    %560 = arith.mulf %558, %559 : vector<16x8xf32>
    %561 = arith.mulf %560, %522 : vector<16x8xf32>
    %cst_133 = arith.constant dense<0.000000e+00> : vector<16xf32>
    %562 = vector.multi_reduction <add>, %561, %cst_133 [1] : vector<16x8xf32> to vector<16xf32>
    %563 = vector.shape_cast %562 : vector<16xf32> to vector<16x1xf32>
    %564 = arith.mulf %560, %523 : vector<16x8xf32>
    %cst_134 = arith.constant dense<0.000000e+00> : vector<16xf32>
    %565 = vector.multi_reduction <add>, %564, %cst_134 [1] : vector<16x8xf32> to vector<16xf32>
    %566 = vector.shape_cast %565 : vector<16xf32> to vector<16x1xf32>
    %567 = arith.mulf %560, %524 : vector<16x8xf32>
    %cst_135 = arith.constant dense<0.000000e+00> : vector<16xf32>
    %568 = vector.multi_reduction <add>, %567, %cst_135 [1] : vector<16x8xf32> to vector<16xf32>
    %569 = vector.shape_cast %568 : vector<16xf32> to vector<16x1xf32>
    %570 = arith.mulf %560, %525 : vector<16x8xf32>
    %cst_136 = arith.constant dense<0.000000e+00> : vector<16xf32>
    %571 = vector.multi_reduction <add>, %570, %cst_136 [1] : vector<16x8xf32> to vector<16xf32>
    %572 = vector.shape_cast %571 : vector<16xf32> to vector<16x1xf32>
    %573 = tpu.concatenate %563, %566, %569, %572 in 1 : vector<16x1xf32>, vector<16x1xf32>, vector<16x1xf32>, vector<16x1xf32> -> vector<16x4xf32>
    %cst_137 = arith.constant dense<0xFF800000> : vector<16xf32>
    %574 = vector.multi_reduction <maximumf>, %573, %cst_137 [1] : vector<16x4xf32> to vector<16xf32>
    %575 = vector.shape_cast %574 : vector<16xf32> to vector<16x1xf32>
    %576 = vector.broadcast %575 : vector<16x1xf32> to vector<16x4xf32>
    %577 = arith.subf %573, %576 : vector<16x4xf32>
    %578 = math.exp %577 : vector<16x4xf32>
    %cst_138 = arith.constant dense<0.000000e+00> : vector<16xf32>
    %579 = vector.multi_reduction <add>, %578, %cst_138 [1] : vector<16x4xf32> to vector<16xf32>
    %580 = vector.shape_cast %579 : vector<16xf32> to vector<16x1xf32>
    %581 = tpu.reciprocal %580 : vector<16x1xf32> -> vector<16x1xf32>
    %582 = vector.broadcast %581 : vector<16x1xf32> to vector<16x4xf32>
    %583 = arith.mulf %578, %582 : vector<16x4xf32>
    %584 = arith.addf %557, %583 : vector<16x4xf32>
    %585 = vector.extract_strided_slice %83 {offsets = [0, 24], sizes = [16, 8], strides = [1, 1]} : vector<16x32xf32> to vector<16x8xf32>
    %cst_139 = arith.constant 0.353553385 : f32
    %586 = vector.broadcast %cst_139 : f32 to vector<16x8xf32>
    %587 = arith.mulf %585, %586 : vector<16x8xf32>
    %588 = arith.mulf %587, %522 : vector<16x8xf32>
    %cst_140 = arith.constant dense<0.000000e+00> : vector<16xf32>
    %589 = vector.multi_reduction <add>, %588, %cst_140 [1] : vector<16x8xf32> to vector<16xf32>
    %590 = vector.shape_cast %589 : vector<16xf32> to vector<16x1xf32>
    %591 = arith.mulf %587, %523 : vector<16x8xf32>
    %cst_141 = arith.constant dense<0.000000e+00> : vector<16xf32>
    %592 = vector.multi_reduction <add>, %591, %cst_141 [1] : vector<16x8xf32> to vector<16xf32>
    %593 = vector.shape_cast %592 : vector<16xf32> to vector<16x1xf32>
    %594 = arith.mulf %587, %524 : vector<16x8xf32>
    %cst_142 = arith.constant dense<0.000000e+00> : vector<16xf32>
    %595 = vector.multi_reduction <add>, %594, %cst_142 [1] : vector<16x8xf32> to vector<16xf32>
    %596 = vector.shape_cast %595 : vector<16xf32> to vector<16x1xf32>
    %597 = arith.mulf %587, %525 : vector<16x8xf32>
    %cst_143 = arith.constant dense<0.000000e+00> : vector<16xf32>
    %598 = vector.multi_reduction <add>, %597, %cst_143 [1] : vector<16x8xf32> to vector<16xf32>
    %599 = vector.shape_cast %598 : vector<16xf32> to vector<16x1xf32>
    %600 = tpu.concatenate %590, %593, %596, %599 in 1 : vector<16x1xf32>, vector<16x1xf32>, vector<16x1xf32>, vector<16x1xf32> -> vector<16x4xf32>
    %cst_144 = arith.constant dense<0xFF800000> : vector<16xf32>
    %601 = vector.multi_reduction <maximumf>, %600, %cst_144 [1] : vector<16x4xf32> to vector<16xf32>
    %602 = vector.shape_cast %601 : vector<16xf32> to vector<16x1xf32>
    %603 = vector.broadcast %602 : vector<16x1xf32> to vector<16x4xf32>
    %604 = arith.subf %600, %603 : vector<16x4xf32>
    %605 = math.exp %604 : vector<16x4xf32>
    %cst_145 = arith.constant dense<0.000000e+00> : vector<16xf32>
    %606 = vector.multi_reduction <add>, %605, %cst_145 [1] : vector<16x4xf32> to vector<16xf32>
    %607 = vector.shape_cast %606 : vector<16xf32> to vector<16x1xf32>
    %608 = tpu.reciprocal %607 : vector<16x1xf32> -> vector<16x1xf32>
    %609 = vector.broadcast %608 : vector<16x1xf32> to vector<16x4xf32>
    %610 = arith.mulf %605, %609 : vector<16x4xf32>
    %611 = arith.addf %584, %610 : vector<16x4xf32>
    %612 = vector.extract_strided_slice %105 {offsets = [0, 24], sizes = [16, 8], strides = [1, 1]} : vector<16x32xf32> to vector<16x8xf32>
    %cst_146 = arith.constant 0.353553385 : f32
    %613 = vector.broadcast %cst_146 : f32 to vector<16x8xf32>
    %614 = arith.mulf %612, %613 : vector<16x8xf32>
    %615 = arith.mulf %614, %522 : vector<16x8xf32>
    %cst_147 = arith.constant dense<0.000000e+00> : vector<16xf32>
    %616 = vector.multi_reduction <add>, %615, %cst_147 [1] : vector<16x8xf32> to vector<16xf32>
    %617 = vector.shape_cast %616 : vector<16xf32> to vector<16x1xf32>
    %618 = arith.mulf %614, %523 : vector<16x8xf32>
    %cst_148 = arith.constant dense<0.000000e+00> : vector<16xf32>
    %619 = vector.multi_reduction <add>, %618, %cst_148 [1] : vector<16x8xf32> to vector<16xf32>
    %620 = vector.shape_cast %619 : vector<16xf32> to vector<16x1xf32>
    %621 = arith.mulf %614, %524 : vector<16x8xf32>
    %cst_149 = arith.constant dense<0.000000e+00> : vector<16xf32>
    %622 = vector.multi_reduction <add>, %621, %cst_149 [1] : vector<16x8xf32> to vector<16xf32>
    %623 = vector.shape_cast %622 : vector<16xf32> to vector<16x1xf32>
    %624 = arith.mulf %614, %525 : vector<16x8xf32>
    %cst_150 = arith.constant dense<0.000000e+00> : vector<16xf32>
    %625 = vector.multi_reduction <add>, %624, %cst_150 [1] : vector<16x8xf32> to vector<16xf32>
    %626 = vector.shape_cast %625 : vector<16xf32> to vector<16x1xf32>
    %627 = tpu.concatenate %617, %620, %623, %626 in 1 : vector<16x1xf32>, vector<16x1xf32>, vector<16x1xf32>, vector<16x1xf32> -> vector<16x4xf32>
    %cst_151 = arith.constant dense<0xFF800000> : vector<16xf32>
    %628 = vector.multi_reduction <maximumf>, %627, %cst_151 [1] : vector<16x4xf32> to vector<16xf32>
    %629 = vector.shape_cast %628 : vector<16xf32> to vector<16x1xf32>
    %630 = vector.broadcast %629 : vector<16x1xf32> to vector<16x4xf32>
    %631 = arith.subf %627, %630 : vector<16x4xf32>
    %632 = math.exp %631 : vector<16x4xf32>
    %cst_152 = arith.constant dense<0.000000e+00> : vector<16xf32>
    %633 = vector.multi_reduction <add>, %632, %cst_152 [1] : vector<16x4xf32> to vector<16xf32>
    %634 = vector.shape_cast %633 : vector<16xf32> to vector<16x1xf32>
    %635 = tpu.reciprocal %634 : vector<16x1xf32> -> vector<16x1xf32>
    %636 = vector.broadcast %635 : vector<16x1xf32> to vector<16x4xf32>
    %637 = arith.mulf %632, %636 : vector<16x4xf32>
    %638 = arith.addf %611, %637 : vector<16x4xf32>
    %cst_153 = arith.constant 2.500000e-01 : f32
    %639 = vector.broadcast %cst_153 : f32 to vector<16x4xf32>
    %640 = arith.mulf %638, %639 : vector<16x4xf32>
    %641 = vector.extract_strided_slice %640 {offsets = [0, 0], sizes = [16, 1], strides = [1, 1]} : vector<16x4xf32> to vector<16x1xf32>
    %642 = vector.broadcast %641 : vector<16x1xf32> to vector<16x8xf32>
    %643 = arith.mulf %642, %526 : vector<16x8xf32>
    %644 = vector.extract_strided_slice %640 {offsets = [0, 1], sizes = [16, 1], strides = [1, 1]} : vector<16x4xf32> to vector<16x1xf32>
    %645 = vector.broadcast %644 : vector<16x1xf32> to vector<16x8xf32>
    %646 = arith.mulf %645, %527 : vector<16x8xf32>
    %647 = arith.addf %643, %646 : vector<16x8xf32>
    %648 = vector.extract_strided_slice %640 {offsets = [0, 2], sizes = [16, 1], strides = [1, 1]} : vector<16x4xf32> to vector<16x1xf32>
    %649 = vector.broadcast %648 : vector<16x1xf32> to vector<16x8xf32>
    %650 = arith.mulf %649, %528 : vector<16x8xf32>
    %651 = arith.addf %647, %650 : vector<16x8xf32>
    %652 = vector.extract_strided_slice %640 {offsets = [0, 3], sizes = [16, 1], strides = [1, 1]} : vector<16x4xf32> to vector<16x1xf32>
    %653 = vector.broadcast %652 : vector<16x1xf32> to vector<16x8xf32>
    %654 = arith.mulf %653, %529 : vector<16x8xf32>
    %655 = arith.addf %651, %654 : vector<16x8xf32>
    %656 = tpu.concatenate %253, %387, %521, %655 in 1 : vector<16x8xf32>, vector<16x8xf32>, vector<16x8xf32>, vector<16x8xf32> -> vector<16x32xf32>
    %cst_154 = arith.constant dense<0.000000e+00> : vector<16x32xf32>
    %657 = tpu.matmul %656, %13, %cst_154 {dimension_numbers = #tpu.dot_dimension_numbers<[1], [0], [0], [1], [0, 0, 1, 1], [], []>} : vector<16x32xf32>, vector<32x32xf32>, vector<16x32xf32> -> vector<16x32xf32>
    %c0_155 = arith.constant 0 : index
    %c0_156 = arith.constant 0 : index
    %c0_157 = arith.constant 0 : index
    %658 = vector.load %arg12[%c0_155, %c0_156, %c0_157] : memref<1x1x32xf32, #tpu.memory_space<vmem>>, vector<1x1x32xf32>
    %659 = vector.shape_cast %658 : vector<1x1x32xf32> to vector<1x32xf32>
    %660 = vector.broadcast %659 : vector<1x32xf32> to vector<16x32xf32>
    %661 = arith.addf %657, %660 : vector<16x32xf32>
    %c0_158 = arith.constant 0 : index
    %c0_159 = arith.constant 0 : index
    %c0_160 = arith.constant 0 : index
    %662 = vector.load %arg13[%c0_158, %c0_159, %c0_160] : memref<1x1x32xf32, #tpu.memory_space<vmem>>, vector<1x1x32xf32>
    %663 = vector.shape_cast %662 : vector<1x1x32xf32> to vector<1x32xf32>
    %c0_161 = arith.constant 0 : index
    %c0_162 = arith.constant 0 : index
    %c0_163 = arith.constant 0 : index
    %664 = vector.load %arg14[%c0_161, %c0_162, %c0_163] : memref<1x1x32xf32, #tpu.memory_space<vmem>>, vector<1x1x32xf32>
    %665 = vector.shape_cast %664 : vector<1x1x32xf32> to vector<1x32xf32>
    %cst_164 = arith.constant dense<0.000000e+00> : vector<16xf32>
    %666 = vector.multi_reduction <add>, %661, %cst_164 [1] : vector<16x32xf32> to vector<16xf32>
    %667 = vector.shape_cast %666 : vector<16xf32> to vector<16x1xf32>
    %cst_165 = arith.constant 3.200000e+01 : f32
    %668 = vector.broadcast %cst_165 : f32 to vector<16x1xf32>
    %669 = arith.divf %667, %668 : vector<16x1xf32>
    %670 = vector.broadcast %669 : vector<16x1xf32> to vector<16x32xf32>
    %671 = arith.subf %661, %670 : vector<16x32xf32>
    %672 = arith.mulf %671, %671 : vector<16x32xf32>
    %cst_166 = arith.constant dense<0.000000e+00> : vector<16xf32>
    %673 = vector.multi_reduction <add>, %672, %cst_166 [1] : vector<16x32xf32> to vector<16xf32>
    %674 = vector.shape_cast %673 : vector<16xf32> to vector<16x1xf32>
    %cst_167 = arith.constant 3.200000e+01 : f32
    %675 = vector.broadcast %cst_167 : f32 to vector<16x1xf32>
    %676 = arith.divf %674, %675 : vector<16x1xf32>
    %cst_168 = arith.constant 9.99999974E-6 : f32
    %677 = vector.broadcast %cst_168 : f32 to vector<16x1xf32>
    %678 = arith.addf %676, %677 : vector<16x1xf32>
    %679 = math.rsqrt %678 : vector<16x1xf32>
    %680 = vector.broadcast %679 : vector<16x1xf32> to vector<16x32xf32>
    %681 = arith.mulf %671, %680 : vector<16x32xf32>
    %682 = vector.broadcast %663 : vector<1x32xf32> to vector<16x32xf32>
    %683 = arith.mulf %681, %682 : vector<16x32xf32>
    %684 = vector.broadcast %665 : vector<1x32xf32> to vector<16x32xf32>
    %685 = arith.addf %683, %684 : vector<16x32xf32>
    %c0_169 = arith.constant 0 : index
    %c0_170 = arith.constant 0 : index
    %c0_171 = arith.constant 0 : index
    %686 = vector.load %arg15[%c0_169, %c0_170, %c0_171] : memref<1x32x32xf32, #tpu.memory_space<vmem>>, vector<1x32x32xf32>
    %687 = vector.shape_cast %686 : vector<1x32x32xf32> to vector<32x32xf32>
    %cst_172 = arith.constant dense<0.000000e+00> : vector<16x32xf32>
    %688 = tpu.matmul %685, %687, %cst_172 {dimension_numbers = #tpu.dot_dimension_numbers<[1], [0], [0], [1], [0, 0, 1, 1], [], []>} : vector<16x32xf32>, vector<32x32xf32>, vector<16x32xf32> -> vector<16x32xf32>
    %c0_173 = arith.constant 0 : index
    %c0_174 = arith.constant 0 : index
    %c0_175 = arith.constant 0 : index
    %689 = vector.load %arg16[%c0_173, %c0_174, %c0_175] : memref<1x1x32xf32, #tpu.memory_space<vmem>>, vector<1x1x32xf32>
    %690 = vector.shape_cast %689 : vector<1x1x32xf32> to vector<1x32xf32>
    %691 = vector.broadcast %690 : vector<1x32xf32> to vector<16x32xf32>
    %692 = arith.addf %688, %691 : vector<16x32xf32>
    %cst_176 = arith.constant 0.000000e+00 : f32
    %693 = vector.broadcast %cst_176 : f32 to vector<16x32xf32>
    %694 = arith.maximumf %692, %693 : vector<16x32xf32>
    %c0_177 = arith.constant 0 : index
    %c0_178 = arith.constant 0 : index
    %c0_179 = arith.constant 0 : index
    %695 = vector.load %arg17[%c0_177, %c0_178, %c0_179] : memref<1x32x32xf32, #tpu.memory_space<vmem>>, vector<1x32x32xf32>
    %696 = vector.shape_cast %695 : vector<1x32x32xf32> to vector<32x32xf32>
    %cst_180 = arith.constant dense<0.000000e+00> : vector<16x32xf32>
    %697 = tpu.matmul %694, %696, %cst_180 {dimension_numbers = #tpu.dot_dimension_numbers<[1], [0], [0], [1], [0, 0, 1, 1], [], []>} : vector<16x32xf32>, vector<32x32xf32>, vector<16x32xf32> -> vector<16x32xf32>
    %c0_181 = arith.constant 0 : index
    %c0_182 = arith.constant 0 : index
    %c0_183 = arith.constant 0 : index
    %698 = vector.load %arg18[%c0_181, %c0_182, %c0_183] : memref<1x1x32xf32, #tpu.memory_space<vmem>>, vector<1x1x32xf32>
    %699 = vector.shape_cast %698 : vector<1x1x32xf32> to vector<1x32xf32>
    %700 = vector.broadcast %699 : vector<1x32xf32> to vector<16x32xf32>
    %701 = arith.addf %697, %700 : vector<16x32xf32>
    %c0_184 = arith.constant 0 : index
    %c0_185 = arith.constant 0 : index
    %c0_186 = arith.constant 0 : index
    %702 = vector.load %arg19[%c0_184, %c0_185, %c0_186] : memref<1x16x32xf32, #tpu.memory_space<vmem>>, vector<1x16x32xf32>
    %703 = vector.shape_cast %702 : vector<1x16x32xf32> to vector<16x32xf32>
    %704 = vector.shape_cast %701 : vector<16x32xf32> to vector<1x16x32xf32>
    tpu.vector_store %arg19[%c0_184, %c0_185, %c0_186], %704 {strides = array<i32>} : memref<1x16x32xf32, #tpu.memory_space<vmem>>, vector<1x16x32xf32>,
    return
  }
  func.func @transform_0(%arg0: i32, %arg1: i32) -> (i32, i32, i32) {
    %c0_i32 = arith.constant 0 : i32
    %c0_i32_0 = arith.constant 0 : i32
    return %arg0, %arg1, %c0_i32 : i32, i32, i32
  }
  func.func @transform_1(%arg0: i32, %arg1: i32) -> (i32, i32, i32) {
    %c0_i32 = arith.constant 0 : i32
    %c0_i32_0 = arith.constant 0 : i32
    %c0_i32_1 = arith.constant 0 : i32
    return %arg0, %c0_i32, %c0_i32_0 : i32, i32, i32
  }
  func.func @transform_2(%arg0: i32, %arg1: i32) -> (i32, i32, i32) {
    %c0_i32 = arith.constant 0 : i32
    %c0_i32_0 = arith.constant 0 : i32
    %c0_i32_1 = arith.constant 0 : i32
    return %arg0, %c0_i32, %c0_i32_0 : i32, i32, i32
  }
  func.func @transform_3(%arg0: i32, %arg1: i32) -> (i32, i32, i32) {
    %c0_i32 = arith.constant 0 : i32
    %c0_i32_0 = arith.constant 0 : i32
    %c0_i32_1 = arith.constant 0 : i32
    return %arg0, %c0_i32, %c0_i32_0 : i32, i32, i32
  }
  func.func @transform_4(%arg0: i32, %arg1: i32) -> (i32, i32, i32) {
    %c0_i32 = arith.constant 0 : i32
    %c0_i32_0 = arith.constant 0 : i32
    %c0_i32_1 = arith.constant 0 : i32
    return %arg0, %c0_i32, %c0_i32_0 : i32, i32, i32
  }
  func.func @transform_5(%arg0: i32, %arg1: i32) -> (i32, i32, i32) {
    %c0_i32 = arith.constant 0 : i32
    %c0_i32_0 = arith.constant 0 : i32
    %c0_i32_1 = arith.constant 0 : i32
    return %arg0, %c0_i32, %c0_i32_0 : i32, i32, i32
  }
  func.func @transform_6(%arg0: i32, %arg1: i32) -> (i32, i32, i32) {
    %c0_i32 = arith.constant 0 : i32
    %c0_i32_0 = arith.constant 0 : i32
    %c0_i32_1 = arith.constant 0 : i32
    return %arg0, %c0_i32, %c0_i32_0 : i32, i32, i32
  }
  func.func @transform_7(%arg0: i32, %arg1: i32) -> (i32, i32, i32) {
    %c0_i32 = arith.constant 0 : i32
    %c0_i32_0 = arith.constant 0 : i32
    %c0_i32_1 = arith.constant 0 : i32
    return %arg0, %c0_i32, %c0_i32_0 : i32, i32, i32
  }
  func.func @transform_8(%arg0: i32, %arg1: i32) -> (i32, i32, i32) {
    %c0_i32 = arith.constant 0 : i32
    %c0_i32_0 = arith.constant 0 : i32
    %c0_i32_1 = arith.constant 0 : i32
    return %arg0, %c0_i32, %c0_i32_0 : i32, i32, i32
  }
  func.func @transform_9(%arg0: i32, %arg1: i32) -> (i32, i32, i32) {
    %c0_i32 = arith.constant 0 : i32
    %c0_i32_0 = arith.constant 0 : i32
    %c0_i32_1 = arith.constant 0 : i32
    return %arg0, %c0_i32, %c0_i32_0 : i32, i32, i32
  }
  func.func @transform_10(%arg0: i32, %arg1: i32) -> (i32, i32, i32) {
    %c0_i32 = arith.constant 0 : i32
    %c0_i32_0 = arith.constant 0 : i32
    %c0_i32_1 = arith.constant 0 : i32
    return %arg0, %c0_i32, %c0_i32_0 : i32, i32, i32
  }
  func.func @transform_11(%arg0: i32, %arg1: i32) -> (i32, i32, i32) {
    %c0_i32 = arith.constant 0 : i32
    %c0_i32_0 = arith.constant 0 : i32
    %c0_i32_1 = arith.constant 0 : i32
    return %arg0, %c0_i32, %c0_i32_0 : i32, i32, i32
  }
  func.func @transform_12(%arg0: i32, %arg1: i32) -> (i32, i32, i32) {
    %c0_i32 = arith.constant 0 : i32
    %c0_i32_0 = arith.constant 0 : i32
    %c0_i32_1 = arith.constant 0 : i32
    return %arg0, %c0_i32, %c0_i32_0 : i32, i32, i32
  }
  func.func @transform_13(%arg0: i32, %arg1: i32) -> (i32, i32, i32) {
    %c0_i32 = arith.constant 0 : i32
    %c0_i32_0 = arith.constant 0 : i32
    %c0_i32_1 = arith.constant 0 : i32
    return %arg0, %c0_i32, %c0_i32_0 : i32, i32, i32
  }
  func.func @transform_14(%arg0: i32, %arg1: i32) -> (i32, i32, i32) {
    %c0_i32 = arith.constant 0 : i32
    %c0_i32_0 = arith.constant 0 : i32
    %c0_i32_1 = arith.constant 0 : i32
    return %arg0, %c0_i32, %c0_i32_0 : i32, i32, i32
  }
  func.func @transform_15(%arg0: i32, %arg1: i32) -> (i32, i32, i32) {
    %c0_i32 = arith.constant 0 : i32
    %c0_i32_0 = arith.constant 0 : i32
    %c0_i32_1 = arith.constant 0 : i32
    return %arg0, %c0_i32, %c0_i32_0 : i32, i32, i32
  }
  func.func @transform_16(%arg0: i32, %arg1: i32) -> (i32, i32, i32) {
    %c0_i32 = arith.constant 0 : i32
    %c0_i32_0 = arith.constant 0 : i32
    %c0_i32_1 = arith.constant 0 : i32
    return %arg0, %c0_i32, %c0_i32_0 : i32, i32, i32
  }
  func.func @transform_17(%arg0: i32, %arg1: i32) -> (i32, i32, i32) {
    %c0_i32 = arith.constant 0 : i32
    %c0_i32_0 = arith.constant 0 : i32
    return %arg0, %arg1, %c0_i32 : i32, i32, i32
  }
}

</mosaic_0001>

<bundles_post_ra>
// kernel: multi_trend_forward.2
= control target key start
LH: loop header
LB: loop body
LE: loop exit
PB: predicated region body
PF: predicated region fallthrough
CT: control target
= control target key end

     0   :  { %s6288_s0 = inlined_call_operand.vmem [shape: f32[4,16,4], index: 0, kind: input, shape index: {}]   ;;  %s6289_s1 = inlined_call_operand.vmem [shape: f32[4,4,32], index: 1, kind: input, shape index: {}]   ;;  %s6290_s2 = inlined_call_operand.vmem [shape: f32[4,4,32], index: 2, kind: input, shape index: {}]   ;;  %s6291_s3 = inlined_call_operand.vmem [shape: f32[4,32,32], index: 3, kind: input, shape index: {}]   ;;  %s6292_s4 = inlined_call_operand.vmem [shape: f32[4,32,32], index: 4, kind: input, shape index: {}]   ;;  %s6293_s5 = inlined_call_operand.hbm [shape: f32[4,32,32], index: 5, kind: input, shape index: {}]   ;;  %s6294_s6 = inlined_call_operand.vmem [shape: f32[4,1,32], index: 6, kind: input, shape index: {}]   ;;  %s6295_s7 = inlined_call_operand.hbm [shape: f32[4,1,32], index: 7, kind: input, shape index: {}]   ;;  %s6296_s8 = inlined_call_operand.vmem [shape: f32[4,1,32], index: 8, kind: input, shape index: {}]   ;;  %s6297_s9 = inlined_call_operand.hbm [shape: f32[4,32,32], index: 9, kind: input, shape index: {}]   ;;  %s6298_s10 = inlined_call_operand.hbm [shape: f32[4,1,32], index: 10, kind: input, shape index: {}]   ;;  %s6299_s11 = inlined_call_operand.vmem [shape: f32[4,1,32], index: 11, kind: input, shape index: {}]   ;;  %s6300_s12 = inlined_call_operand.vmem [shape: f32[4,1,32], index: 12, kind: input, shape index: {}]   ;;  %s6301_s13 = inlined_call_operand.hbm [shape: f32[4,32,32], index: 13, kind: input, shape index: {}]   ;;  %s6302_s14 = inlined_call_operand.hbm [shape: f32[4,1,32], index: 14, kind: input, shape index: {}]   ;;  %s6303_s15 = inlined_call_operand.hbm [shape: f32[4,32,32], index: 15, kind: input, shape index: {}]   ;;  %s6304_s16 = inlined_call_operand.hbm [shape: f32[4,1,32], index: 16, kind: input, shape index: {}]   ;;  %s6305_s17 = inlined_call_operand.vmem [shape: f32[4,16,32], index: 17, kind: output, shape index: {}]  }
   0x1   :  { %6340 = sst [smem:[#allocation40_spill]] %s6288_s0 }
   0x2   :  { %6341 = sst [smem:[#allocation41_spill]] %s6289_s1 }
   0x3   :  { %6342 = sst [smem:[#allocation42_spill]] %s6290_s2 }
   0x4   :  { %6343 = sst [smem:[#allocation43_spill]] %s6291_s3 }
   0x5   :  { %6344 = sst [smem:[#allocation44_spill]] %s6292_s4 }
   0x6   :  { %6345 = sst [smem:[#allocation45_spill]] %s6293_s5 }
   0x7   :  { %6346 = sst [smem:[#allocation46_spill]] %s6294_s6 }
   0x8   :  { %6347 = sst [smem:[#allocation47_spill]] %s6295_s7 }
   0x9   :  { %6348 = sst [smem:[#allocation48_spill]] %s6296_s8 }
   0xa   :  { %6349 = sst [smem:[#allocation49_spill]] %s6297_s9 }
   0xb   :  { %6350 = sst [smem:[#allocation50_spill]] %s6298_s10 }
   0xc   :  { %6351 = sst [smem:[#allocation51_spill]] %s6299_s11 }
   0xd   :  { %6352 = sst [smem:[#allocation52_spill]] %s6300_s12 }
   0xe   :  { %6353 = sst [smem:[#allocation53_spill]] %s6302_s14 }
   0xf   :  { %6354 = sst [smem:[#allocation54_spill]] %s6305_s17 }
  0x10   :  { %22 = vsyncpa [#allocation3], 0 }
  0x11   :  { %24 = vsyncpa [#allocation3 + $0x1], 0 }
  0x12   :  { %25 = vsyncpa [#allocation5], 0 }
  0x13   :  { %27 = vsyncpa [#allocation5 + $0x1], 0 }
  0x14   :  { %28 = vsyncpa [#allocation8], 0 }
  0x15   :  { %30 = vsyncpa [#allocation8 + $0x1], 0 }
  0x16   :  { %31 = vsyncpa [#allocation11], 0 }
  0x17   :  { %33 = vsyncpa [#allocation11 + $0x1], 0 }
  0x18   :  { %34 = vsyncpa [#allocation14], 0 }
  0x19   :  { %36 = vsyncpa [#allocation14 + $0x1], 0  ;;  %s4692_s24 = smov 0   ;;  %s4694_s25 = smov 0  }
  0x1a   :  { %s4696_s26 = smov 0   ;;  %s4698_s27 = smov 0  }
  0x1b   :  { %s4700_s28 = smov 0   ;;  %s4702_s29 = smov 0  }
  0x1c LB: > { %6355 = sst [smem:[#allocation20_spill]] %s4568_s26  ;;  %s6306_s0 = sadd.s32 4294967295, %s4580_s29   ;;  %s4580_s29 = sphi %s4702_s29, %s42_s29   ;;  %s4576_s28 = sphi %s4700_s28, %s6430_s28   ;;  %s4572_s27 = sphi %s4698_s27, %s6429_s27   ;;  %s4568_s26 = sphi %s4696_s26, %s6428_s26   ;;  %s4564_s25 = sphi %s4694_s25, %s6432_s25   ;;  %s4560_s24 = sphi %s4692_s24, %s6431_s24  }
  0x1d   : > { %6356 = sst [smem:[#allocation21_spill]] %s4576_s28  ;;  %s54_s30 = sadd.s32 1, %s4576_s28 }
  0x1e   : > { %p56_p0 = scmp.ge.s32.totalorder %s54_s30, 4  ;;  %s193_s18 = sadd.s32 1, %s4568_s26 }
  0x1f   : > { %p200_p1 = scmp.ne.s32.totalorder %s4568_s26, %s4564_s25  ;;  %p201_p2 = scmp.eq.s32.totalorder %s4580_s29, 0 }
  0x20   : > { %s6434_s30 = smov (%p56_p0, %s54_s30), 0  ;;  %p206_p4 = scmp.ne.s32.totalorder %s4564_s25, %s4560_s24 }
  0x21   : > { %6357 = sst [smem:[#allocation22_spill]] %s6434_s30  ;;  %p202_p3 = por %p201_p2, %p200_p1 }
  0x22   : > { %s190_s19 = ssub.s32 %s4576_s28, %s6434_s30  ;;  %p207_p5 = scmp.eq.s32.totalorder %s6306_s0, 0 }
  0x23   : > { %p191_p6 = scmp.eq.s32.totalorder %s190_s19, 0  ;;  %p4056_p8 = scmp.lt.s32.totalorder %s4580_s29, 4 }
  0x24   : > { %p4733_p7 = por %p207_p5, %p206_p4  ;;  %s4742_s21 = sand.u32 1, %s4568_s26  }
  0x25   : > { %s4739_s20 = scalar_select %p191_p6, %s4568_s26, %s193_s18  }
  0x26   : > { %s6358_s1 = scalar_select %p4733_p7, 1, 0 }
  0x27   : > { %6359 = sst [smem:[#allocation23_spill]] %s4739_s20  ;;  %p4744_p9 = pnand %p4056_p8, %p202_p3 }
  0x28   : > { %s4749_s23 = sand.u32 1, %s4580_s29   ;;  %s4752_s24 = sshll.u32 %s4576_s28, 4 }
  0x29   : > { %s6360_s22 = scalar_select %p4744_p9, 1, 0 }
  0x2a   : > { %s617_s19 = scalar_lea.vmem [#allocation4], %s4742_s21  ;;  %s6361_s7 = sld [smem:[#allocation47_spill]] }
  0x2b   : > { %s624_s0 = sshll.u32 %s617_s19, 4  ;;  %p4768_p11 = pneg %p4744_p9  ;;  %s4761_s0 = int_to_ptr.vmem [resolvable:$true] %s624_s0 }
  0x30   : > { %s4759_s18 = scalar_lea.hbm %s6361_s7, %s4752_s24  ;;  %s4279_s19 = scalar_lea.hbm %s6361_s7, 64 }
  0x31   : > { %s4274_s26 = scalar_lea.hbm %s4759_s18, 16  ;;  %p4280_p0 = scmp.lt.u32.totalorder %s4759_s18, %s6361_s7 }
  0x32   : > { %p4275_p10 = scmp.ne.s32.totalorder %s4759_s18, %s4274_s26  ;;  %p4281_p1 = scmp.lt.u32.totalorder %s4279_s19, %s4274_s26 }
  0x33   : > { %p4283_p3 = scmp.lt.u32.totalorder %s4274_s26, %s4759_s18 }
  0x34   : > { %p4277_p12 = pnand %p4768_p11, %p4275_p10  ;;  %p4282_p2 = por %p4281_p1, %p4280_p0 }
  0x36   : > { %p4278_p13 = pneg %p4277_p12  ;;  %p4284_p4 = por %p4283_p3, %p4282_p2 }
  0x38   : > { %p4285_p5 = pnand %p4284_p4, %p4278_p13 }
  0x3a   : > { %4288 = shalt.err (!%p4285_p5)
}
  0x3b   : > { %s4289_s20 = scalar_lea.vmem %s4761_s0, 16  ;;  %s4582_s17 = smov [#allocation4]  }
  0x3c   : > { %p4290_p6 = scmp.ne.s32.totalorder %s4761_s0, %s4289_s20  ;;  %s4294_s30 = sshll.u32 %s4582_s17, 4  ;;  %s4295_s30 = int_to_ptr.vmem [resolvable:$false] %s4294_s30 }
  0x3d   : > { %s4296_s8 = scalar_lea.vmem %s4295_s30, 32  ;;  %p4297_p12 = scmp.lt.s32.totalorder %s4761_s0, %s4295_s30 }
  0x3e   : > { %p4292_p8 = pnand %p4290_p6, %p4768_p11  ;;  %p4298_p7 = scmp.lt.s32.totalorder %s4296_s8, %s4289_s20 }
  0x40   : > { %p4293_p10 = pneg %p4292_p8  ;;  %p4299_p0 = por %p4298_p7, %p4297_p12 }
  0x42   : > { %p4300_p1 = pnand %p4299_p0, %p4293_p10 }
  0x44   : > { %4303 = shalt.err (!%p4300_p1)
}
  0x45   : > { %s6363_s11 = scalar_lea.sflag [#allocation5], %s4749_s23  ;;  %p3763_p13 = scmp.ge.s32.totalorder %s4580_s29, 1 }
  0x46   : > { %4037 = dma.hbm_to_vmem [thread:$0]  (!%p4744_p9), %s4759_s18, 16, %s4761_s0, %s6363_s11  }
  0x47   : > { %p761_p2 = scmp.lt.s32.totalorder %s4580_s29, 5  ;;  %s6365_s10 = sld [smem:[#allocation50_spill]] }
  0x48   : > { %s661_s30 = scalar_lea.vmem [#allocation7], %s4742_s21 }
  0x49   : > { %p4795_p3 = pnand %p3763_p13, %p761_p2  ;;  %s668_s8 = sshll.u32 %s661_s30, 4  ;;  %s669_s8 = int_to_ptr.vmem [resolvable:$true] %s668_s8 }
  0x4b   : > { %s6364_s26 = scalar_select %p4795_p3, 1, 0 }
  0x4d   : > { %s4803_s17 = scalar_lea.hbm %s6365_s10, %s4752_s24  ;;  %s4309_s6 = scalar_lea.hbm %s6365_s10, 64 }
  0x4e   : > { %s4304_s0 = scalar_lea.hbm %s4803_s17, 16  ;;  %p4310_p6 = scmp.lt.u32.totalorder %s4803_s17, %s6365_s10 }
  0x4f   : > { %p4305_p7 = scmp.ne.s32.totalorder %s4803_s17, %s4304_s0  ;;  %p4311_p8 = scmp.lt.u32.totalorder %s4309_s6, %s4304_s0 }
  0x50   : > { %p4313_p12 = scmp.lt.u32.totalorder %s4304_s0, %s4803_s17 }
  0x51   : > { %p4307_p4 = pnand %p4305_p7, %p4768_p11  ;;  %p4312_p10 = por %p4311_p8, %p4310_p6 }
  0x53   : > { %p4308_p5 = pneg %p4307_p4  ;;  %p4314_p0 = por %p4313_p12, %p4312_p10 }
  0x55   : > { %p4315_p1 = pnand %p4314_p0, %p4308_p5 }
  0x57   : > { %4318 = shalt.err (!%p4315_p1)
}
  0x58   : > { %s4319_s30 = scalar_lea.vmem %s669_s8, 16  ;;  %s4583_s7 = smov [#allocation7]  }
  0x59   : > { %p4320_p13 = scmp.ne.s32.totalorder %s669_s8, %s4319_s30  ;;  %s4324_s2 = sshll.u32 %s4583_s7, 4  ;;  %s4325_s2 = int_to_ptr.vmem [resolvable:$false] %s4324_s2 }
  0x5a   : > { %s4326_s18 = scalar_lea.vmem %s4325_s2, 32  ;;  %p4327_p4 = scmp.lt.s32.totalorder %s669_s8, %s4325_s2 }
  0x5b   : > { %p4322_p2 = pnand %p4320_p13, %p4768_p11  ;;  %p4328_p3 = scmp.lt.s32.totalorder %s4326_s18, %s4319_s30 }
  0x5d   : > { %p4323_p7 = pneg %p4322_p2  ;;  %p4329_p9 = por %p4328_p3, %p4327_p4 }
  0x5f   : > { %p4330_p6 = pnand %p4329_p9, %p4323_p7 }
  0x61   : > { %4333 = shalt.err (!%p4330_p6)
}
  0x62   : > { %p6366_p8 = scmp.ne.s32.totalorder %s6360_s22, 0  ;;  %s6367_s6 = scalar_lea.sflag [#allocation8], %s4749_s23 }
  0x63   : > { %s6368_s14 = sld [smem:[#allocation53_spill]]  ;;  %s711_s2 = scalar_lea.vmem [#allocation10], %s4742_s21 }
  0x64   : > { %4043 = dma.hbm_to_vmem [thread:$0]  (!%p6366_p8), %s4803_s17, 16, %s669_s8, %s6367_s6  }
  0x65   : > { %s718_s20 = sshll.u32 %s711_s2, 4  ;;  %s719_s20 = int_to_ptr.vmem [resolvable:$true] %s718_s20 }
  0x69   : > { %s4830_s7 = scalar_lea.hbm %s6368_s14, %s4752_s24  ;;  %s4339_s8 = scalar_lea.hbm %s6368_s14, 64 }
  0x6a   : > { %s4334_s30 = scalar_lea.hbm %s4830_s7, 16  ;;  %p4340_p10 = scmp.lt.u32.totalorder %s4830_s7, %s6368_s14 }
  0x6b   : > { %p4335_p9 = scmp.ne.s32.totalorder %s4830_s7, %s4334_s30  ;;  %p4341_p12 = scmp.lt.u32.totalorder %s4339_s8, %s4334_s30 }
  0x6c   : > { %p4343_p1 = scmp.lt.u32.totalorder %s4334_s30, %s4830_s7 }
  0x6d   : > { %p4337_p3 = pnand %p4335_p9, %p4768_p11  ;;  %p4342_p0 = por %p4341_p12, %p4340_p10 }
  0x6f   : > { %p4338_p5 = pneg %p4337_p3  ;;  %p4344_p13 = por %p4343_p1, %p4342_p0 }
  0x71   : > { %p4345_p2 = pnand %p4344_p13, %p4338_p5 }
  0x73   : > { %4348 = shalt.err (!%p4345_p2)
}
  0x74   : > { %s4349_s11 = scalar_lea.vmem %s719_s20, 16  ;;  %s4584_s2 = smov [#allocation10]  }
  0x75   : > { %p4350_p7 = scmp.ne.s32.totalorder %s719_s20, %s4349_s11  ;;  %s4354_s19 = sshll.u32 %s4584_s2, 4  ;;  %s4355_s19 = int_to_ptr.vmem [resolvable:$false] %s4354_s19 }
  0x76   : > { %s4356_s18 = scalar_lea.vmem %s4355_s19, 32  ;;  %p4357_p9 = scmp.lt.s32.totalorder %s719_s20, %s4355_s19 }
  0x77   : > { %p4352_p4 = pnand %p4350_p7, %p4768_p11  ;;  %p4358_p3 = scmp.lt.s32.totalorder %s4356_s18, %s4349_s11 }
  0x79   : > { %p4353_p6 = pneg %p4352_p4  ;;  %p4359_p8 = por %p4358_p3, %p4357_p9 }
  0x7b   : > { %p4360_p10 = pnand %p4359_p8, %p4353_p6 }
  0x7d   : > { %4363 = shalt.err (!%p4360_p10)
}
  0x7e   : > { %p6369_p12 = scmp.ne.s32.totalorder %s6360_s22, 0  ;;  %s6370_s30 = scalar_lea.sflag [#allocation11], %s4749_s23 }
  0x7f   : > { %s4854_s17 = sshll.u32 %s4742_s21, 5  ;;  %s4857_s8 = sshll.u32 %s4576_s28, 9 }
  0x80   : > { %4049 = dma.hbm_to_vmem [thread:$0]  (!%p6369_p12), %s4830_s7, 16, %s719_s20, %s6370_s30  }
  0x81   : > { %s6371_s5 = sld [smem:[#allocation45_spill]]  ;;  %s591_s11 = scalar_lea.vmem [#allocation2], %s4854_s17 }
  0x82   : > { %s598_s2 = sshll.u32 %s591_s11, 4  ;;  %s588_s7 = scalar_lea.sflag [#allocation3], %s4742_s21  ;;  %s4866_s2 = int_to_ptr.vmem [resolvable:$true] %s598_s2 }
  0x87   : > { %s4863_s0 = scalar_lea.hbm %s6371_s5, %s4857_s8  ;;  %s4369_s19 = scalar_lea.hbm %s6371_s5, 2048 }
  0x88   : > { %s4364_s20 = scalar_lea.hbm %s4863_s0, 512  ;;  %p4370_p1 = scmp.lt.u32.totalorder %s4863_s0, %s6371_s5 }
  0x89   : > { %p4365_p8 = scmp.ne.s32.totalorder %s4863_s0, %s4364_s20  ;;  %p4371_p13 = scmp.lt.u32.totalorder %s4369_s19, %s4364_s20 }
  0x8a   : > { %p4373_p7 = scmp.lt.u32.totalorder %s4364_s20, %s4863_s0 }
  0x8b   : > { %p4367_p5 = pnand %p4365_p8, %p4768_p11  ;;  %p4372_p2 = por %p4371_p13, %p4370_p1 }
  0x8d   : > { %p4368_p0 = pneg %p4367_p5  ;;  %p4374_p4 = por %p4373_p7, %p4372_p2 }
  0x8f   : > { %p4375_p6 = pnand %p4374_p4, %p4368_p0 }
  0x91   : > { %4378 = shalt.err (!%p4375_p6)
}
  0x92   : > { %s4379_s11 = scalar_lea.vmem %s4866_s2, 512  ;;  %s4585_s18 = smov [#allocation2]  }
  0x93   : > { %p4380_p9 = scmp.ne.s32.totalorder %s4866_s2, %s4379_s11  ;;  %s4384_s30 = sshll.u32 %s4585_s18, 4  ;;  %s4385_s30 = int_to_ptr.vmem [resolvable:$false] %s4384_s30 }
  0x94   : > { %s4386_s10 = scalar_lea.vmem %s4385_s30, 1024  ;;  %p4387_p8 = scmp.lt.s32.totalorder %s4866_s2, %s4385_s30 }
  0x95   : > { %p4382_p3 = pnand %p4380_p9, %p4768_p11  ;;  %p4388_p5 = scmp.lt.s32.totalorder %s4386_s10, %s4379_s11 }
  0x97   : > { %p4383_p10 = pneg %p4382_p3  ;;  %p4389_p1 = por %p4388_p5, %p4387_p8 }
  0x99   : > { %p4390_p13 = pnand %p4389_p1, %p4383_p10 }
  0x9b   : > { %4393 = shalt.err (!%p4390_p13)
}
  0x9c   : > { %s4586_s20 = smov 128   ;;  %s4587_s19 = smov 8  }
  0x9d   : > { %4034 = dma.hbm_to_vmem [thread:$0]  (!%p6369_p12), %s4863_s0, 512, %s4866_s2, %s588_s7, %s4586_s20, %s4586_s20, %s4587_s19  }
  0x9e   : > { %s6372_s9 = sld [smem:[#allocation49_spill]]  ;;  %s641_s30 = scalar_lea.vmem [#allocation6], %s4854_s17 }
  0x9f   : > { %s648_s10 = sshll.u32 %s641_s30, 4  ;;  %s4908_s28 = scalar_lea.hbm %s6301_s13, %s4857_s8  ;;  %s4902_s10 = int_to_ptr.vmem [resolvable:$true] %s648_s10 }
  0xa4   : > { %s4899_s18 = scalar_lea.hbm %s6372_s9, %s4857_s8  ;;  %s4399_s7 = scalar_lea.hbm %s6372_s9, 2048 }
  0xa5   : > { %s4394_s4 = scalar_lea.hbm %s4899_s18, 512  ;;  %p4400_p4 = scmp.lt.u32.totalorder %s4899_s18, %s6372_s9 }
  0xa6   : > { %p4395_p0 = scmp.ne.s32.totalorder %s4899_s18, %s4394_s4  ;;  %p4401_p6 = scmp.lt.u32.totalorder %s4399_s7, %s4394_s4 }
  0xa7   : > { %p4403_p3 = scmp.lt.u32.totalorder %s4394_s4, %s4899_s18 }
  0xa8   : > { %p4397_p2 = pnand %p4395_p0, %p4768_p11  ;;  %p4402_p9 = por %p4401_p6, %p4400_p4 }
  0xaa   : > { %p4398_p7 = pneg %p4397_p2  ;;  %p4404_p10 = por %p4403_p3, %p4402_p9 }
  0xac   : > { %p4405_p8 = pnand %p4404_p10, %p4398_p7 }
  0xae   : > { %4408 = shalt.err (!%p4405_p8)
}
  0xaf   : > { %s4409_s5 = scalar_lea.vmem %s4902_s10, 512  ;;  %s4588_s14 = smov [#allocation6]  }
  0xb0   : > { %p4410_p5 = scmp.ne.s32.totalorder %s4902_s10, %s4409_s5  ;;  %s4414_s30 = sshll.u32 %s4588_s14, 4  ;;  %s4415_s30 = int_to_ptr.vmem [resolvable:$false] %s4414_s30 }
  0xb1   : > { %s4416_s0 = scalar_lea.vmem %s4415_s30, 1024  ;;  %p4417_p0 = scmp.lt.s32.totalorder %s4902_s10, %s4415_s30 }
  0xb2   : > { %p4412_p1 = pnand %p4410_p5, %p4768_p11  ;;  %p4418_p2 = scmp.lt.s32.totalorder %s4416_s0, %s4409_s5 }
  0xb4   : > { %p4413_p13 = pneg %p4412_p1  ;;  %p4419_p4 = por %p4418_p2, %p4417_p0 }
  0xb6   : > { %p4420_p6 = pnand %p4419_p4, %p4413_p13 }
  0xb8   : > { %4423 = shalt.err (!%p4420_p6)
}
  0xb9   : > { %s6373_s4 = scalar_lea.sflag [#allocation5], %s4749_s23  ;;  %s691_s2 = scalar_lea.vmem [#allocation9], %s4854_s17 }
  0xba   : > { %4040 = dma.hbm_to_vmem [thread:$0]  (!%p6369_p12), %s4899_s18, 512, %s4902_s10, %s6373_s4, %s4586_s20, %s4586_s20, %s4587_s19  }
  0xbb   : > { %s698_s7 = sshll.u32 %s691_s2, 4  ;;  %s4943_s5 = scalar_lea.hbm %s6303_s15, %s4857_s8  ;;  %s4937_s7 = int_to_ptr.vmem [resolvable:$true] %s698_s7 }
  0xbc   : > { %s4424_s14 = scalar_lea.hbm %s4908_s28, 512  ;;  %s4429_s9 = scalar_lea.hbm %s6301_s13, 2048 }
  0xbd   : > { %p4425_p7 = scmp.ne.s32.totalorder %s4908_s28, %s4424_s14  ;;  %p4430_p10 = scmp.lt.u32.totalorder %s4908_s28, %s6301_s13 }
  0xbe   : > { %p4431_p8 = scmp.lt.u32.totalorder %s4429_s9, %s4424_s14  ;;  %p4433_p1 = scmp.lt.u32.totalorder %s4424_s14, %s4908_s28 }
  0xbf   : > { %p4427_p9 = pnand %p4425_p7, %p4768_p11 }
  0xc0   : > { %p4432_p5 = por %p4431_p8, %p4430_p10 }
  0xc1   : > { %p4428_p3 = pneg %p4427_p9 }
  0xc2   : > { %p4434_p13 = por %p4433_p1, %p4432_p5 }
  0xc4   : > { %p4435_p0 = pnand %p4434_p13, %p4428_p3 }
  0xc6   : > { %4438 = shalt.err (!%p4435_p0)
}
  0xc7   : > { %s4439_s8 = scalar_lea.vmem %s4937_s7, 512  ;;  %s4589_s10 = smov [#allocation9]  }
  0xc8   : > { %p4440_p2 = scmp.ne.s32.totalorder %s4937_s7, %s4439_s8  ;;  %s4444_s4 = sshll.u32 %s4589_s10, 4  ;;  %s4445_s4 = int_to_ptr.vmem [resolvable:$false] %s4444_s4 }
  0xc9   : > { %s4446_s3 = scalar_lea.vmem %s4445_s4, 1024  ;;  %p4447_p7 = scmp.lt.s32.totalorder %s4937_s7, %s4445_s4 }
  0xca   : > { %p4442_p4 = pnand %p4440_p2, %p4768_p11  ;;  %p4448_p9 = scmp.lt.s32.totalorder %s4446_s3, %s4439_s8 }
  0xcc   : > { %p4443_p6 = pneg %p4442_p4  ;;  %p4449_p10 = por %p4448_p9, %p4447_p7 }
  0xce   : > { %p4450_p8 = pnand %p4449_p10, %p4443_p6 }
  0xd0   : > { %4453 = shalt.err (!%p4450_p8)
}
  0xd1   : > { %s6374_s9 = scalar_lea.sflag [#allocation8], %s4749_s23  ;;  %s729_s2 = scalar_lea.vmem [#allocation12], %s4854_s17 }
  0xd2   : > { %4046 = dma.hbm_to_vmem [thread:$0]  (!%p6369_p12), %s4908_s28, 512, %s4937_s7, %s6374_s9, %s4586_s20, %s4586_s20, %s4587_s19  }
  0xd3   : > { %s736_s6 = sshll.u32 %s729_s2, 4  ;;  %s4454_s11 = scalar_lea.hbm %s4943_s5, 512  ;;  %s4972_s6 = int_to_ptr.vmem [resolvable:$true] %s736_s6 }
  0xd4   : > { %p4455_p3 = scmp.ne.s32.totalorder %s4943_s5, %s4454_s11  ;;  %s4459_s0 = scalar_lea.hbm %s6303_s15, 2048 }
  0xd5   : > { %p4460_p13 = scmp.lt.u32.totalorder %s4943_s5, %s6303_s15  ;;  %p4461_p0 = scmp.lt.u32.totalorder %s4459_s0, %s4454_s11 }
  0xd6   : > { %p4457_p5 = pnand %p4455_p3, %p4768_p11  ;;  %p4463_p4 = scmp.lt.u32.totalorder %s4454_s11, %s4943_s5 }
  0xd7   : > { %p4462_p2 = por %p4461_p0, %p4460_p13 }
  0xd8   : > { %p4458_p1 = pneg %p4457_p5 }
  0xd9   : > { %p4464_p6 = por %p4463_p4, %p4462_p2 }
  0xdb   : > { %p4465_p7 = pnand %p4464_p6, %p4458_p1 }
  0xdd   : > { %4468 = shalt.err (!%p4465_p7)
}
  0xde   : > { %s4469_s28 = scalar_lea.vmem %s4972_s6, 512  ;;  %s4590_s17 = smov [#allocation12]  }
  0xdf   : > { %p4470_p9 = scmp.ne.s32.totalorder %s4972_s6, %s4469_s28  ;;  %s4474_s7 = sshll.u32 %s4590_s17, 4  ;;  %s4475_s7 = int_to_ptr.vmem [resolvable:$false] %s4474_s7 }
  0xe0   : > { %s4476_s10 = scalar_lea.vmem %s4475_s7, 1024  ;;  %p4477_p3 = scmp.lt.s32.totalorder %s4972_s6, %s4475_s7 }
  0xe1   : > { %p4472_p10 = pnand %p4470_p9, %p4768_p11  ;;  %p4478_p5 = scmp.lt.s32.totalorder %s4476_s10, %s4469_s28 }
  0xe3   : > { %p4473_p8 = pneg %p4472_p10  ;;  %p4479_p13 = por %p4478_p5, %p4477_p3 }
  0xe5   : > { %p4480_p0 = pnand %p4479_p13, %p4473_p8 }
  0xe7   : > { %4483 = shalt.err (!%p4480_p0)
}
  0xe8   : > { %s6375_s4 = scalar_lea.sflag [#allocation11], %s4749_s23  ;;  %s5004_s2 = scalar_lea.hbm %s6304_s16, %s4752_s24 }
  0xe9   : > { %4052 = dma.hbm_to_vmem [thread:$0]  (!%p6369_p12), %s4943_s5, 512, %s4972_s6, %s6375_s4, %s4586_s20, %s4586_s20, %s4587_s19  }
  0xea   : > { %s749_s11 = scalar_lea.vmem [#allocation13], %s4742_s21  ;;  %s747_s23 = scalar_lea.sflag [#allocation14], %s4742_s21 }
  0xeb   : > { %s756_s14 = sshll.u32 %s749_s11, 4  ;;  %s4484_s30 = scalar_lea.hbm %s5004_s2, 16  ;;  %s757_s14 = int_to_ptr.vmem [resolvable:$true] %s756_s14 }
  0xec   : > { %p4485_p1 = scmp.ne.s32.totalorder %s5004_s2, %s4484_s30  ;;  %s4489_s19 = scalar_lea.hbm %s6304_s16, 64 }
  0xed   : > { %p4490_p6 = scmp.lt.u32.totalorder %s5004_s2, %s6304_s16  ;;  %p4491_p7 = scmp.lt.u32.totalorder %s4489_s19, %s4484_s30 }
  0xee   : > { %p4487_p2 = pnand %p4485_p1, %p4768_p11  ;;  %p4493_p10 = scmp.lt.u32.totalorder %s4484_s30, %s5004_s2 }
  0xef   : > { %p4492_p9 = por %p4491_p7, %p4490_p6 }
  0xf0   : > { %p4488_p4 = pneg %p4487_p2 }
  0xf1   : > { %p4494_p8 = por %p4493_p10, %p4492_p9 }
  0xf3   : > { %p4495_p3 = pnand %p4494_p8, %p4488_p4 }
  0xf5   : > { %4498 = shalt.err (!%p4495_p3)
}
  0xf6   : > { %s4499_s21 = scalar_lea.vmem %s757_s14, 16  ;;  %s4591_s6 = smov [#allocation13]  }
  0xf7   : > { %p4500_p5 = scmp.ne.s32.totalorder %s757_s14, %s4499_s21  ;;  %s4504_s18 = sshll.u32 %s4591_s6, 4  ;;  %s4505_s18 = int_to_ptr.vmem [resolvable:$false] %s4504_s18 }
  0xf8   : > { %s4506_s8 = scalar_lea.vmem %s4505_s18, 32  ;;  %p4507_p1 = scmp.lt.s32.totalorder %s757_s14, %s4505_s18 }
  0xf9   : > { %p4502_p13 = pnand %p4500_p5, %p4768_p11  ;;  %p4508_p2 = scmp.lt.s32.totalorder %s4506_s8, %s4499_s21 }
  0xfb   : > { %p4503_p0 = pneg %p4502_p13  ;;  %p4509_p12 = por %p4508_p2, %p4507_p1 }
  0xfd   : > { %p4510_p6 = pnand %p4509_p12, %p4503_p0 }
  0xff   : > { %4513 = shalt.err (!%p4510_p6)
}
 0x100   : > { %p6376_p7 = scmp.ne.s32.totalorder %s6360_s22, 0  ;;  %p6377_p4 = scmp.ne.s32.totalorder %s6364_s26, 0 }
 0x102   : > { %4055 = dma.hbm_to_vmem [thread:$0]  (!%p6376_p7), %s5004_s2, 16, %s757_s14, %s747_s23  }
 0x103   : > { %765 = sbr.rel (%p6377_p4) target bundleno = 4793 (0x12b9), region = 88 }
 0x10a   : > { %s5028_s12 = sand.u32 1, %s4564_s25   ;;  %p6378_p11 = scmp.ne.s32.totalorder %s6358_s1, 0 }
 0x10b   : > { %s3764_s28 = sshll.u32 %s5028_s12, 5  ;;  %s768_s17 = scalar_lea.sflag [#allocation3], %s5028_s12 }
 0x10c   : > { %s5032_s7 = scalar_lea.vmem [#allocation2], %s3764_s28 }
 0x10d   : > { %4539 = dma.done.wait (%p6378_p11), %s768_s17, 512  }
 0x10e   : > { %4541 = vsyncadd (%p6378_p11), %s768_s17, 4294966784  ;;  %s6379_s22 = sadd.s32 4294967295, %s4580_s29   ;;  %s779_s4 = scalar_lea.vmem [#allocation4], %s5028_s12 }
 0x10f   : > { %s776_s26 = sand.u32 1, %s6379_s22  }
 0x110   : > { %s777_s10 = scalar_lea.sflag [#allocation5], %s776_s26 }
 0x111   : > { %4543 = dma.done.wait (%p6378_p11), %s777_s10, 528  }
 0x112   : > { %4545 = vsyncadd (%p6378_p11), %s777_s10, 4294966768  ;;  %s5045_s3 = scalar_lea.vmem [#allocation6], %s3764_s28  ;;  %s794_s9 = scalar_lea.sflag [#allocation8], %s776_s26 }
 0x113   : > { %s796_s2 = scalar_lea.vmem [#allocation7], %s5028_s12 }
 0x114   : > { %4547 = dma.done.wait (%p6378_p11), %s794_s9, 528  }
 0x115   : > { %4549 = vsyncadd (%p6378_p11), %s794_s9, 4294966768  ;;  %s5052_s11 = scalar_lea.vmem [#allocation9], %s3764_s28  ;;  %s811_s14 = scalar_lea.sflag [#allocation11], %s776_s26 }
 0x116   : > { %s813_s23 = scalar_lea.vmem [#allocation10], %s5028_s12 }
 0x117   : > { %4551 = dma.done.wait (%p6378_p11), %s811_s14, 528  }
 0x118   : > { %4553 = vsyncadd (%p6378_p11), %s811_s14, 4294966768  ;;  %s5059_s30 = scalar_lea.vmem [#allocation12], %s3764_s28  ;;  %s828_s0 = scalar_lea.sflag [#allocation14], %s5028_s12 }
 0x119   : > { %s830_s20 = scalar_lea.vmem [#allocation13], %s5028_s12 }
 0x11a   : > { %4555 = dma.done.wait (%p6378_p11), %s828_s0, 16  }
 0x11b   : > { %4557 = vsyncadd (%p6378_p11), %s828_s0, 4294967280  ;;  %p956_p12 = scmp.lt.s32.totalorder %s4572_s27, 3  ;;  %v4592_v0 = vmov 0.0|0.0   ;;  %vm4593_vm0 = vmmov 0   ;;  %v4594_v1 = vmov 0.0   ;;  %v6314_v2 = vmov 1  }
 0x11c   : > { %3955 = vmatprep.subr.bf16.mxu0 %v4592_v0  ;;  %3961 = vmatprep.subr.bf16.mxu1 %v4592_v0  ;;  %v6316_v3 = vmov 0   ;;  %s6380_s24 = sld [smem:[#allocation43_spill]]  ;;  %s6381_s8 = sld [smem:[#allocation44_spill]]  ;;  %v1017_v16 = vld [vmem:[%s5032_s7] sm:$0xff]  ;;  %v1018_v17 = vld [vmem:[%s5032_s7 + $0x8] sm:$0xff]  ;;  %vm1025_vm1 = vcmask 261120   ;;  %v1483_v28 = vlaneseq }
 0x11d   : > { %s6436_s27 = smov (!%p956_p12, %s4572_s27), 3  ;;  %3864 = vmatprep.mubr.msk.f32.mxu0 %vm4593_vm0, %v4594_v1  ;;  %3875 = vmatprep.mubr.msk.f32.mxu1 %vm4593_vm0, %v4594_v1  ;;  %s6382_s9 = sld [smem:[#allocation40_spill]]  ;;  %v3968_v21 = vpack.c.bf16 %v1018_v17, %v1017_v16  ;;  %v1019_v22 = vld [vmem:[%s5032_s7 + $0x10] sm:$0xff]  ;;  %v1020_v23 = vld [vmem:[%s5032_s7 + $0x18] sm:$0xff]  ;;  %v6320_v25 = vmov 2   ;;  %v6318_v27 = vmov 3  }
 0x11e   : > { %4118 = vset.pattern.permute.xlu1 %v6314_v2  ;;  %4117 = vset.pattern.permute.xlu0 %v6316_v3  ;;  %s3805_s1 = sshll.u32 %s6436_s27, 5  ;;  %s3804_s17 = sshll.u32 %s6436_s27, 4  ;;  %v3971_v24 = vpack.c.bf16 %v1020_v23, %v1019_v22  ;;  %v1484_v31 = vshrl.u32 %v1483_v28, 7  ;;  %v3783_v16 = vld [vmem:[%s779_s4] ss:$0 sm:$0xff]  ;;  %vm1655_vm2 = vcmask 64512  }
 0x11f   : > { %s3770_s22 = sshll.u32 %s6436_s27, 2  ;;  %s6383_s19 = sld [smem:[#allocation41_spill]]  ;;  %vm1686_vm3 = vcmask 7168   ;;  %vm1689_vm4 = vcmask 15360   ;;  %vm1692_vm5 = vcmask 23552   ;;  %vm1695_vm6 = vcmask 31744  }
 0x120   : > { %s6384_s6 = sld [smem:[#allocation42_spill]]  ;;  %v5141_v32 = vsub.s32 2, %v1484_v31  ;;  %v5143_v33 = vsub.s32 3, %v1484_v31  ;;  %v5151_v42 = vsub.s32 0, %v1484_v31  ;;  %v5153_v43 = vsub.s32 1, %v1484_v31  ;;  %s4599_s4 = smov 120  }
 0x121   : > { %s4600_s0 = smov 112   ;;  %vm3082_vm7 = vcmask 130048   ;;  %vm3085_vm8 = vcmask 195584   ;;  %s6426_s7 = sld [smem:[#allocation54_spill]] }
 0x122   : > { %s977_s21 = scalar_lea.vmem %s6380_s24, %s3805_s1  ;;  %s982_s28 = scalar_lea.vmem %s6381_s8, %s3805_s1 }
 0x123   : > { %v1009_v4 = vld [vmem:[%s977_s21] sm:$0xff]  ;;  %v1010_v5 = vld [vmem:[%s977_s21 + $0x8] sm:$0xff]  ;;  %v1011_v9 = vld [vmem:[%s977_s21 + $0x10] sm:$0xff]  ;;  %s963_s14 = scalar_lea.vmem %s6382_s9, %s3804_s17  ;;  %s6386_s9 = sld [smem:[#allocation48_spill]] }
 0x124   : > { %v1013_v6 = vld [vmem:[%s982_s28] sm:$0xff]  ;;  %v3956_v7 = vpack.c.bf16 %v1010_v5, %v1009_v4  ;;  %v1014_v8 = vld [vmem:[%s982_s28 + $0x8] sm:$0xff]  ;;  %v1012_v10 = vld [vmem:[%s977_s21 + $0x18] sm:$0xff]  ;;  %s4601_s1 = smov 104   ;;  %s6425_s21 = sld [smem:[#allocation52_spill]] }
 0x125   : > { %v3962_v11 = vpack.c.bf16 %v1014_v8, %v1013_v6  ;;  %v1015_v12 = vld [vmem:[%s982_s28 + $0x10] sm:$0xff]  ;;  %v1016_v13 = vld [vmem:[%s982_s28 + $0x18] sm:$0xff]  ;;  %v3959_v14 = vpack.c.bf16 %v1012_v10, %v1011_v9  ;;  %s968_s5 = scalar_lea.vmem %s6383_s19, %s3770_s22  ;;  %v1005_v18 = vld [vmem:[%s963_s14] sm:$0xff]  ;;  %s6385_s28 = sld [smem:[#allocation46_spill]] }
 0x126   : > { %3957 = vmatpush3.bf16.msra.mxu0 %v3956_v7  ;;  %v3965_v15 = vpack.c.bf16 %v1016_v13, %v1015_v12  ;;  %1520 = vperm.xlu1 %4118, %v1005_v18   ;;  %v1006_v19 = vld [vmem:[%s963_s14 + $0x8] sm:$0xff]  ;;  %v1007_v20 = vld [vmem:[%s968_s5] sm:$0xf]  ;;  %s972_s18 = scalar_lea.vmem %s6384_s6, %s3770_s22 }
 0x127   : > { %3963 = vmatpush3.bf16.msra.mxu1 %v3962_v11  ;;  %3958 = vmatprep.subr.bf16.mxu0 %v4592_v0  ;;  %v1008_v26 = vld [vmem:[%s972_s18] sm:$0xf]  ;;  %s1003_s8 = scalar_lea.vmem %s6426_s7, %s3804_s17 }
 0x128   : > { %3964 = vmatprep.subr.bf16.mxu1 %v4592_v0  ;;  %1475 = vperm.xlu0 %4117, %v1005_v18  }
 0x129   : > { %s988_s14 = scalar_lea.vmem %s6386_s9, %s6436_s27 }
 0x12a   : > { %3960 = vmatpush3.bf16.msra.mxu0 %v3959_v14  ;;  %1524 = vperm.xlu1 %4118, %v1006_v19   ;;  %s994_s6 = scalar_lea.vmem %s6425_s21, %s6436_s27 }
 0x12b   : > { %3966 = vmatpush3.bf16.msra.mxu1 %v3965_v15  ;;  %3967 = vmatprep.subr.bf16.mxu0 %v4592_v0  ;;  %s985_s22 = scalar_lea.vmem %s6385_s28, %s6436_s27 }
 0x12c   : > { %3973 = vmatprep.subr.bf16.mxu1 %v4592_v0  ;;  %1480 = vperm.xlu0 %4117, %v1006_v19   ;;  %v3781_v47 = vld [vmem:[%s985_s22] ss:$0 sm:$0xff] }
 0x12d   : > { %3865 = vmatmul.mubr.msk.f32.vlgmr.msra.gmra.mrb[0].mxu0 %vm1025_vm1, %v1007_v20 }
 0x12e   : > { %3876 = vmatmul.mubr.msk.f32.vlgmr.msra.gmra.mrb[0].mxu1 %vm1025_vm1, %v1007_v20  ;;  %3969 = vmatpush3.bf16.msra.mxu0 %v3968_v21 }
 0x12f   : > { %3975 = vmatpush3.bf16.msra.mxu1 %v3956_v7  ;;  %3970 = vmatprep.subr.bf16.mxu0 %v4592_v0 }
 0x130   : > { %3976 = vmatprep.subr.bf16.mxu1 %v4592_v0  ;;  %3886 = vmatprep.mubr.msk.f32.mxu0 %vm4593_vm0, %v4594_v1 }
 0x131   : > { %3897 = vmatprep.mubr.msk.f32.mxu1 %vm4593_vm0, %v4594_v1  ;;  %4120 = vset.pattern.permute.xlu1 %v6320_v25 }
 0x132   : > { %3972 = vmatpush3.bf16.msra.mxu0 %v3971_v24  ;;  %4119 = vset.pattern.permute.xlu0 %v6320_v25 }
 0x133   : > { %3978 = vmatpush3.bf16.msra.mxu1 %v3959_v14  ;;  %3979 = vmatprep.subr.bf16.mxu0 %v4592_v0 }
 0x134   : > { %3985 = vmatprep.subr.bf16.mxu1 %v4592_v0  ;;  %1568 = vperm.xlu1 %4120, %v1006_v19  }
 0x135   : > { %3887 = vmatmul.mubr.msk.f32.vlgmr.msra.gmra.mrb[2].mxu0 %vm1025_vm1, %v1007_v20  ;;  %1564 = vperm.xlu0 %4119, %v1005_v18  }
 0x136   : > { %3898 = vmatmul.mubr.msk.f32.vlgmr.msra.gmra.mrb[2].mxu1 %vm1025_vm1, %v1008_v26  ;;  %3981 = vmatpush3.bf16.msra.mxu0 %v3962_v11 }
 0x137   : > { %3987 = vmatpush3.bf16.msra.mxu1 %v3968_v21  ;;  %3982 = vmatprep.subr.bf16.mxu0 %v4592_v0 }
 0x138   : > { %3988 = vmatprep.subr.bf16.mxu1 %v4592_v0  ;;  %3908 = vmatprep.mubr.msk.f32.mxu0 %vm4593_vm0, %v4594_v1 }
 0x139   : > { %3919 = vmatprep.mubr.msk.f32.mxu1 %vm4593_vm0, %v4594_v1  ;;  %4121 = vset.pattern.permute.xlu1 %v6318_v27 }
 0x13a   : > { %3984 = vmatpush3.bf16.msra.mxu0 %v3965_v15  ;;  %4122 = vset.pattern.permute.xlu0 %v6318_v27 }
 0x13b   : > { %3990 = vmatpush3.bf16.msra.mxu1 %v3971_v24  ;;  %1608 = vperm.xlu1 %4121, %v1005_v18  }
 0x13c   : > { %1612 = vperm.xlu0 %4122, %v1006_v19  }
 0x13d   : > { %3909 = vmatmul.mubr.msk.f32.vlgmr.msra.gmra.mrb[4].mxu0 %vm1025_vm1, %v1008_v26 }
 0x13e   : > { %3920 = vmatmul.mubr.msk.f32.vlgmr.msra.gmra.mrb[4].mxu1 %vm1025_vm1, %v1008_v26 }
 0x13f   : > { %4123 = vset.pattern.permute.xlu1 %v6314_v2 }
 0x140   : > { %4127 = vset.pattern.permute.xlu0 %v6314_v2 }
 0x1a5   : > { %v5137_v29 = vpop.permute.xlu1 %1520 }
 0x1a7   : > { %v5139_v30 = vpop.permute.xlu0 %1475 }
 0x1a9   : > { %v5145_v34 = vpop.permute.xlu1 %1524 }
 0x1ab   : > { %v5147_v35 = vpop.permute.xlu0 %1480 }
 0x1b3   : > { %v5159_v44 = vpop.permute.xlu1 %1568 }
 0x1b4   : > { %v5161_v45 = vpop.permute.xlu0 %1564 }
 0x1ba   : > { %v5181_v62 = vpop.permute.xlu1 %1608 }
 0x1bb   : > { %v5183_v63 = vpop.permute.xlu0 %1612 }
 0x200   : > { %v1095_v36 = vpop.f32.mrb[0].mxu0 }
 0x201   : > { %v1574_v37 = vrot.slane %v1095_v36, %v5141_v32  ;;  %v1618_v38 = vrot.slane %v1095_v36, %v5143_v33  ;;  %v3866_v39 = vpop.f32.mrb[1].mxu0  ;;  %v1165_v40 = vpop.f32.mrb[0].mxu1  ;;  %v1486_v46 = vrot.slane %v1095_v36, %v5151_v42  ;;  %v1530_v48 = vrot.slane %v1095_v36, %v5153_v43 }
 0x202   : > { %v3877_v41 = vpop.f32.mrb[1].mxu1  ;;  %v1498_v56 = vrot.slane %v1165_v40, %v5151_v42  ;;  %v1542_v57 = vrot.slane %v1165_v40, %v5153_v43  ;;  %v1586_v0 = vrot.slane %v1165_v40, %v5141_v32  ;;  %v1630_v1 = vrot.slane %v1165_v40, %v5143_v33 }
 0x203   : > { %v1487_v60 = vmul.f32 %v1486_v46, %v5139_v30  ;;  %v1488_v61 = vmul.f32 %v1486_v46, %v5147_v35  ;;  %v1531_v4 = vmul.f32 %v1530_v48, %v5137_v29  ;;  %v1532_v5 = vmul.f32 %v1530_v48, %v5145_v34 }
 0x204   : > { %v1575_v6 = vmul.f32 %v1574_v37, %v5161_v45  ;;  %v1576_v7 = vmul.f32 %v1574_v37, %v5159_v44  ;;  %v1619_v12 = vmul.f32 %v1618_v38, %v5181_v62  ;;  %v1620_v13 = vmul.f32 %v1618_v38, %v5183_v63  ;;  %v3785_v38 = vld [vmem:[%s988_s14] ss:$0 sm:$0xff] }
 0x205   : > { %v1499_v14 = vmul.f32 %v1498_v56, %v5139_v30  ;;  %v1500_v15 = vmul.f32 %v1498_v56, %v5147_v35  ;;  %v1543_v28 = vmul.f32 %v1542_v57, %v5137_v29  ;;  %v1544_v31 = vmul.f32 %v1542_v57, %v5145_v34 }
 0x206   : > { %v1587_v36 = vmul.f32 %v1586_v0, %v5161_v45  ;;  %v1588_v39 = vmul.f32 %v1586_v0, %v5159_v44  ;;  %v1631_v40 = vmul.f32 %v1630_v1, %v5181_v62  ;;  %v1632_v41 = vmul.f32 %v1630_v1, %v5183_v63 }
 0x208   : > { %v1235_v49 = vpop.f32.mrb[2].mxu0 }
 0x209   : > { %v5166_v50 = vrot.slane %v1235_v49, %v5151_v42  ;;  %v5169_v51 = vrot.slane %v1235_v49, %v5153_v43  ;;  %v5172_v52 = vrot.slane %v1235_v49, %v5141_v32  ;;  %v5175_v53 = vrot.slane %v1235_v49, %v5143_v33  ;;  %v1315_v54 = vpop.f32.mrb[2].mxu1  ;;  %v3888_v55 = vpop.f32.mrb[3].mxu0 }
 0x20a   : > { %v1316_v58 = vadd.f32 %v3781_v47, %v1315_v54  ;;  %v3899_v59 = vpop.f32.mrb[3].mxu1 }
 0x20c   : > { %v1492_v8 = vrot.slane %v1316_v58, %v5151_v42  ;;  %v1536_v9 = vrot.slane %v1316_v58, %v5153_v43  ;;  %v1580_v10 = vrot.slane %v1316_v58, %v5141_v32  ;;  %v1624_v11 = vrot.slane %v1316_v58, %v5143_v33 }
 0x20e   : > { %v1493_v17 = vadd.f32 %v1492_v8, %v1487_v60  ;;  %v1494_v18 = vadd.f32 %v1492_v8, %v1488_v61  ;;  %v1537_v19 = vadd.f32 %v1536_v9, %v1531_v4  ;;  %v1538_v20 = vadd.f32 %v1536_v9, %v1532_v5 }
 0x20f   : > { %v1581_v21 = vadd.f32 %v1580_v10, %v1575_v6  ;;  %v1582_v22 = vadd.f32 %v1580_v10, %v1576_v7  ;;  %v5205_v23 = vadd.f32 %v1624_v11, %v1619_v12  ;;  %v1626_v24 = vadd.f32 %v1624_v11, %v1620_v13 }
 0x210   : > { %v1392_v26 = vpop.f32.mrb[4].mxu0  ;;  %v1651_v46 = vmul.f32 0.35355338, %v1493_v17  ;;  %v1652_v47 = vmul.f32 0.35355338, %v1494_v18 }
 0x211   : > { %v1393_v37 = vadd.f32 %v3783_v16, %v1392_v26  ;;  %v1720_v48 = vmul.f32 0.35355338, %v1537_v19  ;;  %v1469_v55 = vpop.f32.mrb[4].mxu1  ;;  %v3910_v56 = vpop.f32.mrb[5].mxu0  ;;  %v1721_v57 = vmul.f32 0.35355338, %v1538_v20 }
 0x212   : > { %v1470_v60 = vadd.f32 %v3785_v38, %v1469_v55  ;;  %v3921_v61 = vpop.f32.mrb[5].mxu1  ;;  %v1848_v55 = vmul.f32 0.35355338, %v5205_v23 }
 0x213   : > { %v1504_v49 = vrot.slane %v1393_v37, %v5151_v42  ;;  %v1548_v54 = vrot.slane %v1393_v37, %v5153_v43  ;;  %v1592_v58 = vrot.slane %v1393_v37, %v5141_v32  ;;  %v1636_v59 = vrot.slane %v1393_v37, %v5143_v33 }
 0x214   : > { %v5218_v10 = vrot.slane %v1470_v60, %v5151_v42  ;;  %v1560_v11 = vrot.slane %v1470_v60, %v5153_v43  ;;  %v1604_v12 = vrot.slane %v1470_v60, %v5141_v32  ;;  %v1648_v13 = vrot.slane %v1470_v60, %v5143_v33 }
 0x215   : > { %v1505_v0 = vadd.f32 %v1504_v49, %v1499_v14  ;;  %v1506_v4 = vadd.f32 %v1504_v49, %v1500_v15  ;;  %v1549_v5 = vadd.f32 %v1548_v54, %v1543_v28  ;;  %v1550_v1 = vadd.f32 %v1548_v54, %v1544_v31 }
 0x216   : > { %v1593_v6 = vadd.f32 %v1592_v58, %v1587_v36  ;;  %v1594_v7 = vadd.f32 %v1592_v58, %v1588_v39  ;;  %v1637_v8 = vadd.f32 %v1636_v59, %v1631_v40  ;;  %v1638_v9 = vadd.f32 %v1636_v59, %v1632_v41 }
 0x217   : > { %v5223_v16 = vmul.f32 %v1651_v46, %v1549_v5  ;;  %v5225_v17 = vmul.f32 %v1651_v46, %v1505_v0  ;;  %v5227_v14 = vmul.f32 %v1652_v47, %v1506_v4  ;;  %v5231_v18 = vmul.f32 %v1652_v47, %v1550_v1 }
 0x218   : > { %v5229_v15 = vmul.f32 %v1651_v46, %v1593_v6  ;;  %v5233_v19 = vmul.f32 %v1651_v46, %v1637_v8  ;;  %v5235_v42 = vmul.f32 %v1652_v47, %v1594_v7  ;;  %v5237_v20 = vmul.f32 %v1721_v57, %v1506_v4 }
 0x219   : > { %1978 = vrot.lane.b32.xlu0 %v5223_v16, %s4599_s4  ;;  %1964 = vrot.lane.b32.xlu1 %v5225_v17, %s4599_s4  ;;  %v5243_v32 = vmul.f32 %v1652_v47, %v1638_v9  ;;  %v5245_v33 = vmul.f32 %v1720_v48, %v1505_v0  ;;  %v1785_v43 = vmul.f32 0.35355338, %v1582_v22  ;;  %v5247_v26 = vmul.f32 %v1721_v57, %v1550_v1 }
 0x21a   : > { %6387 = vst [vmem:[#allocation24_spill] sm:$0xff] %v5233_v19  ;;  %v5249_v28 = vmul.f32 %v1721_v57, %v1594_v7  ;;  %v5251_v31 = vmul.f32 %v1721_v57, %v1638_v9  ;;  %v5259_v37 = vmul.f32 %v1720_v48, %v1549_v5  ;;  %v1784_v39 = vmul.f32 0.35355338, %v1581_v21 }
 0x21b   : > { %6388 = vst [vmem:[#allocation25_spill] sm:$0xff] %v5243_v32  ;;  %v5253_v36 = vmul.f32 %v1785_v43, %v1506_v4  ;;  %v5261_v38 = vmul.f32 %v1785_v43, %v1550_v1  ;;  %v1849_v22 = vmul.f32 0.35355338, %v1626_v24  ;;  %v5263_v40 = vmul.f32 %v1720_v48, %v1593_v6 }
 0x21c   : > { %6389 = vst [vmem:[#allocation26_spill] sm:$0xff] %v5249_v28  ;;  %6390 = vst [vmem:[#allocation27_spill] sm:$0xff] %v5251_v31  ;;  %v5265_v41 = vmul.f32 %v1785_v43, %v1594_v7  ;;  %v5267_v46 = vmul.f32 %v1720_v48, %v1637_v8  ;;  %v5269_v47 = vmul.f32 %v1785_v43, %v1638_v9  ;;  %v1672_v43 = vsel %vm1655_vm2, %v5229_v15, 0.0 }
 0x21d   : > { %1966 = vrot.lane.b32.xlu1 %v5227_v14, %s4599_s4  ;;  %1992 = vrot.lane.b32.xlu0 %v5229_v15, %s4599_s4  ;;  %6391 = vst [vmem:[#allocation28_spill] sm:$0xff] %v5261_v38  ;;  %v5271_v49 = vmul.f32 %v1784_v39, %v1505_v0  ;;  %v5273_v54 = vmul.f32 %v1849_v22, %v1506_v4 }
 0x21e   : > { %v5279_v21 = vmul.f32 %v1784_v39, %v1549_v5  ;;  %v5281_v24 = vmul.f32 %v1849_v22, %v1550_v1  ;;  %v1511_v48 = vmul.f32 %v5166_v50, %v5139_v30  ;;  %v5286_v56 = vmul.f32 %v1784_v39, %v1593_v6 }
 0x21f   : > { %v5288_v57 = vmul.f32 %v1849_v22, %v1594_v7  ;;  %v1512_v58 = vmul.f32 %v5166_v50, %v5147_v35  ;;  %v1555_v59 = vmul.f32 %v5169_v51, %v5137_v29  ;;  %v5294_v60 = vmul.f32 %v1784_v39, %v1637_v8 }
 0x220   : > { %v5296_v61 = vmul.f32 %v1849_v22, %v1638_v9  ;;  %v1556_v4 = vmul.f32 %v5169_v51, %v5145_v34  ;;  %v1599_v30 = vmul.f32 %v5172_v52, %v5161_v45  ;;  %v5302_v23 = vmul.f32 %v1848_v55, %v1505_v0 }
 0x221   : > { %1980 = vrot.lane.b32.xlu1 %v5231_v18, %s4599_s4  ;;  %2006 = vrot.lane.b32.xlu0 %v5233_v19, %s4599_s4  ;;  %v5304_v1 = vmul.f32 %v1848_v55, %v1549_v5  ;;  %v1600_v35 = vmul.f32 %v5172_v52, %v5159_v44  ;;  %v5312_v29 = vmul.f32 %v1848_v55, %v1593_v6  ;;  %v1683_v9 = vsel %vm1655_vm2, %v5243_v32, 0.0 }
 0x222   : > { %v5314_v50 = vmul.f32 %v1848_v55, %v1637_v8  ;;  %v1643_v34 = vmul.f32 %v5175_v53, %v5181_v62  ;;  %v1644_v45 = vmul.f32 %v5175_v53, %v5183_v63  ;;  %v5320_v51 = vadd.f32 %v1560_v11, %v1555_v59 }
 0x223   : > { %v5322_v0 = vadd.f32 %v1560_v11, %v1556_v4  ;;  %v5324_v44 = vadd.f32 %v1604_v12, %v1599_v30  ;;  %v5326_v52 = vadd.f32 %v1604_v12, %v1600_v35  ;;  %v5333_v7 = vadd.f32 %v5218_v10, %v1511_v48 }
 0x224   : > { %6392 = vst [vmem:[#allocation29_spill] sm:$0xff] %v5320_v51  ;;  %v5328_v5 = vadd.f32 %v1648_v13, %v1643_v34  ;;  %v5330_v6 = vadd.f32 %v1648_v13, %v1644_v45  ;;  %v5336_v62 = vadd.f32 %v5218_v10, %v1512_v58  ;;  %v1659_v53 = vsel %vm1655_vm2, %v5227_v14, 0.0 }
 0x225   : > { %1994 = vrot.lane.b32.xlu1 %v5235_v42, %s4599_s4  ;;  %2052 = vrot.lane.b32.xlu0 %v5237_v20, %s4599_s4  ;;  %6393 = vst [vmem:[#allocation30_spill] sm:$0xff] %v5322_v0  ;;  %6394 = vst [vmem:[#allocation31_spill] sm:$0xff] %v5324_v44  ;;  %v1667_v63 = vsel %vm1655_vm2, %v5231_v18, 0.0  ;;  %v1675_v8 = vsel %vm1655_vm2, %v5235_v42, 0.0  ;;  %v1656_v10 = vsel %vm1655_vm2, %v5225_v17, 0.0  ;;  %v1727_v11 = vsel %vm1655_vm2, %v5237_v20, 0.0 }
 0x226   : > { %6395 = vst [vmem:[#allocation32_spill] sm:$0xff] %v5326_v52  ;;  %6396 = vst [vmem:[#allocation33_spill] sm:$0xff] %v5328_v5  ;;  %v1664_v12 = vsel %vm1655_vm2, %v5223_v16, 0.0  ;;  %v1735_v13 = vsel %vm1655_vm2, %v5247_v26, 0.0  ;;  %v1743_v39 = vsel %vm1655_vm2, %v5249_v28, 0.0  ;;  %v1680_v22 = vsel %vm1655_vm2, %v5233_v19, 0.0 }
 0x227   : > { %6397 = vst [vmem:[#allocation34_spill] sm:$0xff] %v5330_v6  ;;  %6398 = vst [vmem:[#allocation35_spill] sm:$0xff] %v5333_v7  ;;  %v1751_v48 = vsel %vm1655_vm2, %v5251_v31, 0.0  ;;  %v1724_v55 = vsel %vm1655_vm2, %v5245_v33, 0.0  ;;  %v1791_v58 = vsel %vm1655_vm2, %v5253_v36, 0.0  ;;  %v1732_v59 = vsel %vm1655_vm2, %v5259_v37, 0.0 }
 0x228   : > { %6399 = vst [vmem:[#allocation36_spill] sm:$0xff] %v5336_v62  ;;  %v1799_v4 = vsel %vm1655_vm2, %v5261_v38, 0.0  ;;  %v1740_v30 = vsel %vm1655_vm2, %v5263_v40, 0.0  ;;  %v1807_v35 = vsel %vm1655_vm2, %v5265_v41, 0.0  ;;  %v1748_v34 = vsel %vm1655_vm2, %v5267_v46, 0.0 }
 0x229   : > { %2008 = vrot.lane.b32.xlu1 %v5243_v32, %s4599_s4  ;;  %v1815_v45 = vsel %vm1655_vm2, %v5269_v47, 0.0 }
 0x22d   : > { %2050 = vrot.lane.b32.xlu1 %v5245_v33, %s4599_s4 }
 0x244   : > { %1660 = vadd.xlane.f32.xlu0 %v1659_v53  ;;  %v1788_v53 = vsel %vm1655_vm2, %v5271_v49, 0.0 }
 0x248   : > { %1668 = vadd.xlane.f32.xlu0 %v1667_v63  ;;  %v1855_v63 = vsel %vm1655_vm2, %v5273_v54, 0.0 }
 0x24c   : > { %1676 = vadd.xlane.f32.xlu0 %v1675_v8  ;;  %v1796_v8 = vsel %vm1655_vm2, %v5279_v21, 0.0 }
 0x250   : > { %1684 = vadd.xlane.f32.xlu0 %v1683_v9  ;;  %v1863_v9 = vsel %vm1655_vm2, %v5281_v24, 0.0 }
 0x251   : > { %1657 = vadd.xlane.f32.xlu1 %v1656_v10  ;;  %v1804_v10 = vsel %vm1655_vm2, %v5286_v56, 0.0 }
 0x254   : > { %1728 = vadd.xlane.f32.xlu0 %v1727_v11  ;;  %v1871_v11 = vsel %vm1655_vm2, %v5288_v57, 0.0 }
 0x255   : > { %1665 = vadd.xlane.f32.xlu1 %v1664_v12  ;;  %v1812_v12 = vsel %vm1655_vm2, %v5294_v60, 0.0 }
 0x258   : > { %1736 = vadd.xlane.f32.xlu0 %v1735_v13  ;;  %v1879_v13 = vsel %vm1655_vm2, %v5296_v61, 0.0 }
 0x259   : > { %1673 = vadd.xlane.f32.xlu1 %v1672_v43  ;;  %v1852_v43 = vsel %vm1655_vm2, %v5302_v23, 0.0 }
 0x25c   : > { %1744 = vadd.xlane.f32.xlu0 %v1743_v39  ;;  %v1860_v39 = vsel %vm1655_vm2, %v5304_v1, 0.0 }
 0x25d   : > { %1681 = vadd.xlane.f32.xlu1 %v1680_v22  ;;  %v1868_v22 = vsel %vm1655_vm2, %v5312_v29, 0.0 }
 0x260   : > { %1752 = vadd.xlane.f32.xlu0 %v1751_v48 }
 0x261   : > { %1725 = vadd.xlane.f32.xlu1 %v1724_v55 }
 0x264   : > { %1792 = vadd.xlane.f32.xlu0 %v1791_v58  ;;  %v1876_v58 = vsel %vm1655_vm2, %v5314_v50, 0.0 }
 0x265   : > { %1733 = vadd.xlane.f32.xlu1 %v1732_v59 }
 0x268   : > { %1800 = vadd.xlane.f32.xlu0 %v1799_v4 }
 0x269   : > { %1741 = vadd.xlane.f32.xlu1 %v1740_v30 }
 0x26c   : > { %1808 = vadd.xlane.f32.xlu0 %v1807_v35 }
 0x26d   : > { %1749 = vadd.xlane.f32.xlu1 %v1748_v34 }
 0x270   : > { %1816 = vadd.xlane.f32.xlu0 %v1815_v45 }
 0x271   : > { %1789 = vadd.xlane.f32.xlu1 %v1788_v53 }
 0x274   : > { %1856 = vadd.xlane.f32.xlu0 %v1855_v63 }
 0x275   : > { %1797 = vadd.xlane.f32.xlu1 %v1796_v8 }
 0x278   : > { %1864 = vadd.xlane.f32.xlu0 %v1863_v9 }
 0x279   : > { %1805 = vadd.xlane.f32.xlu1 %v1804_v10 }
 0x27c   : > { %1872 = vadd.xlane.f32.xlu0 %v1871_v11 }
 0x27d   : > { %1813 = vadd.xlane.f32.xlu1 %v1812_v12 }
 0x280   : > { %1880 = vadd.xlane.f32.xlu0 %v1879_v13 }
 0x281   : > { %1853 = vadd.xlane.f32.xlu1 %v1852_v43 }
 0x285   : > { %1861 = vadd.xlane.f32.xlu1 %v1860_v39 }
 0x289   : > { %1869 = vadd.xlane.f32.xlu1 %v1868_v22 }
 0x28b   : > { %v1965_v48 = vpop.permute.xlu1 %1964  ;;  %v1979_v55 = vpop.permute.xlu0 %1978 }
 0x28c   : > { %v1970_v59 = vsel %vm1655_vm2, %v1965_v48, 0.0  ;;  %v1984_v34 = vsel %vm1655_vm2, %v1979_v55, 0.0 }
 0x28d   : > { %1877 = vadd.xlane.f32.xlu1 %v1876_v58  ;;  %1971 = vadd.xlane.f32.xlu0 %v1970_v59 }
 0x28f   : > { %v1967_v4 = vpop.permute.xlu1 %1966  ;;  %v1993_v30 = vpop.permute.xlu0 %1992 }
 0x290   : > { %v1973_v35 = vsel %vm1655_vm2, %v1967_v4, 0.0  ;;  %v1998_v8 = vsel %vm1655_vm2, %v1993_v30, 0.0 }
 0x291   : > { %1974 = vadd.xlane.f32.xlu1 %v1973_v35  ;;  %1985 = vadd.xlane.f32.xlu0 %v1984_v34 }
 0x293   : > { %v1981_v45 = vpop.permute.xlu1 %1980  ;;  %v2007_v53 = vpop.permute.xlu0 %2006 }
 0x294   : > { %v1987_v63 = vsel %vm1655_vm2, %v1981_v45, 0.0  ;;  %v2012_v11 = vsel %vm1655_vm2, %v2007_v53, 0.0 }
 0x295   : > { %1988 = vadd.xlane.f32.xlu1 %v1987_v63  ;;  %1999 = vadd.xlane.f32.xlu0 %v1998_v8 }
 0x297   : > { %v1995_v9 = vpop.permute.xlu1 %1994  ;;  %v2053_v12 = vpop.permute.xlu0 %2052 }
 0x298   : > { %v2001_v10 = vsel %vm1655_vm2, %v1995_v9, 0.0  ;;  %v2059_v39 = vsel %vm1655_vm2, %v2053_v12, 0.0 }
 0x299   : > { %2002 = vadd.xlane.f32.xlu1 %v2001_v10  ;;  %2013 = vadd.xlane.f32.xlu0 %v2012_v11 }
 0x29b   : > { %v2009_v13 = vpop.permute.xlu1 %2008 }
 0x29c   : > { %v2015_v43 = vsel %vm1655_vm2, %v2009_v13, 0.0 }
 0x29d   : > { %2016 = vadd.xlane.f32.xlu1 %v2015_v43  ;;  %2060 = vadd.xlane.f32.xlu0 %v2059_v39 }
 0x29f   : > { %v2051_v22 = vpop.permute.xlu1 %2050 }
 0x2a0   : > { %v2056_v48 = vsel %vm1655_vm2, %v2051_v22, 0.0 }
 0x2a1   : > { %2057 = vadd.xlane.f32.xlu1 %v2056_v48 }
 0x2b2   : > { %2064 = vrot.lane.b32.xlu1 %v5259_v37, %s4599_s4 }
 0x2b3   : > { %2066 = vrot.lane.b32.xlu0 %v5247_v26, %s4599_s4 }
 0x2d1   : > { %v1661_v55 = vpop.xlane.xlu0 %1660 }
 0x2d5   : > { %v1669_v58 = vpop.xlane.xlu0 %1668 }
 0x2d6   : > { %v1688_v4 = vsel %vm1686_vm3, %v1661_v55, %v1669_v58 }
 0x2d9   : > { %v1677_v59 = vpop.xlane.xlu0 %1676 }
 0x2da   : > { %v1691_v30 = vsel %vm1689_vm4, %v1688_v4, %v1677_v59 }
 0x2dd   : > { %v1685_v35 = vpop.xlane.xlu0 %1684 }
 0x2de   : > { %v1658_v34 = vpop.xlane.xlu1 %1657  ;;  %v5423_v45 = vsel %vm1692_vm5, %v1691_v30, %v1685_v35 }
 0x2df   : > { %v1699_v53 = vsel %vm1695_vm6, %v5423_v45, -inf }
 0x2e0   : > { %1700 = vmax.xlane.f32.xlu0 %v1699_v53 }
 0x2e1   : > { %v1729_v63 = vpop.xlane.xlu0 %1728 }
 0x2e2   : > { %v1666_v8 = vpop.xlane.xlu1 %1665 }
 0x2e3   : > { %v1687_v11 = vsel %vm1686_vm3, %v1658_v34, %v1666_v8 }
 0x2e5   : > { %v1737_v9 = vpop.xlane.xlu0 %1736 }
 0x2e6   : > { %v1674_v10 = vpop.xlane.xlu1 %1673  ;;  %v1755_v22 = vsel %vm1686_vm3, %v1729_v63, %v1737_v9 }
 0x2e7   : > { %v1690_v13 = vsel %vm1689_vm4, %v1687_v11, %v1674_v10 }
 0x2e9   : > { %v1745_v12 = vpop.xlane.xlu0 %1744 }
 0x2ea   : > { %v1682_v43 = vpop.xlane.xlu1 %1681  ;;  %v1757_v55 = vsel %vm1689_vm4, %v1755_v22, %v1745_v12 }
 0x2eb   : > { %v5430_v39 = vsel %vm1692_vm5, %v1690_v13, %v1682_v43 }
 0x2ec   : > { %v1696_v48 = vsel %vm1695_vm6, %v5430_v39, -inf }
 0x2ed   : > { %1697 = vmax.xlane.f32.xlu1 %v1696_v48  ;;  %v1753_v58 = vpop.xlane.xlu0 %1752 }
 0x2ee   : > { %v1726_v59 = vpop.xlane.xlu1 %1725  ;;  %v5437_v4 = vsel %vm1692_vm5, %v1757_v55, %v1753_v58 }
 0x2ef   : > { %v1763_v30 = vsel %vm1695_vm6, %v5437_v4, -inf }
 0x2f0   : > { %1764 = vmax.xlane.f32.xlu0 %v1763_v30 }
 0x2f1   : > { %v1793_v35 = vpop.xlane.xlu0 %1792 }
 0x2f2   : > { %v1734_v34 = vpop.xlane.xlu1 %1733 }
 0x2f3   : > { %v1754_v63 = vsel %vm1686_vm3, %v1726_v59, %v1734_v34 }
 0x2f5   : > { %v1801_v53 = vpop.xlane.xlu0 %1800 }
 0x2f6   : > { %v1742_v8 = vpop.xlane.xlu1 %1741  ;;  %v1819_v13 = vsel %vm1686_vm3, %v1793_v35, %v1801_v53 }
 0x2f7   : > { %v1756_v10 = vsel %vm1689_vm4, %v1754_v63, %v1742_v8 }
 0x2f9   : > { %v1809_v9 = vpop.xlane.xlu0 %1808 }
 0x2fa   : > { %v1750_v11 = vpop.xlane.xlu1 %1749  ;;  %v1821_v22 = vsel %vm1689_vm4, %v1819_v13, %v1809_v9 }
 0x2fb   : > { %v5444_v12 = vsel %vm1692_vm5, %v1756_v10, %v1750_v11 }
 0x2fc   : > { %v1760_v43 = vsel %vm1695_vm6, %v5444_v12, -inf }
 0x2fd   : > { %1761 = vmax.xlane.f32.xlu1 %v1760_v43  ;;  %v1817_v48 = vpop.xlane.xlu0 %1816 }
 0x2fe   : > { %v1790_v55 = vpop.xlane.xlu1 %1789  ;;  %v5451_v58 = vsel %vm1692_vm5, %v1821_v22, %v1817_v48 }
 0x2ff   : > { %v1827_v59 = vsel %vm1695_vm6, %v5451_v58, -inf }
 0x300   : > { %1828 = vmax.xlane.f32.xlu0 %v1827_v59 }
 0x301   : > { %v1857_v30 = vpop.xlane.xlu0 %1856 }
 0x302   : > { %v1798_v34 = vpop.xlane.xlu1 %1797 }
 0x303   : > { %v1818_v35 = vsel %vm1686_vm3, %v1790_v55, %v1798_v34 }
 0x305   : > { %v1865_v8 = vpop.xlane.xlu0 %1864 }
 0x306   : > { %v1806_v63 = vpop.xlane.xlu1 %1805  ;;  %v1883_v13 = vsel %vm1686_vm3, %v1857_v30, %v1865_v8 }
 0x307   : > { %v1820_v10 = vsel %vm1689_vm4, %v1818_v35, %v1806_v63 }
 0x309   : > { %v1873_v53 = vpop.xlane.xlu0 %1872 }
 0x30a   : > { %v1814_v9 = vpop.xlane.xlu1 %1813  ;;  %v1885_v22 = vsel %vm1689_vm4, %v1883_v13, %v1873_v53 }
 0x30b   : > { %v5458_v11 = vsel %vm1692_vm5, %v1820_v10, %v1814_v9 }
 0x30c   : > { %v1824_v43 = vsel %vm1695_vm6, %v5458_v11, -inf }
 0x30d   : > { %1825 = vmax.xlane.f32.xlu1 %v1824_v43  ;;  %v1881_v48 = vpop.xlane.xlu0 %1880 }
 0x30e   : > { %v1854_v59 = vpop.xlane.xlu1 %1853  ;;  %v5465_v2 = vsel %vm1692_vm5, %v1885_v22, %v1881_v48 }
 0x30f   : > { %v1891_v55 = vsel %vm1695_vm6, %v5465_v2, -inf }
 0x310   : > { %1892 = vmax.xlane.f32.xlu0 %v1891_v55 }
 0x312   : > { %v1862_v34 = vpop.xlane.xlu1 %1861 }
 0x313   : > { %v1882_v35 = vsel %vm1686_vm3, %v1854_v59, %v1862_v34 }
 0x316   : > { %v1870_v63 = vpop.xlane.xlu1 %1869 }
 0x317   : > { %v1884_v30 = vsel %vm1689_vm4, %v1882_v35, %v1870_v63 }
 0x31a   : > { %v1878_v8 = vpop.xlane.xlu1 %1877  ;;  %v1972_v10 = vpop.xlane.xlu0 %1971 }
 0x31b   : > { %v5472_v53 = vsel %vm1692_vm5, %v1884_v30, %v1878_v8 }
 0x31c   : > { %v1888_v9 = vsel %vm1695_vm6, %v5472_v53, -inf }
 0x31d   : > { %1889 = vmax.xlane.f32.xlu1 %v1888_v9 }
 0x31e   : > { %v1975_v13 = vpop.xlane.xlu1 %1974  ;;  %v1986_v43 = vpop.xlane.xlu0 %1985 }
 0x31f   : > { %v2018_v32 = vsel %vm1686_vm3, %v1972_v10, %v1986_v43 }
 0x322   : > { %v1989_v22 = vpop.xlane.xlu1 %1988  ;;  %v2000_v48 = vpop.xlane.xlu0 %1999 }
 0x326   : > { %v2003_v55 = vpop.xlane.xlu1 %2002  ;;  %v2014_v3 = vpop.xlane.xlu0 %2013 }
 0x32a   : > { %v2017_v27 = vpop.xlane.xlu1 %2016  ;;  %v5476_v25 = vpop.xlane.xlu0 %2060 }
 0x32e   : > { %v5478_v59 = vpop.xlane.xlu1 %2057  ;;  %v2067_v34 = vpop.permute.xlu0 %2066 }
 0x32f   : > { %v2073_v63 = vsel %vm1655_vm2, %v2067_v34, 0.0 }
 0x330   : > { %2074 = vadd.xlane.f32.xlu0 %v2073_v63 }
 0x332   : > { %v2065_v35 = vpop.permute.xlu1 %2064 }
 0x333   : > { %v2070_v30 = vsel %vm1655_vm2, %v2065_v35, 0.0 }
 0x334   : > { %2071 = vadd.xlane.f32.xlu1 %v2070_v30 }
 0x345   : > { %2078 = vrot.lane.b32.xlu1 %v5263_v40, %s4599_s4 }
 0x346   : > { %2080 = vrot.lane.b32.xlu0 %v5249_v28, %s4599_s4  ;;  %v2020_v28 = vsel %vm1689_vm4, %v2018_v32, %v2000_v48 }
 0x347   : > { %v5501_v19 = vsel %vm1692_vm5, %v2020_v28, %v2014_v3 }
 0x36d   : > { %v1701_v8 = vpop.xlane.xlu0 %1700 }
 0x36e   : > { %v1703_v32 = vsub.f32 %v5423_v45, %v1701_v8 }
 0x370   : > { %v1706_v28 = vmul.f32 1.442695, %v1703_v32 }
 0x372   : > { %4142 = vpow2.f32 %v1706_v28 }
 0x37a   : > { %v1698_v9 = vpop.xlane.xlu1 %1697 }
 0x37b   : > { %v1702_v3 = vsub.f32 %v5430_v39, %v1698_v9 }
 0x37d   : > { %v1765_v6 = vpop.xlane.xlu0 %1764 }
 0x37e   : > { %v1767_v10 = vsub.f32 %v5437_v4, %v1765_v6 }
 0x38a   : > { %v1762_v52 = vpop.xlane.xlu1 %1761 }
 0x38b   : > { %v1766_v43 = vsub.f32 %v5444_v12, %v1762_v52  ;;  %v5520_v12 = vpop.eup %4142 }
 0x38d   : > { %v1829_v62 = vpop.xlane.xlu0 %1828 }
 0x38e   : > { %v1831_v48 = vsub.f32 %v5451_v58, %v1829_v62 }
 0x39a   : > { %v1826_v0 = vpop.xlane.xlu1 %1825 }
 0x39d   : > { %v5486_v5 = vpop.xlane.xlu0 %1892 }
 0x3aa   : > { %v1890_v34 = vpop.xlane.xlu1 %1889 }
 0x3ab   : > { %v1894_v39 = vsub.f32 %v5472_v53, %v1890_v34 }
 0x3ad   : > { %v1896_v62 = vmul.f32 1.442695, %v1894_v39 }
 0x3bd   : > { %v5488_v63 = vpop.xlane.xlu0 %2074 }
 0x3c1   : > { %v5490_v44 = vpop.xlane.xlu1 %2071  ;;  %v2081_v35 = vpop.permute.xlu0 %2080 }
 0x3c2   : > { %v2087_v30 = vsel %vm1655_vm2, %v2081_v35, 0.0  ;;  %v2019_v35 = vsel %vm1686_vm3, %v1975_v13, %v1989_v22  ;;  %v1704_v13 = vmul.f32 1.442695, %v1702_v3  ;;  %v1770_v22 = vmul.f32 1.442695, %v1767_v10 }
 0x3c3   : > { %2088 = vadd.xlane.f32.xlu0 %v2087_v30  ;;  %v2021_v30 = vsel %vm1689_vm4, %v2019_v35, %v2003_v55  ;;  %v1834_v55 = vmul.f32 1.442695, %v1831_v48 }
 0x3c4   : > { %4144 = vpow2.f32 %v1704_v13 }
 0x3c5   : > { %v2079_v7 = vpop.permute.xlu1 %2078  ;;  %4146 = vpow2.f32 %v1770_v22  ;;  %v1895_v22 = vsub.f32 %v5465_v2, %v5486_v5  ;;  %v2104_v2 = vsel %vm1686_vm3, %v5478_v59, %v5490_v44 }
 0x3c6   : > { %v2084_v51 = vsel %vm1655_vm2, %v2079_v7, 0.0  ;;  %v5508_v7 = vsel %vm1692_vm5, %v2021_v30, %v2017_v27  ;;  %v1768_v27 = vmul.f32 1.442695, %v1766_v43 }
 0x3c7   : > { %2085 = vadd.xlane.f32.xlu1 %v2084_v51  ;;  %v2024_v51 = vsel %vm1695_vm6, %v5501_v19, -inf  ;;  %v1898_v48 = vmul.f32 1.442695, %v1895_v22 }
 0x3c8   : > { %4148 = vpow2.f32 %v1768_v27 }
 0x3c9   : > { %4150 = vpow2.f32 %v1834_v55 }
 0x3ce   : > { %v5522_v8 = vpop.eup %4144 }
 0x3cf   : > { %v5527_v9 = vpop.eup %4146  ;;  %v1708_v34 = vsel %vm1695_vm6, %v5522_v8, 0.0 }
 0x3d0   : > { %v1775_v30 = vsel %vm1695_vm6, %v5527_v9, 0.0 }
 0x3d2   : > { %v5529_v53 = vpop.eup %4148 }
 0x3d3   : > { %v1772_v32 = vsel %vm1695_vm6, %v5529_v53, 0.0 }
 0x3d8   : > { %2092 = vrot.lane.b32.xlu1 %v5267_v46, %s4599_s4 }
 0x3d9   : > { %2094 = vrot.lane.b32.xlu0 %v5251_v31, %s4599_s4  ;;  %v2027_v31 = vsel %vm1695_vm6, %v5508_v7, -inf }
 0x3f8   : > { %2025 = vmax.xlane.f32.xlu0 %v2024_v51  ;;  %v5535_v51 = vpop.eup %4150 }
 0x3f9   : > { %v1839_v3 = vsel %vm1695_vm6, %v5535_v51, 0.0 }
 0x3fc   : > { %2028 = vmax.xlane.f32.xlu0 %v2027_v31  ;;  %v1830_v31 = vsub.f32 %v5458_v11, %v1826_v0  ;;  %v1711_v11 = vsel %vm1695_vm6, %v5520_v12, 0.0 }
 0x3fe   : > { %v1832_v45 = vmul.f32 1.442695, %v1830_v31  ;;  %v2105_v31 = vsel %vm1686_vm3, %v5476_v25, %v5488_v63 }
 0x400   : > { %4152 = vpow2.f32 %v1832_v45 }
 0x401   : > { %4154 = vpow2.f32 %v1896_v62 }
 0x402   : > { %4156 = vpow2.f32 %v1898_v48 }
 0x40a   : > { %v5541_v28 = vpop.eup %4152 }
 0x40b   : > { %v1836_v10 = vsel %vm1695_vm6, %v5541_v28, 0.0  ;;  %v5545_v13 = vpop.eup %4154 }
 0x40c   : > { %v1900_v43 = vsel %vm1695_vm6, %v5545_v13, 0.0  ;;  %v5557_v62 = vpop.eup %4156 }
 0x40d   : > { %v1903_v63 = vsel %vm1695_vm6, %v5557_v62, 0.0 }
 0x450   : > { %v2089_v35 = vpop.xlane.xlu0 %2088 }
 0x451   : > { %v2107_v45 = vsel %vm1689_vm4, %v2105_v31, %v2089_v35 }
 0x454   : > { %v2086_v6 = vpop.xlane.xlu1 %2085  ;;  %v2095_v4 = vpop.permute.xlu0 %2094 }
 0x455   : > { %v2101_v52 = vsel %vm1655_vm2, %v2095_v4, 0.0  ;;  %v2106_v5 = vsel %vm1689_vm4, %v2104_v2, %v2086_v6 }
 0x456   : > { %2102 = vadd.xlane.f32.xlu0 %v2101_v52 }
 0x458   : > { %v2093_v58 = vpop.permute.xlu1 %2092 }
 0x459   : > { %v2098_v0 = vsel %vm1655_vm2, %v2093_v58, 0.0 }
 0x45a   : > { %2099 = vadd.xlane.f32.xlu1 %v2098_v0  ;;  %1712 = vadd.xlane.f32.xlu0 %v1711_v11 }
 0x45e   : > { %1709 = vadd.xlane.f32.xlu1 %v1708_v34  ;;  %1776 = vadd.xlane.f32.xlu0 %v1775_v30 }
 0x462   : > { %1773 = vadd.xlane.f32.xlu1 %v1772_v32  ;;  %1840 = vadd.xlane.f32.xlu0 %v1839_v3 }
 0x466   : > { %1837 = vadd.xlane.f32.xlu1 %v1836_v10 }
 0x46a   : > { %1901 = vadd.xlane.f32.xlu1 %v1900_v43 }
 0x485   : > { %v2026_v27 = vpop.xlane.xlu0 %2025 }
 0x489   : > { %v2029_v55 = vpop.xlane.xlu0 %2028 }
 0x4e3   : > { %v2103_v39 = vpop.xlane.xlu0 %2102 }
 0x4e4   : > { %v2109_v4 = vsel %vm1692_vm5, %v2107_v45, %v2103_v39  ;;  %v2030_v45 = vsub.f32 %v5501_v19, %v2026_v27  ;;  %v2031_v39 = vsub.f32 %v5508_v7, %v2029_v55 }
 0x4e5   : > { %v2113_v52 = vsel %vm1695_vm6, %v2109_v4, -inf }
 0x4e6   : > { %2114 = vmax.xlane.f32.xlu0 %v2113_v52  ;;  %v2032_v52 = vmul.f32 1.442695, %v2030_v45 }
 0x4e7   : > { %v2100_v58 = vpop.xlane.xlu1 %2099  ;;  %v1713_v59 = vpop.xlane.xlu0 %1712 }
 0x4e8   : > { %v2108_v0 = vsel %vm1692_vm5, %v2106_v5, %v2100_v58  ;;  %v2034_v5 = vmul.f32 1.442695, %v2031_v39  ;;  %4158 = vpow2.f32 %v2032_v52 }
 0x4e9   : > { %v2110_v25 = vsel %vm1695_vm6, %v2108_v0, -inf }
 0x4ea   : > { %2111 = vmax.xlane.f32.xlu1 %v2110_v25  ;;  %1904 = vadd.xlane.f32.xlu0 %v1903_v63  ;;  %4160 = vpow2.f32 %v2034_v5 }
 0x4eb   : > { %v1710_v44 = vpop.xlane.xlu1 %1709  ;;  %v1777_v6 = vpop.xlane.xlu0 %1776 }
 0x4ef   : > { %v1774_v35 = vpop.xlane.xlu1 %1773  ;;  %v1841_v34 = vpop.xlane.xlu0 %1840 }
 0x4f3   : > { %v1838_v11 = vpop.xlane.xlu1 %1837 }
 0x4f7   : > { %v1902_v30 = vpop.xlane.xlu1 %1901 }
 0x4fb   : > { %2136 = vrot.lane.b32.xlu1 %v5271_v49, %s4599_s4 }
 0x500   : > { %2138 = vrot.lane.b32.xlu0 %v5253_v36, %s4599_s4 }
 0x573   : > { %v2115_v32 = vpop.xlane.xlu0 %2114 }
 0x574   : > { %v2117_v2 = vsub.f32 %v2109_v4, %v2115_v32 }
 0x576   : > { %v2120_v25 = vmul.f32 1.442695, %v2117_v2 }
 0x577   : > { %v2112_v3 = vpop.xlane.xlu1 %2111  ;;  %v1905_v10 = vpop.xlane.xlu0 %1904 }
 0x578   : > { %v2116_v58 = vsub.f32 %v2108_v0, %v2112_v3  ;;  %4162 = vpow2.f32 %v2120_v25 }
 0x57a   : > { %v2118_v63 = vmul.f32 1.442695, %v2116_v58 }
 0x57b   : > { %v2137_v43 = vpop.permute.xlu1 %2136  ;;  %v2139_v22 = vpop.permute.xlu0 %2138 }
 0x57c   : > { %v2142_v48 = vsel %vm1655_vm2, %v2137_v43, 0.0  ;;  %v2145_v31 = vsel %vm1655_vm2, %v2139_v22, 0.0  ;;  %4164 = vpow2.f32 %v2118_v63 }
 0x57d   : > { %2143 = vadd.xlane.f32.xlu1 %v2142_v48  ;;  %2146 = vadd.xlane.f32.xlu0 %v2145_v31  ;;  %4166 = vrcp.f32 %v1774_v35 }
 0x57e   : > { %4168 = vrcp.f32 %v1710_v44 }
 0x57f   : > { %4170 = vrcp.f32 %v1838_v11 }
 0x580   : > { %4172 = vrcp.f32 %v1777_v6 }
 0x581   : > { %4174 = vrcp.f32 %v1902_v30 }
 0x582   : > { %4176 = vrcp.f32 %v1713_v59 }
 0x583   : > { %4178 = vrcp.f32 %v1841_v34 }
 0x584   : > { %4180 = vrcp.f32 %v1905_v10 }
 0x58e   : > { %2150 = vrot.lane.b32.xlu1 %v5279_v21, %s4599_s4 }
 0x593   : > { %2152 = vrot.lane.b32.xlu0 %v5261_v38, %s4599_s4  ;;  %v5583_v38 = vpop.eup %4158 }
 0x594   : > { %v5587_v27 = vpop.eup %4160  ;;  %v2036_v4 = vsel %vm1695_vm6, %v5583_v38, 0.0 }
 0x595   : > { %v5589_v55 = vpop.eup %4162  ;;  %v2039_v0 = vsel %vm1695_vm6, %v5587_v27, 0.0 }
 0x596   : > { %v5595_v32 = vpop.eup %4164  ;;  %v2125_v44 = vsel %vm1695_vm6, %v5589_v55, 0.0 }
 0x597   : > { %v2122_v35 = vsel %vm1695_vm6, %v5595_v32, 0.0  ;;  %v4167_v3 = vpop.eup %4166 }
 0x598   : > { %v4169_v45 = vpop.eup %4168  ;;  %v1780_v11 = vmul.f32 %v4167_v3, %v5529_v53 }
 0x599   : > { %v4171_v39 = vpop.eup %4170  ;;  %v1716_v59 = vmul.f32 %v4169_v45, %v5522_v8 }
 0x59a   : > { %v4173_v52 = vpop.eup %4172  ;;  %v1844_v30 = vmul.f32 %v4171_v39, %v5541_v28 }
 0x59b   : > { %v4175_v2 = vpop.eup %4174  ;;  %v1781_v58 = vmul.f32 %v4173_v52, %v5527_v9  ;;  %v1782_v25 = vadd.f32 %v1780_v11, %v1716_v59 }
 0x59c   : > { %v4177_v6 = vpop.eup %4176  ;;  %v1908_v34 = vmul.f32 %v4175_v2, %v5545_v13  ;;  %v6401_v13 = vmov 3  }
 0x59d   : > { %v4179_v5 = vpop.eup %4178  ;;  %v1717_v10 = vmul.f32 %v4177_v6, %v5520_v12 }
 0x59e   : > { %v4181_v63 = vpop.eup %4180 }
 0x59f   : > { %v1783_v53 = vadd.f32 %v1781_v58, %v1717_v10 }
 0x60a   : > { %v5579_v43 = vpop.xlane.xlu1 %2143  ;;  %v5581_v22 = vpop.xlane.xlu0 %2146 }
 0x60e   : > { %v2151_v48 = vpop.permute.xlu1 %2150  ;;  %v2153_v31 = vpop.permute.xlu0 %2152 }
 0x60f   : > { %v2156_v19 = vsel %vm1655_vm2, %v2151_v48, 0.0  ;;  %v2159_v7 = vsel %vm1655_vm2, %v2153_v31, 0.0  ;;  %v1846_v48 = vadd.f32 %v1844_v30, %v1782_v25  ;;  %v1845_v31 = vmul.f32 %v4179_v5, %v5535_v51 }
 0x610   : > { %2157 = vadd.xlane.f32.xlu1 %v2156_v19  ;;  %2160 = vadd.xlane.f32.xlu0 %v2159_v7  ;;  %v1909_v7 = vmul.f32 %v4181_v63, %v5557_v62  ;;  %v6400_v51 = vmov 2   ;;  %v6402_v62 = vmov 0  }
 0x611   : > { %v1910_v19 = vadd.f32 %v1908_v34, %v1846_v48  ;;  %v1847_v8 = vadd.f32 %v1845_v31, %v1783_v53 }
 0x613   : > { %v5611_v28 = vmul.f32 0.25, %v1910_v19  ;;  %v1911_v9 = vadd.f32 %v1909_v7, %v1847_v8 }
 0x614   : > { %2037 = vadd.xlane.f32.xlu1 %v2036_v4  ;;  %2040 = vadd.xlane.f32.xlu0 %v2039_v0 }
 0x615   : > { %v5616_v12 = vmul.f32 0.25, %v1911_v9 }
 0x618   : > { %2123 = vadd.xlane.f32.xlu1 %v2122_v35  ;;  %2126 = vadd.xlane.f32.xlu0 %v2125_v44 }
 0x629   : > { %2164 = vrot.lane.b32.xlu1 %v5286_v56, %s4599_s4 }
 0x62d   : > { %1927 = vperm.xlu1 %4123, %v5611_v28  }
 0x62e   : > { %2166 = vrot.lane.b32.xlu0 %v5265_v41, %s4599_s4 }
 0x631   : > { %1931 = vperm.xlu1 %4123, %v5616_v12  }
 0x635   : > { %4124 = vset.pattern.permute.xlu1 %v6400_v51 }
 0x636   : > { %1939 = vperm.xlu1 %4124, %v5611_v28  }
 0x63a   : > { %1943 = vperm.xlu1 %4124, %v5616_v12  }
 0x63e   : > { %4125 = vset.pattern.permute.xlu1 %v6401_v13 }
 0x63f   : > { %1951 = vperm.xlu1 %4125, %v5611_v28  }
 0x643   : > { %1955 = vperm.xlu1 %4125, %v5616_v12  }
 0x647   : > { %4126 = vset.pattern.permute.xlu1 %v6402_v62 }
 0x69d   : > { %v2158_v4 = vpop.xlane.xlu1 %2157  ;;  %v2161_v0 = vpop.xlane.xlu0 %2160 }
 0x69e   : > { %v2190_v53 = vsel %vm1686_vm3, %v5579_v43, %v2158_v4  ;;  %v2191_v7 = vsel %vm1686_vm3, %v5581_v22, %v2161_v0 }
 0x6a1   : > { %v5626_v35 = vpop.xlane.xlu1 %2037  ;;  %v5628_v44 = vpop.xlane.xlu0 %2040 }
 0x6a5   : > { %v5630_v3 = vpop.xlane.xlu1 %2123  ;;  %v5632_v45 = vpop.xlane.xlu0 %2126 }
 0x6a9   : > { %v2165_v39 = vpop.permute.xlu1 %2164  ;;  %v2167_v52 = vpop.permute.xlu0 %2166 }
 0x6aa   : > { %v2170_v11 = vsel %vm1655_vm2, %v2165_v39, 0.0  ;;  %v2173_v2 = vsel %vm1655_vm2, %v2167_v52, 0.0 }
 0x6ab   : > { %2171 = vadd.xlane.f32.xlu1 %v2170_v11  ;;  %2174 = vadd.xlane.f32.xlu0 %v2173_v2 }
 0x6ad   : > { %v5640_v6 = vpop.permute.xlu1 %1927 }
 0x6b1   : > { %v5642_v59 = vpop.permute.xlu1 %1931 }
 0x6b2   : > { %6403 = vst [vmem:[#allocation37_spill] sm:$0xff] %v5642_v59 }
 0x6b5   : > { %v5644_v30 = vpop.permute.xlu1 %1939 }
 0x6b9   : > { %v5646_v5 = vpop.permute.xlu1 %1943 }
 0x6ba   : > { %6404 = vst [vmem:[#allocation38_spill] sm:$0xff] %v5646_v5 }
 0x6bc   : > { %2178 = vrot.lane.b32.xlu1 %v5294_v60, %s4599_s4 }
 0x6be   : > { %v5648_v58 = vpop.permute.xlu1 %1951 }
 0x6c1   : > { %2180 = vrot.lane.b32.xlu0 %v5269_v47, %s4599_s4 }
 0x6c2   : > { %v5650_v25 = vpop.permute.xlu1 %1955 }
 0x6c3   : > { %6405 = vst [vmem:[#allocation39_spill] sm:$0xff] %v5650_v25 }
 0x738   : > { %v2172_v34 = vpop.xlane.xlu1 %2171  ;;  %v2175_v63 = vpop.xlane.xlu0 %2174 }
 0x739   : > { %v2192_v8 = vsel %vm1689_vm4, %v2190_v53, %v2172_v34  ;;  %v2193_v9 = vsel %vm1689_vm4, %v2191_v7, %v2175_v63 }
 0x73c   : > { %v2179_v10 = vpop.permute.xlu1 %2178  ;;  %v2181_v48 = vpop.permute.xlu0 %2180 }
 0x73d   : > { %v2184_v31 = vsel %vm1655_vm2, %v2179_v10, 0.0  ;;  %v2187_v19 = vsel %vm1655_vm2, %v2181_v48, 0.0 }
 0x73e   : > { %2185 = vadd.xlane.f32.xlu1 %v2184_v31  ;;  %2188 = vadd.xlane.f32.xlu0 %v2187_v19 }
 0x7cb   : > { %v2186_v39 = vpop.xlane.xlu1 %2185  ;;  %v2189_v52 = vpop.xlane.xlu0 %2188 }
 0x7cc   : > { %v2194_v11 = vsel %vm1692_vm5, %v2192_v8, %v2186_v39  ;;  %v2195_v2 = vsel %vm1692_vm5, %v2193_v9, %v2189_v52 }
 0x7cd   : > { %v2196_v10 = vsel %vm1695_vm6, %v2194_v11, -inf  ;;  %v2199_v48 = vsel %vm1695_vm6, %v2195_v2, -inf }
 0x7ce   : > { %2197 = vmax.xlane.f32.xlu1 %v2196_v10  ;;  %2200 = vmax.xlane.f32.xlu0 %v2199_v48 }
 0x85b   : > { %v2198_v43 = vpop.xlane.xlu1 %2197  ;;  %v2201_v4 = vpop.xlane.xlu0 %2200 }
 0x85c   : > { %v2202_v31 = vsub.f32 %v2194_v11, %v2198_v43  ;;  %v2203_v22 = vsub.f32 %v2195_v2, %v2201_v4 }
 0x85e   : > { %v2204_v0 = vmul.f32 1.442695, %v2202_v31  ;;  %v2206_v34 = vmul.f32 1.442695, %v2203_v22 }
 0x860   : > { %4182 = vpow2.f32 %v2204_v0 }
 0x861   : > { %4184 = vpow2.f32 %v2206_v34 }
 0x86a   : > { %v5664_v63 = vpop.eup %4182 }
 0x86b   : > { %v5666_v19 = vpop.eup %4184  ;;  %v2208_v53 = vsel %vm1695_vm6, %v5664_v63, 0.0 }
 0x86c   : > { %2209 = vadd.xlane.f32.xlu1 %v2208_v53  ;;  %v2211_v7 = vsel %vm1695_vm6, %v5666_v19, 0.0 }
 0x86d   : > { %2212 = vadd.xlane.f32.xlu0 %v2211_v7 }
 0x87d   : > { %2222 = vrot.lane.b32.xlu1 %v5302_v23, %s4599_s4 }
 0x883   : > { %2224 = vrot.lane.b32.xlu0 %v5273_v54, %s4599_s4 }
 0x8f9   : > { %v5676_v8 = vpop.xlane.xlu1 %2209 }
 0x8fa   : > { %v5678_v9 = vpop.xlane.xlu0 %2212 }
 0x8fd   : > { %v2223_v39 = vpop.permute.xlu1 %2222 }
 0x8fe   : > { %v2225_v52 = vpop.permute.xlu0 %2224  ;;  %v2228_v11 = vsel %vm1655_vm2, %v2223_v39, 0.0 }
 0x8ff   : > { %2229 = vadd.xlane.f32.xlu1 %v2228_v11  ;;  %v2231_v2 = vsel %vm1655_vm2, %v2225_v52, 0.0 }
 0x900   : > { %2232 = vadd.xlane.f32.xlu0 %v2231_v2 }
 0x910   : > { %2236 = vrot.lane.b32.xlu1 %v5304_v1, %s4599_s4 }
 0x916   : > { %2238 = vrot.lane.b32.xlu0 %v5281_v24, %s4599_s4 }
 0x98c   : > { %v2230_v10 = vpop.xlane.xlu1 %2229 }
 0x98d   : > { %v2233_v48 = vpop.xlane.xlu0 %2232 }
 0x990   : > { %v2237_v43 = vpop.permute.xlu1 %2236 }
 0x991   : > { %v2239_v4 = vpop.permute.xlu0 %2238  ;;  %v2242_v31 = vsel %vm1655_vm2, %v2237_v43, 0.0 }
 0x992   : > { %2243 = vadd.xlane.f32.xlu1 %v2242_v31  ;;  %v2245_v22 = vsel %vm1655_vm2, %v2239_v4, 0.0 }
 0x993   : > { %2246 = vadd.xlane.f32.xlu0 %v2245_v22 }
 0x9a3   : > { %2250 = vrot.lane.b32.xlu1 %v5312_v29, %s4599_s4 }
 0x9a9   : > { %2252 = vrot.lane.b32.xlu0 %v5288_v57, %s4599_s4 }
 0xa1f   : > { %v2244_v0 = vpop.xlane.xlu1 %2243 }
 0xa20   : > { %v2247_v34 = vpop.xlane.xlu0 %2246 }
 0xa23   : > { %v2251_v53 = vpop.permute.xlu1 %2250 }
 0xa24   : > { %v2253_v7 = vpop.permute.xlu0 %2252  ;;  %v2256_v39 = vsel %vm1655_vm2, %v2251_v53, 0.0  ;;  %v2276_v53 = vsel %vm1686_vm3, %v2230_v10, %v2244_v0 }
 0xa25   : > { %2257 = vadd.xlane.f32.xlu1 %v2256_v39  ;;  %v2259_v52 = vsel %vm1655_vm2, %v2253_v7, 0.0  ;;  %v2277_v7 = vsel %vm1686_vm3, %v2233_v48, %v2247_v34 }
 0xa26   : > { %2260 = vadd.xlane.f32.xlu0 %v2259_v52 }
 0xa36   : > { %2264 = vrot.lane.b32.xlu1 %v5314_v50, %s4599_s4 }
 0xa3c   : > { %2266 = vrot.lane.b32.xlu0 %v5296_v61, %s4599_s4 }
 0xab2   : > { %v2258_v11 = vpop.xlane.xlu1 %2257 }
 0xab3   : > { %v2261_v2 = vpop.xlane.xlu0 %2260  ;;  %v2278_v39 = vsel %vm1689_vm4, %v2276_v53, %v2258_v11 }
 0xab4   : > { %v2279_v25 = vsel %vm1689_vm4, %v2277_v7, %v2261_v2 }
 0xab6   : > { %v2265_v43 = vpop.permute.xlu1 %2264 }
 0xab7   : > { %v2267_v4 = vpop.permute.xlu0 %2266  ;;  %v2270_v31 = vsel %vm1655_vm2, %v2265_v43, 0.0 }
 0xab8   : > { %2271 = vadd.xlane.f32.xlu1 %v2270_v31  ;;  %v2273_v22 = vsel %vm1655_vm2, %v2267_v4, 0.0 }
 0xab9   : > { %2274 = vadd.xlane.f32.xlu0 %v2273_v22 }
 0xb45   : > { %v2272_v52 = vpop.xlane.xlu1 %2271 }
 0xb46   : > { %v5705_v5 = vsel %vm1692_vm5, %v2278_v39, %v2272_v52  ;;  %v2275_v59 = vpop.xlane.xlu0 %2274 }
 0xb47   : > { %v5708_v13 = vsel %vm1692_vm5, %v2279_v25, %v2275_v59  ;;  %v2282_v43 = vsel %vm1695_vm6, %v5705_v5, -inf  ;;  %v6406_v59 = vld [vmem:[#allocation24_spill] sm:$0xff]  ;;  %v6407_v25 = vld [vmem:[#allocation26_spill] sm:$0xff] }
 0xb48   : > { %2283 = vmax.xlane.f32.xlu1 %v2282_v43  ;;  %v2285_v10 = vsel %vm1695_vm6, %v5708_v13, -inf }
 0xb49   : > { %2286 = vmax.xlane.f32.xlu0 %v2285_v10 }
 0xb59   : > { %2356 = vrot.lane.b32.xlu1 %v5225_v17, %s4600_s0 }
 0xb5d   : > { %2434 = vrot.lane.b32.xlu1 %v5245_v33, %s4600_s0 }
 0xb5f   : > { %2368 = vrot.lane.b32.xlu0 %v5223_v16, %s4600_s0 }
 0xb61   : > { %2446 = vrot.lane.b32.xlu1 %v5259_v37, %s4600_s0 }
 0xb63   : > { %2358 = vrot.lane.b32.xlu0 %v5227_v14, %s4600_s0 }
 0xb65   : > { %2370 = vrot.lane.b32.xlu1 %v5231_v18, %s4600_s0 }
 0xb67   : > { %2380 = vrot.lane.b32.xlu0 %v5229_v15, %s4600_s0 }
 0xb69   : > { %2436 = vrot.lane.b32.xlu1 %v5237_v20, %s4600_s0 }
 0xb6b   : > { %2448 = vrot.lane.b32.xlu0 %v5247_v26, %s4600_s0 }
 0xb6d   : > { %2458 = vrot.lane.b32.xlu1 %v5263_v40, %s4600_s0 }
 0xb6f   : > { %2718 = vrot.lane.b32.xlu0 %v5225_v17, %s4601_s1  ;;  %v6409_v17 = vld [vmem:[#allocation27_spill] sm:$0xff] }
 0xb71   : > { %2730 = vrot.lane.b32.xlu1 %v5223_v16, %s4601_s1  ;;  %v6408_v16 = vld [vmem:[#allocation25_spill] sm:$0xff] }
 0xb73   : > { %2796 = vrot.lane.b32.xlu0 %v5245_v33, %s4601_s1 }
 0xb75   : > { %2808 = vrot.lane.b32.xlu1 %v5259_v37, %s4601_s1 }
 0xb77   : > { %2382 = vrot.lane.b32.xlu0 %v5235_v42, %s4600_s0 }
 0xb79   : > { %2392 = vrot.lane.b32.xlu1 %v6406_v59, %s4600_s0 }
 0xb7b   : > { %2460 = vrot.lane.b32.xlu0 %v6407_v25, %s4600_s0 }
 0xb7d   : > { %2470 = vrot.lane.b32.xlu1 %v5267_v46, %s4600_s0 }
 0xb7f   : > { %2512 = vrot.lane.b32.xlu0 %v5271_v49, %s4600_s0 }
 0xb81   : > { %2524 = vrot.lane.b32.xlu1 %v5279_v21, %s4600_s0 }
 0xb83   : > { %2720 = vrot.lane.b32.xlu0 %v5227_v14, %s4601_s1  ;;  %v6410_v14 = vld [vmem:[#allocation28_spill] sm:$0xff] }
 0xb85   : > { %2732 = vrot.lane.b32.xlu1 %v5231_v18, %s4601_s1 }
 0xb87   : > { %2742 = vrot.lane.b32.xlu0 %v5229_v15, %s4601_s1 }
 0xb89   : > { %2798 = vrot.lane.b32.xlu1 %v5237_v20, %s4601_s1 }
 0xb8b   : > { %2810 = vrot.lane.b32.xlu0 %v5247_v26, %s4601_s1 }
 0xb8d   : > { %2820 = vrot.lane.b32.xlu1 %v5263_v40, %s4601_s1 }
 0xb8f   : > { %2394 = vrot.lane.b32.xlu0 %v6408_v16, %s4600_s0 }
 0xb91   : > { %2472 = vrot.lane.b32.xlu1 %v6409_v17, %s4600_s0 }
 0xb93   : > { %2514 = vrot.lane.b32.xlu0 %v5253_v36, %s4600_s0 }
 0xb95   : > { %2526 = vrot.lane.b32.xlu1 %v6410_v14, %s4600_s0 }
 0xb97   : > { %2536 = vrot.lane.b32.xlu0 %v5286_v56, %s4600_s0 }
 0xb99   : > { %2744 = vrot.lane.b32.xlu1 %v5235_v42, %s4601_s1 }
 0xb9b   : > { %2754 = vrot.lane.b32.xlu0 %v6406_v59, %s4601_s1 }
 0xb9d   : > { %2822 = vrot.lane.b32.xlu1 %v6407_v25, %s4601_s1 }
 0xb9f   : > { %2832 = vrot.lane.b32.xlu0 %v5267_v46, %s4601_s1 }
 0xba1   : > { %2874 = vrot.lane.b32.xlu1 %v5271_v49, %s4601_s1 }
 0xba3   : > { %2886 = vrot.lane.b32.xlu0 %v5279_v21, %s4601_s1 }
 0xba5   : > { %2538 = vrot.lane.b32.xlu1 %v5265_v41, %s4600_s0 }
 0xba7   : > { %2548 = vrot.lane.b32.xlu0 %v5294_v60, %s4600_s0 }
 0xba9   : > { %2590 = vrot.lane.b32.xlu1 %v5302_v23, %s4600_s0 }
 0xbab   : > { %2602 = vrot.lane.b32.xlu0 %v5304_v1, %s4600_s0 }
 0xbad   : > { %2756 = vrot.lane.b32.xlu1 %v6408_v16, %s4601_s1 }
 0xbaf   : > { %2834 = vrot.lane.b32.xlu0 %v6409_v17, %s4601_s1 }
 0xbb1   : > { %2876 = vrot.lane.b32.xlu1 %v5253_v36, %s4601_s1 }
 0xbb3   : > { %2888 = vrot.lane.b32.xlu0 %v6410_v14, %s4601_s1 }
 0xbb5   : > { %2898 = vrot.lane.b32.xlu1 %v5286_v56, %s4601_s1 }
 0xbb7   : > { %2550 = vrot.lane.b32.xlu0 %v5269_v47, %s4600_s0 }
 0xbb9   : > { %2592 = vrot.lane.b32.xlu1 %v5273_v54, %s4600_s0 }
 0xbbb   : > { %2604 = vrot.lane.b32.xlu0 %v5281_v24, %s4600_s0 }
 0xbbd   : > { %2614 = vrot.lane.b32.xlu1 %v5312_v29, %s4600_s0 }
 0xbbf   : > { %2900 = vrot.lane.b32.xlu0 %v5265_v41, %s4601_s1 }
 0xbc1   : > { %2910 = vrot.lane.b32.xlu1 %v5294_v60, %s4601_s1 }
 0xbc3   : > { %2952 = vrot.lane.b32.xlu0 %v5302_v23, %s4601_s1 }
 0xbc5   : > { %2964 = vrot.lane.b32.xlu1 %v5304_v1, %s4601_s1 }
 0xbc7   : > { %2616 = vrot.lane.b32.xlu0 %v5288_v57, %s4600_s0 }
 0xbc9   : > { %2626 = vrot.lane.b32.xlu1 %v5314_v50, %s4600_s0 }
 0xbcb   : > { %2912 = vrot.lane.b32.xlu0 %v5269_v47, %s4601_s1 }
 0xbcd   : > { %2954 = vrot.lane.b32.xlu1 %v5273_v54, %s4601_s1 }
 0xbcf   : > { %2966 = vrot.lane.b32.xlu0 %v5281_v24, %s4601_s1 }
 0xbd1   : > { %2976 = vrot.lane.b32.xlu1 %v5312_v29, %s4601_s1 }
 0xbd3   : > { %2628 = vrot.lane.b32.xlu0 %v5296_v61, %s4600_s0 }
 0xbd5   : > { %2978 = vrot.lane.b32.xlu1 %v5288_v57, %s4601_s1  ;;  %v5838_v15 = vpop.xlane.xlu1 %2283 }
 0xbd6   : > { %v5840_v18 = vpop.xlane.xlu0 %2286 }
 0xbd7   : > { %2988 = vrot.lane.b32.xlu0 %v5314_v50, %s4601_s1 }
 0xbd9   : > { %2990 = vrot.lane.b32.xlu1 %v5296_v61, %s4601_s1  ;;  %v2357_v42 = vpop.permute.xlu1 %2356 }
 0xbda   : > { %v2369_v20 = vpop.permute.xlu0 %2368  ;;  %v2362_v57 = vsel %vm1655_vm2, %v2357_v42, 0.0 }
 0xbdb   : > { %v2374_v29 = vsel %vm1655_vm2, %v2369_v20, 0.0 }
 0xbdd   : > { %v2435_v33 = vpop.permute.xlu1 %2434 }
 0xbde   : > { %v2359_v26 = vpop.permute.xlu0 %2358  ;;  %v2440_v23 = vsel %vm1655_vm2, %v2435_v33, 0.0 }
 0xbdf   : > { %v2365_v34 = vsel %vm1655_vm2, %v2359_v26, 0.0 }
 0xbe1   : > { %v2447_v36 = vpop.permute.xlu1 %2446 }
 0xbe2   : > { %v2381_v37 = vpop.permute.xlu0 %2380  ;;  %v2452_v48 = vsel %vm1655_vm2, %v2447_v36, 0.0 }
 0xbe3   : > { %v2386_v31 = vsel %vm1655_vm2, %v2381_v37, 0.0 }
 0xbe5   : > { %v2371_v40 = vpop.permute.xlu1 %2370 }
 0xbe6   : > { %v2449_v41 = vpop.permute.xlu0 %2448  ;;  %v2377_v2 = vsel %vm1655_vm2, %v2371_v40, 0.0 }
 0xbe7   : > { %v2455_v39 = vsel %vm1655_vm2, %v2449_v41, 0.0 }
 0xbe9   : > { %v2437_v46 = vpop.permute.xlu1 %2436 }
 0xbea   : > { %v2719_v47 = vpop.permute.xlu0 %2718  ;;  %v2443_v53 = vsel %vm1655_vm2, %v2437_v46, 0.0 }
 0xbeb   : > { %v2724_v59 = vsel %vm1655_vm2, %v2719_v47, 0.0 }
 0xbed   : > { %v2459_v49 = vpop.permute.xlu1 %2458 }
 0xbee   : > { %v2797_v54 = vpop.permute.xlu0 %2796  ;;  %v2464_v43 = vsel %vm1655_vm2, %v2459_v49, 0.0 }
 0xbef   : > { %v2802_v14 = vsel %vm1655_vm2, %v2797_v54, 0.0 }
 0xbf1   : > { %v2731_v21 = vpop.permute.xlu1 %2730 }
 0xbf2   : > { %v2383_v24 = vpop.permute.xlu0 %2382  ;;  %v2736_v16 = vsel %vm1655_vm2, %v2731_v21, 0.0 }
 0xbf3   : > { %v2389_v26 = vsel %vm1655_vm2, %v2383_v24, 0.0 }
 0xbf5   : > { %v2809_v56 = vpop.permute.xlu1 %2808 }
 0xbf6   : > { %2363 = vadd.xlane.f32.xlu0 %v2362_v57  ;;  %v2461_v60 = vpop.permute.xlu0 %2460  ;;  %v2814_v20 = vsel %vm1655_vm2, %v2809_v56, 0.0 }
 0xbf7   : > { %v2467_v41 = vsel %vm1655_vm2, %v2461_v60, 0.0 }
 0xbf9   : > { %v2393_v61 = vpop.permute.xlu1 %2392 }
 0xbfa   : > { %2441 = vadd.xlane.f32.xlu0 %v2440_v23  ;;  %v2513_v1 = vpop.permute.xlu0 %2512  ;;  %v2398_v37 = vsel %vm1655_vm2, %v2393_v61, 0.0 }
 0xbfb   : > { %v2518_v49 = vsel %vm1655_vm2, %v2513_v1, 0.0 }
 0xbfd   : > { %v2471_v50 = vpop.permute.xlu1 %2470  ;;  %2375 = vadd.xlane.f32.xlu1 %v2374_v29 }
 0xbfe   : > { %2453 = vadd.xlane.f32.xlu0 %v2452_v48  ;;  %v2721_v0 = vpop.permute.xlu0 %2720  ;;  %v2476_v47 = vsel %vm1655_vm2, %v2471_v50, 0.0 }
 0xbff   : > { %v2727_v24 = vsel %vm1655_vm2, %v2721_v0, 0.0 }
 0xc01   : > { %v2525_v11 = vpop.permute.xlu1 %2524  ;;  %2366 = vadd.xlane.f32.xlu1 %v2365_v34 }
 0xc02   : > { %2378 = vadd.xlane.f32.xlu0 %v2377_v2  ;;  %v2743_v4 = vpop.permute.xlu0 %2742  ;;  %v2530_v56 = vsel %vm1655_vm2, %v2525_v11, 0.0 }
 0xc03   : > { %v2748_v23 = vsel %vm1655_vm2, %v2743_v4, 0.0 }
 0xc05   : > { %v2733_v22 = vpop.permute.xlu1 %2732  ;;  %2387 = vadd.xlane.f32.xlu1 %v2386_v31 }
 0xc06   : > { %2444 = vadd.xlane.f32.xlu0 %v2443_v53  ;;  %v2811_v7 = vpop.permute.xlu0 %2810  ;;  %v2739_v61 = vsel %vm1655_vm2, %v2733_v22, 0.0 }
 0xc07   : > { %v2817_v1 = vsel %vm1655_vm2, %v2811_v7, 0.0 }
 0xc09   : > { %v2799_v52 = vpop.permute.xlu1 %2798  ;;  %2456 = vadd.xlane.f32.xlu1 %v2455_v39 }
 0xc0a   : > { %2465 = vadd.xlane.f32.xlu0 %v2464_v43  ;;  %v2395_v10 = vpop.permute.xlu0 %2394  ;;  %v2805_v50 = vsel %vm1655_vm2, %v2799_v52, 0.0 }
 0xc0b   : > { %v2401_v11 = vsel %vm1655_vm2, %v2395_v10, 0.0 }
 0xc0d   : > { %v2821_v25 = vpop.permute.xlu1 %2820  ;;  %2725 = vadd.xlane.f32.xlu1 %v2724_v59 }
 0xc0e   : > { %2737 = vadd.xlane.f32.xlu0 %v2736_v16  ;;  %v2515_v17 = vpop.permute.xlu0 %2514  ;;  %v2826_v34 = vsel %vm1655_vm2, %v2821_v25, 0.0 }
 0xc0f   : > { %v2521_v22 = vsel %vm1655_vm2, %v2515_v17, 0.0 }
 0xc11   : > { %v2473_v42 = vpop.permute.xlu1 %2472  ;;  %2803 = vadd.xlane.f32.xlu1 %v2802_v14 }
 0xc12   : > { %2815 = vadd.xlane.f32.xlu0 %v2814_v20  ;;  %v2537_v33 = vpop.permute.xlu0 %2536  ;;  %v2479_v2 = vsel %vm1655_vm2, %v2473_v42, 0.0 }
 0xc13   : > { %v2542_v7 = vsel %vm1655_vm2, %v2537_v33, 0.0 }
 0xc15   : > { %v2527_v36 = vpop.permute.xlu1 %2526  ;;  %2390 = vadd.xlane.f32.xlu1 %v2389_v26 }
 0xc16   : > { %2399 = vadd.xlane.f32.xlu0 %v2398_v37  ;;  %v2755_v40 = vpop.permute.xlu0 %2754  ;;  %v2533_v53 = vsel %vm1655_vm2, %v2527_v36, 0.0 }
 0xc17   : > { %v2760_v10 = vsel %vm1655_vm2, %v2755_v40, 0.0 }
 0xc19   : > { %v2745_v46 = vpop.permute.xlu1 %2744  ;;  %2468 = vadd.xlane.f32.xlu1 %v2467_v41 }
 0xc1a   : > { %2477 = vadd.xlane.f32.xlu0 %v2476_v47  ;;  %v2833_v54 = vpop.permute.xlu0 %2832  ;;  %v2751_v52 = vsel %vm1655_vm2, %v2745_v46, 0.0 }
 0xc1b   : > { %v2838_v17 = vsel %vm1655_vm2, %v2833_v54, 0.0 }
 0xc1d   : > { %v2823_v21 = vpop.permute.xlu1 %2822  ;;  %2519 = vadd.xlane.f32.xlu1 %v2518_v49 }
 0xc1e   : > { %2531 = vadd.xlane.f32.xlu0 %v2530_v56  ;;  %v2887_v60 = vpop.permute.xlu0 %2886  ;;  %v2829_v59 = vsel %vm1655_vm2, %v2823_v21, 0.0 }
 0xc1f   : > { %v2892_v42 = vsel %vm1655_vm2, %v2887_v60, 0.0 }
 0xc21   : > { %v2875_v57 = vpop.permute.xlu1 %2874  ;;  %2728 = vadd.xlane.f32.xlu1 %v2727_v24 }
 0xc22   : > { %2740 = vadd.xlane.f32.xlu0 %v2739_v61  ;;  %v2549_v48 = vpop.permute.xlu0 %2548  ;;  %v2880_v14 = vsel %vm1655_vm2, %v2875_v57, 0.0 }
 0xc23   : > { %v2554_v36 = vsel %vm1655_vm2, %v2549_v48, 0.0 }
 0xc25   : > { %v2539_v29 = vpop.permute.xlu1 %2538  ;;  %2749 = vadd.xlane.f32.xlu1 %v2748_v23 }
 0xc26   : > { %2806 = vadd.xlane.f32.xlu0 %v2805_v50  ;;  %v2603_v4 = vpop.permute.xlu0 %2602  ;;  %v2545_v33 = vsel %vm1655_vm2, %v2539_v29, 0.0 }
 0xc27   : > { %v2608_v46 = vsel %vm1655_vm2, %v2603_v4, 0.0 }
 0xc29   : > { %2818 = vadd.xlane.f32.xlu1 %v2817_v1  ;;  %v2591_v0 = vpop.permute.xlu1 %2590 }
 0xc2a   : > { %2827 = vadd.xlane.f32.xlu0 %v2826_v34  ;;  %v2835_v39 = vpop.permute.xlu0 %2834  ;;  %v2596_v37 = vsel %vm1655_vm2, %v2591_v0, 0.0 }
 0xc2b   : > { %v2841_v49 = vsel %vm1655_vm2, %v2835_v39, 0.0 }
 0xc2d   : > { %2402 = vadd.xlane.f32.xlu1 %v2401_v11  ;;  %v2757_v31 = vpop.permute.xlu1 %2756 }
 0xc2e   : > { %2480 = vadd.xlane.f32.xlu0 %v2479_v2  ;;  %v2889_v25 = vpop.permute.xlu0 %2888  ;;  %v2763_v47 = vsel %vm1655_vm2, %v2757_v31, 0.0 }
 0xc2f   : > { %v2895_v24 = vsel %vm1655_vm2, %v2889_v25, 0.0 }
 0xc31   : > { %2522 = vadd.xlane.f32.xlu1 %v2521_v22  ;;  %v2877_v43 = vpop.permute.xlu1 %2876 }
 0xc32   : > { %2534 = vadd.xlane.f32.xlu0 %v2533_v53  ;;  %v2551_v20 = vpop.permute.xlu0 %2550  ;;  %v2883_v21 = vsel %vm1655_vm2, %v2877_v43, 0.0 }
 0xc33   : > { %v2557_v23 = vsel %vm1655_vm2, %v2551_v20, 0.0 }
 0xc35   : > { %2543 = vadd.xlane.f32.xlu1 %v2542_v7  ;;  %v2899_v16 = vpop.permute.xlu1 %2898 }
 0xc36   : > { %2752 = vadd.xlane.f32.xlu0 %v2751_v52  ;;  %v2605_v40 = vpop.permute.xlu0 %2604  ;;  %v2904_v57 = vsel %vm1655_vm2, %v2899_v16, 0.0 }
 0xc37   : > { %v2611_v50 = vsel %vm1655_vm2, %v2605_v40, 0.0 }
 0xc39   : > { %2761 = vadd.xlane.f32.xlu1 %v2760_v10  ;;  %v2593_v26 = vpop.permute.xlu1 %2592 }
 0xc3a   : > { %2830 = vadd.xlane.f32.xlu0 %v2829_v59  ;;  %v2901_v54 = vpop.permute.xlu0 %2900  ;;  %v2599_v29 = vsel %vm1655_vm2, %v2593_v26, 0.0 }
 0xc3b   : > { %v2907_v0 = vsel %vm1655_vm2, %v2901_v54, 0.0 }
 0xc3d   : > { %2839 = vadd.xlane.f32.xlu1 %v2838_v17  ;;  %v2615_v41 = vpop.permute.xlu1 %2614 }
 0xc3e   : > { %2881 = vadd.xlane.f32.xlu0 %v2880_v14  ;;  %v2953_v61 = vpop.permute.xlu0 %2952  ;;  %v2620_v48 = vsel %vm1655_vm2, %v2615_v41, 0.0 }
 0xc3f   : > { %v2958_v31 = vsel %vm1655_vm2, %v2953_v61, 0.0 }
 0xc41   : > { %2893 = vadd.xlane.f32.xlu1 %v2892_v42  ;;  %v2911_v56 = vpop.permute.xlu1 %2910 }
 0xc42   : > { %2546 = vadd.xlane.f32.xlu0 %v2545_v33  ;;  %v2617_v1 = vpop.permute.xlu0 %2616  ;;  %v2916_v11 = vsel %vm1655_vm2, %v2911_v56, 0.0 }
 0xc43   : > { %v2623_v53 = vsel %vm1655_vm2, %v2617_v1, 0.0 }
 0xc45   : > { %2555 = vadd.xlane.f32.xlu1 %v2554_v36  ;;  %v2965_v60 = vpop.permute.xlu1 %2964 }
 0xc46   : > { %2597 = vadd.xlane.f32.xlu0 %v2596_v37  ;;  %v2913_v2 = vpop.permute.xlu0 %2912  ;;  %v2970_v22 = vsel %vm1655_vm2, %v2965_v60, 0.0 }
 0xc47   : > { %v2919_v43 = vsel %vm1655_vm2, %v2913_v2, 0.0 }
 0xc49   : > { %2609 = vadd.xlane.f32.xlu1 %v2608_v46  ;;  %v2627_v34 = vpop.permute.xlu1 %2626 }
 0xc4a   : > { %2764 = vadd.xlane.f32.xlu0 %v2763_v47  ;;  %v2967_v7 = vpop.permute.xlu0 %2966  ;;  %v2632_v39 = vsel %vm1655_vm2, %v2627_v34, 0.0 }
 0xc4b   : > { %v2973_v16 = vsel %vm1655_vm2, %v2967_v7, 0.0 }
 0xc4d   : > { %2842 = vadd.xlane.f32.xlu1 %v2841_v49  ;;  %v2955_v4 = vpop.permute.xlu1 %2954 }
 0xc4e   : > { %2884 = vadd.xlane.f32.xlu0 %v2883_v21  ;;  %v2961_v10 = vsel %vm1655_vm2, %v2955_v4, 0.0  ;;  %v2629_v59 = vpop.permute.xlu0 %2628 }
 0xc4f   : > { %v2635_v14 = vsel %vm1655_vm2, %v2629_v59, 0.0 }
 0xc51   : > { %2896 = vadd.xlane.f32.xlu1 %v2895_v24  ;;  %v2977_v52 = vpop.permute.xlu1 %2976 }
 0xc52   : > { %2905 = vadd.xlane.f32.xlu0 %v2904_v57  ;;  %v2982_v17 = vsel %vm1655_vm2, %v2977_v52, 0.0  ;;  %v2989_v42 = vpop.permute.xlu0 %2988 }
 0xc53   : > { %v2994_v26 = vsel %vm1655_vm2, %v2989_v42, 0.0 }
 0xc55   : > { %2558 = vadd.xlane.f32.xlu1 %v2557_v23  ;;  %v2979_v25 = vpop.permute.xlu1 %2978 }
 0xc56   : > { %2600 = vadd.xlane.f32.xlu0 %v2599_v29  ;;  %v2985_v20 = vsel %vm1655_vm2, %v2979_v25, 0.0 }
 0xc59   : > { %2612 = vadd.xlane.f32.xlu1 %v2611_v50  ;;  %v2991_v33 = vpop.permute.xlu1 %2990 }
 0xc5a   : > { %2621 = vadd.xlane.f32.xlu0 %v2620_v48  ;;  %v2997_v36 = vsel %vm1655_vm2, %v2991_v33, 0.0 }
 0xc5d   : > { %2908 = vadd.xlane.f32.xlu1 %v2907_v0 }
 0xc5e   : > { %2917 = vadd.xlane.f32.xlu0 %v2916_v11 }
 0xc61   : > { %2959 = vadd.xlane.f32.xlu1 %v2958_v31 }
 0xc62   : > { %2971 = vadd.xlane.f32.xlu0 %v2970_v22 }
 0xc65   : > { %2624 = vadd.xlane.f32.xlu1 %v2623_v53 }
 0xc66   : > { %2633 = vadd.xlane.f32.xlu0 %v2632_v39 }
 0xc69   : > { %2920 = vadd.xlane.f32.xlu1 %v2919_v43 }
 0xc6a   : > { %2962 = vadd.xlane.f32.xlu0 %v2961_v10 }
 0xc6d   : > { %2974 = vadd.xlane.f32.xlu1 %v2973_v16 }
 0xc6e   : > { %2983 = vadd.xlane.f32.xlu0 %v2982_v17 }
 0xc71   : > { %2636 = vadd.xlane.f32.xlu1 %v2635_v14 }
 0xc72   : > { %2986 = vadd.xlane.f32.xlu0 %v2985_v20 }
 0xc75   : > { %2995 = vadd.xlane.f32.xlu1 %v2994_v26 }
 0xc76   : > { %2998 = vadd.xlane.f32.xlu0 %v2997_v36 }
 0xc83   : > { %v2364_v37 = vpop.xlane.xlu0 %2363 }
 0xc87   : > { %v2442_v40 = vpop.xlane.xlu0 %2441 }
 0xc8a   : > { %v2376_v41 = vpop.xlane.xlu1 %2375 }
 0xc8b   : > { %v2454_v46 = vpop.xlane.xlu0 %2453  ;;  %v2404_v29 = vsel %vm1686_vm3, %v2364_v37, %v2376_v41 }
 0xc8c   : > { %v2482_v11 = vsel %vm1686_vm3, %v2442_v40, %v2454_v46 }
 0xc8e   : > { %v2367_v47 = vpop.xlane.xlu1 %2366 }
 0xc8f   : > { %v2379_v49 = vpop.xlane.xlu0 %2378 }
 0xc90   : > { %v2405_v17 = vsel %vm1686_vm3, %v2367_v47, %v2379_v49 }
 0xc92   : > { %v2388_v54 = vpop.xlane.xlu1 %2387 }
 0xc93   : > { %v2445_v21 = vpop.xlane.xlu0 %2444  ;;  %v2406_v1 = vsel %vm1689_vm4, %v2404_v29, %v2388_v54 }
 0xc96   : > { %v2457_v56 = vpop.xlane.xlu1 %2456 }
 0xc97   : > { %v2466_v24 = vpop.xlane.xlu0 %2465  ;;  %v2483_v14 = vsel %vm1686_vm3, %v2445_v21, %v2457_v56 }
 0xc98   : > { %v2484_v4 = vsel %vm1689_vm4, %v2482_v11, %v2466_v24 }
 0xc9a   : > { %v2726_v57 = vpop.xlane.xlu1 %2725 }
 0xc9b   : > { %v2738_v61 = vpop.xlane.xlu0 %2737 }
 0xc9c   : > { %v2766_v21 = vsel %vm1686_vm3, %v2726_v57, %v2738_v61 }
 0xc9e   : > { %v2804_v60 = vpop.xlane.xlu1 %2803 }
 0xc9f   : > { %v2816_v23 = vpop.xlane.xlu0 %2815 }
 0xca2   : > { %v2391_v50 = vpop.xlane.xlu1 %2390 }
 0xca3   : > { %v2400_v48 = vpop.xlane.xlu0 %2399  ;;  %v2407_v42 = vsel %vm1689_vm4, %v2405_v17, %v2391_v50 }
 0xca4   : > { %v5913_v34 = vsel %vm1692_vm5, %v2406_v1, %v2400_v48  ;;  %v2844_v48 = vsel %vm1686_vm3, %v2804_v60, %v2816_v23 }
 0xca5   : > { %v2410_v0 = vsel %vm1695_vm6, %v5913_v34, -inf }
 0xca6   : > { %2411 = vmax.xlane.f32.xlu1 %v2410_v0  ;;  %v2469_v2 = vpop.xlane.xlu1 %2468 }
 0xca7   : > { %v2478_v31 = vpop.xlane.xlu0 %2477  ;;  %v2485_v33 = vsel %vm1689_vm4, %v2483_v14, %v2469_v2 }
 0xca8   : > { %v5920_v22 = vsel %vm1692_vm5, %v2484_v4, %v2478_v31 }
 0xca9   : > { %v2488_v53 = vsel %vm1695_vm6, %v5920_v22, -inf }
 0xcaa   : > { %2489 = vmax.xlane.f32.xlu0 %v2488_v53  ;;  %v2520_v7 = vpop.xlane.xlu1 %2519 }
 0xcab   : > { %v2532_v39 = vpop.xlane.xlu0 %2531 }
 0xcac   : > { %v2560_v53 = vsel %vm1686_vm3, %v2520_v7, %v2532_v39 }
 0xcae   : > { %v2729_v52 = vpop.xlane.xlu1 %2728 }
 0xcaf   : > { %v2741_v43 = vpop.xlane.xlu0 %2740 }
 0xcb0   : > { %v2767_v14 = vsel %vm1686_vm3, %v2729_v52, %v2741_v43 }
 0xcb2   : > { %v2750_v10 = vpop.xlane.xlu1 %2749 }
 0xcb3   : > { %v2807_v59 = vpop.xlane.xlu0 %2806  ;;  %v2768_v56 = vsel %vm1689_vm4, %v2766_v21, %v2750_v10 }
 0xcb6   : > { %v2819_v25 = vpop.xlane.xlu1 %2818 }
 0xcb7   : > { %v2828_v16 = vpop.xlane.xlu0 %2827  ;;  %v2845_v7 = vsel %vm1686_vm3, %v2807_v59, %v2819_v25 }
 0xcb8   : > { %v2846_v0 = vsel %vm1689_vm4, %v2844_v48, %v2828_v16 }
 0xcba   : > { %v2403_v20 = vpop.xlane.xlu1 %2402 }
 0xcbb   : > { %v5929_v26 = vsel %vm1692_vm5, %v2407_v42, %v2403_v20  ;;  %v2481_v36 = vpop.xlane.xlu0 %2480 }
 0xcbc   : > { %v5932_v37 = vsel %vm1692_vm5, %v2485_v33, %v2481_v36  ;;  %v2413_v40 = vsel %vm1695_vm6, %v5929_v26, -inf }
 0xcbd   : > { %2414 = vmax.xlane.f32.xlu1 %v2413_v40  ;;  %v2491_v41 = vsel %vm1695_vm6, %v5932_v37, -inf }
 0xcbe   : > { %2492 = vmax.xlane.f32.xlu0 %v2491_v41  ;;  %v2523_v46 = vpop.xlane.xlu1 %2522 }
 0xcbf   : > { %v2535_v47 = vpop.xlane.xlu0 %2534 }
 0xcc2   : > { %v2544_v49 = vpop.xlane.xlu1 %2543 }
 0xcc3   : > { %v2753_v54 = vpop.xlane.xlu0 %2752  ;;  %v2562_v10 = vsel %vm1689_vm4, %v2560_v53, %v2544_v49 }
 0xcc4   : > { %v2769_v20 = vsel %vm1689_vm4, %v2767_v14, %v2753_v54 }
 0xcc6   : > { %v2762_v24 = vpop.xlane.xlu1 %2761 }
 0xcc7   : > { %v5941_v29 = vsel %vm1692_vm5, %v2768_v56, %v2762_v24  ;;  %v2831_v50 = vpop.xlane.xlu0 %2830  ;;  %v2561_v56 = vsel %vm1686_vm3, %v2523_v46, %v2535_v47 }
 0xcc8   : > { %v2772_v1 = vsel %vm1695_vm6, %v5941_v29, -inf  ;;  %v2847_v40 = vsel %vm1689_vm4, %v2845_v7, %v2831_v50 }
 0xcc9   : > { %2773 = vmax.xlane.f32.xlu1 %v2772_v1 }
 0xcca   : > { %v2840_v11 = vpop.xlane.xlu1 %2839 }
 0xccb   : > { %v5948_v2 = vsel %vm1692_vm5, %v2846_v0, %v2840_v11  ;;  %v2882_v57 = vpop.xlane.xlu0 %2881 }
 0xccc   : > { %v2850_v61 = vsel %vm1695_vm6, %v5948_v2, -inf }
 0xccd   : > { %2851 = vmax.xlane.f32.xlu0 %v2850_v61 }
 0xcce   : > { %v2894_v4 = vpop.xlane.xlu1 %2893 }
 0xccf   : > { %v2547_v31 = vpop.xlane.xlu0 %2546  ;;  %v2922_v11 = vsel %vm1686_vm3, %v2882_v57, %v2894_v4 }
 0xcd0   : > { %v2563_v59 = vsel %vm1689_vm4, %v2561_v56, %v2547_v31 }
 0xcd2   : > { %v2556_v17 = vpop.xlane.xlu1 %2555 }
 0xcd3   : > { %v5955_v60 = vsel %vm1692_vm5, %v2562_v10, %v2556_v17  ;;  %v2598_v23 = vpop.xlane.xlu0 %2597 }
 0xcd4   : > { %v2566_v16 = vsel %vm1695_vm6, %v5955_v60, -inf }
 0xcd5   : > { %2567 = vmax.xlane.f32.xlu1 %v2566_v16 }
 0xcd6   : > { %v2610_v42 = vpop.xlane.xlu1 %2609 }
 0xcd7   : > { %v2765_v33 = vpop.xlane.xlu0 %2764  ;;  %v2638_v16 = vsel %vm1686_vm3, %v2598_v23, %v2610_v42 }
 0xcd8   : > { %v5962_v36 = vsel %vm1692_vm5, %v2769_v20, %v2765_v33 }
 0xcd9   : > { %v2775_v39 = vsel %vm1695_vm6, %v5962_v36, -inf }
 0xcda   : > { %2776 = vmax.xlane.f32.xlu0 %v2775_v39  ;;  %v2843_v41 = vpop.xlane.xlu1 %2842 }
 0xcdb   : > { %v5969_v49 = vsel %vm1692_vm5, %v2847_v40, %v2843_v41  ;;  %v2885_v52 = vpop.xlane.xlu0 %2884 }
 0xcdc   : > { %v2853_v43 = vsel %vm1695_vm6, %v5969_v49, -inf }
 0xcdd   : > { %2854 = vmax.xlane.f32.xlu1 %v2853_v43 }
 0xcde   : > { %v2897_v54 = vpop.xlane.xlu1 %2896 }
 0xcdf   : > { %v2906_v21 = vpop.xlane.xlu0 %2905  ;;  %v2923_v4 = vsel %vm1686_vm3, %v2885_v52, %v2897_v54 }
 0xce0   : > { %v2924_v53 = vsel %vm1689_vm4, %v2922_v11, %v2906_v21 }
 0xce2   : > { %v2559_v25 = vpop.xlane.xlu1 %2558 }
 0xce3   : > { %v5976_v24 = vsel %vm1692_vm5, %v2563_v59, %v2559_v25  ;;  %v2601_v50 = vpop.xlane.xlu0 %2600 }
 0xce4   : > { %v2569_v1 = vsel %vm1695_vm6, %v5976_v24, -inf }
 0xce5   : > { %2570 = vmax.xlane.f32.xlu0 %v2569_v1 }
 0xce6   : > { %v2613_v48 = vpop.xlane.xlu1 %2612 }
 0xce7   : > { %v2622_v0 = vpop.xlane.xlu0 %2621  ;;  %v2639_v56 = vsel %vm1686_vm3, %v2601_v50, %v2613_v48 }
 0xce8   : > { %v2640_v20 = vsel %vm1689_vm4, %v2638_v16, %v2622_v0 }
 0xcea   : > { %v2909_v61 = vpop.xlane.xlu1 %2908 }
 0xceb   : > { %v2918_v10 = vpop.xlane.xlu0 %2917  ;;  %v2925_v39 = vsel %vm1689_vm4, %v2923_v4, %v2909_v61 }
 0xcec   : > { %v5983_v46 = vsel %vm1692_vm5, %v2924_v53, %v2918_v10 }
 0xced   : > { %v2928_v47 = vsel %vm1695_vm6, %v5983_v46, -inf }
 0xcee   : > { %2929 = vmax.xlane.f32.xlu1 %v2928_v47  ;;  %v2960_v31 = vpop.xlane.xlu1 %2959 }
 0xcef   : > { %v2972_v17 = vpop.xlane.xlu0 %2971 }
 0xcf0   : > { %v3000_v0 = vsel %vm1686_vm3, %v2960_v31, %v2972_v17 }
 0xcf2   : > { %v2625_v14 = vpop.xlane.xlu1 %2624 }
 0xcf3   : > { %v2634_v33 = vpop.xlane.xlu0 %2633  ;;  %v2641_v52 = vsel %vm1689_vm4, %v2639_v56, %v2625_v14 }
 0xcf4   : > { %v5990_v57 = vsel %vm1692_vm5, %v2640_v20, %v2634_v33 }
 0xcf5   : > { %v2644_v7 = vsel %vm1695_vm6, %v5990_v57, -inf }
 0xcf6   : > { %2645 = vmax.xlane.f32.xlu0 %v2644_v7  ;;  %v2921_v40 = vpop.xlane.xlu1 %2920 }
 0xcf7   : > { %v5997_v41 = vsel %vm1692_vm5, %v2925_v39, %v2921_v40  ;;  %v2963_v23 = vpop.xlane.xlu0 %2962 }
 0xcf8   : > { %v2931_v42 = vsel %vm1695_vm6, %v5997_v41, -inf }
 0xcf9   : > { %2932 = vmax.xlane.f32.xlu1 %v2931_v42 }
 0xcfa   : > { %v2975_v43 = vpop.xlane.xlu1 %2974 }
 0xcfb   : > { %v2984_v21 = vpop.xlane.xlu0 %2983  ;;  %v3001_v11 = vsel %vm1686_vm3, %v2963_v23, %v2975_v43 }
 0xcfc   : > { %v3002_v61 = vsel %vm1689_vm4, %v3000_v0, %v2984_v21 }
 0xcfe   : > { %v2637_v54 = vpop.xlane.xlu1 %2636 }
 0xcff   : > { %v6004_v59 = vsel %vm1692_vm5, %v2641_v52, %v2637_v54  ;;  %v2987_v25 = vpop.xlane.xlu0 %2986 }
 0xd00   : > { %v2647_v1 = vsel %vm1695_vm6, %v6004_v59, -inf  ;;  %v3003_v50 = vsel %vm1689_vm4, %v3001_v11, %v2987_v25 }
 0xd01   : > { %2648 = vmax.xlane.f32.xlu0 %v2647_v1 }
 0xd02   : > { %v2996_v53 = vpop.xlane.xlu1 %2995 }
 0xd03   : > { %v6013_v48 = vsel %vm1692_vm5, %v3002_v61, %v2996_v53  ;;  %v2999_v10 = vpop.xlane.xlu0 %2998 }
 0xd04   : > { %v6016_v47 = vsel %vm1692_vm5, %v3003_v50, %v2999_v10  ;;  %v3006_v16 = vsel %vm1695_vm6, %v6013_v48, -inf }
 0xd05   : > { %3007 = vmax.xlane.f32.xlu1 %v3006_v16  ;;  %v3009_v31 = vsel %vm1695_vm6, %v6016_v47, -inf }
 0xd06   : > { %3010 = vmax.xlane.f32.xlu0 %v3009_v31 }
 0xd33   : > { %v2412_v17 = vpop.xlane.xlu1 %2411 }
 0xd34   : > { %v2416_v14 = vsub.f32 %v5913_v34, %v2412_v17  ;;  %v2288_v17 = vsub.f32 %v5705_v5, %v5838_v15 }
 0xd36   : > { %v2418_v20 = vmul.f32 1.442695, %v2416_v14 }
 0xd37   : > { %v2490_v33 = vpop.xlane.xlu0 %2489 }
 0xd38   : > { %4186 = vpow2.f32 %v2418_v20  ;;  %v2494_v4 = vsub.f32 %v5920_v22, %v2490_v33 }
 0xd3a   : > { %v2496_v7 = vmul.f32 1.442695, %v2494_v4  ;;  %v2290_v4 = vmul.f32 1.442695, %v2288_v17 }
 0xd3c   : > { %4188 = vpow2.f32 %v2496_v7 }
 0xd42   : > { %v6024_v39 = vpop.eup %4186 }
 0xd43   : > { %v2422_v40 = vsel %vm1695_vm6, %v6024_v39, 0.0 }
 0xd44   : > { %2423 = vadd.xlane.f32.xlu1 %v2422_v40 }
 0xd46   : > { %v6028_v23 = vpop.eup %4188 }
 0xd47   : > { %v2500_v42 = vsel %vm1695_vm6, %v6028_v23, 0.0 }
 0xd48   : > { %2501 = vadd.xlane.f32.xlu0 %v2500_v42 }
 0xd4a   : > { %v2415_v34 = vpop.xlane.xlu1 %2414 }
 0xd4b   : > { %v2417_v43 = vsub.f32 %v5929_v26, %v2415_v34  ;;  %v2493_v21 = vpop.xlane.xlu0 %2492 }
 0xd4c   : > { %v2495_v22 = vsub.f32 %v5932_v37, %v2493_v21 }
 0xd4d   : > { %v2420_v56 = vmul.f32 1.442695, %v2417_v43 }
 0xd4e   : > { %v2498_v52 = vmul.f32 1.442695, %v2495_v22 }
 0xd4f   : > { %4190 = vpow2.f32 %v2420_v56 }
 0xd50   : > { %4192 = vpow2.f32 %v2498_v52 }
 0xd56   : > { %v2774_v54 = vpop.xlane.xlu1 %2773 }
 0xd57   : > { %v2778_v25 = vsub.f32 %v5941_v29, %v2774_v54 }
 0xd59   : > { %v6035_v1 = vpop.eup %4190  ;;  %v2780_v0 = vmul.f32 1.442695, %v2778_v25 }
 0xd5a   : > { %v6037_v11 = vpop.eup %4192  ;;  %v2852_v61 = vpop.xlane.xlu0 %2851  ;;  %v2425_v53 = vsel %vm1695_vm6, %v6035_v1, 0.0 }
 0xd5b   : > { %4194 = vpow2.f32 %v2780_v0  ;;  %v2856_v26 = vsub.f32 %v5948_v2, %v2852_v61  ;;  %2426 = vadd.xlane.f32.xlu1 %v2425_v53  ;;  %v2503_v37 = vsel %vm1695_vm6, %v6037_v11, 0.0 }
 0xd5c   : > { %2504 = vadd.xlane.f32.xlu0 %v2503_v37 }
 0xd5d   : > { %v2858_v50 = vmul.f32 1.442695, %v2856_v26 }
 0xd5f   : > { %4196 = vpow2.f32 %v2858_v50 }
 0xd62   : > { %v2568_v29 = vpop.xlane.xlu1 %2567 }
 0xd63   : > { %v2572_v10 = vsub.f32 %v5955_v60, %v2568_v29 }
 0xd65   : > { %v6045_v16 = vpop.eup %4194  ;;  %v2574_v31 = vmul.f32 1.442695, %v2572_v10 }
 0xd66   : > { %v2784_v14 = vsel %vm1695_vm6, %v6045_v16, 0.0 }
 0xd67   : > { %4198 = vpow2.f32 %v2574_v31  ;;  %v2777_v2 = vpop.xlane.xlu0 %2776  ;;  %2785 = vadd.xlane.f32.xlu1 %v2784_v14 }
 0xd68   : > { %v2779_v20 = vsub.f32 %v5962_v36, %v2777_v2  ;;  %v2289_v36 = vsub.f32 %v5708_v13, %v5840_v18 }
 0xd69   : > { %v6052_v33 = vpop.eup %4196 }
 0xd6a   : > { %v2782_v7 = vmul.f32 1.442695, %v2779_v20  ;;  %v2855_v40 = vpop.xlane.xlu1 %2854  ;;  %v2862_v60 = vsel %vm1695_vm6, %v6052_v33, 0.0  ;;  %v2292_v22 = vmul.f32 1.442695, %v2289_v36 }
 0xd6b   : > { %v2857_v42 = vsub.f32 %v5969_v49, %v2855_v40  ;;  %2863 = vadd.xlane.f32.xlu0 %v2862_v60 }
 0xd6c   : > { %4200 = vpow2.f32 %v2782_v7 }
 0xd6d   : > { %v2860_v5 = vmul.f32 1.442695, %v2857_v42  ;;  %4202 = vpow2.f32 %v2290_v4 }
 0xd6f   : > { %4204 = vpow2.f32 %v2860_v5 }
 0xd71   : > { %v6057_v15 = vpop.eup %4198 }
 0xd72   : > { %v2571_v34 = vpop.xlane.xlu0 %2570  ;;  %v2578_v43 = vsel %vm1695_vm6, %v6057_v15, 0.0 }
 0xd73   : > { %v2573_v21 = vsub.f32 %v5976_v24, %v2571_v34  ;;  %2579 = vadd.xlane.f32.xlu1 %v2578_v43 }
 0xd75   : > { %v2576_v56 = vmul.f32 1.442695, %v2573_v21 }
 0xd76   : > { %v6064_v49 = vpop.eup %4200 }
 0xd77   : > { %4206 = vpow2.f32 %v2576_v56  ;;  %v2787_v52 = vsel %vm1695_vm6, %v6064_v49, 0.0  ;;  %v6068_v54 = vpop.eup %4202 }
 0xd78   : > { %2788 = vadd.xlane.f32.xlu0 %v2787_v52  ;;  %4208 = vpow2.f32 %v2292_v22  ;;  %v2294_v24 = vsel %vm1695_vm6, %v6068_v54, 0.0 }
 0xd79   : > { %v6070_v25 = vpop.eup %4204 }
 0xd7a   : > { %v2865_v13 = vsel %vm1695_vm6, %v6070_v25, 0.0 }
 0xd7b   : > { %v2930_v18 = vpop.xlane.xlu1 %2929  ;;  %2866 = vadd.xlane.f32.xlu1 %v2865_v13 }
 0xd7c   : > { %v2934_v0 = vsub.f32 %v5983_v46, %v2930_v18  ;;  %2295 = vadd.xlane.f32.xlu0 %v2294_v24 }
 0xd7e   : > { %v2936_v61 = vmul.f32 1.442695, %v2934_v0 }
 0xd80   : > { %4210 = vpow2.f32 %v2936_v61 }
 0xd81   : > { %v6077_v53 = vpop.eup %4206 }
 0xd82   : > { %v2581_v26 = vsel %vm1695_vm6, %v6077_v53, 0.0  ;;  %v6081_v37 = vpop.eup %4208 }
 0xd83   : > { %v2646_v50 = vpop.xlane.xlu0 %2645  ;;  %2582 = vadd.xlane.f32.xlu1 %v2581_v26  ;;  %v2297_v17 = vsel %vm1695_vm6, %v6081_v37, 0.0 }
 0xd84   : > { %v2650_v29 = vsub.f32 %v5990_v57, %v2646_v50 }
 0xd86   : > { %v2652_v10 = vmul.f32 1.442695, %v2650_v29  ;;  %v2933_v31 = vpop.xlane.xlu1 %2932 }
 0xd87   : > { %v2935_v46 = vsub.f32 %v5997_v41, %v2933_v31  ;;  %2298 = vadd.xlane.f32.xlu1 %v2297_v17 }
 0xd88   : > { %4212 = vpow2.f32 %v2652_v10 }
 0xd89   : > { %v2938_v14 = vmul.f32 1.442695, %v2935_v46 }
 0xd8a   : > { %v6087_v2 = vpop.eup %4210 }
 0xd8b   : > { %4214 = vpow2.f32 %v2938_v14  ;;  %v2940_v20 = vsel %vm1695_vm6, %v6087_v2, 0.0 }
 0xd8c   : > { %2941 = vadd.xlane.f32.xlu0 %v2940_v20 }
 0xd8e   : > { %v2649_v4 = vpop.xlane.xlu0 %2648 }
 0xd8f   : > { %v2651_v57 = vsub.f32 %v6004_v59, %v2649_v4 }
 0xd91   : > { %v2654_v7 = vmul.f32 1.442695, %v2651_v57 }
 0xd92   : > { %v6092_v40 = vpop.eup %4212  ;;  %v3008_v60 = vpop.xlane.xlu1 %3007 }
 0xd93   : > { %4216 = vpow2.f32 %v2654_v7  ;;  %v3012_v41 = vsub.f32 %v6013_v48, %v3008_v60  ;;  %v3011_v42 = vpop.xlane.xlu0 %3010  ;;  %v2656_v5 = vsel %vm1695_vm6, %v6092_v40, 0.0 }
 0xd94   : > { %v3013_v36 = vsub.f32 %v6016_v47, %v3011_v42  ;;  %2657 = vadd.xlane.f32.xlu0 %v2656_v5 }
 0xd95   : > { %v6098_v34 = vpop.eup %4214  ;;  %v3014_v43 = vmul.f32 1.442695, %v3012_v41 }
 0xd96   : > { %v3016_v21 = vmul.f32 1.442695, %v3013_v36  ;;  %v2943_v59 = vsel %vm1695_vm6, %v6098_v34, 0.0 }
 0xd97   : > { %4218 = vpow2.f32 %v3014_v43  ;;  %2944 = vadd.xlane.f32.xlu1 %v2943_v59 }
 0xd98   : > { %4220 = vpow2.f32 %v3016_v21 }
 0xd99   : > { %4222 = vrcp.f32 %v5630_v3 }
 0xd9a   : > { %4224 = vrcp.f32 %v5626_v35 }
 0xd9b   : > { %4226 = vrcp.f32 %v5676_v8 }
 0xd9d   : > { %v6102_v22 = vpop.eup %4216 }
 0xd9e   : > { %v2659_v48 = vsel %vm1695_vm6, %v6102_v22, 0.0 }
 0xd9f   : > { %2660 = vadd.xlane.f32.xlu0 %v2659_v48 }
 0xda1   : > { %v6106_v56 = vpop.eup %4218 }
 0xda2   : > { %v6108_v47 = vpop.eup %4220  ;;  %v3018_v52 = vsel %vm1695_vm6, %v6106_v56, 0.0 }
 0xda3   : > { %3019 = vadd.xlane.f32.xlu1 %v3018_v52  ;;  %v3021_v13 = vsel %vm1695_vm6, %v6108_v47, 0.0  ;;  %v4223_v17 = vpop.eup %4222 }
 0xda4   : > { %3022 = vadd.xlane.f32.xlu0 %v3021_v13  ;;  %v2130_v3 = vmul.f32 %v4223_v17, %v5595_v32 }
 0xdb4   : > { %1916 = vperm.xlu1 %4126, %v5611_v28   ;;  %v4225_v28 = vpop.eup %4224 }
 0xdb5   : > { %v4227_v14 = vpop.eup %4226  ;;  %v2044_v8 = vmul.f32 %v4225_v28, %v5583_v38 }
 0xdb6   : > { %v2216_v20 = vmul.f32 %v4227_v14, %v5664_v63 }
 0xdb7   : > { %v2132_v4 = vadd.f32 %v2130_v3, %v2044_v8 }
 0xdb9   : > { %v2218_v60 = vadd.f32 %v2216_v20, %v2132_v4 }
 0xdd1   : > { %v2424_v24 = vpop.xlane.xlu1 %2423 }
 0xdd5   : > { %v2502_v18 = vpop.xlane.xlu0 %2501 }
 0xde8   : > { %v2427_v61 = vpop.xlane.xlu1 %2426 }
 0xde9   : > { %v2505_v0 = vpop.xlane.xlu0 %2504 }
 0xdf4   : > { %v2786_v50 = vpop.xlane.xlu1 %2785 }
 0xdf8   : > { %v2864_v26 = vpop.xlane.xlu0 %2863 }
 0xe00   : > { %v2580_v10 = vpop.xlane.xlu1 %2579 }
 0xe05   : > { %v6118_v29 = vpop.xlane.xlu0 %2788 }
 0xe08   : > { %v6120_v46 = vpop.xlane.xlu1 %2866 }
 0xe09   : > { %v2296_v31 = vpop.xlane.xlu0 %2295 }
 0xe0a   : > { %4228 = vrcp.f32 %v2296_v31 }
 0xe0b   : > { %4230 = vrcp.f32 %v5632_v45 }
 0xe0c   : > { %4232 = vrcp.f32 %v5628_v44 }
 0xe0d   : > { %4234 = vrcp.f32 %v5678_v9 }
 0xe10   : > { %v2583_v35 = vpop.xlane.xlu1 %2582 }
 0xe14   : > { %v4229_v57 = vpop.eup %4228  ;;  %v2299_v7 = vpop.xlane.xlu1 %2298 }
 0xe15   : > { %4236 = vrcp.f32 %v2299_v7  ;;  %v2302_v41 = vmul.f32 %v4229_v57, %v6068_v54  ;;  %v4231_v45 = vpop.eup %4230  ;;  %v6413_v7 = vld [vmem:[#allocation35_spill] sm:$0xff] }
 0xe16   : > { %v4233_v5 = vpop.eup %4232  ;;  %v2131_v32 = vmul.f32 %v4231_v45, %v5589_v55  ;;  %4238 = vrcp.f32 %v2502_v18 }
 0xe17   : > { %v2304_v42 = vadd.f32 %v2302_v41, %v2218_v60  ;;  %v4235_v44 = vpop.eup %4234  ;;  %4240 = vrcp.f32 %v2424_v24  ;;  %v2045_v38 = vmul.f32 %v4233_v5, %v5587_v27  ;;  %v6414_v5 = vld [vmem:[#allocation31_spill] sm:$0xff] }
 0xe18   : > { %4242 = vrcp.f32 %v2580_v10  ;;  %v2217_v63 = vmul.f32 %v4235_v44, %v5666_v19  ;;  %v1946_v44 = vmul.f32 %v5644_v30, %v6414_v5 }
 0xe19   : > { %v6129_v36 = vmul.f32 0.25, %v2304_v42  ;;  %v2942_v9 = vpop.xlane.xlu0 %2941  ;;  %v2133_v54 = vadd.f32 %v2131_v32, %v2045_v38 }
 0xe1b   : > { %2321 = vperm.xlu0 %4127, %v6129_v36   ;;  %2310 = vperm.xlu1 %4126, %v6129_v36   ;;  %v2219_v21 = vadd.f32 %v2217_v63, %v2133_v54 }
 0xe1f   : > { %v4237_v43 = vpop.eup %4236  ;;  %4128 = vset.pattern.permute.xlu0 %v6402_v62 }
 0xe20   : > { %1921 = vperm.xlu0 %4128, %v5616_v12   ;;  %v2303_v55 = vmul.f32 %v4237_v43, %v6081_v37  ;;  %v4239_v52 = vpop.eup %4238  ;;  %v6411_v37 = vmov 1  }
 0xe21   : > { %v2658_v59 = vpop.xlane.xlu0 %2657  ;;  %v4241_v27 = vpop.eup %4240  ;;  %v2508_v19 = vmul.f32 %v4239_v52, %v6028_v23 }
 0xe22   : > { %4244 = vrcp.f32 %v2658_v59  ;;  %v2305_v48 = vadd.f32 %v2303_v55, %v2219_v21  ;;  %v4243_v18 = vpop.eup %4242  ;;  %v2430_v12 = vmul.f32 %v4241_v27, %v6024_v39 }
 0xe23   : > { %4246 = vrcp.f32 %v2427_v61  ;;  %v2586_v24 = vmul.f32 %v4243_v18, %v6057_v15 }
 0xe24   : > { %v6139_v13 = vmul.f32 0.25, %v2305_v48  ;;  %4248 = vrcp.f32 %v2505_v0  ;;  %v2510_v10 = vadd.f32 %v2508_v19, %v2430_v12  ;;  %v2945_v61 = vpop.xlane.xlu1 %2944 }
 0xe25   : > { %4250 = vrcp.f32 %v2864_v26 }
 0xe26   : > { %2315 = vperm.xlu1 %4126, %v6139_v13   ;;  %4252 = vrcp.f32 %v2583_v35  ;;  %v2588_v28 = vadd.f32 %v2586_v24, %v2510_v10 }
 0xe27   : > { %4254 = vrcp.f32 %v2786_v50 }
 0xe28   : > { %4256 = vrcp.f32 %v2942_v9 }
 0xe2a   : > { %4129 = vset.pattern.permute.xlu1 %v6411_v37 }
 0xe2b   : > { %2325 = vperm.xlu1 %4129, %v6139_v13  }
 0xe2c   : > { %v4245_v31 = vpop.eup %4244  ;;  %v2661_v17 = vpop.xlane.xlu0 %2660 }
 0xe2d   : > { %4258 = vrcp.f32 %v2661_v17  ;;  %v2664_v23 = vmul.f32 %v4245_v31, %v6092_v40  ;;  %v4247_v15 = vpop.eup %4246 }
 0xe2e   : > { %4260 = vrcp.f32 %v6118_v29  ;;  %v4249_v26 = vpop.eup %4248  ;;  %v2431_v29 = vmul.f32 %v4247_v15, %v6035_v1  ;;  %v6417_v15 = vld [vmem:[#allocation30_spill] sm:$0xff] }
 0xe2f   : > { %4130 = vset.pattern.permute.xlu1 %v6402_v62  ;;  %v2666_v39 = vadd.f32 %v2664_v23, %v2588_v28  ;;  %4262 = vrcp.f32 %v6120_v46  ;;  %v4251_v3 = vpop.eup %4250  ;;  %v2509_v8 = vmul.f32 %v4249_v26, %v6037_v11  ;;  %v6412_v46 = vld [vmem:[#allocation29_spill] sm:$0xff] }
 0xe30   : > { %v3020_v0 = vpop.xlane.xlu1 %3019  ;;  %v4253_v35 = vpop.eup %4252  ;;  %v1934_v57 = vmul.f32 %v5640_v6, %v6412_v46  ;;  %v2870_v41 = vmul.f32 %v4251_v3, %v6052_v33  ;;  %v6415_v33 = vld [vmem:[#allocation33_spill] sm:$0xff]  ;;  %v6420_v3 = vld [vmem:[#allocation32_spill] sm:$0xff] }
 0xe31   : > { %4264 = vrcp.f32 %v3020_v0  ;;  %v3023_v50 = vpop.xlane.xlu0 %3022  ;;  %v6151_v14 = vmul.f32 0.25, %v2666_v39  ;;  %v4255_v40 = vpop.eup %4254  ;;  %v2587_v45 = vmul.f32 %v4253_v35, %v6077_v53  ;;  %v2511_v6 = vadd.f32 %v2509_v8, %v2431_v29  ;;  %v6418_v0 = vld [vmem:[#allocation37_spill] sm:$0xff]  ;;  %v6421_v35 = vld [vmem:[#allocation38_spill] sm:$0xff] }
 0xe32   : > { %4266 = vrcp.f32 %v2945_v61  ;;  %v4257_v4 = vpop.eup %4256  ;;  %v2792_v1 = vmul.f32 %v4255_v40, %v6045_v16  ;;  %v1958_v53 = vmul.f32 %v5648_v58, %v6415_v33  ;;  %v1935_v26 = vmul.f32 %v6418_v0, %v6417_v15  ;;  %v6422_v8 = vld [vmem:[#allocation34_spill] sm:$0xff] }
 0xe33   : > { %2672 = vperm.xlu1 %4130, %v6151_v14   ;;  %4268 = vrcp.f32 %v3023_v50  ;;  %v2948_v11 = vmul.f32 %v4257_v4, %v6087_v2  ;;  %v2589_v43 = vadd.f32 %v2587_v45, %v2511_v6  ;;  %v6419_v50 = vld [vmem:[#allocation36_spill] sm:$0xff]  ;;  %v1947_v40 = vmul.f32 %v6421_v35, %v6420_v3 }
 0xe34   : > { %v1917_v20 = vpop.permute.xlu1 %1916  ;;  %v2872_v30 = vadd.f32 %v2870_v41, %v2792_v1 }
 0xe35   : > { %v1924_v60 = vmul.f32 %v1917_v20, %v6413_v7  ;;  %v6423_v20 = vld [vmem:[#allocation39_spill] sm:$0xff] }
 0xe36   : > { %v2950_v2 = vadd.f32 %v2948_v11, %v2872_v30  ;;  %v1959_v4 = vmul.f32 %v6423_v20, %v6422_v8 }
 0xe37   : > { %v4259_v42 = vpop.eup %4258  ;;  %v1936_v32 = vadd.f32 %v1934_v57, %v1924_v60  ;;  %4131 = vset.pattern.permute.xlu1 %v6411_v37 }
 0xe38   : > { %2683 = vperm.xlu1 %4131, %v6151_v14   ;;  %v2665_v38 = vmul.f32 %v4259_v42, %v6102_v22  ;;  %v4261_v63 = vpop.eup %4260 }
 0xe39   : > { %v1948_v9 = vadd.f32 %v1946_v44, %v1936_v32  ;;  %v4263_v54 = vpop.eup %4262  ;;  %v2793_v27 = vmul.f32 %v4261_v63, %v6064_v49 }
 0xe3a   : > { %v2667_v16 = vadd.f32 %v2665_v38, %v2589_v43  ;;  %v2871_v22 = vmul.f32 %v4263_v54, %v6070_v25  ;;  %v6416_v25 = vmov 3  }
 0xe3b   : > { %v4265_v21 = vpop.eup %4264  ;;  %v6170_v55 = vadd.f32 %v1958_v53, %v1948_v9 }
 0xe3c   : > { %v4267_v59 = vpop.eup %4266  ;;  %4132 = vset.pattern.permute.xlu1 %v6400_v51  ;;  %v3026_v48 = vmul.f32 %v4265_v21, %v6106_v56  ;;  %v2669_v19 = vmul.f32 0.25, %v2667_v16  ;;  %v2873_v24 = vadd.f32 %v2871_v22, %v2793_v27 }
 0xe3d   : > { %2333 = vperm.xlu1 %4132, %v6129_v36   ;;  %v4269_v52 = vpop.eup %4268  ;;  %v2949_v18 = vmul.f32 %v4267_v59, %v6098_v34  ;;  %v1022_v34 = vld [vmem:[%s5045_s3 + $0x8] sm:$0xff] }
 0xe3e   : > { %v3028_v58 = vadd.f32 %v3026_v48, %v2950_v2  ;;  %v3027_v10 = vmul.f32 %v4269_v52, %v6108_v47 }
 0xe3f   : > { %v2951_v56 = vadd.f32 %v2949_v18, %v2873_v24 }
 0xe40   : > { %v3030_v12 = vmul.f32 0.25, %v3028_v58 }
 0xe41   : > { %4133 = vset.pattern.permute.xlu1 %v6402_v62  ;;  %v3029_v31 = vadd.f32 %v3027_v10, %v2951_v56 }
 0xe42   : > { %2677 = vperm.xlu1 %4133, %v2669_v19   ;;  %3034 = vperm.xlu0 %4128, %v3030_v12  }
 0xe43   : > { %v3031_v49 = vmul.f32 0.25, %v3029_v31 }
 0xe46   : > { %4134 = vset.pattern.permute.xlu1 %v6411_v37  ;;  %4136 = vset.pattern.permute.xlu0 %v6400_v51 }
 0xe47   : > { %2687 = vperm.xlu1 %4134, %v2669_v19   ;;  %2695 = vperm.xlu0 %4136, %v6151_v14  }
 0xe4b   : > { %3045 = vperm.xlu1 %4134, %v3030_v12   ;;  %3061 = vperm.xlu0 %4136, %v3031_v49  }
 0xe4f   : > { %4135 = vset.pattern.permute.xlu1 %v6400_v51  ;;  %4141 = vset.pattern.permute.xlu0 %v6416_v25 }
 0xe50   : > { %2337 = vperm.xlu1 %4135, %v6139_v13   ;;  %2345 = vperm.xlu0 %4141, %v6129_v36   ;;  %v1023_v36 = vld [vmem:[%s5045_s3 + $0x10] sm:$0xff] }
 0xe54   : > { %4137 = vset.pattern.permute.xlu1 %v6402_v62  ;;  %2349 = vperm.xlu0 %4141, %v6139_v13   ;;  %v1021_v62 = vld [vmem:[%s5045_s3] sm:$0xff]  ;;  %v1024_v13 = vld [vmem:[%s5045_s3 + $0x18] sm:$0xff] }
 0xe55   : > { %3039 = vperm.xlu1 %4137, %v3031_v49   ;;  %v3991_v47 = vpack.c.bf16 %v1022_v34, %v1021_v62  ;;  %v3995_v61 = vpack.c.bf16 %v1024_v13, %v1023_v36 }
 0xe57   : > { %3992 = vmatprep.subr.bf16.mxu0 %v3991_v47 }
 0xe58   : > { %3073 = vperm.xlu0 %4141, %v3031_v49   ;;  %3994 = vmatpush3.bf16.msra.mxu0 %v3991_v47 }
 0xe59   : > { %4138 = vset.pattern.permute.xlu1 %v6411_v37  ;;  %3996 = vmatprep.subr.bf16.mxu0 %v3995_v61 }
 0xe5a   : > { %3049 = vperm.xlu1 %4138, %v3031_v49  }
 0xe5c   : > { %3998 = vmatpush3.bf16.msra.mxu0 %v3995_v61 }
 0xe5e   : > { %4139 = vset.pattern.permute.xlu1 %v6400_v51 }
 0xe5f   : > { %2699 = vperm.xlu1 %4139, %v2669_v19  }
 0xe63   : > { %3057 = vperm.xlu1 %4139, %v3030_v12  }
 0xe67   : > { %4140 = vset.pattern.permute.xlu1 %v6416_v25 }
 0xe68   : > { %2707 = vperm.xlu1 %4140, %v6151_v14  }
 0xe6c   : > { %2711 = vperm.xlu1 %4140, %v2669_v19  }
 0xe70   : > { %3069 = vperm.xlu1 %4140, %v3030_v12  }
 0xe9a   : > { %v2311_v37 = vpop.permute.xlu1 %2310  ;;  %v2322_v51 = vpop.permute.xlu0 %2321 }
 0xe9b   : > { %v2318_v17 = vmul.f32 %v2311_v37, %v6413_v7  ;;  %v2328_v28 = vmul.f32 %v2322_v51, %v6412_v46 }
 0xe9d   : > { %v2330_v23 = vadd.f32 %v2328_v28, %v2318_v17 }
 0xe9f   : > { %v1922_v39 = vpop.permute.xlu0 %1921 }
 0xea0   : > { %v1925_v14 = vmul.f32 %v1922_v39, %v6419_v50 }
 0xea2   : > { %v1937_v29 = vadd.f32 %v1935_v26, %v1925_v14 }
 0xea4   : > { %v1949_v57 = vadd.f32 %v1947_v40, %v1937_v29 }
 0xea5   : > { %v2316_v60 = vpop.permute.xlu1 %2315 }
 0xea6   : > { %v1961_v41 = vadd.f32 %v1959_v4, %v1949_v57  ;;  %v2319_v42 = vmul.f32 %v2316_v60, %v6419_v50 }
 0xeaa   : > { %v2326_v45 = vpop.permute.xlu1 %2325 }
 0xeab   : > { %v2329_v44 = vmul.f32 %v2326_v45, %v6417_v15 }
 0xead   : > { %v2331_v32 = vadd.f32 %v2329_v44, %v2319_v42 }
 0xeb2   : > { %v2673_v1 = vpop.permute.xlu1 %2672 }
 0xeb3   : > { %v2680_v6 = vmul.f32 %v2673_v1, %v6413_v7  ;;  %v3787_v1 = vld [vmem:[%s796_s2] ss:$0 sm:$0xff] }
 0xeb7   : > { %v2684_v11 = vpop.permute.xlu1 %2683 }
 0xeb8   : > { %v2690_v38 = vmul.f32 %v2684_v11, %v6412_v46 }
 0xeba   : > { %v2692_v63 = vadd.f32 %v2690_v38, %v2680_v6 }
 0xebc   : > { %v2334_v53 = vpop.permute.xlu1 %2333 }
 0xebd   : > { %v2340_v9 = vmul.f32 %v2334_v53, %v6414_v5 }
 0xebf   : > { %v2342_v54 = vadd.f32 %v2340_v9, %v2330_v23 }
 0xec1   : > { %v2678_v43 = vpop.permute.xlu1 %2677  ;;  %v3035_v30 = vpop.permute.xlu0 %3034 }
 0xec2   : > { %v2681_v16 = vmul.f32 %v2678_v43, %v6419_v50  ;;  %v3042_v18 = vmul.f32 %v3035_v30, %v6413_v7 }
 0xec6   : > { %v2688_v21 = vpop.permute.xlu1 %2687  ;;  %v2696_v59 = vpop.permute.xlu0 %2695 }
 0xec7   : > { %v2691_v2 = vmul.f32 %v2688_v21, %v6417_v15  ;;  %v2702_v48 = vmul.f32 %v2696_v59, %v6414_v5 }
 0xec9   : > { %v2693_v22 = vadd.f32 %v2691_v2, %v2681_v16  ;;  %v2704_v52 = vadd.f32 %v2702_v48, %v2692_v63 }
 0xeca   : > { %v3046_v58 = vpop.permute.xlu1 %3045  ;;  %v3062_v27 = vpop.permute.xlu0 %3061 }
 0xecb   : > { %v3052_v19 = vmul.f32 %v3046_v58, %v6412_v46  ;;  %v3065_v17 = vmul.f32 %v3062_v27, %v6420_v3  ;;  %v3223_v58 = vld [vmem:[%s5052_s11 + $0x10] sm:$0xff] }
 0xecd   : > { %v3054_v12 = vadd.f32 %v3052_v19, %v3042_v18  ;;  %v3224_v18 = vld [vmem:[%s5052_s11 + $0x18] sm:$0xff] }
 0xece   : > { %v4003_v19 = vpack.c.bf16 %v3224_v18, %v3223_v58 }
 0xecf   : > { %v2338_v24 = vpop.permute.xlu1 %2337  ;;  %v2346_v10 = vpop.permute.xlu0 %2345 }
 0xed0   : > { %v2341_v56 = vmul.f32 %v2338_v24, %v6420_v3  ;;  %v2352_v31 = vmul.f32 %v2346_v10, %v6415_v33  ;;  %v3316_v24 = vld [vmem:[%s5059_s30 + $0x8] sm:$0xff] }
 0xed2   : > { %v2343_v49 = vadd.f32 %v2341_v56, %v2331_v32  ;;  %v2354_v25 = vadd.f32 %v2352_v31, %v2342_v54 }
 0xed3   : > { %v2350_v62 = vpop.permute.xlu0 %2349 }
 0xed4   : > { %v3080_v34 = vsel %vm1655_vm2, %v6170_v55, %v2354_v25  ;;  %v3040_v47 = vpop.permute.xlu1 %3039  ;;  %v2353_v36 = vmul.f32 %v2350_v62, %v6422_v8 }
 0xed5   : > { %v3043_v61 = vmul.f32 %v3040_v47, %v6419_v50 }
 0xed6   : > { %v2355_v13 = vadd.f32 %v2353_v36, %v2343_v49 }
 0xed7   : > { %v3074_v51 = vpop.permute.xlu0 %3073 }
 0xed8   : > { %v3081_v7 = vsel %vm1655_vm2, %v1961_v41, %v2355_v13  ;;  %v3077_v23 = vmul.f32 %v3074_v51, %v6422_v8 }
 0xed9   : > { %v3050_v46 = vpop.permute.xlu1 %3049 }
 0xeda   : > { %v3053_v37 = vmul.f32 %v3050_v46, %v6417_v15 }
 0xedc   : > { %v3055_v28 = vadd.f32 %v3053_v37, %v3043_v61  ;;  %v3791_v61 = vld [vmem:[%s994_s6] ss:$0 sm:$0xff] }
 0xede   : > { %v3067_v39 = vadd.f32 %v3065_v17, %v3055_v28  ;;  %v2700_v0 = vpop.permute.xlu1 %2699 }
 0xedf   : > { %v2703_v55 = vmul.f32 %v2700_v0, %v6420_v3 }
 0xee0   : > { %v3079_v26 = vadd.f32 %v3077_v23, %v3067_v39  ;;  %v3317_v23 = vld [vmem:[%s5059_s30 + $0x10] sm:$0xff]  ;;  %v3318_v39 = vld [vmem:[%s5059_s30 + $0x18] sm:$0xff] }
 0xee1   : > { %v2705_v14 = vadd.f32 %v2703_v55, %v2693_v22  ;;  %v3221_v22 = vld [vmem:[%s5052_s11] sm:$0xff]  ;;  %v4011_v0 = vpack.c.bf16 %v3318_v39, %v3317_v23  ;;  %v3792_v55 = vld [vmem:[%s813_s23] ss:$0 sm:$0xff] }
 0xee2   : > { %v3058_v35 = vpop.permute.xlu1 %3057 }
 0xee3   : > { %v3064_v40 = vmul.f32 %v3058_v35, %v6414_v5 }
 0xee5   : > { %v3066_v29 = vadd.f32 %v3064_v40, %v3054_v12  ;;  %v3315_v12 = vld [vmem:[%s5059_s30] sm:$0xff] }
 0xee6   : > { %v4007_v10 = vpack.c.bf16 %v3316_v24, %v3315_v12 }
 0xee7   : > { %v2708_v20 = vpop.permute.xlu1 %2707 }
 0xee8   : > { %v2714_v50 = vmul.f32 %v2708_v20, %v6415_v33  ;;  %4008 = vmatprep.subr.bf16.mxu0 %v4007_v10 }
 0xeea   : > { %v2716_v15 = vadd.f32 %v2714_v50, %v2704_v52  ;;  %v3222_v52 = vld [vmem:[%s5052_s11 + $0x8] sm:$0xff]  ;;  %s6424_s11 = sld [smem:[#allocation51_spill]]  ;;  %v3795_v50 = vld [vmem:[%s830_s20] ss:$0 sm:$0xff] }
 0xeeb   : > { %v2712_v4 = vpop.permute.xlu1 %2711  ;;  %v3999_v27 = vpack.c.bf16 %v3222_v52, %v3221_v22 }
 0xeec   : > { %v2715_v57 = vmul.f32 %v2712_v4, %v6422_v8  ;;  %v3083_v60 = vsel %vm3082_vm7, %v3080_v34, %v2716_v15 }
 0xeed   : > { %4000 = vmatprep.subr.bf16.mxu1 %v3999_v27 }
 0xeee   : > { %v2717_v41 = vadd.f32 %v2715_v57, %v2705_v14  ;;  %4002 = vmatpush3.bf16.msra.mxu1 %v3999_v27 }
 0xeef   : > { %v3070_v45 = vpop.permute.xlu1 %3069  ;;  %4004 = vmatprep.subr.bf16.mxu1 %v4003_v19 }
 0xef0   : > { %v3084_v3 = vsel %vm3082_vm7, %v3081_v7, %v2717_v41  ;;  %v3076_v42 = vmul.f32 %v3070_v45, %v6415_v33  ;;  %s991_s19 = scalar_lea.vmem %s6424_s11, %s6436_s27 }
 0xef1   : > { %v3087_v44 = vsel %vm3085_vm8, %v3084_v3, %v3079_v26  ;;  %v3790_v36 = vld [vmem:[%s991_s19] ss:$0 sm:$0xff] }
 0xef2   : > { %v3078_v32 = vadd.f32 %v3076_v42, %v3066_v29  ;;  %4006 = vmatpush3.bf16.msra.mxu1 %v4003_v19 }
 0xef4   : > { %v3086_v5 = vsel %vm3085_vm8, %v3083_v60, %v3078_v32 }
 0xef5   : > { %3930 = vmatprep.mubr.msk.f32.mxu0 %vm1025_vm1, %v3086_v5 }
 0xef6   : > { %3931 = vmatmul.mubr.msk.f32.vlgmr.msra.gmra.mrb[6].mxu0 %vm1025_vm1, %v3087_v44 }
 0xef7   : > { %4010 = vmatpush3.bf16.msra.mxu0 %v4007_v10 }
 0xef8   : > { %4012 = vmatprep.subr.bf16.mxu0 %v4011_v0 }
 0xefb   : > { %4014 = vmatpush3.bf16.msra.mxu0 %v4011_v0 }
 0xfc9   : > { %v3932_v11 = vpop.f32.mrb[6].mxu0 }
 0xfca   : > { %v3173_v6 = vadd.f32 %v3932_v11, %v3787_v1  ;;  %v3167_v38 = vpop.f32.mrb[7].mxu0 }
 0xfcb   : > { %v3168_v8 = vadd.f32 %v3787_v1, %v3167_v38 }
 0xfcc   : > { %v3181_v63 = vsel %vm1025_vm1, %v3173_v6, 0.0 }
 0xfcd   : > { %3182 = vadd.xlane.f32.xlu0 %v3181_v63  ;;  %v3178_v33 = vsel %vm1025_vm1, %v3168_v8, 0.0 }
 0xfce   : > { %3179 = vadd.xlane.f32.xlu1 %v3178_v33 }
0x105a   : > { %v3183_v53 = vpop.xlane.xlu0 %3182 }
0x105b   : > { %v3186_v9 = vmul.f32 0.03125, %v3183_v53  ;;  %v3180_v54 = vpop.xlane.xlu1 %3179 }
0x105c   : > { %v3185_v43 = vmul.f32 0.03125, %v3180_v54 }
0x105d   : > { %v3188_v30 = vsub.f32 %v3173_v6, %v3186_v9 }
0x105e   : > { %v3187_v21 = vsub.f32 %v3168_v8, %v3185_v43 }
0x105f   : > { %v3190_v59 = vmul.f32 %v3188_v30, %v3188_v30 }
0x1060   : > { %v3189_v16 = vmul.f32 %v3187_v21, %v3187_v21 }
0x1061   : > { %v3194_v2 = vsel %vm1025_vm1, %v3190_v59, 0.0 }
0x1062   : > { %3195 = vadd.xlane.f32.xlu0 %v3194_v2  ;;  %v3191_v48 = vsel %vm1025_vm1, %v3189_v16, 0.0 }
0x1063   : > { %3192 = vadd.xlane.f32.xlu1 %v3191_v48 }
0x10ef   : > { %v3196_v56 = vpop.xlane.xlu0 %3195 }
0x10f0   : > { %v3198_v31 = vmul.f32 0.03125, %v3196_v56  ;;  %v3193_v49 = vpop.xlane.xlu1 %3192 }
0x10f1   : > { %v3197_v25 = vmul.f32 0.03125, %v3193_v49 }
0x10f2   : > { %v3200_v62 = vadd.f32 1e-05, %v3198_v31 }
0x10f3   : > { %v3199_v34 = vadd.f32 1e-05, %v3197_v25 }
0x10f4   : > { %4270 = vrsqrt.f32 %v3200_v62 }
0x10f5   : > { %4272 = vrsqrt.f32 %v3199_v34 }
0x10fe   : > { %v4271_v47 = vpop.eup %4270 }
0x10ff   : > { %v4273_v13 = vpop.eup %4272  ;;  %v3204_v7 = vmul.f32 %v4271_v47, %v3188_v30 }
0x1100   : > { %v3203_v46 = vmul.f32 %v4273_v13, %v3187_v21 }
0x1101   : > { %v3212_v37 = vmul.f32 %v3790_v36, %v3204_v7 }
0x1102   : > { %v3211_v51 = vmul.f32 %v3790_v36, %v3203_v46 }
0x1103   : > { %v3220_v28 = vadd.f32 %v3791_v61, %v3212_v37 }
0x1104   : > { %v3219_v17 = vadd.f32 %v3791_v61, %v3211_v51 }
0x1106   : > { %3941 = vmatprep.mubr.msk.f32.mxu1 %vm1025_vm1, %v3219_v17 }
0x1107   : > { %3942 = vmatmul.mubr.msk.f32.vlgmr.msra.gmra.mrb[6].mxu1 %vm1025_vm1, %v3220_v28 }
0x11da   : > { %v3943_v26 = vpop.f32.mrb[6].mxu1 }
0x11db   : > { %v3310_v14 = vadd.f32 %v3943_v26, %v3792_v55  ;;  %v3304_v35 = vpop.f32.mrb[7].mxu1 }
0x11dc   : > { %v3305_v40 = vadd.f32 %v3792_v55, %v3304_v35 }
0x11dd   : > { %v3314_v20 = vmax.f32 %v3310_v14, 0.0 }
0x11de   : > { %v3313_v29 = vmax.f32 %v3305_v40, 0.0 }
0x11e0   : > { %3952 = vmatprep.mubr.msk.f32.mxu0 %vm1025_vm1, %v3313_v29 }
0x11e1   : > { %3953 = vmatmul.mubr.msk.f32.vlgmr.msra.gmra.mrb[8].mxu0 %vm1025_vm1, %v3314_v20 }
0x12b4   : > { %v3954_v15 = vpop.f32.mrb[8].mxu0 }
0x12b5   : > { %v3404_v4 = vadd.f32 %v3954_v15, %v3795_v50  ;;  %v3398_v57 = vpop.f32.mrb[9].mxu0 }
0x12b6   : > { %v3399_v60 = vadd.f32 %v3795_v50, %v3398_v57 }
0x12b7   : > { %3408 = vst.msk [vmem:[%s1003_s8 + $0x8] sm:$0xff] %vm1025_vm1, %v3404_v4 }
0x12b8   : > { %3407 = vst.msk [vmem:[%s1003_s8] sm:$0xff] %vm1025_vm1, %v3399_v60 }
0x12b9 PF: > { %s42_s29 = sadd.s32 1, %s4580_s29   ;;  %s6427_s12 = sld [smem:[#allocation20_spill]] }
0x12ba   : > { %p39_p9 = scmp.ge.s32.totalorder %s42_s29, 6   ;;  %s6428_s26 = sld [smem:[#allocation23_spill]] }
0x12bb   : > { %s6429_s27 = sld [smem:[#allocation21_spill]]  ;;  %s6430_s28 = sld [smem:[#allocation22_spill]] }
0x12bc   : > { %s6431_s24 = smov %s4564_s25  ;;  %41 = sbr.rel (!%p39_p9) target bundleno = 28 (0x1c), region = 240 }
0x12bf   : > { %s6432_s25 = smov %s6427_s12 }
0x12c3   :  { %3439 = vsyncpa [#allocation3], 1 }
0x12c4   :  { %3441 = vsyncpa [#allocation3 + $0x1], 1 }
0x12c5   :  { %3442 = vsyncpa [#allocation5], 1 }
0x12c6   :  { %3444 = vsyncpa [#allocation5 + $0x1], 1 }
0x12c7   :  { %3445 = vsyncpa [#allocation8], 1 }
0x12c8   :  { %3447 = vsyncpa [#allocation8 + $0x1], 1 }
0x12c9   :  { %3448 = vsyncpa [#allocation11], 1 }
0x12ca   :  { %3450 = vsyncpa [#allocation11 + $0x1], 1 }
0x12cb   :  { %3451 = vsyncpa [#allocation14], 1 }
0x12cc   :  { %3453 = vsyncpa [#allocation14 + $0x1], 1 }

// kernel: multi_trend_forward.3
= control target key start
LH: loop header
LB: loop body
LE: loop exit
PB: predicated region body
PF: predicated region fallthrough
CT: control target
= control target key end

     0   :  { %s6132_s0 = inlined_call_operand.vmem [shape: f32[4,16,32], index: 0, kind: input, shape index: {}]   ;;  %s6133_s1 = inlined_call_operand.vmem [shape: f32[32,32], index: 1, kind: input, shape index: {}]   ;;  %s6134_s2 = inlined_call_operand.vmem [shape: f32[32,32], index: 2, kind: input, shape index: {}]   ;;  %s6135_s3 = inlined_call_operand.vmem [shape: f32[32,32], index: 3, kind: input, shape index: {}]   ;;  %s6136_s4 = inlined_call_operand.vmem [shape: f32[1,32], index: 4, kind: input, shape index: {}]   ;;  %s6137_s5 = inlined_call_operand.vmem [shape: f32[1,32], index: 5, kind: input, shape index: {}]   ;;  %s6138_s6 = inlined_call_operand.vmem [shape: f32[1,32], index: 6, kind: input, shape index: {}]   ;;  %s6139_s7 = inlined_call_operand.vmem [shape: f32[32,32], index: 7, kind: input, shape index: {}]   ;;  %s6140_s8 = inlined_call_operand.vmem [shape: f32[1,32], index: 8, kind: input, shape index: {}]   ;;  %s6141_s9 = inlined_call_operand.vmem [shape: f32[1,32], index: 9, kind: input, shape index: {}]   ;;  %s6142_s10 = inlined_call_operand.vmem [shape: f32[1,32], index: 10, kind: input, shape index: {}]   ;;  %s6143_s11 = inlined_call_operand.vmem [shape: f32[32,32], index: 11, kind: input, shape index: {}]   ;;  %s6144_s12 = inlined_call_operand.vmem [shape: f32[32,32], index: 12, kind: input, shape index: {}]   ;;  %s6145_s13 = inlined_call_operand.vmem [shape: f32[32,32], index: 13, kind: input, shape index: {}]   ;;  %s6146_s14 = inlined_call_operand.vmem [shape: f32[1,32], index: 14, kind: input, shape index: {}]   ;;  %s6147_s15 = inlined_call_operand.vmem [shape: f32[1,32], index: 15, kind: input, shape index: {}]   ;;  %s6148_s16 = inlined_call_operand.vmem [shape: f32[1,32], index: 16, kind: input, shape index: {}]   ;;  %s6149_s17 = inlined_call_operand.vmem [shape: f32[32,32], index: 17, kind: input, shape index: {}]   ;;  %s6150_s18 = inlined_call_operand.vmem [shape: f32[1,32], index: 18, kind: input, shape index: {}]   ;;  %s6151_s19 = inlined_call_operand.vmem [shape: f32[1,32], index: 19, kind: input, shape index: {}]   ;;  %s6152_s20 = inlined_call_operand.vmem [shape: f32[1,32], index: 20, kind: input, shape index: {}]   ;;  %s6153_s21 = inlined_call_operand.vmem [shape: f32[32,32], index: 21, kind: input, shape index: {}]   ;;  %s6154_s22 = inlined_call_operand.vmem [shape: f32[1,32], index: 22, kind: input, shape index: {}]   ;;  %s6155_s23 = inlined_call_operand.vmem [shape: f32[32,32], index: 23, kind: input, shape index: {}]   ;;  %s6156_s24 = inlined_call_operand.vmem [shape: f32[1,32], index: 24, kind: input, shape index: {}]   ;;  %s6157_s25 = inlined_call_operand.hbm [shape: f32[16,32], index: 25, kind: output, shape index: {}]  }
   0x1   :  { %6165 = sst [smem:[#allocation5_spill]] %s6132_s0 }
   0x2   :  { %6166 = sst [smem:[#allocation6_spill]] %s6133_s1 }
   0x3   :  { %6167 = sst [smem:[#allocation7_spill]] %s6134_s2 }
   0x4   :  { %6168 = sst [smem:[#allocation8_spill]] %s6135_s3 }
   0x5   :  { %6169 = sst [smem:[#allocation9_spill]] %s6136_s4 }
   0x6   :  { %6170 = sst [smem:[#allocation10_spill]] %s6137_s5 }
   0x7   :  { %6171 = sst [smem:[#allocation11_spill]] %s6138_s6 }
   0x8   :  { %6172 = sst [smem:[#allocation12_spill]] %s6139_s7 }
   0x9   :  { %6173 = sst [smem:[#allocation13_spill]] %s6140_s8 }
   0xa   :  { %6174 = sst [smem:[#allocation14_spill]] %s6141_s9 }
   0xb   :  { %s6175_s6 = sld [smem:[#allocation6_spill]]  ;;  %vm118_vm0 = vcmask 261120   ;;  %s6176_s28 = sld [smem:[#allocation5_spill]] }
   0xc   :  { %s6177_s0 = sld [smem:[#allocation7_spill]] }
  0x11   :  { %v92_v0 = vld [vmem:[%s6175_s6] sm:$0xff]  ;;  %v93_v1 = vld [vmem:[%s6175_s6 + $0x8] sm:$0xff]  ;;  %v94_v2 = vld [vmem:[%s6175_s6 + $0x10] sm:$0xff] }
  0x12   :  { %v4881_v3 = vpack.c.bf16 %v93_v1, %v92_v0  ;;  %v95_v4 = vld [vmem:[%s6175_s6 + $0x18] sm:$0xff]  ;;  %v5488_v5 = vld [vmem:[%s6176_s28] sm:$0xff]  ;;  %v97_v8 = vld [vmem:[%s6177_s0 + $0x8] sm:$0xff] }
  0x13   :  { %v96_v6 = vld [vmem:[%s6177_s0] sm:$0xff]  ;;  %v4885_v7 = vpack.c.bf16 %v95_v4, %v94_v2  ;;  %4511 = vmatprep.mubr.msk.f32.mxu0 %vm118_vm0, %v5488_v5  ;;  %v98_v9 = vld [vmem:[%s6177_s0 + $0x10] sm:$0xff]  ;;  %v99_v11 = vld [vmem:[%s6177_s0 + $0x18] sm:$0xff] }
  0x14   :  { %4882 = vmatprep.subr.bf16.mxu0 %v4881_v3  ;;  %v4889_v10 = vpack.c.bf16 %v97_v8, %v96_v6  ;;  %v4211_v12 = vld [vmem:[%s6176_s28 + $0x10] sm:$0xff]  ;;  %v4893_v13 = vpack.c.bf16 %v99_v11, %v98_v9 }
  0x15   :  { %4884 = vmatpush3.bf16.msra.mxu0 %v4881_v3  ;;  %4522 = vmatprep.mubr.msk.f32.mxu1 %vm118_vm0, %v4211_v12 }
  0x16   :  { %30 = vsyncpa [#allocation3], 0  ;;  %4886 = vmatprep.subr.bf16.mxu0 %v4885_v7  ;;  %4890 = vmatprep.subr.bf16.mxu1 %v4889_v10  ;;  %v5511_v14 = vld [vmem:[%s6176_s28 + $0x8] sm:$0xff]  ;;  %v4213_v15 = vld [vmem:[%s6176_s28 + $0x20] sm:$0xff]  ;;  %s6178_s6 = sld [smem:[#allocation8_spill]]  ;;  %v5332_v24 = vmov 0.0|0.0  }
  0x17   :  { %4892 = vmatpush3.bf16.msra.mxu1 %v4889_v10  ;;  %v4212_v16 = vld [vmem:[%s6176_s28 + $0x18] sm:$0xff]  ;;  %v4214_v17 = vld [vmem:[%s6176_s28 + $0x28] sm:$0xff]  ;;  %vm5333_vm1 = vmmov 0   ;;  %v5334_v25 = vmov 0.0   ;;  %s6179_s0 = sld [smem:[#allocation9_spill]]  ;;  %s6180_s30 = sld [smem:[#allocation10_spill]] }
  0x18   :  { %4894 = vmatprep.subr.bf16.mxu1 %v4893_v13  ;;  %vm525_vm2 = vcmask 64512   ;;  %s5335_s7 = smov 120   ;;  %s6183_s26 = sld [smem:[#allocation11_spill]]  ;;  %vm605_vm4 = vcmask 130048   ;;  %vm1222_vm5 = vcmask 195584  }
  0x19   :  { %4888 = vmatpush3.bf16.msra.mxu0 %v4885_v7  ;;  %vm5565_vm3 = vmpackc.low %vm525_vm2, %vm525_vm2  ;;  %s5336_s1 = smov 112   ;;  %s5337_s8 = smov 104  }
  0x1a   :  { %4898 = vmatprep.subr.bf16.mxu0 %v4889_v10  ;;  %s5338_s27 = smov 16   ;;  %s6163_s4 = smov 8  }
  0x1b   :  { %4896 = vmatpush3.bf16.msra.mxu1 %v4893_v13  ;;  %s5340_s9 = smov 24   ;;  %s6184_s29 = sld [smem:[#allocation12_spill]] }
  0x1c   :  { %4512 = vmatmul.mubr.msk.f32.vlgmr.msra.gmra.mrb[0].mxu0 %vm118_vm0, %v5511_v14  ;;  %v100_v18 = vld [vmem:[%s6178_s6] sm:$0xff]  ;;  %v101_v19 = vld [vmem:[%s6178_s6 + $0x8] sm:$0xff]  ;;  %v102_v21 = vld [vmem:[%s6178_s6 + $0x10] sm:$0xff] }
  0x1d   :  { %4900 = vmatpush3.bf16.msra.mxu0 %v4889_v10  ;;  %4533 = vmatprep.mubr.msk.f32.mxu0 %vm118_vm0, %v4213_v15  ;;  %v4905_v20 = vpack.c.bf16 %v101_v19, %v100_v18  ;;  %v103_v22 = vld [vmem:[%s6178_s6 + $0x18] sm:$0xff]  ;;  %v4217_v26 = vld [vmem:[%s6179_s0] ss:$0 sm:$0xff]  ;;  %s6185_s0 = sld [smem:[#allocation13_spill]] }
  0x1e   :  { %4902 = vmatprep.subr.bf16.mxu0 %v4893_v13  ;;  %4523 = vmatmul.mubr.msk.f32.vlgmr.msra.gmra.mrb[0].mxu1 %vm118_vm0, %v4212_v16  ;;  %v4909_v23 = vpack.c.bf16 %v103_v22, %v102_v21  ;;  %v4220_v28 = vld [vmem:[%s6180_s30] ss:$0 sm:$0xff]  ;;  %s6186_s30 = sld [smem:[#allocation14_spill]] }
  0x1f   :  { %4544 = vmatprep.mubr.msk.f32.mxu1 %vm118_vm0, %v4211_v12  ;;  %4906 = vmatprep.subr.bf16.mxu1 %v4905_v20  ;;  %v4225_v46 = vld [vmem:[%s6183_s26] ss:$0 sm:$0xff] }
  0x20   :  { %4908 = vmatpush3.bf16.msra.mxu1 %v4905_v20 }
  0x21   :  { %4904 = vmatpush3.bf16.msra.mxu0 %v4893_v13  ;;  %4910 = vmatprep.subr.bf16.mxu1 %v4909_v23 }
  0x22   :  { %4914 = vmatprep.subr.bf16.mxu0 %v4905_v20 }
  0x24   :  { %4534 = vmatmul.mubr.msk.f32.vlgmr.msra.gmra.mrb[2].mxu0 %vm118_vm0, %v4214_v17  ;;  %4912 = vmatpush3.bf16.msra.mxu1 %v4909_v23 }
  0x25   :  { %4555 = vmatprep.mubr.msk.f32.mxu0 %vm118_vm0, %v4213_v15  ;;  %4916 = vmatpush3.bf16.msra.mxu0 %v4905_v20 }
  0x26   :  { %4918 = vmatprep.subr.bf16.mxu0 %v4909_v23  ;;  %4921 = vmatprep.subr.bf16.mxu1 %v5332_v24 }
  0x27   :  { %4545 = vmatmul.mubr.msk.f32.vlgmr.msra.gmra.mrb[2].mxu1 %vm118_vm0, %v4212_v16 }
  0x28   :  { %4562 = vmatprep.mubr.msk.f32.mxu1 %vm5333_vm1, %v5334_v25 }
  0x29   :  { %4920 = vmatpush3.bf16.msra.mxu0 %v4909_v23 }
  0x2a   :  { %4932 = vmatprep.subr.bf16.mxu0 %v5332_v24 }
  0x2c   :  { %4556 = vmatmul.mubr.msk.f32.vlgmr.msra.gmra.mrb[4].mxu0 %vm118_vm0, %v4214_v17 }
  0x2d   :  { %4583 = vmatprep.mubr.msk.f32.mxu0 %vm5333_vm1, %v5334_v25 }
  0xef   :  { %v4513_v27 = vpop.f32.mrb[0].mxu0 }
  0xf0   :  { %v5555_v29 = vadd.f32 %v4513_v27, %v4217_v26  ;;  %v191_v30 = vpop.f32.mrb[1].mxu0 }
  0xf1   :  { %v4524_v31 = vpop.f32.mrb[0].mxu1  ;;  %v192_v38 = vadd.f32 %v4217_v26, %v191_v30 }
  0xf2   :  { %v5557_v32 = vadd.f32 %v4524_v31, %v4220_v28  ;;  %v278_v33 = vpop.f32.mrb[1].mxu1 }
  0xf3   :  { %v279_v34 = vadd.f32 %v4220_v28, %v278_v33  ;;  %v5580_v45 = vmul.f32 0.35355338, %v192_v38 }
  0xf7   :  { %v4535_v35 = vpop.f32.mrb[2].mxu0 }
  0xf8   :  { %v5559_v36 = vadd.f32 %v4535_v35, %v4220_v28  ;;  %v359_v37 = vpop.f32.mrb[3].mxu0 }
  0xf9   :  { %v360_v39 = vadd.f32 %v4220_v28, %v359_v37 }
  0xfa   :  { %v4950_v40 = vpack.c.bf16 %v5559_v36, %v5557_v32  ;;  %v5571_v42 = vpack.i.bf16 %v5559_v36, %v5557_v32  ;;  %v4546_v47 = vpop.f32.mrb[2].mxu1 }
  0xfb   :  { %v4922_v43 = vpack.c.bf16 %v360_v39, %v279_v34  ;;  %v5573_v44 = vpack.i.bf16 %v360_v39, %v279_v34  ;;  %v5591_v49 = vadd.f32 %v4546_v47, %v4225_v46  ;;  %v440_v51 = vpop.f32.mrb[3].mxu1 }
  0xfc   :  { %v441_v53 = vadd.f32 %v4225_v46, %v440_v51 }
  0xfd   :  { %5117 = vrot.lane.b32.xlu1 %v5573_v44, %s5335_s7  ;;  %4924 = vmatpush3.bf16.xpose.msk.msra.mxu1 %vm5565_vm3, %v4922_v43 }
  0xfe   :  { %4925 = vmatprep.subr.bf16.mxu1 %v5332_v24 }
  0xff   :  { %v4557_v48 = vpop.f32.mrb[4].mxu0 }
 0x100   :  { %v5593_v50 = vadd.f32 %v4557_v48, %v4225_v46  ;;  %v515_v52 = vpop.f32.mrb[5].mxu0 }
 0x101   :  { %690 = vrot.lane.b32.xlu1 %v5580_v45, %s5335_s7  ;;  %v516_v54 = vadd.f32 %v4225_v46, %v515_v52 }
 0x102   :  { %v4954_v57 = vpack.c.bf16 %v5593_v50, %v5591_v49  ;;  %v5602_v58 = vpack.i.bf16 %v5593_v50, %v5591_v49 }
 0x103   :  { %v4926_v55 = vpack.c.bf16 %v516_v54, %v441_v53  ;;  %v5596_v56 = vpack.i.bf16 %v516_v54, %v441_v53 }
 0x104   :  { %4563 = vmatmul.mubr.msk.f32.vlgmr.msra.gmra.mrb[4].mxu1 %vm525_vm2, %v5580_v45 }
 0x105   :  { %4569 = vmatprep.mubr.msk.f32.mxu1 %vm5333_vm1, %v5334_v25  ;;  %4927 = vmatpush3.bf16.msra.mxu1 %v4926_v55 }
 0x106   :  { %4928 = vmatprep.subr.bf16.mxu1 %v5332_v24 }
 0x16f   :  { %v5118_v4 = vpop.permute.xlu1 %5117 }
 0x170   :  { %v5120_v6 = vunpack.i.h.bf16 %v5118_v4  ;;  %v5119_v7 = vunpack.i.l.bf16 %v5118_v4 }
 0x172   :  { %v4929_v10 = vpack.c.bf16 %v5120_v6, %v5119_v7 }
 0x173   :  { %v691_v11 = vpop.permute.xlu1 %690 }
 0x1d7   :  { %v601_v59 = vpop.f32.mrb[4].mxu1 }
 0x1d8   :  { %v4564_v60 = vpop.f32.mrb[5].mxu1  ;;  %v606_v61 = vsel %vm605_vm4, %v601_v59, -inf }
 0x1d9   :  { %607 = vmax.xlane.f32.xlu0 %v606_v61 }
 0x266   :  { %v608_v62 = vpop.xlane.xlu0 %607 }
 0x267   :  { %v609_v63 = vsub.f32 %v601_v59, %v608_v62 }
 0x269   :  { %v610_v0 = vmul.f32 1.442695, %v609_v63 }
 0x26b   :  { %5236 = vpow2.f32 %v610_v0 }
 0x275   :  { %v5237_v1 = vpop.eup %5236 }
 0x276   :  { %v612_v2 = vsel %vm605_vm4, %v5237_v1, 0.0 }
 0x277   :  { %613 = vadd.xlane.f32.xlu0 %v612_v2 }
 0x304   :  { %v614_v3 = vpop.xlane.xlu0 %613 }
 0x305   :  { %5238 = vrcp.f32 %v614_v3 }
 0x30f   :  { %v5239_v8 = vpop.eup %5238 }
 0x310   :  { %v616_v9 = vmul.f32 %v5239_v8, %v5237_v1 }
 0x312   :  { %4570 = vmatmul.mubr.msk.f32.vlgmr.msra.gmra.mrb[6].mxu1 %vm605_vm4, %v616_v9 }
 0x313   :  { %4931 = vmatpush3.bf16.xpose.msk.msra.mxu1 %vm5565_vm3, %v4929_v10  ;;  %4576 = vmatprep.mubr.msk.f32.mxu1 %vm5333_vm1, %v5334_v25 }
 0x314   :  { %4939 = vmatprep.subr.bf16.mxu1 %v5332_v24 }
 0x31a   :  { %4577 = vmatmul.mubr.msk.f32.vlgmr.msra.gmra.mrb[8].mxu1 %vm525_vm2, %v691_v11 }
 0x31b   :  { %4597 = vmatprep.mubr.msk.f32.mxu1 %vm5333_vm1, %v5334_v25 }
 0x3e5   :  { %v5615_v12 = vpop.f32.mrb[6].mxu1 }
 0x3e6   :  { %v4571_v13 = vpop.f32.mrb[7].mxu1 }
 0x3ed   :  { %v768_v15 = vpop.f32.mrb[8].mxu1 }
 0x3ee   :  { %v4578_v16 = vpop.f32.mrb[9].mxu1  ;;  %v772_v17 = vsel %vm605_vm4, %v768_v15, -inf }
 0x3ef   :  { %773 = vmax.xlane.f32.xlu0 %v772_v17 }
 0x405   :  { %5122 = vrot.lane.b32.xlu0 %v5596_v56, %s5335_s7 }
 0x409   :  { %5127 = vrot.lane.b32.xlu0 %v5573_v44, %s5336_s1 }
 0x40d   :  { %864 = vrot.lane.b32.xlu0 %v5580_v45, %s5336_s1 }
 0x47c   :  { %v774_v18 = vpop.xlane.xlu0 %773 }
 0x47d   :  { %v775_v19 = vsub.f32 %v768_v15, %v774_v18 }
 0x47f   :  { %v776_v20 = vmul.f32 1.442695, %v775_v19 }
 0x480   :  { %v5123_v21 = vpop.permute.xlu0 %5122 }
 0x481   :  { %5240 = vpow2.f32 %v776_v20  ;;  %v5125_v22 = vunpack.i.h.bf16 %v5123_v21  ;;  %v5124_v23 = vunpack.i.l.bf16 %v5123_v21 }
 0x483   :  { %v4933_v26 = vpack.c.bf16 %v5125_v22, %v5124_v23 }
 0x484   :  { %v5128_v35 = vpop.permute.xlu0 %5127 }
 0x485   :  { %4934 = vmatpush3.bf16.msra.mxu0 %v4933_v26  ;;  %v5130_v38 = vunpack.i.h.bf16 %v5128_v35  ;;  %v5129_v39 = vunpack.i.l.bf16 %v5128_v35 }
 0x486   :  { %4935 = vmatprep.subr.bf16.mxu0 %v5332_v24 }
 0x487   :  { %v4936_v47 = vpack.c.bf16 %v5130_v38, %v5129_v39 }
 0x48b   :  { %v5241_v27 = vpop.eup %5240 }
 0x48c   :  { %v778_v28 = vsel %vm605_vm4, %v5241_v27, 0.0 }
 0x48d   :  { %779 = vadd.xlane.f32.xlu1 %v778_v28 }
 0x49e   :  { %5132 = vrot.lane.b32.xlu1 %v5596_v56, %s5336_s1 }
 0x4a2   :  { %5137 = vrot.lane.b32.xlu1 %v5573_v44, %s5337_s8  ;;  %v865_v44 = vpop.permute.xlu0 %864 }
 0x51a   :  { %v780_v30 = vpop.xlane.xlu1 %779 }
 0x51b   :  { %5242 = vrcp.f32 %v780_v30 }
 0x51e   :  { %v5133_v31 = vpop.permute.xlu1 %5132 }
 0x51f   :  { %v5135_v33 = vunpack.i.h.bf16 %v5133_v31  ;;  %v5134_v34 = vunpack.i.l.bf16 %v5133_v31 }
 0x521   :  { %v4940_v37 = vpack.c.bf16 %v5135_v33, %v5134_v34 }
 0x522   :  { %v5138_v63 = vpop.permute.xlu1 %5137 }
 0x523   :  { %4941 = vmatpush3.bf16.msra.mxu1 %v4940_v37  ;;  %v5140_v1 = vunpack.i.h.bf16 %v5138_v63  ;;  %v5139_v2 = vunpack.i.l.bf16 %v5138_v63 }
 0x524   :  { %4942 = vmatprep.subr.bf16.mxu1 %v5332_v24 }
 0x525   :  { %v5243_v43 = vpop.eup %5242  ;;  %v4943_v6 = vpack.c.bf16 %v5140_v1, %v5139_v2 }
 0x526   :  { %v782_v46 = vmul.f32 %v5243_v43, %v5241_v27 }
 0x528   :  { %4584 = vmatmul.mubr.msk.f32.vlgmr.msra.gmra.mrb[6].mxu0 %vm605_vm4, %v782_v46 }
 0x529   :  { %4938 = vmatpush3.bf16.xpose.msk.msra.mxu0 %vm5565_vm3, %v4936_v47  ;;  %4590 = vmatprep.mubr.msk.f32.mxu0 %vm5333_vm1, %v5334_v25 }
 0x52a   :  { %4946 = vmatprep.subr.bf16.mxu0 %v5332_v24 }
 0x530   :  { %4591 = vmatmul.mubr.msk.f32.vlgmr.msra.gmra.mrb[8].mxu0 %vm525_vm2, %v865_v44 }
 0x531   :  { %4611 = vmatprep.mubr.msk.f32.mxu0 %vm5333_vm1, %v5334_v25 }
 0x5fb   :  { %v5640_v48 = vpop.f32.mrb[6].mxu0 }
 0x5fc   :  { %v4585_v51 = vpop.f32.mrb[7].mxu0 }
 0x603   :  { %v942_v52 = vpop.f32.mrb[8].mxu0 }
 0x604   :  { %v4592_v53 = vpop.f32.mrb[9].mxu0  ;;  %v946_v54 = vsel %vm605_vm4, %v942_v52, -inf }
 0x605   :  { %947 = vmax.xlane.f32.xlu0 %v946_v54 }
 0x692   :  { %v948_v55 = vpop.xlane.xlu0 %947 }
 0x693   :  { %v949_v59 = vsub.f32 %v942_v52, %v948_v55 }
 0x695   :  { %v950_v60 = vmul.f32 1.442695, %v949_v59 }
 0x697   :  { %5244 = vpow2.f32 %v950_v60 }
 0x6a1   :  { %v5245_v61 = vpop.eup %5244 }
 0x6a2   :  { %v952_v62 = vsel %vm605_vm4, %v5245_v61, 0.0 }
 0x6a3   :  { %953 = vadd.xlane.f32.xlu1 %v952_v62 }
 0x6b4   :  { %1036 = vrot.lane.b32.xlu1 %v5580_v45, %s5337_s8 }
 0x730   :  { %v954_v0 = vpop.xlane.xlu1 %953 }
 0x731   :  { %5246 = vrcp.f32 %v954_v0 }
 0x734   :  { %v1037_v7 = vpop.permute.xlu1 %1036 }
 0x73b   :  { %v5247_v3 = vpop.eup %5246 }
 0x73c   :  { %v956_v4 = vmul.f32 %v5247_v3, %v5245_v61 }
 0x73e   :  { %4598 = vmatmul.mubr.msk.f32.vlgmr.msra.gmra.mrb[10].mxu1 %vm605_vm4, %v956_v4 }
 0x73f   :  { %4945 = vmatpush3.bf16.xpose.msk.msra.mxu1 %vm5565_vm3, %v4943_v6  ;;  %4604 = vmatprep.mubr.msk.f32.mxu1 %vm5333_vm1, %v5334_v25 }
 0x740   :  { %4953 = vmatprep.subr.bf16.mxu1 %v5332_v24 }
 0x746   :  { %4605 = vmatmul.mubr.msk.f32.vlgmr.msra.gmra.mrb[12].mxu1 %vm525_vm2, %v1037_v7 }
 0x747   :  { %4955 = vmatpush3.bf16.msra.mxu1 %v4954_v57  ;;  %4625 = vmatprep.mubr.msk.f32.mxu1 %vm5333_vm1, %v5334_v25 }
 0x748   :  { %4956 = vmatprep.subr.bf16.mxu1 %v5332_v24 }
 0x811   :  { %v5659_v45 = vpop.f32.mrb[10].mxu1 }
 0x812   :  { %v4599_v8 = vpop.f32.mrb[11].mxu1 }
 0x819   :  { %v1114_v9 = vpop.f32.mrb[12].mxu1 }
 0x81a   :  { %v4606_v10 = vpop.f32.mrb[13].mxu1  ;;  %v1118_v11 = vsel %vm605_vm4, %v1114_v9, -inf }
 0x81b   :  { %1119 = vmax.xlane.f32.xlu0 %v1118_v11 }
 0x831   :  { %5142 = vrot.lane.b32.xlu0 %v5596_v56, %s5337_s8  ;;  %v5676_v56 = vmul.f32 0.35355338, %v5555_v29 }
 0x8a8   :  { %v1120_v13 = vpop.xlane.xlu0 %1119 }
 0x8a9   :  { %v1121_v15 = vsub.f32 %v1114_v9, %v1120_v13 }
 0x8ab   :  { %v1122_v49 = vmul.f32 1.442695, %v1121_v15 }
 0x8ac   :  { %v5143_v50 = vpop.permute.xlu0 %5142 }
 0x8ad   :  { %5248 = vpow2.f32 %v1122_v49  ;;  %v5145_v57 = vunpack.i.h.bf16 %v5143_v50  ;;  %v5144_v16 = vunpack.i.l.bf16 %v5143_v50 }
 0x8af   :  { %v4947_v17 = vpack.c.bf16 %v5145_v57, %v5144_v16 }
 0x8b1   :  { %4948 = vmatpush3.bf16.msra.mxu0 %v4947_v17 }
 0x8b2   :  { %4949 = vmatprep.subr.bf16.mxu0 %v5332_v24 }
 0x8b7   :  { %v5249_v18 = vpop.eup %5248 }
 0x8b8   :  { %v1124_v19 = vsel %vm605_vm4, %v5249_v18, 0.0 }
 0x8b9   :  { %1125 = vadd.xlane.f32.xlu1 %v1124_v19 }
 0x946   :  { %v1126_v20 = vpop.xlane.xlu1 %1125 }
 0x947   :  { %5250 = vrcp.f32 %v1126_v20 }
 0x951   :  { %v5251_v21 = vpop.eup %5250 }
 0x952   :  { %v1128_v22 = vmul.f32 %v5251_v21, %v5249_v18 }
 0x954   :  { %4612 = vmatmul.mubr.msk.f32.vlgmr.msra.gmra.mrb[10].mxu0 %vm605_vm4, %v1128_v22 }
 0x955   :  { %4952 = vmatpush3.bf16.xpose.msk.msra.mxu0 %vm5565_vm3, %v4950_v40  ;;  %4618 = vmatprep.mubr.msk.f32.mxu0 %vm5333_vm1, %v5334_v25 }
 0x956   :  { %4960 = vmatprep.subr.bf16.mxu0 %v5332_v24 }
 0x95c   :  { %4619 = vmatmul.mubr.msk.f32.vlgmr.msra.gmra.mrb[12].mxu0 %vm525_vm2, %v5676_v56 }
 0x95d   :  { %4639 = vmatprep.mubr.msk.f32.mxu0 %vm5333_vm1, %v5334_v25 }
 0xa27   :  { %v5682_v23 = vpop.f32.mrb[10].mxu0 }
 0xa28   :  { %v4613_v32 = vpop.f32.mrb[11].mxu0 }
 0xa2f   :  { %v1300_v36 = vpop.f32.mrb[12].mxu0 }
 0xa30   :  { %v4620_v26 = vpop.f32.mrb[13].mxu0  ;;  %v1304_v40 = vsel %vm605_vm4, %v1300_v36, -inf }
 0xa31   :  { %1305 = vmax.xlane.f32.xlu0 %v1304_v40 }
 0xa47   :  { %1388 = vrot.lane.b32.xlu0 %v5676_v56, %s5335_s7 }
 0xabe   :  { %v1306_v27 = vpop.xlane.xlu0 %1305 }
 0xabf   :  { %v1307_v29 = vsub.f32 %v1300_v36, %v1306_v27 }
 0xac1   :  { %v1308_v28 = vmul.f32 1.442695, %v1307_v29 }
 0xac2   :  { %v1389_v46 = vpop.permute.xlu0 %1388 }
 0xac3   :  { %5252 = vpow2.f32 %v1308_v28 }
 0xacd   :  { %v5253_v30 = vpop.eup %5252 }
 0xace   :  { %v1310_v31 = vsel %vm605_vm4, %v5253_v30, 0.0 }
 0xacf   :  { %1311 = vadd.xlane.f32.xlu1 %v1310_v31 }
 0xae0   :  { %5147 = vrot.lane.b32.xlu1 %v5571_v42, %s5335_s7 }
 0xb5c   :  { %v1312_v33 = vpop.xlane.xlu1 %1311 }
 0xb5d   :  { %5254 = vrcp.f32 %v1312_v33 }
 0xb60   :  { %v5148_v34 = vpop.permute.xlu1 %5147 }
 0xb61   :  { %v5150_v35 = vunpack.i.h.bf16 %v5148_v34  ;;  %v5149_v37 = vunpack.i.l.bf16 %v5148_v34 }
 0xb63   :  { %v4957_v43 = vpack.c.bf16 %v5150_v35, %v5149_v37 }
 0xb67   :  { %v5255_v38 = vpop.eup %5254 }
 0xb68   :  { %v1314_v39 = vmul.f32 %v5255_v38, %v5253_v30 }
 0xb6a   :  { %4626 = vmatmul.mubr.msk.f32.vlgmr.msra.gmra.mrb[14].mxu1 %vm605_vm4, %v1314_v39 }
 0xb6b   :  { %4959 = vmatpush3.bf16.xpose.msk.msra.mxu1 %vm5565_vm3, %v4957_v43  ;;  %4632 = vmatprep.mubr.msk.f32.mxu1 %vm5333_vm1, %v5334_v25 }
 0xb6c   :  { %4967 = vmatprep.subr.bf16.mxu1 %v5332_v24 }
 0xb72   :  { %4633 = vmatmul.mubr.msk.f32.vlgmr.msra.gmra.mrb[16].mxu1 %vm525_vm2, %v1389_v46 }
 0xb73   :  { %4653 = vmatprep.mubr.msk.f32.mxu1 %vm5333_vm1, %v5334_v25 }
 0xc3d   :  { %v5699_v47 = vpop.f32.mrb[14].mxu1 }
 0xc3e   :  { %v4627_v44 = vpop.f32.mrb[15].mxu1 }
 0xc45   :  { %v1466_v51 = vpop.f32.mrb[16].mxu1 }
 0xc46   :  { %v4634_v52 = vpop.f32.mrb[17].mxu1  ;;  %v1470_v53 = vsel %vm605_vm4, %v1466_v51, -inf }
 0xc47   :  { %1471 = vmax.xlane.f32.xlu1 %v1470_v53 }
 0xc58   :  { %5152 = vrot.lane.b32.xlu1 %v5602_v58, %s5335_s7 }
 0xc5c   :  { %1562 = vrot.lane.b32.xlu1 %v5676_v56, %s5336_s1 }
 0xcd4   :  { %v1472_v54 = vpop.xlane.xlu1 %1471 }
 0xcd5   :  { %v1473_v55 = vsub.f32 %v1466_v51, %v1472_v54 }
 0xcd7   :  { %v1474_v59 = vmul.f32 1.442695, %v1473_v55 }
 0xcd8   :  { %v5153_v60 = vpop.permute.xlu1 %5152 }
 0xcd9   :  { %5256 = vpow2.f32 %v1474_v59  ;;  %v5155_v61 = vunpack.i.h.bf16 %v5153_v60  ;;  %v5154_v62 = vunpack.i.l.bf16 %v5153_v60 }
 0xcdb   :  { %v4961_v63 = vpack.c.bf16 %v5155_v61, %v5154_v62 }
 0xcdc   :  { %v1563_v10 = vpop.permute.xlu1 %1562 }
 0xcdd   :  { %4962 = vmatpush3.bf16.msra.mxu0 %v4961_v63 }
 0xcde   :  { %4963 = vmatprep.subr.bf16.mxu0 %v5332_v24 }
 0xce3   :  { %v5257_v0 = vpop.eup %5256 }
 0xce4   :  { %v1476_v1 = vsel %vm605_vm4, %v5257_v0, 0.0 }
 0xce5   :  { %1477 = vadd.xlane.f32.xlu0 %v1476_v1 }
 0xcfb   :  { %5157 = vrot.lane.b32.xlu0 %v5571_v42, %s5336_s1 }
 0xd72   :  { %v1478_v2 = vpop.xlane.xlu0 %1477 }
 0xd73   :  { %5258 = vrcp.f32 %v1478_v2  ;;  %v110_v2 = vld [vmem:[%s6184_s29 + $0x18] sm:$0xff] }
 0xd76   :  { %v5158_v3 = vpop.permute.xlu0 %5157 }
 0xd77   :  { %v5160_v4 = vunpack.i.h.bf16 %v5158_v3  ;;  %v5159_v6 = vunpack.i.l.bf16 %v5158_v3 }
 0xd79   :  { %v4964_v9 = vpack.c.bf16 %v5160_v4, %v5159_v6 }
 0xd7d   :  { %v5259_v7 = vpop.eup %5258 }
 0xd7e   :  { %v1480_v8 = vmul.f32 %v5259_v7, %v5257_v0  ;;  %v109_v0 = vld [vmem:[%s6184_s29 + $0x10] sm:$0xff] }
 0xd7f   :  { %v4981_v3 = vpack.c.bf16 %v110_v2, %v109_v0  ;;  %v4215_v2 = vld [vmem:[%s6176_s28 + $0x30] sm:$0xff] }
 0xd80   :  { %4640 = vmatmul.mubr.msk.f32.vlgmr.msra.gmra.mrb[14].mxu0 %vm605_vm4, %v1480_v8 }
 0xd81   :  { %4966 = vmatpush3.bf16.xpose.msk.msra.mxu0 %vm5565_vm3, %v4964_v9  ;;  %4646 = vmatprep.mubr.msk.f32.mxu0 %vm5333_vm1, %v5334_v25 }
 0xd82   :  { %4974 = vmatprep.subr.bf16.mxu0 %v5332_v24 }
 0xd88   :  { %4647 = vmatmul.mubr.msk.f32.vlgmr.msra.gmra.mrb[16].mxu0 %vm525_vm2, %v1563_v10 }
 0xd89   :  { %4667 = vmatprep.mubr.msk.f32.mxu0 %vm5333_vm1, %v5334_v25 }
 0xe53   :  { %v1558_v11 = vpop.f32.mrb[14].mxu0 }
 0xe54   :  { %v4641_v13 = vpop.f32.mrb[15].mxu0 }
 0xe5b   :  { %v1640_v15 = vpop.f32.mrb[16].mxu0 }
 0xe5c   :  { %v4648_v49 = vpop.f32.mrb[17].mxu0  ;;  %v1644_v50 = vsel %vm605_vm4, %v1640_v15, -inf }
 0xe5d   :  { %1645 = vmax.xlane.f32.xlu1 %v1644_v50 }
 0xe6e   :  { %5162 = vrot.lane.b32.xlu1 %v5602_v58, %s5336_s1 }
 0xe72   :  { %1734 = vrot.lane.b32.xlu1 %v5676_v56, %s5337_s8 }
 0xeea   :  { %v1646_v57 = vpop.xlane.xlu1 %1645 }
 0xeeb   :  { %v1647_v16 = vsub.f32 %v1640_v15, %v1646_v57 }
 0xeed   :  { %v1648_v17 = vmul.f32 1.442695, %v1647_v16 }
 0xeee   :  { %v5163_v18 = vpop.permute.xlu1 %5162 }
 0xeef   :  { %5260 = vpow2.f32 %v1648_v17  ;;  %v5165_v19 = vunpack.i.h.bf16 %v5163_v18  ;;  %v5164_v20 = vunpack.i.l.bf16 %v5163_v18 }
 0xef1   :  { %v4968_v21 = vpack.c.bf16 %v5165_v19, %v5164_v20 }
 0xef2   :  { %v1735_v30 = vpop.permute.xlu1 %1734 }
 0xef3   :  { %4969 = vmatpush3.bf16.msra.mxu1 %v4968_v21 }
 0xef4   :  { %4970 = vmatprep.subr.bf16.mxu1 %v5332_v24 }
 0xef9   :  { %v5261_v22 = vpop.eup %5260 }
 0xefa   :  { %v1650_v32 = vsel %vm605_vm4, %v5261_v22, 0.0 }
 0xefb   :  { %1651 = vadd.xlane.f32.xlu0 %v1650_v32 }
 0xf11   :  { %5167 = vrot.lane.b32.xlu0 %v5571_v42, %s5337_s8 }
 0xf88   :  { %v1652_v36 = vpop.xlane.xlu0 %1651 }
 0xf89   :  { %5262 = vrcp.f32 %v1652_v36 }
 0xf8c   :  { %v5168_v56 = vpop.permute.xlu0 %5167 }
 0xf8d   :  { %v5170_v26 = vunpack.i.h.bf16 %v5168_v56  ;;  %v5169_v40 = vunpack.i.l.bf16 %v5168_v56 }
 0xf8f   :  { %v4971_v28 = vpack.c.bf16 %v5170_v26, %v5169_v40 }
 0xf93   :  { %v5263_v27 = vpop.eup %5262 }
 0xf94   :  { %v1654_v29 = vmul.f32 %v5263_v27, %v5261_v22  ;;  %v2056_v27 = vld [vmem:[%s6143_s11 + $0x8] sm:$0xff] }
 0xf96   :  { %4654 = vmatmul.mubr.msk.f32.vlgmr.msra.gmra.mrb[18].mxu1 %vm605_vm4, %v1654_v29  ;;  %v2059_v29 = vld [vmem:[%s6144_s12] sm:$0xff] }
 0xf97   :  { %4973 = vmatpush3.bf16.xpose.msk.msra.mxu1 %vm5565_vm3, %v4971_v28  ;;  %4660 = vmatprep.mubr.msk.f32.mxu1 %vm5333_vm1, %v5334_v25 }
 0xf9e   :  { %4661 = vmatmul.mubr.msk.f32.vlgmr.msra.gmra.mrb[20].mxu1 %vm525_vm2, %v1735_v30  ;;  %v2060_v30 = vld [vmem:[%s6144_s12 + $0x8] sm:$0xff] }
0x1069   :  { %v1730_v42 = vpop.f32.mrb[18].mxu1 }
0x106a   :  { %v4655_v31 = vpop.f32.mrb[19].mxu1 }
0x106b   :  { %v2057_v31 = vld [vmem:[%s6143_s11 + $0x10] sm:$0xff] }
0x1071   :  { %v1812_v33 = vpop.f32.mrb[20].mxu1 }
0x1072   :  { %v4662_v34 = vpop.f32.mrb[21].mxu1  ;;  %v1816_v35 = vsel %vm605_vm4, %v1812_v33, -inf }
0x1073   :  { %1817 = vmax.xlane.f32.xlu1 %v1816_v35  ;;  %v2061_v34 = vld [vmem:[%s6144_s12 + $0x10] sm:$0xff] }
0x1084   :  { %5172 = vrot.lane.b32.xlu1 %v5602_v58, %s5337_s8 }
0x1088   :  { %1213 = vrot.lane.b32.xlu1 %v5659_v45, %s5338_s27 }
0x108c   :  { %1907 = vrot.lane.b32.xlu1 %v1558_v11, %s6163_s4  ;;  %v4262_v11 = vld [vmem:[%s6185_s0] ss:$0 sm:$0xff] }
0x1090   :  { %1217 = vrot.lane.b32.xlu1 %v5682_v23, %s5340_s9 }
0x1094   :  { %1911 = vrot.lane.b32.xlu1 %v1730_v42, %s5338_s27  ;;  %v4993_v42 = vpack.c.bf16 %v2060_v30, %v2059_v29 }
0x1100   :  { %v1818_v37 = vpop.xlane.xlu1 %1817 }
0x1101   :  { %v1819_v38 = vsub.f32 %v1812_v33, %v1818_v37  ;;  %v2058_v33 = vld [vmem:[%s6143_s11 + $0x18] sm:$0xff] }
0x1102   :  { %v4989_v35 = vpack.c.bf16 %v2058_v33, %v2057_v31  ;;  %v2062_v37 = vld [vmem:[%s6144_s12 + $0x18] sm:$0xff] }
0x1103   :  { %v1820_v39 = vmul.f32 1.442695, %v1819_v38  ;;  %v4997_v38 = vpack.c.bf16 %v2062_v37, %v2061_v34 }
0x1104   :  { %v5173_v43 = vpop.permute.xlu1 %5172 }
0x1105   :  { %5264 = vpow2.f32 %v1820_v39  ;;  %v5175_v46 = vunpack.i.h.bf16 %v5173_v43  ;;  %v5174_v58 = vunpack.i.l.bf16 %v5173_v43  ;;  %v2063_v39 = vld [vmem:[%s6145_s13] sm:$0xff]  ;;  %v2064_v43 = vld [vmem:[%s6145_s13 + $0x8] sm:$0xff] }
0x1107   :  { %v4975_v44 = vpack.c.bf16 %v5175_v46, %v5174_v58  ;;  %v5009_v46 = vpack.c.bf16 %v2064_v43, %v2063_v39 }
0x1108   :  { %v1214_v51 = vpop.permute.xlu1 %1213 }
0x1109   :  { %4976 = vmatpush3.bf16.msra.mxu0 %v4975_v44 }
0x110c   :  { %v1908_v45 = vpop.permute.xlu1 %1907 }
0x110d   :  { %v1918_v52 = vsel %vm525_vm2, %v5699_v47, %v1908_v45 }
0x110f   :  { %v5265_v53 = vpop.eup %5264 }
0x1110   :  { %v1822_v54 = vsel %vm605_vm4, %v5265_v53, 0.0  ;;  %v1218_v63 = vpop.permute.xlu1 %1217 }
0x1111   :  { %1823 = vadd.xlane.f32.xlu0 %v1822_v54 }
0x1114   :  { %v1912_v7 = vpop.permute.xlu1 %1911 }
0x1115   :  { %v1919_v8 = vsel %vm605_vm4, %v1918_v52, %v1912_v7 }
0x1127   :  { %1209 = vrot.lane.b32.xlu0 %v5640_v48, %s6163_s4  ;;  %v107_v48 = vld [vmem:[%s6184_s29] sm:$0xff] }
0x119e   :  { %v1824_v23 = vpop.xlane.xlu0 %1823 }
0x119f   :  { %5266 = vrcp.f32 %v1824_v23  ;;  %v4265_v23 = vld [vmem:[%s6186_s30] ss:$0 sm:$0xff] }
0x11a2   :  { %v1210_v55 = vpop.permute.xlu0 %1209 }
0x11a3   :  { %v1220_v59 = vsel %vm525_vm2, %v5615_v12, %v1210_v55  ;;  %v108_v12 = vld [vmem:[%s6184_s29 + $0x8] sm:$0xff] }
0x11a4   :  { %v1221_v61 = vsel %vm605_vm4, %v1220_v59, %v1214_v51  ;;  %v4977_v1 = vpack.c.bf16 %v108_v12, %v107_v48  ;;  %v2066_v48 = vld [vmem:[%s6145_s13 + $0x18] sm:$0xff] }
0x11a5   :  { %v1223_v47 = vsel %vm1222_vm5, %v1221_v61, %v1218_v63  ;;  %v4266_v61 = vld [vmem:[%s6142_s10] ss:$0 sm:$0xff] }
0x11a6   :  { %4978 = vmatprep.subr.bf16.mxu0 %v4977_v1 }
0x11a9   :  { %v5267_v60 = vpop.eup %5266 }
0x11aa   :  { %v1826_v62 = vmul.f32 %v5267_v60, %v5265_v53 }
0x11ac   :  { %4668 = vmatmul.mubr.msk.f32.vlgmr.msra.gmra.mrb[18].mxu0 %vm605_vm4, %v1826_v62 }
0x11ad   :  { %4678 = vmatprep.mubr.msk.f32.mxu0 %vm118_vm0, %v1223_v47  ;;  %4980 = vmatpush3.bf16.msra.mxu0 %v4977_v1  ;;  %v2065_v47 = vld [vmem:[%s6145_s13 + $0x10] sm:$0xff] }
0x11ae   :  { %4982 = vmatprep.subr.bf16.mxu0 %v4981_v3  ;;  %v5013_v1 = vpack.c.bf16 %v2066_v48, %v2065_v47 }
0x11b1   :  { %4984 = vmatpush3.bf16.msra.mxu0 %v4981_v3  ;;  %v4216_v3 = vld [vmem:[%s6176_s28 + $0x38] sm:$0xff] }
0x11b2   :  { %4994 = vmatprep.subr.bf16.mxu0 %v4993_v42 }
0x127f   :  { %v1902_v4 = vpop.f32.mrb[18].mxu0 }
0x1280   :  { %1915 = vrot.lane.b32.xlu0 %v1902_v4, %s5340_s9  ;;  %v4669_v6 = vpop.f32.mrb[19].mxu0  ;;  %v4267_v4 = vld [vmem:[%s6146_s14] ss:$0 sm:$0xff]  ;;  %s6187_s14 = smov 8  }
0x1281   :  { %v4270_v6 = vld [vmem:[%s6147_s15] ss:$0 sm:$0xff] }
0x12f2   :  { %v1916_v9 = vpop.permute.xlu0 %1915 }
0x12f3   :  { %v1920_v10 = vsel %vm1222_vm5, %v1919_v8, %v1916_v9 }
0x12f4   :  { %4679 = vmatmul.mubr.msk.f32.vlgmr.msra.gmra.mrb[20].mxu0 %vm118_vm0, %v1920_v10 }
0x12f5   :  { %4996 = vmatpush3.bf16.msra.mxu0 %v4993_v42 }
0x12f6   :  { %4998 = vmatprep.subr.bf16.mxu0 %v4997_v38 }
0x12f9   :  { %5000 = vmatpush3.bf16.msra.mxu0 %v4997_v38 }
0x12fa   :  { %5010 = vmatprep.subr.bf16.mxu0 %v5009_v46 }
0x13c7   :  { %v4680_v13 = vpop.f32.mrb[20].mxu0 }
0x13c8   :  { %v2005_v15 = vadd.f32 %v4680_v13, %v4262_v11  ;;  %v1999_v49 = vpop.f32.mrb[21].mxu0 }
0x13c9   :  { %v2000_v50 = vadd.f32 %v4262_v11, %v1999_v49 }
0x13ca   :  { %v2009_v57 = vadd.f32 %v2005_v15, %v5511_v14  ;;  %v4275_v15 = vld [vmem:[%s6148_s16] ss:$0 sm:$0xff] }
0x13cb   :  { %v2008_v16 = vadd.f32 %v2000_v50, %v5488_v5  ;;  %v2055_v5 = vld [vmem:[%s6143_s11] sm:$0xff] }
0x13cc   :  { %v2015_v17 = vsel %vm118_vm0, %v2009_v57, 0.0  ;;  %v4985_v28 = vpack.c.bf16 %v2056_v27, %v2055_v5 }
0x13cd   :  { %2016 = vadd.xlane.f32.xlu0 %v2015_v17  ;;  %v2012_v18 = vsel %vm118_vm0, %v2008_v16, 0.0 }
0x13ce   :  { %2013 = vadd.xlane.f32.xlu1 %v2012_v18  ;;  %4986 = vmatprep.subr.bf16.mxu1 %v4985_v28 }
0x13cf   :  { %4988 = vmatpush3.bf16.msra.mxu1 %v4985_v28 }
0x13d0   :  { %4990 = vmatprep.subr.bf16.mxu1 %v4989_v35 }
0x13d3   :  { %4992 = vmatpush3.bf16.msra.mxu1 %v4989_v35 }
0x13d4   :  { %5002 = vmatprep.subr.bf16.mxu1 %v4993_v42 }
0x145a   :  { %v2017_v19 = vpop.xlane.xlu0 %2016 }
0x145b   :  { %v2020_v20 = vmul.f32 0.03125, %v2017_v19  ;;  %v2014_v21 = vpop.xlane.xlu1 %2013 }
0x145c   :  { %v2019_v22 = vmul.f32 0.03125, %v2014_v21 }
0x145d   :  { %v2022_v32 = vsub.f32 %v2009_v57, %v2020_v20 }
0x145e   :  { %v2021_v36 = vsub.f32 %v2008_v16, %v2019_v22 }
0x145f   :  { %v2024_v56 = vmul.f32 %v2022_v32, %v2022_v32 }
0x1460   :  { %v2023_v26 = vmul.f32 %v2021_v36, %v2021_v36 }
0x1461   :  { %v2028_v40 = vsel %vm118_vm0, %v2024_v56, 0.0 }
0x1462   :  { %2029 = vadd.xlane.f32.xlu1 %v2028_v40  ;;  %v2025_v14 = vsel %vm118_vm0, %v2023_v26, 0.0 }
0x1463   :  { %2026 = vadd.xlane.f32.xlu0 %v2025_v14 }
0x14ef   :  { %v2030_v58 = vpop.xlane.xlu1 %2029 }
0x14f0   :  { %v2032_v44 = vmul.f32 0.03125, %v2030_v58  ;;  %v2027_v51 = vpop.xlane.xlu0 %2026 }
0x14f1   :  { %v2031_v45 = vmul.f32 0.03125, %v2027_v51 }
0x14f2   :  { %v2034_v52 = vadd.f32 1e-05, %v2032_v44 }
0x14f3   :  { %v2033_v53 = vadd.f32 1e-05, %v2031_v45 }
0x14f4   :  { %5268 = vrsqrt.f32 %v2034_v52 }
0x14f5   :  { %5270 = vrsqrt.f32 %v2033_v53 }
0x14fe   :  { %v5269_v54 = vpop.eup %5268 }
0x14ff   :  { %v5271_v55 = vpop.eup %5270  ;;  %v2038_v59 = vmul.f32 %v5269_v54, %v2022_v32 }
0x1500   :  { %v2037_v60 = vmul.f32 %v5271_v55, %v2021_v36 }
0x1501   :  { %v2046_v62 = vmul.f32 %v4265_v23, %v2038_v59 }
0x1502   :  { %v2045_v63 = vmul.f32 %v4265_v23, %v2037_v60 }
0x1503   :  { %v5823_v0 = vadd.f32 %v4266_v61, %v2046_v62 }
0x1504   :  { %v5821_v12 = vadd.f32 %v4266_v61, %v2045_v63 }
0x1506   :  { %4689 = vmatprep.mubr.msk.f32.mxu1 %vm118_vm0, %v5821_v12  ;;  %4700 = vmatprep.mubr.msk.f32.mxu0 %vm118_vm0, %v5821_v12 }
0x1507   :  { %4690 = vmatmul.mubr.msk.f32.vlgmr.msra.gmra.mrb[22].mxu1 %vm118_vm0, %v5823_v0  ;;  %4701 = vmatmul.mubr.msk.f32.vlgmr.msra.gmra.mrb[22].mxu0 %vm118_vm0, %v5823_v0 }
0x1508   :  { %5004 = vmatpush3.bf16.msra.mxu1 %v4993_v42  ;;  %5012 = vmatpush3.bf16.msra.mxu0 %v5009_v46 }
0x1509   :  { %4722 = vmatprep.mubr.msk.f32.mxu0 %vm118_vm0, %v5821_v12  ;;  %5006 = vmatprep.subr.bf16.mxu1 %v4997_v38 }
0x150a   :  { %5014 = vmatprep.subr.bf16.mxu0 %v5013_v1  ;;  %4711 = vmatprep.mubr.msk.f32.mxu1 %vm118_vm0, %v4215_v2 }
0x150c   :  { %5008 = vmatpush3.bf16.msra.mxu1 %v4997_v38  ;;  %5016 = vmatpush3.bf16.msra.mxu0 %v5013_v1 }
0x150d   :  { %5018 = vmatprep.subr.bf16.mxu1 %v5009_v46  ;;  %5025 = vmatprep.subr.bf16.mxu0 %v5332_v24 }
0x150f   :  { %4712 = vmatmul.mubr.msk.f32.vlgmr.msra.gmra.mrb[24].mxu1 %vm118_vm0, %v4216_v3  ;;  %4723 = vmatmul.mubr.msk.f32.vlgmr.msra.gmra.mrb[24].mxu0 %vm118_vm0, %v5823_v0 }
0x1510   :  { %5020 = vmatpush3.bf16.msra.mxu1 %v5009_v46  ;;  %4733 = vmatprep.mubr.msk.f32.mxu1 %vm118_vm0, %v4215_v2 }
0x1511   :  { %5022 = vmatprep.subr.bf16.mxu1 %v5013_v1  ;;  %4740 = vmatprep.mubr.msk.f32.mxu0 %vm5333_vm1, %v5334_v25 }
0x1514   :  { %5024 = vmatpush3.bf16.msra.mxu1 %v5013_v1 }
0x1515   :  { %5029 = vmatprep.subr.bf16.mxu1 %v5332_v24 }
0x1517   :  { %4734 = vmatmul.mubr.msk.f32.vlgmr.msra.gmra.mrb[26].mxu1 %vm118_vm0, %v4216_v3 }
0x1518   :  { %4747 = vmatprep.mubr.msk.f32.mxu1 %vm5333_vm1, %v5334_v25 }
0x15da   :  { %v4691_v7 = vpop.f32.mrb[22].mxu1  ;;  %v4702_v8 = vpop.f32.mrb[22].mxu0 }
0x15db   :  { %v5859_v9 = vadd.f32 %v4691_v7, %v4267_v4  ;;  %v5861_v10 = vadd.f32 %v4702_v8, %v4270_v6  ;;  %v2153_v11 = vpop.f32.mrb[23].mxu1  ;;  %v2234_v13 = vpop.f32.mrb[23].mxu0 }
0x15dc   :  { %v2235_v19 = vadd.f32 %v4270_v6, %v2234_v13  ;;  %v2154_v56 = vadd.f32 %v4267_v4, %v2153_v11 }
0x15de   :  { %v5883_v5 = vmul.f32 0.35355338, %v2154_v56 }
0x15e2   :  { %v4713_v49 = vpop.f32.mrb[24].mxu1  ;;  %v4724_v50 = vpop.f32.mrb[24].mxu0 }
0x15e3   :  { %v5866_v57 = vadd.f32 %v4713_v49, %v4270_v6  ;;  %v5868_v16 = vadd.f32 %v4724_v50, %v4275_v15  ;;  %v2315_v17 = vpop.f32.mrb[25].mxu1  ;;  %v2396_v18 = vpop.f32.mrb[25].mxu0 }
0x15e4   :  { %v2316_v20 = vadd.f32 %v4270_v6, %v2315_v17  ;;  %v2397_v27 = vadd.f32 %v4275_v15, %v2396_v18 }
0x15e5   :  { %v5054_v21 = vpack.c.bf16 %v5866_v57, %v5861_v10  ;;  %v5874_v22 = vpack.i.bf16 %v5866_v57, %v5861_v10 }
0x15e6   :  { %v5026_v32 = vpack.c.bf16 %v2316_v20, %v2235_v19  ;;  %v5876_v36 = vpack.i.bf16 %v2316_v20, %v2235_v19 }
0x15e8   :  { %5028 = vmatpush3.bf16.xpose.msk.msra.mxu0 %vm5565_vm3, %v5026_v32 }
0x15e9   :  { %5036 = vmatprep.subr.bf16.mxu0 %v5332_v24 }
0x15ea   :  { %v4735_v26 = vpop.f32.mrb[26].mxu1 }
0x15eb   :  { %v5881_v40 = vadd.f32 %v4735_v26, %v4275_v15  ;;  %v2471_v14 = vpop.f32.mrb[27].mxu1 }
0x15ec   :  { %v2472_v29 = vadd.f32 %v4275_v15, %v2471_v14 }
0x15ed   :  { %v5058_v28 = vpack.c.bf16 %v5881_v40, %v5868_v16  ;;  %v5889_v30 = vpack.i.bf16 %v5881_v40, %v5868_v16  ;;  %v5964_v40 = vmul.f32 0.35355338, %v5859_v9 }
0x15ee   :  { %v5030_v42 = vpack.c.bf16 %v2472_v29, %v2397_v27  ;;  %v5891_v31 = vpack.i.bf16 %v2472_v29, %v2397_v27 }
0x15ef   :  { %4741 = vmatmul.mubr.msk.f32.vlgmr.msra.gmra.mrb[26].mxu0 %vm525_vm2, %v5883_v5 }
0x15f0   :  { %5031 = vmatpush3.bf16.msra.mxu1 %v5030_v42  ;;  %4761 = vmatprep.mubr.msk.f32.mxu0 %vm5333_vm1, %v5334_v25 }
0x15f1   :  { %5032 = vmatprep.subr.bf16.mxu1 %v5332_v24 }
0x16c2   :  { %v2556_v33 = vpop.f32.mrb[26].mxu0 }
0x16c3   :  { %v4742_v34 = vpop.f32.mrb[27].mxu0  ;;  %v2560_v35 = vsel %vm605_vm4, %v2556_v33, -inf }
0x16c4   :  { %2561 = vmax.xlane.f32.xlu0 %v2560_v35 }
0x16da   :  { %5177 = vrot.lane.b32.xlu0 %v5876_v36, %s5335_s7 }
0x1751   :  { %v2562_v37 = vpop.xlane.xlu0 %2561 }
0x1752   :  { %v2563_v38 = vsub.f32 %v2556_v33, %v2562_v37 }
0x1754   :  { %v2564_v39 = vmul.f32 1.442695, %v2563_v38 }
0x1755   :  { %v5178_v44 = vpop.permute.xlu0 %5177 }
0x1756   :  { %5272 = vpow2.f32 %v2564_v39  ;;  %v5180_v51 = vunpack.i.h.bf16 %v5178_v44  ;;  %v5179_v45 = vunpack.i.l.bf16 %v5178_v44 }
0x1758   :  { %v5033_v54 = vpack.c.bf16 %v5180_v51, %v5179_v45 }
0x1760   :  { %v5273_v43 = vpop.eup %5272 }
0x1761   :  { %v2566_v46 = vsel %vm605_vm4, %v5273_v43, 0.0 }
0x1762   :  { %2567 = vadd.xlane.f32.xlu1 %v2566_v46 }
0x1773   :  { %2644 = vrot.lane.b32.xlu1 %v5883_v5, %s5335_s7 }
0x17ef   :  { %v2568_v58 = vpop.xlane.xlu1 %2567 }
0x17f0   :  { %5274 = vrcp.f32 %v2568_v58 }
0x17f3   :  { %v2645_v23 = vpop.permute.xlu1 %2644 }
0x17fa   :  { %v5275_v52 = vpop.eup %5274 }
0x17fb   :  { %v2570_v53 = vmul.f32 %v5275_v52, %v5273_v43 }
0x17fd   :  { %4748 = vmatmul.mubr.msk.f32.vlgmr.msra.gmra.mrb[28].mxu1 %vm605_vm4, %v2570_v53 }
0x17fe   :  { %5035 = vmatpush3.bf16.xpose.msk.msra.mxu1 %vm5565_vm3, %v5033_v54  ;;  %4754 = vmatprep.mubr.msk.f32.mxu1 %vm5333_vm1, %v5334_v25 }
0x17ff   :  { %5043 = vmatprep.subr.bf16.mxu1 %v5332_v24 }
0x1805   :  { %4755 = vmatmul.mubr.msk.f32.vlgmr.msra.gmra.mrb[30].mxu1 %vm525_vm2, %v2645_v23 }
0x1806   :  { %4775 = vmatprep.mubr.msk.f32.mxu1 %vm5333_vm1, %v5334_v25 }
0x18d0   :  { %v5913_v55 = vpop.f32.mrb[28].mxu1 }
0x18d1   :  { %v4749_v59 = vpop.f32.mrb[29].mxu1 }
0x18d8   :  { %v2722_v60 = vpop.f32.mrb[30].mxu1 }
0x18d9   :  { %v4756_v61 = vpop.f32.mrb[31].mxu1  ;;  %v2726_v62 = vsel %vm605_vm4, %v2722_v60, -inf }
0x18da   :  { %2727 = vmax.xlane.f32.xlu1 %v2726_v62 }
0x18eb   :  { %5187 = vrot.lane.b32.xlu1 %v5876_v36, %s5336_s1 }
0x18ef   :  { %2818 = vrot.lane.b32.xlu1 %v5883_v5, %s5336_s1 }
0x1967   :  { %v2728_v63 = vpop.xlane.xlu1 %2727 }
0x1968   :  { %v2729_v47 = vsub.f32 %v2722_v60, %v2728_v63 }
0x196a   :  { %v2730_v48 = vmul.f32 1.442695, %v2729_v47 }
0x196b   :  { %v5188_v11 = vpop.permute.xlu1 %5187 }
0x196c   :  { %5276 = vpow2.f32 %v2730_v48  ;;  %v5190_v15 = vunpack.i.h.bf16 %v5188_v11  ;;  %v5189_v49 = vunpack.i.l.bf16 %v5188_v11 }
0x196e   :  { %v5040_v17 = vpack.c.bf16 %v5190_v15, %v5189_v49 }
0x196f   :  { %v2819_v18 = vpop.permute.xlu1 %2818 }
0x1976   :  { %v5277_v1 = vpop.eup %5276 }
0x1977   :  { %v2732_v2 = vsel %vm605_vm4, %v5277_v1, 0.0 }
0x1978   :  { %2733 = vadd.xlane.f32.xlu0 %v2732_v2 }
0x198e   :  { %5182 = vrot.lane.b32.xlu0 %v5891_v31, %s5335_s7 }
0x1a05   :  { %v2734_v3 = vpop.xlane.xlu0 %2733 }
0x1a06   :  { %5278 = vrcp.f32 %v2734_v3 }
0x1a09   :  { %v5183_v4 = vpop.permute.xlu0 %5182 }
0x1a0a   :  { %v5185_v6 = vunpack.i.h.bf16 %v5183_v4  ;;  %v5184_v7 = vunpack.i.l.bf16 %v5183_v4 }
0x1a0c   :  { %v5037_v8 = vpack.c.bf16 %v5185_v6, %v5184_v7 }
0x1a0e   :  { %5038 = vmatpush3.bf16.msra.mxu0 %v5037_v8 }
0x1a0f   :  { %5039 = vmatprep.subr.bf16.mxu0 %v5332_v24 }
0x1a10   :  { %v5279_v13 = vpop.eup %5278 }
0x1a11   :  { %v2736_v50 = vmul.f32 %v5279_v13, %v5277_v1 }
0x1a13   :  { %4762 = vmatmul.mubr.msk.f32.vlgmr.msra.gmra.mrb[28].mxu0 %vm605_vm4, %v2736_v50 }
0x1a14   :  { %4768 = vmatprep.mubr.msk.f32.mxu0 %vm5333_vm1, %v5334_v25 }
0x1a17   :  { %5042 = vmatpush3.bf16.xpose.msk.msra.mxu0 %vm5565_vm3, %v5040_v17 }
0x1a18   :  { %5050 = vmatprep.subr.bf16.mxu0 %v5332_v24 }
0x1a1e   :  { %4769 = vmatmul.mubr.msk.f32.vlgmr.msra.gmra.mrb[30].mxu0 %vm525_vm2, %v2819_v18 }
0x1a1f   :  { %4789 = vmatprep.mubr.msk.f32.mxu0 %vm5333_vm1, %v5334_v25 }
0x1ae6   :  { %v5933_v19 = vpop.f32.mrb[28].mxu0 }
0x1ae7   :  { %v4763_v20 = vpop.f32.mrb[29].mxu0 }
0x1af1   :  { %v2896_v32 = vpop.f32.mrb[30].mxu0 }
0x1af2   :  { %v4770_v56 = vpop.f32.mrb[31].mxu0  ;;  %v2900_v26 = vsel %vm605_vm4, %v2896_v32, -inf }
0x1af3   :  { %2901 = vmax.xlane.f32.xlu0 %v2900_v26 }
0x1b09   :  { %5192 = vrot.lane.b32.xlu0 %v5891_v31, %s5336_s1 }
0x1b0d   :  { %2990 = vrot.lane.b32.xlu0 %v5883_v5, %s5337_s8 }
0x1b80   :  { %v2902_v14 = vpop.xlane.xlu0 %2901 }
0x1b81   :  { %v2903_v27 = vsub.f32 %v2896_v32, %v2902_v14 }
0x1b83   :  { %v2904_v29 = vmul.f32 1.442695, %v2903_v27 }
0x1b84   :  { %v5193_v42 = vpop.permute.xlu0 %5192 }
0x1b85   :  { %5280 = vpow2.f32 %v2904_v29  ;;  %v5195_v33 = vunpack.i.h.bf16 %v5193_v42  ;;  %v5194_v34 = vunpack.i.l.bf16 %v5193_v42 }
0x1b87   :  { %v5044_v35 = vpack.c.bf16 %v5195_v33, %v5194_v34 }
0x1b88   :  { %v2991_v45 = vpop.permute.xlu0 %2990 }
0x1b89   :  { %5045 = vmatpush3.bf16.msra.mxu1 %v5044_v35 }
0x1b8a   :  { %5046 = vmatprep.subr.bf16.mxu1 %v5332_v24 }
0x1b8f   :  { %v5281_v37 = vpop.eup %5280 }
0x1b90   :  { %v2906_v38 = vsel %vm605_vm4, %v5281_v37, 0.0 }
0x1b91   :  { %2907 = vadd.xlane.f32.xlu1 %v2906_v38 }
0x1ba2   :  { %5197 = vrot.lane.b32.xlu1 %v5876_v36, %s5337_s8 }
0x1c1e   :  { %v2908_v39 = vpop.xlane.xlu1 %2907 }
0x1c1f   :  { %5282 = vrcp.f32 %v2908_v39 }
0x1c22   :  { %v5198_v5 = vpop.permute.xlu1 %5197 }
0x1c23   :  { %v5200_v43 = vunpack.i.h.bf16 %v5198_v5  ;;  %v5199_v46 = vunpack.i.l.bf16 %v5198_v5 }
0x1c25   :  { %v5047_v51 = vpack.c.bf16 %v5200_v43, %v5199_v46 }
0x1c29   :  { %v5283_v58 = vpop.eup %5282 }
0x1c2a   :  { %v2910_v44 = vmul.f32 %v5283_v58, %v5281_v37 }
0x1c2c   :  { %4776 = vmatmul.mubr.msk.f32.vlgmr.msra.gmra.mrb[32].mxu1 %vm605_vm4, %v2910_v44 }
0x1c2d   :  { %5049 = vmatpush3.bf16.xpose.msk.msra.mxu1 %vm5565_vm3, %v5047_v51  ;;  %4782 = vmatprep.mubr.msk.f32.mxu1 %vm5333_vm1, %v5334_v25 }
0x1c2e   :  { %5057 = vmatprep.subr.bf16.mxu1 %v5332_v24 }
0x1c34   :  { %4783 = vmatmul.mubr.msk.f32.vlgmr.msra.gmra.mrb[34].mxu1 %vm525_vm2, %v2991_v45 }
0x1c35   :  { %5059 = vmatpush3.bf16.msra.mxu1 %v5058_v28  ;;  %4803 = vmatprep.mubr.msk.f32.mxu1 %vm5333_vm1, %v5334_v25 }
0x1c36   :  { %5060 = vmatprep.subr.bf16.mxu1 %v5332_v24 }
0x1cff   :  { %v5957_v36 = vpop.f32.mrb[32].mxu1 }
0x1d00   :  { %v4777_v52 = vpop.f32.mrb[33].mxu1 }
0x1d07   :  { %v3068_v53 = vpop.f32.mrb[34].mxu1 }
0x1d08   :  { %v4784_v54 = vpop.f32.mrb[35].mxu1  ;;  %v3072_v23 = vsel %vm605_vm4, %v3068_v53, -inf }
0x1d09   :  { %3073 = vmax.xlane.f32.xlu1 %v3072_v23 }
0x1d96   :  { %v3074_v59 = vpop.xlane.xlu1 %3073 }
0x1d97   :  { %v3075_v60 = vsub.f32 %v3068_v53, %v3074_v59 }
0x1d99   :  { %v3076_v61 = vmul.f32 1.442695, %v3075_v60 }
0x1d9b   :  { %5284 = vpow2.f32 %v3076_v61 }
0x1da5   :  { %v5285_v62 = vpop.eup %5284 }
0x1da6   :  { %v3078_v16 = vsel %vm605_vm4, %v5285_v62, 0.0 }
0x1da7   :  { %3079 = vadd.xlane.f32.xlu0 %v3078_v16 }
0x1dbd   :  { %5202 = vrot.lane.b32.xlu0 %v5891_v31, %s5337_s8 }
0x1dc1   :  { %3341 = vrot.lane.b32.xlu0 %v5964_v40, %s5335_s7 }
0x1e34   :  { %v3080_v28 = vpop.xlane.xlu0 %3079 }
0x1e35   :  { %5286 = vrcp.f32 %v3080_v28 }
0x1e38   :  { %v5203_v63 = vpop.permute.xlu0 %5202 }
0x1e39   :  { %v5205_v47 = vunpack.i.h.bf16 %v5203_v63  ;;  %v5204_v48 = vunpack.i.l.bf16 %v5203_v63 }
0x1e3b   :  { %v5051_v1 = vpack.c.bf16 %v5205_v47, %v5204_v48 }
0x1e3c   :  { %v3342_v32 = vpop.permute.xlu0 %3341 }
0x1e3d   :  { %5052 = vmatpush3.bf16.msra.mxu0 %v5051_v1 }
0x1e3e   :  { %5053 = vmatprep.subr.bf16.mxu0 %v5332_v24 }
0x1e3f   :  { %v5287_v2 = vpop.eup %5286 }
0x1e40   :  { %v3082_v3 = vmul.f32 %v5287_v2, %v5285_v62 }
0x1e42   :  { %4790 = vmatmul.mubr.msk.f32.vlgmr.msra.gmra.mrb[32].mxu0 %vm605_vm4, %v3082_v3 }
0x1e43   :  { %4796 = vmatprep.mubr.msk.f32.mxu0 %vm5333_vm1, %v5334_v25 }
0x1e46   :  { %5056 = vmatpush3.bf16.xpose.msk.msra.mxu0 %vm5565_vm3, %v5054_v21 }
0x1e47   :  { %5064 = vmatprep.subr.bf16.mxu0 %v5332_v24 }
0x1e4d   :  { %4797 = vmatmul.mubr.msk.f32.vlgmr.msra.gmra.mrb[34].mxu0 %vm525_vm2, %v5964_v40 }
0x1e4e   :  { %4817 = vmatprep.mubr.msk.f32.mxu0 %vm5333_vm1, %v5334_v25 }
0x1f15   :  { %v5982_v9 = vpop.f32.mrb[32].mxu0 }
0x1f16   :  { %v4791_v31 = vpop.f32.mrb[33].mxu0 }
0x1f20   :  { %v3253_v4 = vpop.f32.mrb[34].mxu0 }
0x1f21   :  { %v4798_v6 = vpop.f32.mrb[35].mxu0  ;;  %v3257_v7 = vsel %vm605_vm4, %v3253_v4, -inf }
0x1f22   :  { %3258 = vmax.xlane.f32.xlu1 %v3257_v7 }
0x1faf   :  { %v3259_v10 = vpop.xlane.xlu1 %3258 }
0x1fb0   :  { %v3260_v57 = vsub.f32 %v3253_v4, %v3259_v10 }
0x1fb2   :  { %v3261_v8 = vmul.f32 1.442695, %v3260_v57 }
0x1fb4   :  { %5288 = vpow2.f32 %v3261_v8 }
0x1fbe   :  { %v5289_v21 = vpop.eup %5288 }
0x1fbf   :  { %v3263_v11 = vsel %vm605_vm4, %v5289_v21, 0.0 }
0x1fc0   :  { %3264 = vadd.xlane.f32.xlu1 %v3263_v11 }
0x1fd1   :  { %5207 = vrot.lane.b32.xlu1 %v5874_v22, %s5335_s7 }
0x204d   :  { %v3265_v13 = vpop.xlane.xlu1 %3264 }
0x204e   :  { %5290 = vrcp.f32 %v3265_v13 }
0x2051   :  { %v5208_v15 = vpop.permute.xlu1 %5207 }
0x2052   :  { %v5210_v49 = vunpack.i.h.bf16 %v5208_v15  ;;  %v5209_v50 = vunpack.i.l.bf16 %v5208_v15 }
0x2054   :  { %v5061_v20 = vpack.c.bf16 %v5210_v49, %v5209_v50 }
0x2058   :  { %v5291_v17 = vpop.eup %5290 }
0x2059   :  { %v3267_v18 = vmul.f32 %v5291_v17, %v5289_v21 }
0x205b   :  { %4804 = vmatmul.mubr.msk.f32.vlgmr.msra.gmra.mrb[36].mxu1 %vm605_vm4, %v3267_v18 }
0x205c   :  { %5063 = vmatpush3.bf16.xpose.msk.msra.mxu1 %vm5565_vm3, %v5061_v20  ;;  %4810 = vmatprep.mubr.msk.f32.mxu1 %vm5333_vm1, %v5334_v25 }
0x205d   :  { %5071 = vmatprep.subr.bf16.mxu1 %v5332_v24 }
0x2063   :  { %4811 = vmatmul.mubr.msk.f32.vlgmr.msra.gmra.mrb[38].mxu1 %vm525_vm2, %v3342_v32 }
0x2064   :  { %4831 = vmatprep.mubr.msk.f32.mxu1 %vm5333_vm1, %v5334_v25 }
0x212e   :  { %v5997_v56 = vpop.f32.mrb[36].mxu1 }
0x212f   :  { %v4805_v26 = vpop.f32.mrb[37].mxu1 }
0x2136   :  { %v3419_v14 = vpop.f32.mrb[38].mxu1 }
0x2137   :  { %v4812_v27 = vpop.f32.mrb[39].mxu1  ;;  %v3423_v29 = vsel %vm605_vm4, %v3419_v14, -inf }
0x2138   :  { %3424 = vmax.xlane.f32.xlu0 %v3423_v29 }
0x214e   :  { %5212 = vrot.lane.b32.xlu0 %v5889_v30, %s5335_s7 }
0x2152   :  { %3515 = vrot.lane.b32.xlu0 %v5964_v40, %s5336_s1 }
0x21c5   :  { %v3425_v42 = vpop.xlane.xlu0 %3424 }
0x21c6   :  { %v3426_v33 = vsub.f32 %v3419_v14, %v3425_v42 }
0x21c8   :  { %v3427_v34 = vmul.f32 1.442695, %v3426_v33 }
0x21c9   :  { %v5213_v35 = vpop.permute.xlu0 %5212 }
0x21ca   :  { %5292 = vpow2.f32 %v3427_v34  ;;  %v5215_v37 = vunpack.i.h.bf16 %v5213_v35  ;;  %v5214_v38 = vunpack.i.l.bf16 %v5213_v35  ;;  %v2070_v34 = vld [vmem:[%s6149_s17] sm:$0xff]  ;;  %v2071_v35 = vld [vmem:[%s6149_s17 + $0x8] sm:$0xff] }
0x21cc   :  { %v5065_v39 = vpack.c.bf16 %v5215_v37, %v5214_v38  ;;  %v5081_v37 = vpack.c.bf16 %v2071_v35, %v2070_v34  ;;  %v2073_v38 = vld [vmem:[%s6149_s17 + $0x18] sm:$0xff] }
0x21cd   :  { %v3516_v54 = vpop.permute.xlu0 %3515 }
0x21ce   :  { %5066 = vmatpush3.bf16.msra.mxu0 %v5065_v39 }
0x21cf   :  { %5067 = vmatprep.subr.bf16.mxu0 %v5332_v24 }
0x21d4   :  { %v5293_v5 = vpop.eup %5292 }
0x21d5   :  { %v3429_v43 = vsel %vm605_vm4, %v5293_v5, 0.0 }
0x21d6   :  { %3430 = vadd.xlane.f32.xlu1 %v3429_v43 }
0x21e7   :  { %5217 = vrot.lane.b32.xlu1 %v5874_v22, %s5336_s1 }
0x2263   :  { %v3431_v46 = vpop.xlane.xlu1 %3430 }
0x2264   :  { %5294 = vrcp.f32 %v3431_v46 }
0x2267   :  { %v5218_v58 = vpop.permute.xlu1 %5217 }
0x2268   :  { %v5220_v44 = vunpack.i.h.bf16 %v5218_v58  ;;  %v5219_v51 = vunpack.i.l.bf16 %v5218_v58 }
0x226a   :  { %v5068_v53 = vpack.c.bf16 %v5220_v44, %v5219_v51 }
0x226e   :  { %v5295_v45 = vpop.eup %5294 }
0x226f   :  { %v3433_v52 = vmul.f32 %v5295_v45, %v5293_v5 }
0x2271   :  { %4818 = vmatmul.mubr.msk.f32.vlgmr.msra.gmra.mrb[36].mxu0 %vm605_vm4, %v3433_v52 }
0x2272   :  { %5070 = vmatpush3.bf16.xpose.msk.msra.mxu0 %vm5565_vm3, %v5068_v53  ;;  %4824 = vmatprep.mubr.msk.f32.mxu0 %vm5333_vm1, %v5334_v25  ;;  %v4312_v53 = vld [vmem:[%s6150_s18] ss:$0 sm:$0xff] }
0x2273   :  { %5078 = vmatprep.subr.bf16.mxu0 %v5332_v24 }
0x2279   :  { %4825 = vmatmul.mubr.msk.f32.vlgmr.msra.gmra.mrb[38].mxu0 %vm525_vm2, %v3516_v54 }
0x227a   :  { %4845 = vmatprep.mubr.msk.f32.mxu0 %vm5333_vm1, %v5334_v25 }
0x2344   :  { %v3511_v23 = vpop.f32.mrb[36].mxu0 }
0x2345   :  { %v4819_v59 = vpop.f32.mrb[37].mxu0 }
0x234c   :  { %v3593_v60 = vpop.f32.mrb[38].mxu0 }
0x234d   :  { %v4826_v61 = vpop.f32.mrb[39].mxu0  ;;  %v3597_v62 = vsel %vm605_vm4, %v3593_v60, -inf }
0x234e   :  { %3598 = vmax.xlane.f32.xlu1 %v3597_v62 }
0x235f   :  { %5227 = vrot.lane.b32.xlu1 %v5874_v22, %s5337_s8 }
0x2363   :  { %3687 = vrot.lane.b32.xlu1 %v5964_v40, %s5337_s8 }
0x23db   :  { %v3599_v16 = vpop.xlane.xlu1 %3598 }
0x23dc   :  { %v3600_v28 = vsub.f32 %v3593_v60, %v3599_v16 }
0x23de   :  { %v3601_v63 = vmul.f32 1.442695, %v3600_v28 }
0x23df   :  { %v5228_v4 = vpop.permute.xlu1 %5227 }
0x23e0   :  { %5296 = vpow2.f32 %v3601_v63  ;;  %v5230_v6 = vunpack.i.h.bf16 %v5228_v4  ;;  %v5229_v7 = vunpack.i.l.bf16 %v5228_v4  ;;  %v4008_v4 = vld [vmem:[%s6153_s21 + $0x8] sm:$0xff] }
0x23e2   :  { %v5075_v57 = vpack.c.bf16 %v5230_v6, %v5229_v7  ;;  %v4009_v6 = vld [vmem:[%s6153_s21 + $0x10] sm:$0xff]  ;;  %v4010_v7 = vld [vmem:[%s6153_s21 + $0x18] sm:$0xff] }
0x23e3   :  { %v3688_v8 = vpop.permute.xlu1 %3687 }
0x23ea   :  { %v5297_v47 = vpop.eup %5296 }
0x23eb   :  { %v3603_v48 = vsel %vm605_vm4, %v5297_v47, 0.0 }
0x23ec   :  { %3604 = vadd.xlane.f32.xlu0 %v3603_v48 }
0x2402   :  { %5222 = vrot.lane.b32.xlu0 %v5889_v30, %s5336_s1 }
0x2479   :  { %v3605_v1 = vpop.xlane.xlu0 %3604 }
0x247a   :  { %5298 = vrcp.f32 %v3605_v1 }
0x247d   :  { %v5223_v2 = vpop.permute.xlu0 %5222 }
0x247e   :  { %v5225_v3 = vunpack.i.h.bf16 %v5223_v2  ;;  %v5224_v31 = vunpack.i.l.bf16 %v5223_v2 }
0x2480   :  { %v5072_v22 = vpack.c.bf16 %v5225_v3, %v5224_v31 }
0x2482   :  { %5073 = vmatpush3.bf16.msra.mxu1 %v5072_v22 }
0x2483   :  { %5074 = vmatprep.subr.bf16.mxu1 %v5332_v24 }
0x2484   :  { %v5299_v40 = vpop.eup %5298 }
0x2485   :  { %v3607_v10 = vmul.f32 %v5299_v40, %v5297_v47 }
0x2487   :  { %4832 = vmatmul.mubr.msk.f32.vlgmr.msra.gmra.mrb[40].mxu1 %vm605_vm4, %v3607_v10  ;;  %v5093_v10 = vpack.c.bf16 %v4010_v7, %v4009_v6 }
0x2488   :  { %4838 = vmatprep.mubr.msk.f32.mxu1 %vm5333_vm1, %v5334_v25 }
0x248b   :  { %5077 = vmatpush3.bf16.xpose.msk.msra.mxu1 %vm5565_vm3, %v5075_v57  ;;  %v4101_v57 = vld [vmem:[%s6155_s23] sm:$0xff] }
0x2492   :  { %4839 = vmatmul.mubr.msk.f32.vlgmr.msra.gmra.mrb[42].mxu1 %vm525_vm2, %v3688_v8  ;;  %v4102_v8 = vld [vmem:[%s6155_s23 + $0x8] sm:$0xff] }
0x255a   :  { %v3683_v21 = vpop.f32.mrb[40].mxu1 }
0x255b   :  { %v4833_v11 = vpop.f32.mrb[41].mxu1 }
0x2565   :  { %v3765_v13 = vpop.f32.mrb[42].mxu1 }
0x2566   :  { %v4840_v24 = vpop.f32.mrb[43].mxu1  ;;  %v3769_v15 = vsel %vm605_vm4, %v3765_v13, -inf }
0x2567   :  { %3770 = vmax.xlane.f32.xlu0 %v3769_v15 }
0x257d   :  { %5232 = vrot.lane.b32.xlu0 %v5889_v30, %s5337_s8 }
0x2581   :  { %3167 = vrot.lane.b32.xlu0 %v5957_v36, %s5338_s27 }
0x2585   :  { %3171 = vrot.lane.b32.xlu0 %v5982_v9, %s5340_s9 }
0x25f4   :  { %v3771_v25 = vpop.xlane.xlu0 %3770 }
0x25f5   :  { %v3772_v41 = vsub.f32 %v3765_v13, %v3771_v25 }
0x25f7   :  { %v3773_v49 = vmul.f32 1.442695, %v3772_v41 }
0x25f8   :  { %v5233_v50 = vpop.permute.xlu0 %5232 }
0x25f9   :  { %5300 = vpow2.f32 %v3773_v49  ;;  %v5235_v17 = vunpack.i.h.bf16 %v5233_v50  ;;  %v5234_v18 = vunpack.i.l.bf16 %v5233_v50  ;;  %v4315_v50 = vld [vmem:[%s6151_s19] ss:$0 sm:$0xff] }
0x25fb   :  { %v5079_v20 = vpack.c.bf16 %v5235_v17, %v5234_v18 }
0x25fc   :  { %v3168_v9 = vpop.permute.xlu0 %3167 }
0x25fd   :  { %5080 = vmatpush3.bf16.msra.mxu0 %v5079_v20 }
0x25fe   :  { %5082 = vmatprep.subr.bf16.mxu0 %v5081_v37 }
0x2600   :  { %v3172_v33 = vpop.permute.xlu0 %3171 }
0x2603   :  { %v5301_v32 = vpop.eup %5300 }
0x2604   :  { %v3775_v26 = vsel %vm605_vm4, %v5301_v32, 0.0 }
0x2605   :  { %3776 = vadd.xlane.f32.xlu1 %v3775_v26 }
0x2616   :  { %3163 = vrot.lane.b32.xlu1 %v5933_v19, %s6187_s14 }
0x261a   :  { %3860 = vrot.lane.b32.xlu1 %v3511_v23, %s6187_s14 }
0x261e   :  { %3864 = vrot.lane.b32.xlu1 %v3683_v21, %s5338_s27  ;;  %v5097_v21 = vpack.c.bf16 %v4102_v8, %v4101_v57 }
0x2692   :  { %v3777_v30 = vpop.xlane.xlu1 %3776 }
0x2693   :  { %5302 = vrcp.f32 %v3777_v30 }
0x2696   :  { %v3164_v36 = vpop.permute.xlu1 %3163 }
0x2697   :  { %v3174_v14 = vsel %vm525_vm2, %v5913_v55, %v3164_v36  ;;  %v2072_v55 = vld [vmem:[%s6149_s17 + $0x10] sm:$0xff] }
0x2698   :  { %v3175_v29 = vsel %vm605_vm4, %v3174_v14, %v3168_v9  ;;  %v5085_v39 = vpack.c.bf16 %v2073_v38, %v2072_v55  ;;  %v4103_v14 = vld [vmem:[%s6155_s23 + $0x10] sm:$0xff]  ;;  %v4320_v38 = vld [vmem:[%s6156_s24] ss:$0 sm:$0xff] }
0x2699   :  { %v3176_v19 = vsel %vm1222_vm5, %v3175_v29, %v3172_v33 }
0x269a   :  { %v3861_v46 = vpop.permute.xlu1 %3860 }
0x269b   :  { %v3871_v44 = vsel %vm525_vm2, %v5997_v56, %v3861_v46 }
0x269d   :  { %v5303_v27 = vpop.eup %5302 }
0x269e   :  { %v3779_v42 = vmul.f32 %v5303_v27, %v5301_v32  ;;  %v3865_v58 = vpop.permute.xlu1 %3864  ;;  %v4316_v32 = vld [vmem:[%s6152_s20] ss:$0 sm:$0xff]  ;;  %v4104_v27 = vld [vmem:[%s6155_s23 + $0x18] sm:$0xff]  ;;  %s5341_s23 = smov [#allocation2]  }
0x269f   :  { %v3872_v51 = vsel %vm605_vm4, %v3871_v44, %v3865_v58  ;;  %v5101_v29 = vpack.c.bf16 %v4104_v27, %v4103_v14  ;;  %s4200_s17 = sshll.u32 %s5341_s23, 4  ;;  %s4201_s17 = int_to_ptr.vmem [resolvable:$true] %s4200_s17 }
0x26a0   :  { %4846 = vmatmul.mubr.msk.f32.vlgmr.msra.gmra.mrb[40].mxu0 %vm605_vm4, %v3779_v42  ;;  %v4317_v42 = vld [vmem:[%s6154_s22] ss:$0 sm:$0xff]  ;;  %s5308_s22 = scalar_lea.vmem %s4201_s17, 256  ;;  %p5313_p1 = scmp.lt.s32.totalorder %s4201_s17, %s4201_s17 }
0x26a1   :  { %4856 = vmatprep.mubr.msk.f32.mxu0 %vm118_vm0, %v3176_v19  ;;  %5084 = vmatpush3.bf16.msra.mxu0 %v5081_v37  ;;  %p5309_p0 = scmp.ne.s32.totalorder %s4201_s17, %s5308_s22  ;;  %p5314_p2 = scmp.lt.s32.totalorder %s5308_s22, %s5308_s22 }
0x26a2   :  { %5086 = vmatprep.subr.bf16.mxu0 %v5085_v39 }
0x26a3   :  { %p5315_p3 = por %p5314_p2, %p5313_p1 }
0x26a5   :  { %5088 = vmatpush3.bf16.msra.mxu0 %v5085_v39  ;;  %p5316_p4 = pnand %p5315_p3, %p5309_p0 }
0x26a6   :  { %5098 = vmatprep.subr.bf16.mxu0 %v5097_v21 }
0x2773   :  { %v3855_v5 = vpop.f32.mrb[40].mxu0 }
0x2774   :  { %3868 = vrot.lane.b32.xlu0 %v3855_v5, %s5340_s9  ;;  %v4847_v43 = vpop.f32.mrb[41].mxu0 }
0x27e6   :  { %v3869_v45 = vpop.permute.xlu0 %3868 }
0x27e7   :  { %v3873_v52 = vsel %vm1222_vm5, %v3872_v51, %v3869_v45 }
0x27e8   :  { %4857 = vmatmul.mubr.msk.f32.vlgmr.msra.gmra.mrb[42].mxu0 %vm118_vm0, %v3873_v52 }
0x27e9   :  { %5100 = vmatpush3.bf16.msra.mxu0 %v5097_v21 }
0x27ea   :  { %5102 = vmatprep.subr.bf16.mxu0 %v5101_v29 }
0x27ed   :  { %5104 = vmatpush3.bf16.msra.mxu0 %v5101_v29 }
0x28bb   :  { %v4858_v54 = vpop.f32.mrb[42].mxu0 }
0x28bc   :  { %v3958_v23 = vadd.f32 %v4858_v54, %v4312_v53  ;;  %v3952_v59 = vpop.f32.mrb[43].mxu0 }
0x28bd   :  { %v3953_v60 = vadd.f32 %v4312_v53, %v3952_v59 }
0x28be   :  { %v3962_v61 = vadd.f32 %v3958_v23, %v5823_v0 }
0x28bf   :  { %v3961_v62 = vadd.f32 %v3953_v60, %v5821_v12  ;;  %v4007_v12 = vld [vmem:[%s6153_s21] sm:$0xff] }
0x28c0   :  { %v3968_v56 = vsel %vm118_vm0, %v3962_v61, 0.0  ;;  %v5089_v40 = vpack.c.bf16 %v4008_v4, %v4007_v12 }
0x28c1   :  { %3969 = vadd.xlane.f32.xlu0 %v3968_v56  ;;  %v3965_v16 = vsel %vm118_vm0, %v3961_v62, 0.0 }
0x28c2   :  { %3966 = vadd.xlane.f32.xlu1 %v3965_v16  ;;  %5090 = vmatprep.subr.bf16.mxu1 %v5089_v40 }
0x28c3   :  { %5092 = vmatpush3.bf16.msra.mxu1 %v5089_v40 }
0x28c4   :  { %5094 = vmatprep.subr.bf16.mxu1 %v5093_v10 }
0x28c7   :  { %5096 = vmatpush3.bf16.msra.mxu1 %v5093_v10 }
0x294e   :  { %v3970_v28 = vpop.xlane.xlu0 %3969 }
0x294f   :  { %v3972_v63 = vmul.f32 0.03125, %v3970_v28  ;;  %v3967_v47 = vpop.xlane.xlu1 %3966 }
0x2950   :  { %v3971_v48 = vmul.f32 0.03125, %v3967_v47 }
0x2951   :  { %v3974_v1 = vsub.f32 %v3962_v61, %v3972_v63 }
0x2952   :  { %v3973_v2 = vsub.f32 %v3961_v62, %v3971_v48 }
0x2953   :  { %v3976_v3 = vmul.f32 %v3974_v1, %v3974_v1 }
0x2954   :  { %v3975_v31 = vmul.f32 %v3973_v2, %v3973_v2 }
0x2955   :  { %v3980_v22 = vsel %vm118_vm0, %v3976_v3, 0.0 }
0x2956   :  { %3981 = vadd.xlane.f32.xlu1 %v3980_v22  ;;  %v3977_v0 = vsel %vm118_vm0, %v3975_v31, 0.0 }
0x2957   :  { %3978 = vadd.xlane.f32.xlu0 %v3977_v0 }
0x29e3   :  { %v3982_v11 = vpop.xlane.xlu1 %3981 }
0x29e4   :  { %v3984_v13 = vmul.f32 0.03125, %v3982_v11  ;;  %v3979_v24 = vpop.xlane.xlu0 %3978 }
0x29e5   :  { %v3983_v15 = vmul.f32 0.03125, %v3979_v24 }
0x29e6   :  { %v3986_v25 = vadd.f32 1e-05, %v3984_v13 }
0x29e7   :  { %v3985_v41 = vadd.f32 1e-05, %v3983_v15 }
0x29e8   :  { %5304 = vrsqrt.f32 %v3986_v25 }
0x29e9   :  { %5306 = vrsqrt.f32 %v3985_v41 }
0x29f2   :  { %v5305_v49 = vpop.eup %5304 }
0x29f3   :  { %v5307_v17 = vpop.eup %5306  ;;  %v3990_v18 = vmul.f32 %v5305_v49, %v3974_v1 }
0x29f4   :  { %v3989_v20 = vmul.f32 %v5307_v17, %v3973_v2 }
0x29f5   :  { %v3998_v26 = vmul.f32 %v4315_v50, %v3990_v18 }
0x29f6   :  { %v3997_v30 = vmul.f32 %v4315_v50, %v3989_v20 }
0x29f7   :  { %v4006_v9 = vadd.f32 %v4316_v32, %v3998_v26 }
0x29f8   :  { %v4005_v36 = vadd.f32 %v4316_v32, %v3997_v30 }
0x29fa   :  { %4867 = vmatprep.mubr.msk.f32.mxu1 %vm118_vm0, %v4005_v36 }
0x29fb   :  { %4868 = vmatmul.mubr.msk.f32.vlgmr.msra.gmra.mrb[44].mxu1 %vm118_vm0, %v4006_v9 }
0x2ace   :  { %v4869_v33 = vpop.f32.mrb[44].mxu1 }
0x2acf   :  { %v4096_v19 = vadd.f32 %v4869_v33, %v4317_v42  ;;  %v4090_v34 = vpop.f32.mrb[45].mxu1 }
0x2ad0   :  { %v4091_v35 = vadd.f32 %v4317_v42, %v4090_v34 }
0x2ad1   :  { %v4100_v37 = vmax.f32 %v4096_v19, 0.0 }
0x2ad2   :  { %v4099_v55 = vmax.f32 %v4091_v35, 0.0 }
0x2ad4   :  { %4878 = vmatprep.mubr.msk.f32.mxu0 %vm118_vm0, %v4099_v55 }
0x2ad5   :  { %4879 = vmatmul.mubr.msk.f32.vlgmr.msra.gmra.mrb[44].mxu0 %vm118_vm0, %v4100_v37 }
0x2ba8   :  { %v4880_v39 = vpop.f32.mrb[44].mxu0 }
0x2ba9   :  { %v4190_v5 = vadd.f32 %v4880_v39, %v4320_v38  ;;  %v4184_v43 = vpop.f32.mrb[45].mxu0 }
0x2baa   :  { %v4185_v46 = vadd.f32 %v4320_v38, %v4184_v43 }
0x2bab   :  { %4194 = vst.msk [vmem:[#allocation2 + $0x8] sm:$0xff] %vm118_vm0, %v4190_v5 }
0x2bac   :  { %4193 = vst.msk [vmem:[#allocation2] sm:$0xff] %vm118_vm0, %v4185_v46 }
0x2bad   :  { %5319 = shalt.err (!%p5316_p4)
}
0x2bae   :  { %s5320_s18 = scalar_lea.hbm %s6157_s25, 256 }
0x2baf   :  { %p5321_p5 = scmp.ne.s32.totalorder %s6157_s25, %s5320_s18  ;;  %p5324_p6 = scmp.lt.u32.totalorder %s5320_s18, %s6157_s25 }
0x2bb1   :  { %p5326_p7 = pnand %p5324_p6, %p5321_p5 }
0x2bb3   :  { %5329 = shalt.err (!%p5326_p7)
}
0x2bb4   :  { %s5342_s13 = smov 128  }
0x2bb5   :  { %4206 = dma.vmem_to_hbm [thread:$0]  %s4201_s17, 256, %s6157_s25, [#allocation3], %s5342_s13, %s5342_s13, %s6187_s14  }
0x2bb6   :  { %5330 = dma.done.wait [#allocation3], 256  }
0x2bb7   :  { %5331 = vsyncadd [#allocation3], 4294967040 }
0x2bb8   :  { %4210 = vsyncpa [#allocation3], 1 }

</bundles_post_ra>
